<compile_context>
chip_gen: v7x
topology: tpu7x:2x2x1
jax: 0.10.0
libtpu: 0.0.40
codegen_flags: <defaults>
</compile_context>

<pallas_src>
import functools
import math

import jax
import jax.numpy as jnp
from jax import lax
from jax.experimental import pallas as pl
from jax.experimental.pallas import tpu as pltpu

BN_EPS = 1e-5
# dot_general dimension numbers: contract dim 1 of lhs with dim 1 of rhs ("NT").
_NT = (((1,), (1,)), ((), ()))


# ----------------------------------------------------------------------------
# Fused encoder kernel: one grid step = one batch element, whole network.
# ----------------------------------------------------------------------------
def _encoder_kernel(*refs, levels, n_in, n_out):
    in_refs = refs[:n_in]
    out_refs = refs[n_in:n_in + n_out]
    scr = refs[n_in + n_out:]

    a = in_refs[0][0]                       # (H0, W0, C0) channels-last, f32
    wi, si = 1, 0
    for li, lvl in enumerate(levels):
        H, W = lvl["H"], lvl["W"]
        if lvl["down"]:
            sel_ref, wd_ref, bd_ref = in_refs[wi:wi + 3]
            wi += 3
            dslab_ref = scr[si]
            si += 1
            # 'a' is channels-first (C, Hp*Wp) coming from the previous level's
            # last conv. MXU-based space-to-depth: each 0/1 selection matrix
            # picks one (dy, dx) parity plane, producing a channels-last
            # (Ho*Wo, C) chunk of the (Ho*Wo, 4*C) downsample slab.
            C = a.shape[0]
            for t in range(4):
                dslab_ref[:, t * C:(t + 1) * C] = lax.dot_general(
                    sel_ref[t], a, _NT, preferred_element_type=jnp.float32)
            y = jnp.dot(dslab_ref[...], wd_ref[...],
                        preferred_element_type=jnp.float32) + bd_ref[...]
            a = y.reshape(H, W, C)          # back to channels-last

        nconv = len(lvl["convs"])
        for k, (cin, cout) in enumerate(lvl["convs"]):
            w_ref, sc_ref, sh_ref = in_refs[wi:wi + 3]
            wi += 3
            pad_ref, slab_ref = scr[si:si + 2]
            si += 2
            # In-kernel halo padding into a zeroed VMEM scratch.
            pad_ref[...] = jnp.zeros_like(pad_ref)
            pad_ref[1:H + 1, 1:W + 1, :] = a
            # Build the (H*W, 9*Cin) im2col slab once.
            for ky in range(3):
                for kx in range(3):
                    t = ky * 3 + kx
                    slab_ref[:, t * cin:(t + 1) * cin] = (
                        pad_ref[ky:ky + H, kx:kx + W, :].reshape(H * W, cin))
            if k == nconv - 1:
                # Last conv of the level: compute channels-first (Cout, H*W) so
                # the HBM store is lane-dense (spatial on lanes) and already in
                # NCHW order; it also feeds the next level's downsample.
                y = lax.dot_general(w_ref[...], slab_ref[...], _NT,
                                    preferred_element_type=jnp.float32)
                a = jnp.maximum(y * sc_ref[...] + sh_ref[...], 0.0)
            else:
                y = jnp.dot(slab_ref[...], w_ref[...],
                            preferred_element_type=jnp.float32)
                y = jnp.maximum(y * sc_ref[...] + sh_ref[...], 0.0)
                a = y.reshape(H, W, cout)
        out_refs[li][0] = a                 # (C_last, H*W) == NCHW block


# ----------------------------------------------------------------------------
# Wrapper-side parameter preparation (tiny, one-time, traced under jit).
# ----------------------------------------------------------------------------
def _prep_conv_layer(layer, channels_first_out):
    w, scale, shift = layer["w"], layer["scale"], layer["shift"]
    cin, cout = w.shape[2], w.shape[3]
    if channels_first_out:
        wk = w.transpose(3, 0, 1, 2).reshape(cout, 9 * cin)   # (Cout, 9*Cin)
        sc = scale.reshape(cout, 1)
        sh = shift.reshape(cout, 1)
    else:
        wk = w.reshape(9 * cin, cout)                          # (9*Cin, Cout)
        sc = scale.reshape(1, cout)
        sh = shift.reshape(1, cout)
    return [wk.astype(jnp.float32), sc.astype(jnp.float32),
            sh.astype(jnp.float32)]


def _space_to_depth_selectors(hp, wp):
    """(4, ho*wo, hp*wp) 0/1 matrices: sel[dy*2+dx, q, p]=1 iff pixel p is the
    (dy, dx) element of output pixel q's 2x2 window."""
    ho, wo = hp // 2, wp // 2
    q = jnp.arange(ho * wo, dtype=jnp.int32)
    p = jnp.arange(hp * wp, dtype=jnp.int32)
    qh, qw = q // wo, q % wo
    ph, pw = p // wp, p % wp
    sels = []
    for dy in range(2):
        for dx in range(2):
            sels.append(((ph[None, :] == (2 * qh + dy)[:, None]) &
                         (pw[None, :] == (2 * qw + dx)[:, None]))
                        .astype(jnp.float32))
    return jnp.stack(sels, axis=0)


# ----------------------------------------------------------------------------
# Forward pass (NCHW in / NCHW out, matching the PyTorch module)
# ----------------------------------------------------------------------------
def unet_encoder_forward(x_nchw, params):
    N, C0, H0, W0 = x_nchw.shape
    # Single boundary layout op (network input only); all outputs come out of
    # the kernel already in NCHW order.
    x = jnp.transpose(x_nchw, (0, 2, 3, 1)).astype(jnp.float32)

    block_param_lists = [(None, params["in_block"])] + [
        (d, d["conv_block"]) for d in params["down_blocks"]]

    levels, flat_inputs, scratch = [], [], []
    in_specs = [pl.BlockSpec((1, H0, W0, C0), lambda n: (n, 0, 0, 0))]
    out_shapes, out_specs, out_dims = [], [], []
    flops = 0
    H, W = H0, W0
    prev_cout = C0

    def _full_spec(arr):
        nd = arr.ndim
        return pl.BlockSpec(arr.shape, lambda n, _nd=nd: (0,) * _nd)

    for dparams, conv_layers in block_param_lists:
        lvl = {"down": dparams is not None, "convs": []}
        if dparams is not None:
            assert H % 2 == 0 and W % 2 == 0, "downsample requires even H, W"
            c = dparams["dw"].shape[2]
            assert c == prev_cout, "block channel mismatch"
            Hp, Wp = H, W
            H, W = H // 2, W // 2
            sel = _space_to_depth_selectors(Hp, Wp)
            wd = dparams["dw"].reshape(4 * c, c).astype(jnp.float32)
            bd = dparams["db"].reshape(1, c).astype(jnp.float32)
            flat_inputs += [sel, wd, bd]
            in_specs += [_full_spec(sel), _full_spec(wd), _full_spec(bd)]
            scratch.append(pltpu.VMEM((H * W, 4 * c), jnp.float32))
            flops += N * (8 * (H * W) * (Hp * Wp) * c + 2 * (H * W) * 4 * c * c)
        lvl["H"], lvl["W"] = H, W
        nconv = len(conv_layers)
        for k, layer in enumerate(conv_layers):
            cin, cout = layer["w"].shape[2], layer["w"].shape[3]
            lvl["convs"].append((cin, cout))
            prep = _prep_conv_layer(layer, channels_first_out=(k == nconv - 1))
            flat_inputs += prep
            in_specs += [_full_spec(arr) for arr in prep]
            scratch.append(pltpu.VMEM((H + 2, W + 2, cin), jnp.float32))
            scratch.append(pltpu.VMEM((H * W, 9 * cin), jnp.float32))
            flops += N * 2 * (H * W) * 9 * cin * cout
            prev_cout = cout
        out_shapes.append(jax.ShapeDtypeStruct((N, prev_cout, H * W),
                                               jnp.float32))
        out_specs.append(pl.BlockSpec((1, prev_cout, H * W),
                                      lambda n: (n, 0, 0)))
        out_dims.append((prev_cout, H, W))
        levels.append(lvl)

    n_in = 1 + len(flat_inputs)
    n_out = len(out_shapes)
    in_bytes = 4 * (x.size + N * sum(a.size for a in flat_inputs))
    out_bytes = 4 * sum(math.prod(s.shape) for s in out_shapes)
    cost = pl.CostEstimate(flops=int(flops), transcendentals=0,
                           bytes_accessed=int(in_bytes + out_bytes))

    kernel = functools.partial(_encoder_kernel, levels=levels,
                               n_in=n_in, n_out=n_out)
    outs = pl.pallas_call(
        kernel,
        out_shape=tuple(out_shapes),
        grid_spec=pltpu.PrefetchScalarGridSpec(
            num_scalar_prefetch=0,
            grid=(N,),
            in_specs=in_specs,
            out_specs=tuple(out_specs),
            scratch_shapes=scratch,
        ),
        compiler_params=pltpu.CompilerParams(
            dimension_semantics=("parallel",)),
        cost_estimate=cost,
    )(x, *flat_inputs)

    # Free metadata reshapes: kernel already wrote NCHW-ordered data.
    outs_nchw = [o.reshape(N, c, h, w) for o, (c, h, w) in zip(outs, out_dims)]
    return outs_nchw[-1], outs_nchw[:-1]


# ----------------------------------------------------------------------------
# Deterministic parameter construction (BN folded into scale/shift, eval mode)
# ----------------------------------------------------------------------------
def _init_conv_layer(key, cin, cout, batch_norm):
    ks = jax.random.split(key, 6)
    w = 0.1 * jax.random.normal(ks[0], (3, 3, cin, cout), jnp.float32)
    b = 0.1 * jax.random.normal(ks[1], (cout,), jnp.float32)
    if batch_norm:
        gamma = 1.0 + 0.1 * jax.random.normal(ks[2], (cout,), jnp.float32)
        beta = 0.1 * jax.random.normal(ks[3], (cout,), jnp.float32)
        mean = 0.1 * jax.random.normal(ks[4], (cout,), jnp.float32)
        var = 0.5 + jnp.abs(jax.random.normal(ks[5], (cout,), jnp.float32))
        scale = gamma / jnp.sqrt(var + BN_EPS)
        shift = (b - mean) * scale + beta
    else:
        scale = jnp.ones((cout,), jnp.float32)
        shift = b
    return {"w": w, "scale": scale, "shift": shift}


def _init_conv_block(key, channels, batch_norm):
    return [_init_conv_layer(jax.random.fold_in(key, i), cin, cout, batch_norm)
            for i, (cin, cout) in enumerate(zip(channels[:-1], channels[1:]))]


def init_unet_encoder_params(key, blocks, batch_norm=True):
    params = {"in_block": _init_conv_block(jax.random.fold_in(key, 0),
                                           blocks[0], batch_norm),
              "down_blocks": []}
    for bi, channels in enumerate(blocks[1:]):
        dkey = jax.random.fold_in(key, 100 + bi)
        c = channels[0]
        dw = 0.1 * jax.random.normal(jax.random.fold_in(dkey, 0),
                                     (2, 2, c, c), jnp.float32)
        db = 0.1 * jax.random.normal(jax.random.fold_in(dkey, 1),
                                     (c,), jnp.float32)
        params["down_blocks"].append({
            "dw": dw, "db": db,
            "conv_block": _init_conv_block(jax.random.fold_in(dkey, 2),
                                           channels, batch_norm),
        })
    return params


# ----------------------------------------------------------------------------
# Pure-JAX reference (same assumed semantics) for a correctness self-check.
# ----------------------------------------------------------------------------
def _reference_forward(x_nchw, params):
    dn = ("NCHW", "OIHW", "NCHW")
    hi = lax.Precision.HIGHEST

    def conv_block(x, layers):
        for l in layers:
            w = jnp.transpose(l["w"], (3, 2, 0, 1))
            y = lax.conv_general_dilated(x, w, (1, 1), "SAME",
                                         dimension_numbers=dn, precision=hi)
            y = y * l["scale"][None, :, None, None] + \
                l["shift"][None, :, None, None]
            x = jnp.maximum(y, 0.0)
        return x

    x = conv_block(x_nchw, params["in_block"])
    hidden = []
    for d in params["down_blocks"]:
        hidden.append(x)
        wd = jnp.transpose(d["dw"], (3, 2, 0, 1))
        x = lax.conv_general_dilated(x, wd, (2, 2), "VALID",
                                     dimension_numbers=dn, precision=hi)
        x = x + d["db"][None, :, None, None]
        x = conv_block(x, d["conv_block"])
    return x, hidden


if __name__ == "__main__":
    key = jax.random.PRNGKey(0)
    # dim=2, blocks=((4,8,8),(8,16,16),(16,32,32)), use_pooling=False, batch_norm=True
    blocks = ((4, 8, 8), (8, 16, 16), (16, 32, 32))
    params = init_unet_encoder_params(jax.random.fold_in(key, 1), blocks,
                                      batch_norm=True)
    x = jax.random.normal(jax.random.fold_in(key, 2), (2, 4, 16, 16),
                          jnp.float32)

    fwd = jax.jit(unet_encoder_forward)
    out, hidden = fwd(x, params)
    out = jax.block_until_ready(out)
    hidden = [jax.block_until_ready(h) for h in hidden]

    assert out.shape == (2, 32, 4, 4), out.shape
    assert hidden[0].shape == (2, 8, 16, 16), hidden[0].shape
    assert hidden[1].shape == (2, 16, 8, 8), hidden[1].shape
    assert bool(jnp.isfinite(out).all())

    ref_out, ref_hidden = _reference_forward(x, params)
    assert jnp.allclose(out, ref_out, atol=5e-2, rtol=5e-2), \
        float(jnp.max(jnp.abs(out - ref_out)))
    for h, rh in zip(hidden, ref_hidden):
        assert jnp.allclose(h, rh, atol=5e-2, rtol=5e-2), \
            float(jnp.max(jnp.abs(h - rh)))

    print("KERNEL_OK")
</pallas_src>

<mosaic_0001>
module attributes {stable_mosaic.version = 11 : i64} {
  func.func @_encoder_kernel(%arg0: i32, %arg1: memref<1x16x16x4xf32, #tpu.memory_space<vmem>>, %arg2: memref<36x8xf32, #tpu.memory_space<vmem>>, %arg3: memref<1x8xf32, #tpu.memory_space<vmem>>, %arg4: memref<1x8xf32, #tpu.memory_space<vmem>>, %arg5: memref<8x72xf32, #tpu.memory_space<vmem>>, %arg6: memref<8x1xf32, #tpu.memory_space<vmem>>, %arg7: memref<8x1xf32, #tpu.memory_space<vmem>>, %arg8: memref<4x64x256xf32, #tpu.memory_space<vmem>>, %arg9: memref<32x8xf32, #tpu.memory_space<vmem>>, %arg10: memref<1x8xf32, #tpu.memory_space<vmem>>, %arg11: memref<72x16xf32, #tpu.memory_space<vmem>>, %arg12: memref<1x16xf32, #tpu.memory_space<vmem>>, %arg13: memref<1x16xf32, #tpu.memory_space<vmem>>, %arg14: memref<16x144xf32, #tpu.memory_space<vmem>>, %arg15: memref<16x1xf32, #tpu.memory_space<vmem>>, %arg16: memref<16x1xf32, #tpu.memory_space<vmem>>, %arg17: memref<4x16x64xf32, #tpu.memory_space<vmem>>, %arg18: memref<64x16xf32, #tpu.memory_space<vmem>>, %arg19: memref<1x16xf32, #tpu.memory_space<vmem>>, %arg20: memref<144x32xf32, #tpu.memory_space<vmem>>, %arg21: memref<1x32xf32, #tpu.memory_space<vmem>>, %arg22: memref<1x32xf32, #tpu.memory_space<vmem>>, %arg23: memref<32x288xf32, #tpu.memory_space<vmem>>, %arg24: memref<32x1xf32, #tpu.memory_space<vmem>>, %arg25: memref<32x1xf32, #tpu.memory_space<vmem>>, %arg26: memref<1x8x256xf32, #tpu.memory_space<vmem>>, %arg27: memref<1x16x64xf32, #tpu.memory_space<vmem>>, %arg28: memref<1x32x16xf32, #tpu.memory_space<vmem>>, %arg29: memref<18x18x4xf32, #tpu.memory_space<vmem>>, %arg30: memref<256x36xf32, #tpu.memory_space<vmem>>, %arg31: memref<18x18x8xf32, #tpu.memory_space<vmem>>, %arg32: memref<256x72xf32, #tpu.memory_space<vmem>>, %arg33: memref<64x32xf32, #tpu.memory_space<vmem>>, %arg34: memref<10x10x8xf32, #tpu.memory_space<vmem>>, %arg35: memref<64x72xf32, #tpu.memory_space<vmem>>, %arg36: memref<10x10x16xf32, #tpu.memory_space<vmem>>, %arg37: memref<64x144xf32, #tpu.memory_space<vmem>>, %arg38: memref<16x64xf32, #tpu.memory_space<vmem>>, %arg39: memref<6x6x16xf32, #tpu.memory_space<vmem>>, %arg40: memref<16x144xf32, #tpu.memory_space<vmem>>, %arg41: memref<6x6x32xf32, #tpu.memory_space<vmem>>, %arg42: memref<16x288xf32, #tpu.memory_space<vmem>>) attributes {dimension_semantics = [#tpu.dimension_semantics<parallel>], iteration_bounds = array<i64: 2>, scalar_prefetch = 0 : i64, scratch_operands = 14 : i64, tpu.core_type = #tpu.core_type<tc>, window_params = [{transform_indices = @transform_0, window_bounds = array<i64: 1, 16, 16, 4>}, {pipeline_mode = #tpu.pipeline_mode<synchronous>, transform_indices = @transform_1, window_bounds = array<i64: 36, 8>}, {pipeline_mode = #tpu.pipeline_mode<synchronous>, transform_indices = @transform_2, window_bounds = array<i64: 1, 8>}, {pipeline_mode = #tpu.pipeline_mode<synchronous>, transform_indices = @transform_3, window_bounds = array<i64: 1, 8>}, {pipeline_mode = #tpu.pipeline_mode<synchronous>, transform_indices = @transform_4, window_bounds = array<i64: 8, 72>}, {pipeline_mode = #tpu.pipeline_mode<synchronous>, transform_indices = @transform_5, window_bounds = array<i64: 8, 1>}, {pipeline_mode = #tpu.pipeline_mode<synchronous>, transform_indices = @transform_6, window_bounds = array<i64: 8, 1>}, {pipeline_mode = #tpu.pipeline_mode<synchronous>, transform_indices = @transform_7, window_bounds = array<i64: 4, 64, 256>}, {pipeline_mode = #tpu.pipeline_mode<synchronous>, transform_indices = @transform_8, window_bounds = array<i64: 32, 8>}, {pipeline_mode = #tpu.pipeline_mode<synchronous>, transform_indices = @transform_9, window_bounds = array<i64: 1, 8>}, {pipeline_mode = #tpu.pipeline_mode<synchronous>, transform_indices = @transform_10, window_bounds = array<i64: 72, 16>}, {pipeline_mode = #tpu.pipeline_mode<synchronous>, transform_indices = @transform_11, window_bounds = array<i64: 1, 16>}, {pipeline_mode = #tpu.pipeline_mode<synchronous>, transform_indices = @transform_12, window_bounds = array<i64: 1, 16>}, {pipeline_mode = #tpu.pipeline_mode<synchronous>, transform_indices = @transform_13, window_bounds = array<i64: 16, 144>}, {pipeline_mode = #tpu.pipeline_mode<synchronous>, transform_indices = @transform_14, window_bounds = array<i64: 16, 1>}, {pipeline_mode = #tpu.pipeline_mode<synchronous>, transform_indices = @transform_15, window_bounds = array<i64: 16, 1>}, {pipeline_mode = #tpu.pipeline_mode<synchronous>, transform_indices = @transform_16, window_bounds = array<i64: 4, 16, 64>}, {pipeline_mode = #tpu.pipeline_mode<synchronous>, transform_indices = @transform_17, window_bounds = array<i64: 64, 16>}, {pipeline_mode = #tpu.pipeline_mode<synchronous>, transform_indices = @transform_18, window_bounds = array<i64: 1, 16>}, {pipeline_mode = #tpu.pipeline_mode<synchronous>, transform_indices = @transform_19, window_bounds = array<i64: 144, 32>}, {pipeline_mode = #tpu.pipeline_mode<synchronous>, transform_indices = @transform_20, window_bounds = array<i64: 1, 32>}, {pipeline_mode = #tpu.pipeline_mode<synchronous>, transform_indices = @transform_21, window_bounds = array<i64: 1, 32>}, {pipeline_mode = #tpu.pipeline_mode<synchronous>, transform_indices = @transform_22, window_bounds = array<i64: 32, 288>}, {pipeline_mode = #tpu.pipeline_mode<synchronous>, transform_indices = @transform_23, window_bounds = array<i64: 32, 1>}, {pipeline_mode = #tpu.pipeline_mode<synchronous>, transform_indices = @transform_24, window_bounds = array<i64: 32, 1>}, {transform_indices = @transform_25, window_bounds = array<i64: 1, 8, 256>}, {transform_indices = @transform_26, window_bounds = array<i64: 1, 16, 64>}, {transform_indices = @transform_27, window_bounds = array<i64: 1, 32, 16>}]} {
    %c0 = arith.constant 0 : index
    %c0_0 = arith.constant 0 : index
    %c0_1 = arith.constant 0 : index
    %c0_2 = arith.constant 0 : index
    %0 = vector.load %arg1[%c0, %c0_0, %c0_1, %c0_2] : memref<1x16x16x4xf32, #tpu.memory_space<vmem>>, vector<1x16x16x4xf32>
    %1 = vector.shape_cast %0 : vector<1x16x16x4xf32> to vector<16x16x4xf32>
    %cst = arith.constant 0.000000e+00 : f32
    %2 = vector.broadcast %cst : f32 to vector<18x18x4xf32>
    %c0_3 = arith.constant 0 : index
    %c0_4 = arith.constant 0 : index
    %c0_5 = arith.constant 0 : index
    %3 = vector.load %arg29[%c0_3, %c0_4, %c0_5] : memref<18x18x4xf32, #tpu.memory_space<vmem>>, vector<18x18x4xf32>
    tpu.vector_store %arg29[%c0_3, %c0_4, %c0_5], %2 {strides = array<i32>} : memref<18x18x4xf32, #tpu.memory_space<vmem>>, vector<18x18x4xf32>,
    %c1 = arith.constant 1 : index
    %c1_6 = arith.constant 1 : index
    %c0_7 = arith.constant 0 : index
    %4 = vector.load %arg29[%c1, %c1_6, %c0_7] : memref<18x18x4xf32, #tpu.memory_space<vmem>>, vector<16x16x4xf32>
    tpu.vector_store %arg29[%c1, %c1_6, %c0_7], %1 {strides = array<i32>} : memref<18x18x4xf32, #tpu.memory_space<vmem>>, vector<16x16x4xf32>,
    %c0_8 = arith.constant 0 : index
    %c0_9 = arith.constant 0 : index
    %c0_10 = arith.constant 0 : index
    %5 = vector.load %arg29[%c0_8, %c0_9, %c0_10] : memref<18x18x4xf32, #tpu.memory_space<vmem>>, vector<16x16x4xf32>
    %6 = vector.shape_cast %5 : vector<16x16x4xf32> to vector<256x4xf32>
    %c0_11 = arith.constant 0 : index
    %c0_12 = arith.constant 0 : index
    %7 = vector.load %arg30[%c0_11, %c0_12] : memref<256x36xf32, #tpu.memory_space<vmem>>, vector<256x4xf32>
    tpu.vector_store %arg30[%c0_11, %c0_12], %6 {strides = array<i32>} : memref<256x36xf32, #tpu.memory_space<vmem>>, vector<256x4xf32>,
    %c0_13 = arith.constant 0 : index
    %c1_14 = arith.constant 1 : index
    %c0_15 = arith.constant 0 : index
    %8 = vector.load %arg29[%c0_13, %c1_14, %c0_15] : memref<18x18x4xf32, #tpu.memory_space<vmem>>, vector<16x16x4xf32>
    %9 = vector.shape_cast %8 : vector<16x16x4xf32> to vector<256x4xf32>
    %c0_16 = arith.constant 0 : index
    %c4 = arith.constant 4 : index
    %10 = vector.load %arg30[%c0_16, %c4] : memref<256x36xf32, #tpu.memory_space<vmem>>, vector<256x4xf32>
    tpu.vector_store %arg30[%c0_16, %c4], %9 {strides = array<i32>} : memref<256x36xf32, #tpu.memory_space<vmem>>, vector<256x4xf32>,
    %c0_17 = arith.constant 0 : index
    %c2 = arith.constant 2 : index
    %c0_18 = arith.constant 0 : index
    %11 = vector.load %arg29[%c0_17, %c2, %c0_18] : memref<18x18x4xf32, #tpu.memory_space<vmem>>, vector<16x16x4xf32>
    %12 = vector.shape_cast %11 : vector<16x16x4xf32> to vector<256x4xf32>
    %c0_19 = arith.constant 0 : index
    %c8 = arith.constant 8 : index
    %13 = vector.load %arg30[%c0_19, %c8] : memref<256x36xf32, #tpu.memory_space<vmem>>, vector<256x4xf32>
    tpu.vector_store %arg30[%c0_19, %c8], %12 {strides = array<i32>} : memref<256x36xf32, #tpu.memory_space<vmem>>, vector<256x4xf32>,
    %c1_20 = arith.constant 1 : index
    %c0_21 = arith.constant 0 : index
    %c0_22 = arith.constant 0 : index
    %14 = vector.load %arg29[%c1_20, %c0_21, %c0_22] : memref<18x18x4xf32, #tpu.memory_space<vmem>>, vector<16x16x4xf32>
    %15 = vector.shape_cast %14 : vector<16x16x4xf32> to vector<256x4xf32>
    %c0_23 = arith.constant 0 : index
    %c12 = arith.constant 12 : index
    %16 = vector.load %arg30[%c0_23, %c12] : memref<256x36xf32, #tpu.memory_space<vmem>>, vector<256x4xf32>
    tpu.vector_store %arg30[%c0_23, %c12], %15 {strides = array<i32>} : memref<256x36xf32, #tpu.memory_space<vmem>>, vector<256x4xf32>,
    %c1_24 = arith.constant 1 : index
    %c1_25 = arith.constant 1 : index
    %c0_26 = arith.constant 0 : index
    %17 = vector.load %arg29[%c1_24, %c1_25, %c0_26] : memref<18x18x4xf32, #tpu.memory_space<vmem>>, vector<16x16x4xf32>
    %18 = vector.shape_cast %17 : vector<16x16x4xf32> to vector<256x4xf32>
    %c0_27 = arith.constant 0 : index
    %c16 = arith.constant 16 : index
    %19 = vector.load %arg30[%c0_27, %c16] : memref<256x36xf32, #tpu.memory_space<vmem>>, vector<256x4xf32>
    tpu.vector_store %arg30[%c0_27, %c16], %18 {strides = array<i32>} : memref<256x36xf32, #tpu.memory_space<vmem>>, vector<256x4xf32>,
    %c1_28 = arith.constant 1 : index
    %c2_29 = arith.constant 2 : index
    %c0_30 = arith.constant 0 : index
    %20 = vector.load %arg29[%c1_28, %c2_29, %c0_30] : memref<18x18x4xf32, #tpu.memory_space<vmem>>, vector<16x16x4xf32>
    %21 = vector.shape_cast %20 : vector<16x16x4xf32> to vector<256x4xf32>
    %c0_31 = arith.constant 0 : index
    %c20 = arith.constant 20 : index
    %22 = vector.load %arg30[%c0_31, %c20] : memref<256x36xf32, #tpu.memory_space<vmem>>, vector<256x4xf32>
    tpu.vector_store %arg30[%c0_31, %c20], %21 {strides = array<i32>} : memref<256x36xf32, #tpu.memory_space<vmem>>, vector<256x4xf32>,
    %c2_32 = arith.constant 2 : index
    %c0_33 = arith.constant 0 : index
    %c0_34 = arith.constant 0 : index
    %23 = vector.load %arg29[%c2_32, %c0_33, %c0_34] : memref<18x18x4xf32, #tpu.memory_space<vmem>>, vector<16x16x4xf32>
    %24 = vector.shape_cast %23 : vector<16x16x4xf32> to vector<256x4xf32>
    %c0_35 = arith.constant 0 : index
    %c24 = arith.constant 24 : index
    %25 = vector.load %arg30[%c0_35, %c24] : memref<256x36xf32, #tpu.memory_space<vmem>>, vector<256x4xf32>
    tpu.vector_store %arg30[%c0_35, %c24], %24 {strides = array<i32>} : memref<256x36xf32, #tpu.memory_space<vmem>>, vector<256x4xf32>,
    %c2_36 = arith.constant 2 : index
    %c1_37 = arith.constant 1 : index
    %c0_38 = arith.constant 0 : index
    %26 = vector.load %arg29[%c2_36, %c1_37, %c0_38] : memref<18x18x4xf32, #tpu.memory_space<vmem>>, vector<16x16x4xf32>
    %27 = vector.shape_cast %26 : vector<16x16x4xf32> to vector<256x4xf32>
    %c0_39 = arith.constant 0 : index
    %c28 = arith.constant 28 : index
    %28 = vector.load %arg30[%c0_39, %c28] : memref<256x36xf32, #tpu.memory_space<vmem>>, vector<256x4xf32>
    tpu.vector_store %arg30[%c0_39, %c28], %27 {strides = array<i32>} : memref<256x36xf32, #tpu.memory_space<vmem>>, vector<256x4xf32>,
    %c2_40 = arith.constant 2 : index
    %c2_41 = arith.constant 2 : index
    %c0_42 = arith.constant 0 : index
    %29 = vector.load %arg29[%c2_40, %c2_41, %c0_42] : memref<18x18x4xf32, #tpu.memory_space<vmem>>, vector<16x16x4xf32>
    %30 = vector.shape_cast %29 : vector<16x16x4xf32> to vector<256x4xf32>
    %c0_43 = arith.constant 0 : index
    %c32 = arith.constant 32 : index
    %31 = vector.load %arg30[%c0_43, %c32] : memref<256x36xf32, #tpu.memory_space<vmem>>, vector<256x4xf32>
    tpu.vector_store %arg30[%c0_43, %c32], %30 {strides = array<i32>} : memref<256x36xf32, #tpu.memory_space<vmem>>, vector<256x4xf32>,
    %c0_44 = arith.constant 0 : index
    %c0_45 = arith.constant 0 : index
    %32 = vector.load %arg30[%c0_44, %c0_45] : memref<256x36xf32, #tpu.memory_space<vmem>>, vector<256x36xf32>
    %c0_46 = arith.constant 0 : index
    %c0_47 = arith.constant 0 : index
    %33 = vector.load %arg2[%c0_46, %c0_47] : memref<36x8xf32, #tpu.memory_space<vmem>>, vector<36x8xf32>
    %cst_48 = arith.constant dense<0.000000e+00> : vector<256x8xf32>
    %34 = tpu.matmul %32, %33, %cst_48 {dimension_numbers = #tpu.dot_dimension_numbers<[1], [0], [0], [1], [0, 0, 1, 1], [], []>} : vector<256x36xf32>, vector<36x8xf32>, vector<256x8xf32> -> vector<256x8xf32>
    %c0_49 = arith.constant 0 : index
    %c0_50 = arith.constant 0 : index
    %35 = vector.load %arg3[%c0_49, %c0_50] : memref<1x8xf32, #tpu.memory_space<vmem>>, vector<1x8xf32>
    %36 = vector.broadcast %35 : vector<1x8xf32> to vector<256x8xf32>
    %37 = arith.mulf %34, %36 : vector<256x8xf32>
    %c0_51 = arith.constant 0 : index
    %c0_52 = arith.constant 0 : index
    %38 = vector.load %arg4[%c0_51, %c0_52] : memref<1x8xf32, #tpu.memory_space<vmem>>, vector<1x8xf32>
    %39 = vector.broadcast %38 : vector<1x8xf32> to vector<256x8xf32>
    %40 = arith.addf %37, %39 : vector<256x8xf32>
    %cst_53 = arith.constant 0.000000e+00 : f32
    %41 = vector.broadcast %cst_53 : f32 to vector<256x8xf32>
    %42 = arith.maximumf %40, %41 : vector<256x8xf32>
    %43 = vector.shape_cast %42 : vector<256x8xf32> to vector<16x16x8xf32>
    %cst_54 = arith.constant 0.000000e+00 : f32
    %44 = vector.broadcast %cst_54 : f32 to vector<18x18x8xf32>
    %c0_55 = arith.constant 0 : index
    %c0_56 = arith.constant 0 : index
    %c0_57 = arith.constant 0 : index
    %45 = vector.load %arg31[%c0_55, %c0_56, %c0_57] : memref<18x18x8xf32, #tpu.memory_space<vmem>>, vector<18x18x8xf32>
    tpu.vector_store %arg31[%c0_55, %c0_56, %c0_57], %44 {strides = array<i32>} : memref<18x18x8xf32, #tpu.memory_space<vmem>>, vector<18x18x8xf32>,
    %c1_58 = arith.constant 1 : index
    %c1_59 = arith.constant 1 : index
    %c0_60 = arith.constant 0 : index
    %46 = vector.load %arg31[%c1_58, %c1_59, %c0_60] : memref<18x18x8xf32, #tpu.memory_space<vmem>>, vector<16x16x8xf32>
    tpu.vector_store %arg31[%c1_58, %c1_59, %c0_60], %43 {strides = array<i32>} : memref<18x18x8xf32, #tpu.memory_space<vmem>>, vector<16x16x8xf32>,
    %c0_61 = arith.constant 0 : index
    %c0_62 = arith.constant 0 : index
    %c0_63 = arith.constant 0 : index
    %47 = vector.load %arg31[%c0_61, %c0_62, %c0_63] : memref<18x18x8xf32, #tpu.memory_space<vmem>>, vector<16x16x8xf32>
    %48 = vector.shape_cast %47 : vector<16x16x8xf32> to vector<256x8xf32>
    %c0_64 = arith.constant 0 : index
    %c0_65 = arith.constant 0 : index
    %49 = vector.load %arg32[%c0_64, %c0_65] : memref<256x72xf32, #tpu.memory_space<vmem>>, vector<256x8xf32>
    tpu.vector_store %arg32[%c0_64, %c0_65], %48 {strides = array<i32>} : memref<256x72xf32, #tpu.memory_space<vmem>>, vector<256x8xf32>,
    %c0_66 = arith.constant 0 : index
    %c1_67 = arith.constant 1 : index
    %c0_68 = arith.constant 0 : index
    %50 = vector.load %arg31[%c0_66, %c1_67, %c0_68] : memref<18x18x8xf32, #tpu.memory_space<vmem>>, vector<16x16x8xf32>
    %51 = vector.shape_cast %50 : vector<16x16x8xf32> to vector<256x8xf32>
    %c0_69 = arith.constant 0 : index
    %c8_70 = arith.constant 8 : index
    %52 = vector.load %arg32[%c0_69, %c8_70] : memref<256x72xf32, #tpu.memory_space<vmem>>, vector<256x8xf32>
    tpu.vector_store %arg32[%c0_69, %c8_70], %51 {strides = array<i32>} : memref<256x72xf32, #tpu.memory_space<vmem>>, vector<256x8xf32>,
    %c0_71 = arith.constant 0 : index
    %c2_72 = arith.constant 2 : index
    %c0_73 = arith.constant 0 : index
    %53 = vector.load %arg31[%c0_71, %c2_72, %c0_73] : memref<18x18x8xf32, #tpu.memory_space<vmem>>, vector<16x16x8xf32>
    %54 = vector.shape_cast %53 : vector<16x16x8xf32> to vector<256x8xf32>
    %c0_74 = arith.constant 0 : index
    %c16_75 = arith.constant 16 : index
    %55 = vector.load %arg32[%c0_74, %c16_75] : memref<256x72xf32, #tpu.memory_space<vmem>>, vector<256x8xf32>
    tpu.vector_store %arg32[%c0_74, %c16_75], %54 {strides = array<i32>} : memref<256x72xf32, #tpu.memory_space<vmem>>, vector<256x8xf32>,
    %c1_76 = arith.constant 1 : index
    %c0_77 = arith.constant 0 : index
    %c0_78 = arith.constant 0 : index
    %56 = vector.load %arg31[%c1_76, %c0_77, %c0_78] : memref<18x18x8xf32, #tpu.memory_space<vmem>>, vector<16x16x8xf32>
    %57 = vector.shape_cast %56 : vector<16x16x8xf32> to vector<256x8xf32>
    %c0_79 = arith.constant 0 : index
    %c24_80 = arith.constant 24 : index
    %58 = vector.load %arg32[%c0_79, %c24_80] : memref<256x72xf32, #tpu.memory_space<vmem>>, vector<256x8xf32>
    tpu.vector_store %arg32[%c0_79, %c24_80], %57 {strides = array<i32>} : memref<256x72xf32, #tpu.memory_space<vmem>>, vector<256x8xf32>,
    %c1_81 = arith.constant 1 : index
    %c1_82 = arith.constant 1 : index
    %c0_83 = arith.constant 0 : index
    %59 = vector.load %arg31[%c1_81, %c1_82, %c0_83] : memref<18x18x8xf32, #tpu.memory_space<vmem>>, vector<16x16x8xf32>
    %60 = vector.shape_cast %59 : vector<16x16x8xf32> to vector<256x8xf32>
    %c0_84 = arith.constant 0 : index
    %c32_85 = arith.constant 32 : index
    %61 = vector.load %arg32[%c0_84, %c32_85] : memref<256x72xf32, #tpu.memory_space<vmem>>, vector<256x8xf32>
    tpu.vector_store %arg32[%c0_84, %c32_85], %60 {strides = array<i32>} : memref<256x72xf32, #tpu.memory_space<vmem>>, vector<256x8xf32>,
    %c1_86 = arith.constant 1 : index
    %c2_87 = arith.constant 2 : index
    %c0_88 = arith.constant 0 : index
    %62 = vector.load %arg31[%c1_86, %c2_87, %c0_88] : memref<18x18x8xf32, #tpu.memory_space<vmem>>, vector<16x16x8xf32>
    %63 = vector.shape_cast %62 : vector<16x16x8xf32> to vector<256x8xf32>
    %c0_89 = arith.constant 0 : index
    %c40 = arith.constant 40 : index
    %64 = vector.load %arg32[%c0_89, %c40] : memref<256x72xf32, #tpu.memory_space<vmem>>, vector<256x8xf32>
    tpu.vector_store %arg32[%c0_89, %c40], %63 {strides = array<i32>} : memref<256x72xf32, #tpu.memory_space<vmem>>, vector<256x8xf32>,
    %c2_90 = arith.constant 2 : index
    %c0_91 = arith.constant 0 : index
    %c0_92 = arith.constant 0 : index
    %65 = vector.load %arg31[%c2_90, %c0_91, %c0_92] : memref<18x18x8xf32, #tpu.memory_space<vmem>>, vector<16x16x8xf32>
    %66 = vector.shape_cast %65 : vector<16x16x8xf32> to vector<256x8xf32>
    %c0_93 = arith.constant 0 : index
    %c48 = arith.constant 48 : index
    %67 = vector.load %arg32[%c0_93, %c48] : memref<256x72xf32, #tpu.memory_space<vmem>>, vector<256x8xf32>
    tpu.vector_store %arg32[%c0_93, %c48], %66 {strides = array<i32>} : memref<256x72xf32, #tpu.memory_space<vmem>>, vector<256x8xf32>,
    %c2_94 = arith.constant 2 : index
    %c1_95 = arith.constant 1 : index
    %c0_96 = arith.constant 0 : index
    %68 = vector.load %arg31[%c2_94, %c1_95, %c0_96] : memref<18x18x8xf32, #tpu.memory_space<vmem>>, vector<16x16x8xf32>
    %69 = vector.shape_cast %68 : vector<16x16x8xf32> to vector<256x8xf32>
    %c0_97 = arith.constant 0 : index
    %c56 = arith.constant 56 : index
    %70 = vector.load %arg32[%c0_97, %c56] : memref<256x72xf32, #tpu.memory_space<vmem>>, vector<256x8xf32>
    tpu.vector_store %arg32[%c0_97, %c56], %69 {strides = array<i32>} : memref<256x72xf32, #tpu.memory_space<vmem>>, vector<256x8xf32>,
    %c2_98 = arith.constant 2 : index
    %c2_99 = arith.constant 2 : index
    %c0_100 = arith.constant 0 : index
    %71 = vector.load %arg31[%c2_98, %c2_99, %c0_100] : memref<18x18x8xf32, #tpu.memory_space<vmem>>, vector<16x16x8xf32>
    %72 = vector.shape_cast %71 : vector<16x16x8xf32> to vector<256x8xf32>
    %c0_101 = arith.constant 0 : index
    %c64 = arith.constant 64 : index
    %73 = vector.load %arg32[%c0_101, %c64] : memref<256x72xf32, #tpu.memory_space<vmem>>, vector<256x8xf32>
    tpu.vector_store %arg32[%c0_101, %c64], %72 {strides = array<i32>} : memref<256x72xf32, #tpu.memory_space<vmem>>, vector<256x8xf32>,
    %c0_102 = arith.constant 0 : index
    %c0_103 = arith.constant 0 : index
    %74 = vector.load %arg5[%c0_102, %c0_103] : memref<8x72xf32, #tpu.memory_space<vmem>>, vector<8x72xf32>
    %c0_104 = arith.constant 0 : index
    %c0_105 = arith.constant 0 : index
    %75 = vector.load %arg32[%c0_104, %c0_105] : memref<256x72xf32, #tpu.memory_space<vmem>>, vector<256x72xf32>
    %cst_106 = arith.constant dense<0.000000e+00> : vector<8x256xf32>
    %76 = tpu.matmul %74, %75, %cst_106 {dimension_numbers = #tpu.dot_dimension_numbers<[1], [1], [0], [0], [0, 0, 1, 0], [], []>} : vector<8x72xf32>, vector<256x72xf32>, vector<8x256xf32> -> vector<8x256xf32>
    %c0_107 = arith.constant 0 : index
    %c0_108 = arith.constant 0 : index
    %77 = vector.load %arg6[%c0_107, %c0_108] : memref<8x1xf32, #tpu.memory_space<vmem>>, vector<8x1xf32>
    %78 = vector.broadcast %77 : vector<8x1xf32> to vector<8x256xf32>
    %79 = arith.mulf %76, %78 : vector<8x256xf32>
    %c0_109 = arith.constant 0 : index
    %c0_110 = arith.constant 0 : index
    %80 = vector.load %arg7[%c0_109, %c0_110] : memref<8x1xf32, #tpu.memory_space<vmem>>, vector<8x1xf32>
    %81 = vector.broadcast %80 : vector<8x1xf32> to vector<8x256xf32>
    %82 = arith.addf %79, %81 : vector<8x256xf32>
    %cst_111 = arith.constant 0.000000e+00 : f32
    %83 = vector.broadcast %cst_111 : f32 to vector<8x256xf32>
    %84 = arith.maximumf %82, %83 : vector<8x256xf32>
    %c0_112 = arith.constant 0 : index
    %c0_113 = arith.constant 0 : index
    %c0_114 = arith.constant 0 : index
    %85 = vector.load %arg26[%c0_112, %c0_113, %c0_114] : memref<1x8x256xf32, #tpu.memory_space<vmem>>, vector<1x8x256xf32>
    %86 = vector.shape_cast %85 : vector<1x8x256xf32> to vector<8x256xf32>
    %87 = vector.shape_cast %84 : vector<8x256xf32> to vector<1x8x256xf32>
    tpu.vector_store %arg26[%c0_112, %c0_113, %c0_114], %87 {strides = array<i32>} : memref<1x8x256xf32, #tpu.memory_space<vmem>>, vector<1x8x256xf32>,
    %c0_115 = arith.constant 0 : index
    %c0_116 = arith.constant 0 : index
    %c0_117 = arith.constant 0 : index
    %88 = vector.load %arg8[%c0_115, %c0_116, %c0_117] : memref<4x64x256xf32, #tpu.memory_space<vmem>>, vector<1x64x256xf32>
    %89 = vector.shape_cast %88 : vector<1x64x256xf32> to vector<64x256xf32>
    %cst_118 = arith.constant dense<0.000000e+00> : vector<64x8xf32>
    %90 = tpu.matmul %89, %84, %cst_118 {dimension_numbers = #tpu.dot_dimension_numbers<[1], [1], [0], [0], [0, 0, 1, 0], [], []>} : vector<64x256xf32>, vector<8x256xf32>, vector<64x8xf32> -> vector<64x8xf32>
    %c0_119 = arith.constant 0 : index
    %c0_120 = arith.constant 0 : index
    %91 = vector.load %arg33[%c0_119, %c0_120] : memref<64x32xf32, #tpu.memory_space<vmem>>, vector<64x8xf32>
    tpu.vector_store %arg33[%c0_119, %c0_120], %90 {strides = array<i32>} : memref<64x32xf32, #tpu.memory_space<vmem>>, vector<64x8xf32>,
    %c1_121 = arith.constant 1 : index
    %c0_122 = arith.constant 0 : index
    %c0_123 = arith.constant 0 : index
    %92 = vector.load %arg8[%c1_121, %c0_122, %c0_123] : memref<4x64x256xf32, #tpu.memory_space<vmem>>, vector<1x64x256xf32>
    %93 = vector.shape_cast %92 : vector<1x64x256xf32> to vector<64x256xf32>
    %cst_124 = arith.constant dense<0.000000e+00> : vector<64x8xf32>
    %94 = tpu.matmul %93, %84, %cst_124 {dimension_numbers = #tpu.dot_dimension_numbers<[1], [1], [0], [0], [0, 0, 1, 0], [], []>} : vector<64x256xf32>, vector<8x256xf32>, vector<64x8xf32> -> vector<64x8xf32>
    %c0_125 = arith.constant 0 : index
    %c8_126 = arith.constant 8 : index
    %95 = vector.load %arg33[%c0_125, %c8_126] : memref<64x32xf32, #tpu.memory_space<vmem>>, vector<64x8xf32>
    tpu.vector_store %arg33[%c0_125, %c8_126], %94 {strides = array<i32>} : memref<64x32xf32, #tpu.memory_space<vmem>>, vector<64x8xf32>,
    %c2_127 = arith.constant 2 : index
    %c0_128 = arith.constant 0 : index
    %c0_129 = arith.constant 0 : index
    %96 = vector.load %arg8[%c2_127, %c0_128, %c0_129] : memref<4x64x256xf32, #tpu.memory_space<vmem>>, vector<1x64x256xf32>
    %97 = vector.shape_cast %96 : vector<1x64x256xf32> to vector<64x256xf32>
    %cst_130 = arith.constant dense<0.000000e+00> : vector<64x8xf32>
    %98 = tpu.matmul %97, %84, %cst_130 {dimension_numbers = #tpu.dot_dimension_numbers<[1], [1], [0], [0], [0, 0, 1, 0], [], []>} : vector<64x256xf32>, vector<8x256xf32>, vector<64x8xf32> -> vector<64x8xf32>
    %c0_131 = arith.constant 0 : index
    %c16_132 = arith.constant 16 : index
    %99 = vector.load %arg33[%c0_131, %c16_132] : memref<64x32xf32, #tpu.memory_space<vmem>>, vector<64x8xf32>
    tpu.vector_store %arg33[%c0_131, %c16_132], %98 {strides = array<i32>} : memref<64x32xf32, #tpu.memory_space<vmem>>, vector<64x8xf32>,
    %c3 = arith.constant 3 : index
    %c0_133 = arith.constant 0 : index
    %c0_134 = arith.constant 0 : index
    %100 = vector.load %arg8[%c3, %c0_133, %c0_134] : memref<4x64x256xf32, #tpu.memory_space<vmem>>, vector<1x64x256xf32>
    %101 = vector.shape_cast %100 : vector<1x64x256xf32> to vector<64x256xf32>
    %cst_135 = arith.constant dense<0.000000e+00> : vector<64x8xf32>
    %102 = tpu.matmul %101, %84, %cst_135 {dimension_numbers = #tpu.dot_dimension_numbers<[1], [1], [0], [0], [0, 0, 1, 0], [], []>} : vector<64x256xf32>, vector<8x256xf32>, vector<64x8xf32> -> vector<64x8xf32>
    %c0_136 = arith.constant 0 : index
    %c24_137 = arith.constant 24 : index
    %103 = vector.load %arg33[%c0_136, %c24_137] : memref<64x32xf32, #tpu.memory_space<vmem>>, vector<64x8xf32>
    tpu.vector_store %arg33[%c0_136, %c24_137], %102 {strides = array<i32>} : memref<64x32xf32, #tpu.memory_space<vmem>>, vector<64x8xf32>,
    %c0_138 = arith.constant 0 : index
    %c0_139 = arith.constant 0 : index
    %104 = vector.load %arg33[%c0_138, %c0_139] : memref<64x32xf32, #tpu.memory_space<vmem>>, vector<64x32xf32>
    %c0_140 = arith.constant 0 : index
    %c0_141 = arith.constant 0 : index
    %105 = vector.load %arg9[%c0_140, %c0_141] : memref<32x8xf32, #tpu.memory_space<vmem>>, vector<32x8xf32>
    %cst_142 = arith.constant dense<0.000000e+00> : vector<64x8xf32>
    %106 = tpu.matmul %104, %105, %cst_142 {dimension_numbers = #tpu.dot_dimension_numbers<[1], [0], [0], [1], [0, 0, 1, 1], [], []>} : vector<64x32xf32>, vector<32x8xf32>, vector<64x8xf32> -> vector<64x8xf32>
    %c0_143 = arith.constant 0 : index
    %c0_144 = arith.constant 0 : index
    %107 = vector.load %arg10[%c0_143, %c0_144] : memref<1x8xf32, #tpu.memory_space<vmem>>, vector<1x8xf32>
    %108 = vector.broadcast %107 : vector<1x8xf32> to vector<64x8xf32>
    %109 = arith.addf %106, %108 : vector<64x8xf32>
    %110 = vector.shape_cast %109 : vector<64x8xf32> to vector<8x8x8xf32>
    %cst_145 = arith.constant 0.000000e+00 : f32
    %111 = vector.broadcast %cst_145 : f32 to vector<10x10x8xf32>
    %c0_146 = arith.constant 0 : index
    %c0_147 = arith.constant 0 : index
    %c0_148 = arith.constant 0 : index
    %112 = vector.load %arg34[%c0_146, %c0_147, %c0_148] : memref<10x10x8xf32, #tpu.memory_space<vmem>>, vector<10x10x8xf32>
    tpu.vector_store %arg34[%c0_146, %c0_147, %c0_148], %111 {strides = array<i32>} : memref<10x10x8xf32, #tpu.memory_space<vmem>>, vector<10x10x8xf32>,
    %c1_149 = arith.constant 1 : index
    %c1_150 = arith.constant 1 : index
    %c0_151 = arith.constant 0 : index
    %113 = vector.load %arg34[%c1_149, %c1_150, %c0_151] : memref<10x10x8xf32, #tpu.memory_space<vmem>>, vector<8x8x8xf32>
    tpu.vector_store %arg34[%c1_149, %c1_150, %c0_151], %110 {strides = array<i32>} : memref<10x10x8xf32, #tpu.memory_space<vmem>>, vector<8x8x8xf32>,
    %c0_152 = arith.constant 0 : index
    %c0_153 = arith.constant 0 : index
    %c0_154 = arith.constant 0 : index
    %114 = vector.load %arg34[%c0_152, %c0_153, %c0_154] : memref<10x10x8xf32, #tpu.memory_space<vmem>>, vector<8x8x8xf32>
    %115 = vector.shape_cast %114 : vector<8x8x8xf32> to vector<64x8xf32>
    %c0_155 = arith.constant 0 : index
    %c0_156 = arith.constant 0 : index
    %116 = vector.load %arg35[%c0_155, %c0_156] : memref<64x72xf32, #tpu.memory_space<vmem>>, vector<64x8xf32>
    tpu.vector_store %arg35[%c0_155, %c0_156], %115 {strides = array<i32>} : memref<64x72xf32, #tpu.memory_space<vmem>>, vector<64x8xf32>,
    %c0_157 = arith.constant 0 : index
    %c1_158 = arith.constant 1 : index
    %c0_159 = arith.constant 0 : index
    %117 = vector.load %arg34[%c0_157, %c1_158, %c0_159] : memref<10x10x8xf32, #tpu.memory_space<vmem>>, vector<8x8x8xf32>
    %118 = vector.shape_cast %117 : vector<8x8x8xf32> to vector<64x8xf32>
    %c0_160 = arith.constant 0 : index
    %c8_161 = arith.constant 8 : index
    %119 = vector.load %arg35[%c0_160, %c8_161] : memref<64x72xf32, #tpu.memory_space<vmem>>, vector<64x8xf32>
    tpu.vector_store %arg35[%c0_160, %c8_161], %118 {strides = array<i32>} : memref<64x72xf32, #tpu.memory_space<vmem>>, vector<64x8xf32>,
    %c0_162 = arith.constant 0 : index
    %c2_163 = arith.constant 2 : index
    %c0_164 = arith.constant 0 : index
    %120 = vector.load %arg34[%c0_162, %c2_163, %c0_164] : memref<10x10x8xf32, #tpu.memory_space<vmem>>, vector<8x8x8xf32>
    %121 = vector.shape_cast %120 : vector<8x8x8xf32> to vector<64x8xf32>
    %c0_165 = arith.constant 0 : index
    %c16_166 = arith.constant 16 : index
    %122 = vector.load %arg35[%c0_165, %c16_166] : memref<64x72xf32, #tpu.memory_space<vmem>>, vector<64x8xf32>
    tpu.vector_store %arg35[%c0_165, %c16_166], %121 {strides = array<i32>} : memref<64x72xf32, #tpu.memory_space<vmem>>, vector<64x8xf32>,
    %c1_167 = arith.constant 1 : index
    %c0_168 = arith.constant 0 : index
    %c0_169 = arith.constant 0 : index
    %123 = vector.load %arg34[%c1_167, %c0_168, %c0_169] : memref<10x10x8xf32, #tpu.memory_space<vmem>>, vector<8x8x8xf32>
    %124 = vector.shape_cast %123 : vector<8x8x8xf32> to vector<64x8xf32>
    %c0_170 = arith.constant 0 : index
    %c24_171 = arith.constant 24 : index
    %125 = vector.load %arg35[%c0_170, %c24_171] : memref<64x72xf32, #tpu.memory_space<vmem>>, vector<64x8xf32>
    tpu.vector_store %arg35[%c0_170, %c24_171], %124 {strides = array<i32>} : memref<64x72xf32, #tpu.memory_space<vmem>>, vector<64x8xf32>,
    %c1_172 = arith.constant 1 : index
    %c1_173 = arith.constant 1 : index
    %c0_174 = arith.constant 0 : index
    %126 = vector.load %arg34[%c1_172, %c1_173, %c0_174] : memref<10x10x8xf32, #tpu.memory_space<vmem>>, vector<8x8x8xf32>
    %127 = vector.shape_cast %126 : vector<8x8x8xf32> to vector<64x8xf32>
    %c0_175 = arith.constant 0 : index
    %c32_176 = arith.constant 32 : index
    %128 = vector.load %arg35[%c0_175, %c32_176] : memref<64x72xf32, #tpu.memory_space<vmem>>, vector<64x8xf32>
    tpu.vector_store %arg35[%c0_175, %c32_176], %127 {strides = array<i32>} : memref<64x72xf32, #tpu.memory_space<vmem>>, vector<64x8xf32>,
    %c1_177 = arith.constant 1 : index
    %c2_178 = arith.constant 2 : index
    %c0_179 = arith.constant 0 : index
    %129 = vector.load %arg34[%c1_177, %c2_178, %c0_179] : memref<10x10x8xf32, #tpu.memory_space<vmem>>, vector<8x8x8xf32>
    %130 = vector.shape_cast %129 : vector<8x8x8xf32> to vector<64x8xf32>
    %c0_180 = arith.constant 0 : index
    %c40_181 = arith.constant 40 : index
    %131 = vector.load %arg35[%c0_180, %c40_181] : memref<64x72xf32, #tpu.memory_space<vmem>>, vector<64x8xf32>
    tpu.vector_store %arg35[%c0_180, %c40_181], %130 {strides = array<i32>} : memref<64x72xf32, #tpu.memory_space<vmem>>, vector<64x8xf32>,
    %c2_182 = arith.constant 2 : index
    %c0_183 = arith.constant 0 : index
    %c0_184 = arith.constant 0 : index
    %132 = vector.load %arg34[%c2_182, %c0_183, %c0_184] : memref<10x10x8xf32, #tpu.memory_space<vmem>>, vector<8x8x8xf32>
    %133 = vector.shape_cast %132 : vector<8x8x8xf32> to vector<64x8xf32>
    %c0_185 = arith.constant 0 : index
    %c48_186 = arith.constant 48 : index
    %134 = vector.load %arg35[%c0_185, %c48_186] : memref<64x72xf32, #tpu.memory_space<vmem>>, vector<64x8xf32>
    tpu.vector_store %arg35[%c0_185, %c48_186], %133 {strides = array<i32>} : memref<64x72xf32, #tpu.memory_space<vmem>>, vector<64x8xf32>,
    %c2_187 = arith.constant 2 : index
    %c1_188 = arith.constant 1 : index
    %c0_189 = arith.constant 0 : index
    %135 = vector.load %arg34[%c2_187, %c1_188, %c0_189] : memref<10x10x8xf32, #tpu.memory_space<vmem>>, vector<8x8x8xf32>
    %136 = vector.shape_cast %135 : vector<8x8x8xf32> to vector<64x8xf32>
    %c0_190 = arith.constant 0 : index
    %c56_191 = arith.constant 56 : index
    %137 = vector.load %arg35[%c0_190, %c56_191] : memref<64x72xf32, #tpu.memory_space<vmem>>, vector<64x8xf32>
    tpu.vector_store %arg35[%c0_190, %c56_191], %136 {strides = array<i32>} : memref<64x72xf32, #tpu.memory_space<vmem>>, vector<64x8xf32>,
    %c2_192 = arith.constant 2 : index
    %c2_193 = arith.constant 2 : index
    %c0_194 = arith.constant 0 : index
    %138 = vector.load %arg34[%c2_192, %c2_193, %c0_194] : memref<10x10x8xf32, #tpu.memory_space<vmem>>, vector<8x8x8xf32>
    %139 = vector.shape_cast %138 : vector<8x8x8xf32> to vector<64x8xf32>
    %c0_195 = arith.constant 0 : index
    %c64_196 = arith.constant 64 : index
    %140 = vector.load %arg35[%c0_195, %c64_196] : memref<64x72xf32, #tpu.memory_space<vmem>>, vector<64x8xf32>
    tpu.vector_store %arg35[%c0_195, %c64_196], %139 {strides = array<i32>} : memref<64x72xf32, #tpu.memory_space<vmem>>, vector<64x8xf32>,
    %c0_197 = arith.constant 0 : index
    %c0_198 = arith.constant 0 : index
    %141 = vector.load %arg35[%c0_197, %c0_198] : memref<64x72xf32, #tpu.memory_space<vmem>>, vector<64x72xf32>
    %c0_199 = arith.constant 0 : index
    %c0_200 = arith.constant 0 : index
    %142 = vector.load %arg11[%c0_199, %c0_200] : memref<72x16xf32, #tpu.memory_space<vmem>>, vector<72x16xf32>
    %cst_201 = arith.constant dense<0.000000e+00> : vector<64x16xf32>
    %143 = tpu.matmul %141, %142, %cst_201 {dimension_numbers = #tpu.dot_dimension_numbers<[1], [0], [0], [1], [0, 0, 1, 1], [], []>} : vector<64x72xf32>, vector<72x16xf32>, vector<64x16xf32> -> vector<64x16xf32>
    %c0_202 = arith.constant 0 : index
    %c0_203 = arith.constant 0 : index
    %144 = vector.load %arg12[%c0_202, %c0_203] : memref<1x16xf32, #tpu.memory_space<vmem>>, vector<1x16xf32>
    %145 = vector.broadcast %144 : vector<1x16xf32> to vector<64x16xf32>
    %146 = arith.mulf %143, %145 : vector<64x16xf32>
    %c0_204 = arith.constant 0 : index
    %c0_205 = arith.constant 0 : index
    %147 = vector.load %arg13[%c0_204, %c0_205] : memref<1x16xf32, #tpu.memory_space<vmem>>, vector<1x16xf32>
    %148 = vector.broadcast %147 : vector<1x16xf32> to vector<64x16xf32>
    %149 = arith.addf %146, %148 : vector<64x16xf32>
    %cst_206 = arith.constant 0.000000e+00 : f32
    %150 = vector.broadcast %cst_206 : f32 to vector<64x16xf32>
    %151 = arith.maximumf %149, %150 : vector<64x16xf32>
    %152 = vector.shape_cast %151 : vector<64x16xf32> to vector<8x8x16xf32>
    %cst_207 = arith.constant 0.000000e+00 : f32
    %153 = vector.broadcast %cst_207 : f32 to vector<10x10x16xf32>
    %c0_208 = arith.constant 0 : index
    %c0_209 = arith.constant 0 : index
    %c0_210 = arith.constant 0 : index
    %154 = vector.load %arg36[%c0_208, %c0_209, %c0_210] : memref<10x10x16xf32, #tpu.memory_space<vmem>>, vector<10x10x16xf32>
    tpu.vector_store %arg36[%c0_208, %c0_209, %c0_210], %153 {strides = array<i32>} : memref<10x10x16xf32, #tpu.memory_space<vmem>>, vector<10x10x16xf32>,
    %c1_211 = arith.constant 1 : index
    %c1_212 = arith.constant 1 : index
    %c0_213 = arith.constant 0 : index
    %155 = vector.load %arg36[%c1_211, %c1_212, %c0_213] : memref<10x10x16xf32, #tpu.memory_space<vmem>>, vector<8x8x16xf32>
    tpu.vector_store %arg36[%c1_211, %c1_212, %c0_213], %152 {strides = array<i32>} : memref<10x10x16xf32, #tpu.memory_space<vmem>>, vector<8x8x16xf32>,
    %c0_214 = arith.constant 0 : index
    %c0_215 = arith.constant 0 : index
    %c0_216 = arith.constant 0 : index
    %156 = vector.load %arg36[%c0_214, %c0_215, %c0_216] : memref<10x10x16xf32, #tpu.memory_space<vmem>>, vector<8x8x16xf32>
    %157 = vector.shape_cast %156 : vector<8x8x16xf32> to vector<64x16xf32>
    %c0_217 = arith.constant 0 : index
    %c0_218 = arith.constant 0 : index
    %158 = vector.load %arg37[%c0_217, %c0_218] : memref<64x144xf32, #tpu.memory_space<vmem>>, vector<64x16xf32>
    tpu.vector_store %arg37[%c0_217, %c0_218], %157 {strides = array<i32>} : memref<64x144xf32, #tpu.memory_space<vmem>>, vector<64x16xf32>,
    %c0_219 = arith.constant 0 : index
    %c1_220 = arith.constant 1 : index
    %c0_221 = arith.constant 0 : index
    %159 = vector.load %arg36[%c0_219, %c1_220, %c0_221] : memref<10x10x16xf32, #tpu.memory_space<vmem>>, vector<8x8x16xf32>
    %160 = vector.shape_cast %159 : vector<8x8x16xf32> to vector<64x16xf32>
    %c0_222 = arith.constant 0 : index
    %c16_223 = arith.constant 16 : index
    %161 = vector.load %arg37[%c0_222, %c16_223] : memref<64x144xf32, #tpu.memory_space<vmem>>, vector<64x16xf32>
    tpu.vector_store %arg37[%c0_222, %c16_223], %160 {strides = array<i32>} : memref<64x144xf32, #tpu.memory_space<vmem>>, vector<64x16xf32>,
    %c0_224 = arith.constant 0 : index
    %c2_225 = arith.constant 2 : index
    %c0_226 = arith.constant 0 : index
    %162 = vector.load %arg36[%c0_224, %c2_225, %c0_226] : memref<10x10x16xf32, #tpu.memory_space<vmem>>, vector<8x8x16xf32>
    %163 = vector.shape_cast %162 : vector<8x8x16xf32> to vector<64x16xf32>
    %c0_227 = arith.constant 0 : index
    %c32_228 = arith.constant 32 : index
    %164 = vector.load %arg37[%c0_227, %c32_228] : memref<64x144xf32, #tpu.memory_space<vmem>>, vector<64x16xf32>
    tpu.vector_store %arg37[%c0_227, %c32_228], %163 {strides = array<i32>} : memref<64x144xf32, #tpu.memory_space<vmem>>, vector<64x16xf32>,
    %c1_229 = arith.constant 1 : index
    %c0_230 = arith.constant 0 : index
    %c0_231 = arith.constant 0 : index
    %165 = vector.load %arg36[%c1_229, %c0_230, %c0_231] : memref<10x10x16xf32, #tpu.memory_space<vmem>>, vector<8x8x16xf32>
    %166 = vector.shape_cast %165 : vector<8x8x16xf32> to vector<64x16xf32>
    %c0_232 = arith.constant 0 : index
    %c48_233 = arith.constant 48 : index
    %167 = vector.load %arg37[%c0_232, %c48_233] : memref<64x144xf32, #tpu.memory_space<vmem>>, vector<64x16xf32>
    tpu.vector_store %arg37[%c0_232, %c48_233], %166 {strides = array<i32>} : memref<64x144xf32, #tpu.memory_space<vmem>>, vector<64x16xf32>,
    %c1_234 = arith.constant 1 : index
    %c1_235 = arith.constant 1 : index
    %c0_236 = arith.constant 0 : index
    %168 = vector.load %arg36[%c1_234, %c1_235, %c0_236] : memref<10x10x16xf32, #tpu.memory_space<vmem>>, vector<8x8x16xf32>
    %169 = vector.shape_cast %168 : vector<8x8x16xf32> to vector<64x16xf32>
    %c0_237 = arith.constant 0 : index
    %c64_238 = arith.constant 64 : index
    %170 = vector.load %arg37[%c0_237, %c64_238] : memref<64x144xf32, #tpu.memory_space<vmem>>, vector<64x16xf32>
    tpu.vector_store %arg37[%c0_237, %c64_238], %169 {strides = array<i32>} : memref<64x144xf32, #tpu.memory_space<vmem>>, vector<64x16xf32>,
    %c1_239 = arith.constant 1 : index
    %c2_240 = arith.constant 2 : index
    %c0_241 = arith.constant 0 : index
    %171 = vector.load %arg36[%c1_239, %c2_240, %c0_241] : memref<10x10x16xf32, #tpu.memory_space<vmem>>, vector<8x8x16xf32>
    %172 = vector.shape_cast %171 : vector<8x8x16xf32> to vector<64x16xf32>
    %c0_242 = arith.constant 0 : index
    %c80 = arith.constant 80 : index
    %173 = vector.load %arg37[%c0_242, %c80] : memref<64x144xf32, #tpu.memory_space<vmem>>, vector<64x16xf32>
    tpu.vector_store %arg37[%c0_242, %c80], %172 {strides = array<i32>} : memref<64x144xf32, #tpu.memory_space<vmem>>, vector<64x16xf32>,
    %c2_243 = arith.constant 2 : index
    %c0_244 = arith.constant 0 : index
    %c0_245 = arith.constant 0 : index
    %174 = vector.load %arg36[%c2_243, %c0_244, %c0_245] : memref<10x10x16xf32, #tpu.memory_space<vmem>>, vector<8x8x16xf32>
    %175 = vector.shape_cast %174 : vector<8x8x16xf32> to vector<64x16xf32>
    %c0_246 = arith.constant 0 : index
    %c96 = arith.constant 96 : index
    %176 = vector.load %arg37[%c0_246, %c96] : memref<64x144xf32, #tpu.memory_space<vmem>>, vector<64x16xf32>
    tpu.vector_store %arg37[%c0_246, %c96], %175 {strides = array<i32>} : memref<64x144xf32, #tpu.memory_space<vmem>>, vector<64x16xf32>,
    %c2_247 = arith.constant 2 : index
    %c1_248 = arith.constant 1 : index
    %c0_249 = arith.constant 0 : index
    %177 = vector.load %arg36[%c2_247, %c1_248, %c0_249] : memref<10x10x16xf32, #tpu.memory_space<vmem>>, vector<8x8x16xf32>
    %178 = vector.shape_cast %177 : vector<8x8x16xf32> to vector<64x16xf32>
    %c0_250 = arith.constant 0 : index
    %c112 = arith.constant 112 : index
    %179 = vector.load %arg37[%c0_250, %c112] : memref<64x144xf32, #tpu.memory_space<vmem>>, vector<64x16xf32>
    tpu.vector_store %arg37[%c0_250, %c112], %178 {strides = array<i32>} : memref<64x144xf32, #tpu.memory_space<vmem>>, vector<64x16xf32>,
    %c2_251 = arith.constant 2 : index
    %c2_252 = arith.constant 2 : index
    %c0_253 = arith.constant 0 : index
    %180 = vector.load %arg36[%c2_251, %c2_252, %c0_253] : memref<10x10x16xf32, #tpu.memory_space<vmem>>, vector<8x8x16xf32>
    %181 = vector.shape_cast %180 : vector<8x8x16xf32> to vector<64x16xf32>
    %c0_254 = arith.constant 0 : index
    %c128 = arith.constant 128 : index
    %182 = vector.load %arg37[%c0_254, %c128] : memref<64x144xf32, #tpu.memory_space<vmem>>, vector<64x16xf32>
    tpu.vector_store %arg37[%c0_254, %c128], %181 {strides = array<i32>} : memref<64x144xf32, #tpu.memory_space<vmem>>, vector<64x16xf32>,
    %c0_255 = arith.constant 0 : index
    %c0_256 = arith.constant 0 : index
    %183 = vector.load %arg14[%c0_255, %c0_256] : memref<16x144xf32, #tpu.memory_space<vmem>>, vector<16x144xf32>
    %c0_257 = arith.constant 0 : index
    %c0_258 = arith.constant 0 : index
    %184 = vector.load %arg37[%c0_257, %c0_258] : memref<64x144xf32, #tpu.memory_space<vmem>>, vector<64x144xf32>
    %cst_259 = arith.constant dense<0.000000e+00> : vector<16x64xf32>
    %185 = tpu.matmul %183, %184, %cst_259 {dimension_numbers = #tpu.dot_dimension_numbers<[1], [1], [0], [0], [0, 0, 1, 0], [], []>} : vector<16x144xf32>, vector<64x144xf32>, vector<16x64xf32> -> vector<16x64xf32>
    %c0_260 = arith.constant 0 : index
    %c0_261 = arith.constant 0 : index
    %186 = vector.load %arg15[%c0_260, %c0_261] : memref<16x1xf32, #tpu.memory_space<vmem>>, vector<16x1xf32>
    %187 = vector.broadcast %186 : vector<16x1xf32> to vector<16x64xf32>
    %188 = arith.mulf %185, %187 : vector<16x64xf32>
    %c0_262 = arith.constant 0 : index
    %c0_263 = arith.constant 0 : index
    %189 = vector.load %arg16[%c0_262, %c0_263] : memref<16x1xf32, #tpu.memory_space<vmem>>, vector<16x1xf32>
    %190 = vector.broadcast %189 : vector<16x1xf32> to vector<16x64xf32>
    %191 = arith.addf %188, %190 : vector<16x64xf32>
    %cst_264 = arith.constant 0.000000e+00 : f32
    %192 = vector.broadcast %cst_264 : f32 to vector<16x64xf32>
    %193 = arith.maximumf %191, %192 : vector<16x64xf32>
    %c0_265 = arith.constant 0 : index
    %c0_266 = arith.constant 0 : index
    %c0_267 = arith.constant 0 : index
    %194 = vector.load %arg27[%c0_265, %c0_266, %c0_267] : memref<1x16x64xf32, #tpu.memory_space<vmem>>, vector<1x16x64xf32>
    %195 = vector.shape_cast %194 : vector<1x16x64xf32> to vector<16x64xf32>
    %196 = vector.shape_cast %193 : vector<16x64xf32> to vector<1x16x64xf32>
    tpu.vector_store %arg27[%c0_265, %c0_266, %c0_267], %196 {strides = array<i32>} : memref<1x16x64xf32, #tpu.memory_space<vmem>>, vector<1x16x64xf32>,
    %c0_268 = arith.constant 0 : index
    %c0_269 = arith.constant 0 : index
    %c0_270 = arith.constant 0 : index
    %197 = vector.load %arg17[%c0_268, %c0_269, %c0_270] : memref<4x16x64xf32, #tpu.memory_space<vmem>>, vector<1x16x64xf32>
    %198 = vector.shape_cast %197 : vector<1x16x64xf32> to vector<16x64xf32>
    %cst_271 = arith.constant dense<0.000000e+00> : vector<16x16xf32>
    %199 = tpu.matmul %198, %193, %cst_271 {dimension_numbers = #tpu.dot_dimension_numbers<[1], [1], [0], [0], [0, 0, 1, 0], [], []>} : vector<16x64xf32>, vector<16x64xf32>, vector<16x16xf32> -> vector<16x16xf32>
    %c0_272 = arith.constant 0 : index
    %c0_273 = arith.constant 0 : index
    %200 = vector.load %arg38[%c0_272, %c0_273] : memref<16x64xf32, #tpu.memory_space<vmem>>, vector<16x16xf32>
    tpu.vector_store %arg38[%c0_272, %c0_273], %199 {strides = array<i32>} : memref<16x64xf32, #tpu.memory_space<vmem>>, vector<16x16xf32>,
    %c1_274 = arith.constant 1 : index
    %c0_275 = arith.constant 0 : index
    %c0_276 = arith.constant 0 : index
    %201 = vector.load %arg17[%c1_274, %c0_275, %c0_276] : memref<4x16x64xf32, #tpu.memory_space<vmem>>, vector<1x16x64xf32>
    %202 = vector.shape_cast %201 : vector<1x16x64xf32> to vector<16x64xf32>
    %cst_277 = arith.constant dense<0.000000e+00> : vector<16x16xf32>
    %203 = tpu.matmul %202, %193, %cst_277 {dimension_numbers = #tpu.dot_dimension_numbers<[1], [1], [0], [0], [0, 0, 1, 0], [], []>} : vector<16x64xf32>, vector<16x64xf32>, vector<16x16xf32> -> vector<16x16xf32>
    %c0_278 = arith.constant 0 : index
    %c16_279 = arith.constant 16 : index
    %204 = vector.load %arg38[%c0_278, %c16_279] : memref<16x64xf32, #tpu.memory_space<vmem>>, vector<16x16xf32>
    tpu.vector_store %arg38[%c0_278, %c16_279], %203 {strides = array<i32>} : memref<16x64xf32, #tpu.memory_space<vmem>>, vector<16x16xf32>,
    %c2_280 = arith.constant 2 : index
    %c0_281 = arith.constant 0 : index
    %c0_282 = arith.constant 0 : index
    %205 = vector.load %arg17[%c2_280, %c0_281, %c0_282] : memref<4x16x64xf32, #tpu.memory_space<vmem>>, vector<1x16x64xf32>
    %206 = vector.shape_cast %205 : vector<1x16x64xf32> to vector<16x64xf32>
    %cst_283 = arith.constant dense<0.000000e+00> : vector<16x16xf32>
    %207 = tpu.matmul %206, %193, %cst_283 {dimension_numbers = #tpu.dot_dimension_numbers<[1], [1], [0], [0], [0, 0, 1, 0], [], []>} : vector<16x64xf32>, vector<16x64xf32>, vector<16x16xf32> -> vector<16x16xf32>
    %c0_284 = arith.constant 0 : index
    %c32_285 = arith.constant 32 : index
    %208 = vector.load %arg38[%c0_284, %c32_285] : memref<16x64xf32, #tpu.memory_space<vmem>>, vector<16x16xf32>
    tpu.vector_store %arg38[%c0_284, %c32_285], %207 {strides = array<i32>} : memref<16x64xf32, #tpu.memory_space<vmem>>, vector<16x16xf32>,
    %c3_286 = arith.constant 3 : index
    %c0_287 = arith.constant 0 : index
    %c0_288 = arith.constant 0 : index
    %209 = vector.load %arg17[%c3_286, %c0_287, %c0_288] : memref<4x16x64xf32, #tpu.memory_space<vmem>>, vector<1x16x64xf32>
    %210 = vector.shape_cast %209 : vector<1x16x64xf32> to vector<16x64xf32>
    %cst_289 = arith.constant dense<0.000000e+00> : vector<16x16xf32>
    %211 = tpu.matmul %210, %193, %cst_289 {dimension_numbers = #tpu.dot_dimension_numbers<[1], [1], [0], [0], [0, 0, 1, 0], [], []>} : vector<16x64xf32>, vector<16x64xf32>, vector<16x16xf32> -> vector<16x16xf32>
    %c0_290 = arith.constant 0 : index
    %c48_291 = arith.constant 48 : index
    %212 = vector.load %arg38[%c0_290, %c48_291] : memref<16x64xf32, #tpu.memory_space<vmem>>, vector<16x16xf32>
    tpu.vector_store %arg38[%c0_290, %c48_291], %211 {strides = array<i32>} : memref<16x64xf32, #tpu.memory_space<vmem>>, vector<16x16xf32>,
    %c0_292 = arith.constant 0 : index
    %c0_293 = arith.constant 0 : index
    %213 = vector.load %arg38[%c0_292, %c0_293] : memref<16x64xf32, #tpu.memory_space<vmem>>, vector<16x64xf32>
    %c0_294 = arith.constant 0 : index
    %c0_295 = arith.constant 0 : index
    %214 = vector.load %arg18[%c0_294, %c0_295] : memref<64x16xf32, #tpu.memory_space<vmem>>, vector<64x16xf32>
    %cst_296 = arith.constant dense<0.000000e+00> : vector<16x16xf32>
    %215 = tpu.matmul %213, %214, %cst_296 {dimension_numbers = #tpu.dot_dimension_numbers<[1], [0], [0], [1], [0, 0, 1, 1], [], []>} : vector<16x64xf32>, vector<64x16xf32>, vector<16x16xf32> -> vector<16x16xf32>
    %c0_297 = arith.constant 0 : index
    %c0_298 = arith.constant 0 : index
    %216 = vector.load %arg19[%c0_297, %c0_298] : memref<1x16xf32, #tpu.memory_space<vmem>>, vector<1x16xf32>
    %217 = vector.broadcast %216 : vector<1x16xf32> to vector<16x16xf32>
    %218 = arith.addf %215, %217 : vector<16x16xf32>
    %219 = vector.shape_cast %218 : vector<16x16xf32> to vector<4x4x16xf32>
    %cst_299 = arith.constant 0.000000e+00 : f32
    %220 = vector.broadcast %cst_299 : f32 to vector<6x6x16xf32>
    %c0_300 = arith.constant 0 : index
    %c0_301 = arith.constant 0 : index
    %c0_302 = arith.constant 0 : index
    %221 = vector.load %arg39[%c0_300, %c0_301, %c0_302] : memref<6x6x16xf32, #tpu.memory_space<vmem>>, vector<6x6x16xf32>
    tpu.vector_store %arg39[%c0_300, %c0_301, %c0_302], %220 {strides = array<i32>} : memref<6x6x16xf32, #tpu.memory_space<vmem>>, vector<6x6x16xf32>,
    %c1_303 = arith.constant 1 : index
    %c1_304 = arith.constant 1 : index
    %c0_305 = arith.constant 0 : index
    %222 = vector.load %arg39[%c1_303, %c1_304, %c0_305] : memref<6x6x16xf32, #tpu.memory_space<vmem>>, vector<4x4x16xf32>
    tpu.vector_store %arg39[%c1_303, %c1_304, %c0_305], %219 {strides = array<i32>} : memref<6x6x16xf32, #tpu.memory_space<vmem>>, vector<4x4x16xf32>,
    %c0_306 = arith.constant 0 : index
    %c0_307 = arith.constant 0 : index
    %c0_308 = arith.constant 0 : index
    %223 = vector.load %arg39[%c0_306, %c0_307, %c0_308] : memref<6x6x16xf32, #tpu.memory_space<vmem>>, vector<4x4x16xf32>
    %224 = vector.shape_cast %223 : vector<4x4x16xf32> to vector<16x16xf32>
    %c0_309 = arith.constant 0 : index
    %c0_310 = arith.constant 0 : index
    %225 = vector.load %arg40[%c0_309, %c0_310] : memref<16x144xf32, #tpu.memory_space<vmem>>, vector<16x16xf32>
    tpu.vector_store %arg40[%c0_309, %c0_310], %224 {strides = array<i32>} : memref<16x144xf32, #tpu.memory_space<vmem>>, vector<16x16xf32>,
    %c0_311 = arith.constant 0 : index
    %c1_312 = arith.constant 1 : index
    %c0_313 = arith.constant 0 : index
    %226 = vector.load %arg39[%c0_311, %c1_312, %c0_313] : memref<6x6x16xf32, #tpu.memory_space<vmem>>, vector<4x4x16xf32>
    %227 = vector.shape_cast %226 : vector<4x4x16xf32> to vector<16x16xf32>
    %c0_314 = arith.constant 0 : index
    %c16_315 = arith.constant 16 : index
    %228 = vector.load %arg40[%c0_314, %c16_315] : memref<16x144xf32, #tpu.memory_space<vmem>>, vector<16x16xf32>
    tpu.vector_store %arg40[%c0_314, %c16_315], %227 {strides = array<i32>} : memref<16x144xf32, #tpu.memory_space<vmem>>, vector<16x16xf32>,
    %c0_316 = arith.constant 0 : index
    %c2_317 = arith.constant 2 : index
    %c0_318 = arith.constant 0 : index
    %229 = vector.load %arg39[%c0_316, %c2_317, %c0_318] : memref<6x6x16xf32, #tpu.memory_space<vmem>>, vector<4x4x16xf32>
    %230 = vector.shape_cast %229 : vector<4x4x16xf32> to vector<16x16xf32>
    %c0_319 = arith.constant 0 : index
    %c32_320 = arith.constant 32 : index
    %231 = vector.load %arg40[%c0_319, %c32_320] : memref<16x144xf32, #tpu.memory_space<vmem>>, vector<16x16xf32>
    tpu.vector_store %arg40[%c0_319, %c32_320], %230 {strides = array<i32>} : memref<16x144xf32, #tpu.memory_space<vmem>>, vector<16x16xf32>,
    %c1_321 = arith.constant 1 : index
    %c0_322 = arith.constant 0 : index
    %c0_323 = arith.constant 0 : index
    %232 = vector.load %arg39[%c1_321, %c0_322, %c0_323] : memref<6x6x16xf32, #tpu.memory_space<vmem>>, vector<4x4x16xf32>
    %233 = vector.shape_cast %232 : vector<4x4x16xf32> to vector<16x16xf32>
    %c0_324 = arith.constant 0 : index
    %c48_325 = arith.constant 48 : index
    %234 = vector.load %arg40[%c0_324, %c48_325] : memref<16x144xf32, #tpu.memory_space<vmem>>, vector<16x16xf32>
    tpu.vector_store %arg40[%c0_324, %c48_325], %233 {strides = array<i32>} : memref<16x144xf32, #tpu.memory_space<vmem>>, vector<16x16xf32>,
    %c1_326 = arith.constant 1 : index
    %c1_327 = arith.constant 1 : index
    %c0_328 = arith.constant 0 : index
    %235 = vector.load %arg39[%c1_326, %c1_327, %c0_328] : memref<6x6x16xf32, #tpu.memory_space<vmem>>, vector<4x4x16xf32>
    %236 = vector.shape_cast %235 : vector<4x4x16xf32> to vector<16x16xf32>
    %c0_329 = arith.constant 0 : index
    %c64_330 = arith.constant 64 : index
    %237 = vector.load %arg40[%c0_329, %c64_330] : memref<16x144xf32, #tpu.memory_space<vmem>>, vector<16x16xf32>
    tpu.vector_store %arg40[%c0_329, %c64_330], %236 {strides = array<i32>} : memref<16x144xf32, #tpu.memory_space<vmem>>, vector<16x16xf32>,
    %c1_331 = arith.constant 1 : index
    %c2_332 = arith.constant 2 : index
    %c0_333 = arith.constant 0 : index
    %238 = vector.load %arg39[%c1_331, %c2_332, %c0_333] : memref<6x6x16xf32, #tpu.memory_space<vmem>>, vector<4x4x16xf32>
    %239 = vector.shape_cast %238 : vector<4x4x16xf32> to vector<16x16xf32>
    %c0_334 = arith.constant 0 : index
    %c80_335 = arith.constant 80 : index
    %240 = vector.load %arg40[%c0_334, %c80_335] : memref<16x144xf32, #tpu.memory_space<vmem>>, vector<16x16xf32>
    tpu.vector_store %arg40[%c0_334, %c80_335], %239 {strides = array<i32>} : memref<16x144xf32, #tpu.memory_space<vmem>>, vector<16x16xf32>,
    %c2_336 = arith.constant 2 : index
    %c0_337 = arith.constant 0 : index
    %c0_338 = arith.constant 0 : index
    %241 = vector.load %arg39[%c2_336, %c0_337, %c0_338] : memref<6x6x16xf32, #tpu.memory_space<vmem>>, vector<4x4x16xf32>
    %242 = vector.shape_cast %241 : vector<4x4x16xf32> to vector<16x16xf32>
    %c0_339 = arith.constant 0 : index
    %c96_340 = arith.constant 96 : index
    %243 = vector.load %arg40[%c0_339, %c96_340] : memref<16x144xf32, #tpu.memory_space<vmem>>, vector<16x16xf32>
    tpu.vector_store %arg40[%c0_339, %c96_340], %242 {strides = array<i32>} : memref<16x144xf32, #tpu.memory_space<vmem>>, vector<16x16xf32>,
    %c2_341 = arith.constant 2 : index
    %c1_342 = arith.constant 1 : index
    %c0_343 = arith.constant 0 : index
    %244 = vector.load %arg39[%c2_341, %c1_342, %c0_343] : memref<6x6x16xf32, #tpu.memory_space<vmem>>, vector<4x4x16xf32>
    %245 = vector.shape_cast %244 : vector<4x4x16xf32> to vector<16x16xf32>
    %c0_344 = arith.constant 0 : index
    %c112_345 = arith.constant 112 : index
    %246 = vector.load %arg40[%c0_344, %c112_345] : memref<16x144xf32, #tpu.memory_space<vmem>>, vector<16x16xf32>
    tpu.vector_store %arg40[%c0_344, %c112_345], %245 {strides = array<i32>} : memref<16x144xf32, #tpu.memory_space<vmem>>, vector<16x16xf32>,
    %c2_346 = arith.constant 2 : index
    %c2_347 = arith.constant 2 : index
    %c0_348 = arith.constant 0 : index
    %247 = vector.load %arg39[%c2_346, %c2_347, %c0_348] : memref<6x6x16xf32, #tpu.memory_space<vmem>>, vector<4x4x16xf32>
    %248 = vector.shape_cast %247 : vector<4x4x16xf32> to vector<16x16xf32>
    %c0_349 = arith.constant 0 : index
    %c128_350 = arith.constant 128 : index
    %249 = vector.load %arg40[%c0_349, %c128_350] : memref<16x144xf32, #tpu.memory_space<vmem>>, vector<16x16xf32>
    tpu.vector_store %arg40[%c0_349, %c128_350], %248 {strides = array<i32>} : memref<16x144xf32, #tpu.memory_space<vmem>>, vector<16x16xf32>,
    %c0_351 = arith.constant 0 : index
    %c0_352 = arith.constant 0 : index
    %250 = vector.load %arg40[%c0_351, %c0_352] : memref<16x144xf32, #tpu.memory_space<vmem>>, vector<16x144xf32>
    %c0_353 = arith.constant 0 : index
    %c0_354 = arith.constant 0 : index
    %251 = vector.load %arg20[%c0_353, %c0_354] : memref<144x32xf32, #tpu.memory_space<vmem>>, vector<144x32xf32>
    %cst_355 = arith.constant dense<0.000000e+00> : vector<16x32xf32>
    %252 = tpu.matmul %250, %251, %cst_355 {dimension_numbers = #tpu.dot_dimension_numbers<[1], [0], [0], [1], [0, 0, 1, 1], [], []>} : vector<16x144xf32>, vector<144x32xf32>, vector<16x32xf32> -> vector<16x32xf32>
    %c0_356 = arith.constant 0 : index
    %c0_357 = arith.constant 0 : index
    %253 = vector.load %arg21[%c0_356, %c0_357] : memref<1x32xf32, #tpu.memory_space<vmem>>, vector<1x32xf32>
    %254 = vector.broadcast %253 : vector<1x32xf32> to vector<16x32xf32>
    %255 = arith.mulf %252, %254 : vector<16x32xf32>
    %c0_358 = arith.constant 0 : index
    %c0_359 = arith.constant 0 : index
    %256 = vector.load %arg22[%c0_358, %c0_359] : memref<1x32xf32, #tpu.memory_space<vmem>>, vector<1x32xf32>
    %257 = vector.broadcast %256 : vector<1x32xf32> to vector<16x32xf32>
    %258 = arith.addf %255, %257 : vector<16x32xf32>
    %cst_360 = arith.constant 0.000000e+00 : f32
    %259 = vector.broadcast %cst_360 : f32 to vector<16x32xf32>
    %260 = arith.maximumf %258, %259 : vector<16x32xf32>
    %261 = vector.shape_cast %260 : vector<16x32xf32> to vector<4x4x32xf32>
    %cst_361 = arith.constant 0.000000e+00 : f32
    %262 = vector.broadcast %cst_361 : f32 to vector<6x6x32xf32>
    %c0_362 = arith.constant 0 : index
    %c0_363 = arith.constant 0 : index
    %c0_364 = arith.constant 0 : index
    %263 = vector.load %arg41[%c0_362, %c0_363, %c0_364] : memref<6x6x32xf32, #tpu.memory_space<vmem>>, vector<6x6x32xf32>
    tpu.vector_store %arg41[%c0_362, %c0_363, %c0_364], %262 {strides = array<i32>} : memref<6x6x32xf32, #tpu.memory_space<vmem>>, vector<6x6x32xf32>,
    %c1_365 = arith.constant 1 : index
    %c1_366 = arith.constant 1 : index
    %c0_367 = arith.constant 0 : index
    %264 = vector.load %arg41[%c1_365, %c1_366, %c0_367] : memref<6x6x32xf32, #tpu.memory_space<vmem>>, vector<4x4x32xf32>
    tpu.vector_store %arg41[%c1_365, %c1_366, %c0_367], %261 {strides = array<i32>} : memref<6x6x32xf32, #tpu.memory_space<vmem>>, vector<4x4x32xf32>,
    %c0_368 = arith.constant 0 : index
    %c0_369 = arith.constant 0 : index
    %c0_370 = arith.constant 0 : index
    %265 = vector.load %arg41[%c0_368, %c0_369, %c0_370] : memref<6x6x32xf32, #tpu.memory_space<vmem>>, vector<4x4x32xf32>
    %266 = vector.shape_cast %265 : vector<4x4x32xf32> to vector<16x32xf32>
    %c0_371 = arith.constant 0 : index
    %c0_372 = arith.constant 0 : index
    %267 = vector.load %arg42[%c0_371, %c0_372] : memref<16x288xf32, #tpu.memory_space<vmem>>, vector<16x32xf32>
    tpu.vector_store %arg42[%c0_371, %c0_372], %266 {strides = array<i32>} : memref<16x288xf32, #tpu.memory_space<vmem>>, vector<16x32xf32>,
    %c0_373 = arith.constant 0 : index
    %c1_374 = arith.constant 1 : index
    %c0_375 = arith.constant 0 : index
    %268 = vector.load %arg41[%c0_373, %c1_374, %c0_375] : memref<6x6x32xf32, #tpu.memory_space<vmem>>, vector<4x4x32xf32>
    %269 = vector.shape_cast %268 : vector<4x4x32xf32> to vector<16x32xf32>
    %c0_376 = arith.constant 0 : index
    %c32_377 = arith.constant 32 : index
    %270 = vector.load %arg42[%c0_376, %c32_377] : memref<16x288xf32, #tpu.memory_space<vmem>>, vector<16x32xf32>
    tpu.vector_store %arg42[%c0_376, %c32_377], %269 {strides = array<i32>} : memref<16x288xf32, #tpu.memory_space<vmem>>, vector<16x32xf32>,
    %c0_378 = arith.constant 0 : index
    %c2_379 = arith.constant 2 : index
    %c0_380 = arith.constant 0 : index
    %271 = vector.load %arg41[%c0_378, %c2_379, %c0_380] : memref<6x6x32xf32, #tpu.memory_space<vmem>>, vector<4x4x32xf32>
    %272 = vector.shape_cast %271 : vector<4x4x32xf32> to vector<16x32xf32>
    %c0_381 = arith.constant 0 : index
    %c64_382 = arith.constant 64 : index
    %273 = vector.load %arg42[%c0_381, %c64_382] : memref<16x288xf32, #tpu.memory_space<vmem>>, vector<16x32xf32>
    tpu.vector_store %arg42[%c0_381, %c64_382], %272 {strides = array<i32>} : memref<16x288xf32, #tpu.memory_space<vmem>>, vector<16x32xf32>,
    %c1_383 = arith.constant 1 : index
    %c0_384 = arith.constant 0 : index
    %c0_385 = arith.constant 0 : index
    %274 = vector.load %arg41[%c1_383, %c0_384, %c0_385] : memref<6x6x32xf32, #tpu.memory_space<vmem>>, vector<4x4x32xf32>
    %275 = vector.shape_cast %274 : vector<4x4x32xf32> to vector<16x32xf32>
    %c0_386 = arith.constant 0 : index
    %c96_387 = arith.constant 96 : index
    %276 = vector.load %arg42[%c0_386, %c96_387] : memref<16x288xf32, #tpu.memory_space<vmem>>, vector<16x32xf32>
    tpu.vector_store %arg42[%c0_386, %c96_387], %275 {strides = array<i32>} : memref<16x288xf32, #tpu.memory_space<vmem>>, vector<16x32xf32>,
    %c1_388 = arith.constant 1 : index
    %c1_389 = arith.constant 1 : index
    %c0_390 = arith.constant 0 : index
    %277 = vector.load %arg41[%c1_388, %c1_389, %c0_390] : memref<6x6x32xf32, #tpu.memory_space<vmem>>, vector<4x4x32xf32>
    %278 = vector.shape_cast %277 : vector<4x4x32xf32> to vector<16x32xf32>
    %c0_391 = arith.constant 0 : index
    %c128_392 = arith.constant 128 : index
    %279 = vector.load %arg42[%c0_391, %c128_392] : memref<16x288xf32, #tpu.memory_space<vmem>>, vector<16x32xf32>
    tpu.vector_store %arg42[%c0_391, %c128_392], %278 {strides = array<i32>} : memref<16x288xf32, #tpu.memory_space<vmem>>, vector<16x32xf32>,
    %c1_393 = arith.constant 1 : index
    %c2_394 = arith.constant 2 : index
    %c0_395 = arith.constant 0 : index
    %280 = vector.load %arg41[%c1_393, %c2_394, %c0_395] : memref<6x6x32xf32, #tpu.memory_space<vmem>>, vector<4x4x32xf32>
    %281 = vector.shape_cast %280 : vector<4x4x32xf32> to vector<16x32xf32>
    %c0_396 = arith.constant 0 : index
    %c160 = arith.constant 160 : index
    %282 = vector.load %arg42[%c0_396, %c160] : memref<16x288xf32, #tpu.memory_space<vmem>>, vector<16x32xf32>
    tpu.vector_store %arg42[%c0_396, %c160], %281 {strides = array<i32>} : memref<16x288xf32, #tpu.memory_space<vmem>>, vector<16x32xf32>,
    %c2_397 = arith.constant 2 : index
    %c0_398 = arith.constant 0 : index
    %c0_399 = arith.constant 0 : index
    %283 = vector.load %arg41[%c2_397, %c0_398, %c0_399] : memref<6x6x32xf32, #tpu.memory_space<vmem>>, vector<4x4x32xf32>
    %284 = vector.shape_cast %283 : vector<4x4x32xf32> to vector<16x32xf32>
    %c0_400 = arith.constant 0 : index
    %c192 = arith.constant 192 : index
    %285 = vector.load %arg42[%c0_400, %c192] : memref<16x288xf32, #tpu.memory_space<vmem>>, vector<16x32xf32>
    tpu.vector_store %arg42[%c0_400, %c192], %284 {strides = array<i32>} : memref<16x288xf32, #tpu.memory_space<vmem>>, vector<16x32xf32>,
    %c2_401 = arith.constant 2 : index
    %c1_402 = arith.constant 1 : index
    %c0_403 = arith.constant 0 : index
    %286 = vector.load %arg41[%c2_401, %c1_402, %c0_403] : memref<6x6x32xf32, #tpu.memory_space<vmem>>, vector<4x4x32xf32>
    %287 = vector.shape_cast %286 : vector<4x4x32xf32> to vector<16x32xf32>
    %c0_404 = arith.constant 0 : index
    %c224 = arith.constant 224 : index
    %288 = vector.load %arg42[%c0_404, %c224] : memref<16x288xf32, #tpu.memory_space<vmem>>, vector<16x32xf32>
    tpu.vector_store %arg42[%c0_404, %c224], %287 {strides = array<i32>} : memref<16x288xf32, #tpu.memory_space<vmem>>, vector<16x32xf32>,
    %c2_405 = arith.constant 2 : index
    %c2_406 = arith.constant 2 : index
    %c0_407 = arith.constant 0 : index
    %289 = vector.load %arg41[%c2_405, %c2_406, %c0_407] : memref<6x6x32xf32, #tpu.memory_space<vmem>>, vector<4x4x32xf32>
    %290 = vector.shape_cast %289 : vector<4x4x32xf32> to vector<16x32xf32>
    %c0_408 = arith.constant 0 : index
    %c256 = arith.constant 256 : index
    %291 = vector.load %arg42[%c0_408, %c256] : memref<16x288xf32, #tpu.memory_space<vmem>>, vector<16x32xf32>
    tpu.vector_store %arg42[%c0_408, %c256], %290 {strides = array<i32>} : memref<16x288xf32, #tpu.memory_space<vmem>>, vector<16x32xf32>,
    %c0_409 = arith.constant 0 : index
    %c0_410 = arith.constant 0 : index
    %292 = vector.load %arg23[%c0_409, %c0_410] : memref<32x288xf32, #tpu.memory_space<vmem>>, vector<32x288xf32>
    %c0_411 = arith.constant 0 : index
    %c0_412 = arith.constant 0 : index
    %293 = vector.load %arg42[%c0_411, %c0_412] : memref<16x288xf32, #tpu.memory_space<vmem>>, vector<16x288xf32>
    %cst_413 = arith.constant dense<0.000000e+00> : vector<32x16xf32>
    %294 = tpu.matmul %292, %293, %cst_413 {dimension_numbers = #tpu.dot_dimension_numbers<[1], [1], [0], [0], [0, 0, 1, 0], [], []>} : vector<32x288xf32>, vector<16x288xf32>, vector<32x16xf32> -> vector<32x16xf32>
    %c0_414 = arith.constant 0 : index
    %c0_415 = arith.constant 0 : index
    %295 = vector.load %arg24[%c0_414, %c0_415] : memref<32x1xf32, #tpu.memory_space<vmem>>, vector<32x1xf32>
    %296 = vector.broadcast %295 : vector<32x1xf32> to vector<32x16xf32>
    %297 = arith.mulf %294, %296 : vector<32x16xf32>
    %c0_416 = arith.constant 0 : index
    %c0_417 = arith.constant 0 : index
    %298 = vector.load %arg25[%c0_416, %c0_417] : memref<32x1xf32, #tpu.memory_space<vmem>>, vector<32x1xf32>
    %299 = vector.broadcast %298 : vector<32x1xf32> to vector<32x16xf32>
    %300 = arith.addf %297, %299 : vector<32x16xf32>
    %cst_418 = arith.constant 0.000000e+00 : f32
    %301 = vector.broadcast %cst_418 : f32 to vector<32x16xf32>
    %302 = arith.maximumf %300, %301 : vector<32x16xf32>
    %c0_419 = arith.constant 0 : index
    %c0_420 = arith.constant 0 : index
    %c0_421 = arith.constant 0 : index
    %303 = vector.load %arg28[%c0_419, %c0_420, %c0_421] : memref<1x32x16xf32, #tpu.memory_space<vmem>>, vector<1x32x16xf32>
    %304 = vector.shape_cast %303 : vector<1x32x16xf32> to vector<32x16xf32>
    %305 = vector.shape_cast %302 : vector<32x16xf32> to vector<1x32x16xf32>
    tpu.vector_store %arg28[%c0_419, %c0_420, %c0_421], %305 {strides = array<i32>} : memref<1x32x16xf32, #tpu.memory_space<vmem>>, vector<1x32x16xf32>,
    return
  }
  func.func @transform_0(%arg0: i32) -> (i32, i32, i32, i32) {
    %c0_i32 = arith.constant 0 : i32
    %c0_i32_0 = arith.constant 0 : i32
    %c0_i32_1 = arith.constant 0 : i32
    %c0_i32_2 = arith.constant 0 : i32
    return %arg0, %c0_i32, %c0_i32_0, %c0_i32_1 : i32, i32, i32, i32
  }
  func.func @transform_1(%arg0: i32) -> (i32, i32) {
    %c0_i32 = arith.constant 0 : i32
    %c0_i32_0 = arith.constant 0 : i32
    %c0_i32_1 = arith.constant 0 : i32
    return %c0_i32, %c0_i32_0 : i32, i32
  }
  func.func @transform_2(%arg0: i32) -> (i32, i32) {
    %c0_i32 = arith.constant 0 : i32
    %c0_i32_0 = arith.constant 0 : i32
    %c0_i32_1 = arith.constant 0 : i32
    return %c0_i32, %c0_i32_0 : i32, i32
  }
  func.func @transform_3(%arg0: i32) -> (i32, i32) {
    %c0_i32 = arith.constant 0 : i32
    %c0_i32_0 = arith.constant 0 : i32
    %c0_i32_1 = arith.constant 0 : i32
    return %c0_i32, %c0_i32_0 : i32, i32
  }
  func.func @transform_4(%arg0: i32) -> (i32, i32) {
    %c0_i32 = arith.constant 0 : i32
    %c0_i32_0 = arith.constant 0 : i32
    %c0_i32_1 = arith.constant 0 : i32
    return %c0_i32, %c0_i32_0 : i32, i32
  }
  func.func @transform_5(%arg0: i32) -> (i32, i32) {
    %c0_i32 = arith.constant 0 : i32
    %c0_i32_0 = arith.constant 0 : i32
    %c0_i32_1 = arith.constant 0 : i32
    return %c0_i32, %c0_i32_0 : i32, i32
  }
  func.func @transform_6(%arg0: i32) -> (i32, i32) {
    %c0_i32 = arith.constant 0 : i32
    %c0_i32_0 = arith.constant 0 : i32
    %c0_i32_1 = arith.constant 0 : i32
    return %c0_i32, %c0_i32_0 : i32, i32
  }
  func.func @transform_7(%arg0: i32) -> (i32, i32, i32) {
    %c0_i32 = arith.constant 0 : i32
    %c0_i32_0 = arith.constant 0 : i32
    %c0_i32_1 = arith.constant 0 : i32
    %c0_i32_2 = arith.constant 0 : i32
    return %c0_i32, %c0_i32_0, %c0_i32_1 : i32, i32, i32
  }
  func.func @transform_8(%arg0: i32) -> (i32, i32) {
    %c0_i32 = arith.constant 0 : i32
    %c0_i32_0 = arith.constant 0 : i32
    %c0_i32_1 = arith.constant 0 : i32
    return %c0_i32, %c0_i32_0 : i32, i32
  }
  func.func @transform_9(%arg0: i32) -> (i32, i32) {
    %c0_i32 = arith.constant 0 : i32
    %c0_i32_0 = arith.constant 0 : i32
    %c0_i32_1 = arith.constant 0 : i32
    return %c0_i32, %c0_i32_0 : i32, i32
  }
  func.func @transform_10(%arg0: i32) -> (i32, i32) {
    %c0_i32 = arith.constant 0 : i32
    %c0_i32_0 = arith.constant 0 : i32
    %c0_i32_1 = arith.constant 0 : i32
    return %c0_i32, %c0_i32_0 : i32, i32
  }
  func.func @transform_11(%arg0: i32) -> (i32, i32) {
    %c0_i32 = arith.constant 0 : i32
    %c0_i32_0 = arith.constant 0 : i32
    %c0_i32_1 = arith.constant 0 : i32
    return %c0_i32, %c0_i32_0 : i32, i32
  }
  func.func @transform_12(%arg0: i32) -> (i32, i32) {
    %c0_i32 = arith.constant 0 : i32
    %c0_i32_0 = arith.constant 0 : i32
    %c0_i32_1 = arith.constant 0 : i32
    return %c0_i32, %c0_i32_0 : i32, i32
  }
  func.func @transform_13(%arg0: i32) -> (i32, i32) {
    %c0_i32 = arith.constant 0 : i32
    %c0_i32_0 = arith.constant 0 : i32
    %c0_i32_1 = arith.constant 0 : i32
    return %c0_i32, %c0_i32_0 : i32, i32
  }
  func.func @transform_14(%arg0: i32) -> (i32, i32) {
    %c0_i32 = arith.constant 0 : i32
    %c0_i32_0 = arith.constant 0 : i32
    %c0_i32_1 = arith.constant 0 : i32
    return %c0_i32, %c0_i32_0 : i32, i32
  }
  func.func @transform_15(%arg0: i32) -> (i32, i32) {
    %c0_i32 = arith.constant 0 : i32
    %c0_i32_0 = arith.constant 0 : i32
    %c0_i32_1 = arith.constant 0 : i32
    return %c0_i32, %c0_i32_0 : i32, i32
  }
  func.func @transform_16(%arg0: i32) -> (i32, i32, i32) {
    %c0_i32 = arith.constant 0 : i32
    %c0_i32_0 = arith.constant 0 : i32
    %c0_i32_1 = arith.constant 0 : i32
    %c0_i32_2 = arith.constant 0 : i32
    return %c0_i32, %c0_i32_0, %c0_i32_1 : i32, i32, i32
  }
  func.func @transform_17(%arg0: i32) -> (i32, i32) {
    %c0_i32 = arith.constant 0 : i32
    %c0_i32_0 = arith.constant 0 : i32
    %c0_i32_1 = arith.constant 0 : i32
    return %c0_i32, %c0_i32_0 : i32, i32
  }
  func.func @transform_18(%arg0: i32) -> (i32, i32) {
    %c0_i32 = arith.constant 0 : i32
    %c0_i32_0 = arith.constant 0 : i32
    %c0_i32_1 = arith.constant 0 : i32
    return %c0_i32, %c0_i32_0 : i32, i32
  }
  func.func @transform_19(%arg0: i32) -> (i32, i32) {
    %c0_i32 = arith.constant 0 : i32
    %c0_i32_0 = arith.constant 0 : i32
    %c0_i32_1 = arith.constant 0 : i32
    return %c0_i32, %c0_i32_0 : i32, i32
  }
  func.func @transform_20(%arg0: i32) -> (i32, i32) {
    %c0_i32 = arith.constant 0 : i32
    %c0_i32_0 = arith.constant 0 : i32
    %c0_i32_1 = arith.constant 0 : i32
    return %c0_i32, %c0_i32_0 : i32, i32
  }
  func.func @transform_21(%arg0: i32) -> (i32, i32) {
    %c0_i32 = arith.constant 0 : i32
    %c0_i32_0 = arith.constant 0 : i32
    %c0_i32_1 = arith.constant 0 : i32
    return %c0_i32, %c0_i32_0 : i32, i32
  }
  func.func @transform_22(%arg0: i32) -> (i32, i32) {
    %c0_i32 = arith.constant 0 : i32
    %c0_i32_0 = arith.constant 0 : i32
    %c0_i32_1 = arith.constant 0 : i32
    return %c0_i32, %c0_i32_0 : i32, i32
  }
  func.func @transform_23(%arg0: i32) -> (i32, i32) {
    %c0_i32 = arith.constant 0 : i32
    %c0_i32_0 = arith.constant 0 : i32
    %c0_i32_1 = arith.constant 0 : i32
    return %c0_i32, %c0_i32_0 : i32, i32
  }
  func.func @transform_24(%arg0: i32) -> (i32, i32) {
    %c0_i32 = arith.constant 0 : i32
    %c0_i32_0 = arith.constant 0 : i32
    %c0_i32_1 = arith.constant 0 : i32
    return %c0_i32, %c0_i32_0 : i32, i32
  }
  func.func @transform_25(%arg0: i32) -> (i32, i32, i32) {
    %c0_i32 = arith.constant 0 : i32
    %c0_i32_0 = arith.constant 0 : i32
    %c0_i32_1 = arith.constant 0 : i32
    return %arg0, %c0_i32, %c0_i32_0 : i32, i32, i32
  }
  func.func @transform_26(%arg0: i32) -> (i32, i32, i32) {
    %c0_i32 = arith.constant 0 : i32
    %c0_i32_0 = arith.constant 0 : i32
    %c0_i32_1 = arith.constant 0 : i32
    return %arg0, %c0_i32, %c0_i32_0 : i32, i32, i32
  }
  func.func @transform_27(%arg0: i32) -> (i32, i32, i32) {
    %c0_i32 = arith.constant 0 : i32
    %c0_i32_0 = arith.constant 0 : i32
    %c0_i32_1 = arith.constant 0 : i32
    return %arg0, %c0_i32, %c0_i32_0 : i32, i32, i32
  }
}

</mosaic_0001>

<bundles_post_ra>
// kernel: unet_encoder_forward.1
= control target key start
LH: loop header
LB: loop body
LE: loop exit
PB: predicated region body
PF: predicated region fallthrough
CT: control target
= control target key end

     0   :  { %s12481_s0 = inlined_call_operand.vmem [shape: f32[2,16,16,4], index: 0, kind: input, shape index: {}]   ;;  %s12482_s1 = inlined_call_operand.vmem [shape: f32[36,8], index: 1, kind: input, shape index: {}]   ;;  %s12483_s2 = inlined_call_operand.vmem [shape: f32[1,8], index: 2, kind: input, shape index: {}]   ;;  %s12484_s3 = inlined_call_operand.vmem [shape: f32[1,8], index: 3, kind: input, shape index: {}]   ;;  %s12485_s4 = inlined_call_operand.vmem [shape: f32[8,72], index: 4, kind: input, shape index: {}]   ;;  %s12486_s5 = inlined_call_operand.vmem [shape: f32[8,1], index: 5, kind: input, shape index: {}]   ;;  %s12487_s6 = inlined_call_operand.vmem [shape: f32[8,1], index: 6, kind: input, shape index: {}]   ;;  %s12488_s7 = inlined_call_operand.vmem [shape: f32[4,64,256], index: 7, kind: input, shape index: {}]   ;;  %s12489_s8 = inlined_call_operand.vmem [shape: f32[32,8], index: 8, kind: input, shape index: {}]   ;;  %s12490_s9 = inlined_call_operand.vmem [shape: f32[1,8], index: 9, kind: input, shape index: {}]   ;;  %s12491_s10 = inlined_call_operand.vmem [shape: f32[72,16], index: 10, kind: input, shape index: {}]   ;;  %s12492_s11 = inlined_call_operand.vmem [shape: f32[1,16], index: 11, kind: input, shape index: {}]   ;;  %s12493_s12 = inlined_call_operand.vmem [shape: f32[1,16], index: 12, kind: input, shape index: {}]   ;;  %s12494_s13 = inlined_call_operand.vmem [shape: f32[16,144], index: 13, kind: input, shape index: {}]   ;;  %s12495_s14 = inlined_call_operand.vmem [shape: f32[16,1], index: 14, kind: input, shape index: {}]   ;;  %s12496_s15 = inlined_call_operand.vmem [shape: f32[16,1], index: 15, kind: input, shape index: {}]   ;;  %s12497_s16 = inlined_call_operand.vmem [shape: f32[4,16,64], index: 16, kind: input, shape index: {}]   ;;  %s12498_s17 = inlined_call_operand.vmem [shape: f32[64,16], index: 17, kind: input, shape index: {}]   ;;  %s12499_s18 = inlined_call_operand.vmem [shape: f32[1,16], index: 18, kind: input, shape index: {}]   ;;  %s12500_s19 = inlined_call_operand.vmem [shape: f32[144,32], index: 19, kind: input, shape index: {}]   ;;  %s12501_s20 = inlined_call_operand.vmem [shape: f32[1,32], index: 20, kind: input, shape index: {}]   ;;  %s12502_s21 = inlined_call_operand.vmem [shape: f32[1,32], index: 21, kind: input, shape index: {}]   ;;  %s12503_s22 = inlined_call_operand.vmem [shape: f32[32,288], index: 22, kind: input, shape index: {}]   ;;  %s12504_s23 = inlined_call_operand.vmem [shape: f32[32,1], index: 23, kind: input, shape index: {}]   ;;  %s12505_s24 = inlined_call_operand.vmem [shape: f32[32,1], index: 24, kind: input, shape index: {}]   ;;  %s12506_s25 = inlined_call_operand.vmem [shape: f32[2,8,256], index: 25, kind: output, shape index: {0}]   ;;  %s12507_s26 = inlined_call_operand.vmem [shape: f32[2,16,64], index: 26, kind: output, shape index: {1}]   ;;  %s12508_s27 = inlined_call_operand.vmem [shape: f32[2,32,16], index: 27, kind: output, shape index: {2}]  }
   0x1   :  { %12545 = sst [smem:[#allocation17_spill]] %s12481_s0 }
   0x2   :  { %12546 = sst [smem:[#allocation18_spill]] %s12482_s1 }
   0x3   :  { %12547 = sst [smem:[#allocation19_spill]] %s12483_s2 }
   0x4   :  { %12548 = sst [smem:[#allocation20_spill]] %s12484_s3 }
   0x5   :  { %12549 = sst [smem:[#allocation21_spill]] %s12485_s4 }
   0x6   :  { %12550 = sst [smem:[#allocation22_spill]] %s12486_s5 }
   0x7   :  { %12551 = sst [smem:[#allocation23_spill]] %s12487_s6 }
   0x8   :  { %12552 = sst [smem:[#allocation24_spill]] %s12488_s7  ;;  %s9147_s7 = smov 0  }
   0x9   :  { %12553 = sst [smem:[#allocation25_spill]] %s12489_s8 }
   0xa   :  { %12554 = sst [smem:[#allocation26_spill]] %s12490_s9 }
   0xb   :  { %12555 = sst [smem:[#allocation27_spill]] %s12491_s10 }
   0xc   :  { %12556 = sst [smem:[#allocation28_spill]] %s12492_s11 }
   0xd   :  { %12557 = sst [smem:[#allocation29_spill]] %s12505_s24 }
   0xe   :  { %12558 = sst [smem:[#allocation30_spill]] %s12506_s25 }
   0xf   :  { %12559 = sst [smem:[#allocation31_spill]] %s12508_s27 }
  0x10 LB: > { %12560 = sst [smem:[#allocation16_spill]] %s8987_s7  ;;  %s8244_s4 = sadd.s32 4294967295, %s8987_s7   ;;  %s8987_s7 = sphi %s9147_s7, %s38_s7  }
  0x11   : > { %p8248_p0 = scmp.ge.s32.totalorder %s8987_s7, 1  ;;  %p742_p1 = scmp.lt.s32.totalorder %s8987_s7, 3 }
  0x13   : > { %p743_p2 = pnand %p8248_p0, %p742_p1 }
  0x14   : > { %vm876_vm0 = vcmask (!%p743_p2), 31744   ;;  %vm879_vm1 = vcmask (!%p743_p2), 25600   ;;  %v8989_v0 = vmov (!%p743_p2), 0.0   ;;  %p824_p3 = scmp.lt.s32.totalorder (!%p743_p2), %s8244_s4, 1  ;;  %s12561_s5 = sld [smem:[#allocation17_spill]] (!%p743_p2)  ;;  %vm2708_vm2 = vcmask (!%p743_p2), 1043456  }
  0x15   : > { %746 = sbr.rel (%p743_p2) target bundleno = 4376 (0x1118), region = 120  ;;  %877 = vst.msk [vmem:[#allocation2] sm:$0xff] (!%p743_p2), %vm876_vm0, %v8989_v0  ;;  %878 = vst.msk [vmem:[#allocation2 + $0x8] sm:$0xff] (!%p743_p2), %vm876_vm0, %v8989_v0  ;;  %s12519_s0 = smov (!%p743_p2), 8   ;;  %vm1189_vm3 = vcmask (!%p743_p2), 64544   ;;  %vm1382_vm4 = vcmask (!%p743_p2), 97344  }
  0x16   : > { %881 = vst.msk [vmem:[#allocation2 + $0x18] sm:$0xff] (!%p743_p2), %vm876_vm0, %v8989_v0  ;;  %882 = vst.msk [vmem:[#allocation2 + $0x20] sm:$0xff] (!%p743_p2), %vm876_vm0, %v8989_v0  ;;  %s8991_s10 = smov (!%p743_p2), 4   ;;  %s12517_s29 = smov (!%p743_p2), 12   ;;  %vm1575_vm5 = vcmask (!%p743_p2), 130144   ;;  %vm1768_vm6 = vcmask (!%p743_p2), 162944  }
  0x17   : > { %884 = vst.msk [vmem:[#allocation2 + $0x30] sm:$0xff] (!%p743_p2), %vm876_vm0, %v8989_v0  ;;  %885 = vst.msk [vmem:[#allocation2 + $0x38] sm:$0xff] (!%p743_p2), %vm876_vm0, %v8989_v0  ;;  %s12525_s1 = smov (!%p743_p2), 16   ;;  %s12523_s6 = smov (!%p743_p2), 20   ;;  %vm1961_vm7 = vcmask (!%p743_p2), 195744   ;;  %vm2155_vm8 = vcmask (!%p743_p2), 228544  }
  0x18   : > { %887 = vst.msk [vmem:[#allocation2 + $0x48] sm:$0xff] (!%p743_p2), %vm876_vm0, %v8989_v0  ;;  %888 = vst.msk [vmem:[#allocation2 + $0x50] sm:$0xff] (!%p743_p2), %vm876_vm0, %v8989_v0  ;;  %s12515_s11 = smov (!%p743_p2), 24   ;;  %s12521_s2 = smov (!%p743_p2), 28   ;;  %vm2348_vm9 = vcmask (!%p743_p2), 261344   ;;  %vm2541_vm10 = vcmask (!%p743_p2), 294144  }
  0x19   : > { %890 = vst.msk [vmem:[#allocation2 + $0x60] sm:$0xff] (!%p743_p2), %vm876_vm0, %v8989_v0  ;;  %891 = vst.msk [vmem:[#allocation2 + $0x68] sm:$0xff] (!%p743_p2), %vm876_vm0, %v8989_v0  ;;  %s12562_s30 = sld [smem:[#allocation18_spill]] (!%p743_p2)  ;;  %s12565_s3 = smov (!%p743_p2), 12   ;;  %vm2611_vm11 = vcmask (!%p743_p2), 293888   ;;  %vm3047_vm12 = vcmask (!%p743_p2), 64512  }
  0x1a   : > { %893 = vst.msk [vmem:[#allocation2 + $0x78] sm:$0xff] (!%p743_p2), %vm876_vm0, %v8989_v0  ;;  %894 = vst.msk [vmem:[#allocation2 + $0x80] sm:$0xff] (!%p743_p2), %vm876_vm0, %v8989_v0  ;;  %vm3050_vm13 = vcmask (!%p743_p2), 58368   ;;  %vm3360_vm14 = vcmask (!%p743_p2), 130112   ;;  %vm3553_vm15 = vcmask (!%p743_p2), 195712   ;;  %s12574_s9 = sld [smem:[#allocation22_spill]] (!%p743_p2) }
  0x1b   : > { %896 = vst.msk [vmem:[#allocation2 + $0x90] sm:$0xff] (!%p743_p2), %vm876_vm0, %v8989_v0  ;;  %897 = vst.msk [vmem:[#allocation2 + $0x98] sm:$0xff] (!%p743_p2), %vm876_vm0, %v8989_v0  ;;  %s12577_s25 = sld [smem:[#allocation30_spill]] (!%p743_p2)  ;;  %s9004_s7 = smov (!%p743_p2), 112  }
  0x1c   : > { %899 = vst.msk [vmem:[#allocation2 + $0xa8] sm:$0xff] %vm876_vm0, %v8989_v0  ;;  %900 = vst.msk [vmem:[#allocation2 + $0xb0] sm:$0xff] %vm876_vm0, %v8989_v0  ;;  %s12596_s4 = smov (!%p824_p3, %s8244_s4), 1  ;;  %v1222_v4 = vld [vmem:[#allocation2 + $0x2] sm:$0xff] }
  0x1d   : > { %902 = vst.msk [vmem:[#allocation2 + $0xc0] sm:$0xff] %vm876_vm0, %v8989_v0  ;;  %903 = vst.msk [vmem:[#allocation2 + $0xc8] sm:$0xff] %vm876_vm0, %v8989_v0  ;;  %s8439_s8 = sshll.u32 %s12596_s4, 8  ;;  %v1029_v5 = vld [vmem:[#allocation2 + $0x1] sm:$0xff]  ;;  %1286 = vrot.lane.b32.xlu1 %v1222_v4, %s12519_s0  ;;  %s12589_s24 = sshll.u32 %s12596_s4, 4 }
  0x1e   : > { %905 = vst.msk [vmem:[#allocation2 + $0xd8] sm:$0xff] %vm876_vm0, %v8989_v0  ;;  %906 = vst.msk [vmem:[#allocation2 + $0xe0] sm:$0xff] %vm876_vm0, %v8989_v0  ;;  %s9273_s28 = scalar_lea.vmem %s12561_s5, %s8439_s8  ;;  %1093 = vrot.lane.b32.xlu0 %v1029_v5, %s8991_s10  ;;  %v965_v13 = vld [vmem:[#allocation2] sm:$0xff]  ;;  %v966_v14 = vld [vmem:[#allocation2 + $0x8] sm:$0xff]  ;;  %s12566_s5 = sld [smem:[#allocation19_spill]] }
  0x1f   : > { %908 = vst.msk [vmem:[#allocation2 + $0xf0] sm:$0xff] %vm876_vm0, %v8989_v0  ;;  %909 = vst.msk [vmem:[#allocation2 + $0xf8] sm:$0xff] %vm876_vm0, %v8989_v0  ;;  %v844_v1 = vld [vmem:[%s9273_s28] sm:$0xff]  ;;  %v845_v2 = vld [vmem:[%s9273_s28 + $0x8] sm:$0xff]  ;;  %s12570_s8 = smov 28  }
  0x20   : > { %911 = vst.msk [vmem:[#allocation2 + $0x108] sm:$0xff] %vm876_vm0, %v8989_v0  ;;  %912 = vst.msk [vmem:[#allocation2 + $0x110] sm:$0xff] %vm876_vm0, %v8989_v0  ;;  %v846_v3 = vld [vmem:[%s9273_s28 + $0x10] sm:$0xff]  ;;  %v847_v8 = vld [vmem:[%s9273_s28 + $0x18] sm:$0xff] }
  0x21   : > { %914 = vst.msk [vmem:[#allocation2 + $0x120] sm:$0xff] %vm876_vm0, %v8989_v0  ;;  %915 = vst.msk [vmem:[#allocation2 + $0x128] sm:$0xff] %vm876_vm0, %v8989_v0  ;;  %v848_v9 = vld [vmem:[%s9273_s28 + $0x20] sm:$0xff]  ;;  %v849_v10 = vld [vmem:[%s9273_s28 + $0x28] sm:$0xff] }
  0x22   : > { %917 = vst.msk [vmem:[#allocation2 + $0x138] sm:$0xff] %vm876_vm0, %v8989_v0  ;;  %918 = vst.msk [vmem:[#allocation2 + $0x140] sm:$0xff] %vm876_vm0, %v8989_v0  ;;  %v850_v11 = vld [vmem:[%s9273_s28 + $0x30] sm:$0xff]  ;;  %v851_v12 = vld [vmem:[%s9273_s28 + $0x38] sm:$0xff] }
  0x23   : > { %920 = vst.msk [vmem:[#allocation2 + $0x150] sm:$0xff] %vm876_vm0, %v8989_v0  ;;  %921 = vst.msk [vmem:[#allocation2 + $0x158] sm:$0xff] %vm876_vm0, %v8989_v0  ;;  %v852_v15 = vld [vmem:[%s9273_s28 + $0x40] sm:$0xff]  ;;  %v853_v16 = vld [vmem:[%s9273_s28 + $0x48] sm:$0xff] }
  0x24   : > { %923 = vst.msk [vmem:[#allocation2 + $0x168] sm:$0xff] %vm876_vm0, %v8989_v0  ;;  %924 = vst.msk [vmem:[#allocation2 + $0x170] sm:$0xff] %vm876_vm0, %v8989_v0  ;;  %v854_v30 = vld [vmem:[%s9273_s28 + $0x50] sm:$0xff]  ;;  %v855_v32 = vld [vmem:[%s9273_s28 + $0x58] sm:$0xff] }
  0x25   : > { %926 = vst.msk [vmem:[#allocation2 + $0x180] sm:$0xff] %vm876_vm0, %v8989_v0  ;;  %927 = vst.msk [vmem:[#allocation2 + $0x188] sm:$0xff] %vm876_vm0, %v8989_v0  ;;  %v2606_v36 = vld [vmem:[%s12562_s30] sm:$0xff]  ;;  %v2607_v37 = vld [vmem:[%s12562_s30 + $0x8] sm:$0xff] }
  0x26   : > { %929 = vst.msk [vmem:[#allocation2 + $0x198] sm:$0xff] %vm876_vm0, %v8989_v0  ;;  %930 = vst.msk [vmem:[#allocation2 + $0x1a0] sm:$0xff] %vm876_vm0, %v8989_v0  ;;  %v8740_v40 = vpack.c.bf16 %v2607_v37, %v2606_v36  ;;  %v2608_v41 = vld [vmem:[%s12562_s30 + $0x10] sm:$0xff]  ;;  %v2609_v42 = vld [vmem:[%s12562_s30 + $0x18] sm:$0xff] }
  0x27   : > { %880 = vst.msk [vmem:[#allocation2 + $0x10] sm:$0x3] %vm879_vm1, %v8989_v0  ;;  %883 = vst.msk [vmem:[#allocation2 + $0x28] sm:$0x3] %vm879_vm1, %v8989_v0  ;;  %v8744_v43 = vpack.c.bf16 %v2609_v42, %v2608_v41  ;;  %v2610_v45 = vld [vmem:[%s12562_s30 + $0x20] sm:$0xf] }
  0x28   : > { %886 = vst.msk [vmem:[#allocation2 + $0x40] sm:$0x3] %vm879_vm1, %v8989_v0  ;;  %889 = vst.msk [vmem:[#allocation2 + $0x58] sm:$0x3] %vm879_vm1, %v8989_v0  ;;  %8741 = vmatprep.subr.bf16.mxu0 %v8740_v40  ;;  %v856_v46 = vld [vmem:[%s9273_s28 + $0x60] sm:$0xff]  ;;  %v857_v48 = vld [vmem:[%s9273_s28 + $0x68] sm:$0xff] }
  0x29   : > { %892 = vst.msk [vmem:[#allocation2 + $0x70] sm:$0x3] %vm879_vm1, %v8989_v0  ;;  %895 = vst.msk [vmem:[#allocation2 + $0x88] sm:$0x3] %vm879_vm1, %v8989_v0  ;;  %8743 = vmatpush3.bf16.msra.mxu0 %v8740_v40  ;;  %v858_v54 = vld [vmem:[%s9273_s28 + $0x70] sm:$0xff]  ;;  %v859_v56 = vld [vmem:[%s9273_s28 + $0x78] sm:$0xff] }
  0x2a   : > { %898 = vst.msk [vmem:[#allocation2 + $0xa0] sm:$0x3] %vm879_vm1, %v8989_v0  ;;  %901 = vst.msk [vmem:[#allocation2 + $0xb8] sm:$0x3] %vm879_vm1, %v8989_v0  ;;  %8745 = vmatprep.subr.bf16.mxu0 %v8744_v43  ;;  %v860_v62 = vld [vmem:[%s9273_s28 + $0x80] sm:$0xff]  ;;  %v861_v5 = vld [vmem:[%s9273_s28 + $0x88] sm:$0xff] }
  0x2b   : > { %904 = vst.msk [vmem:[#allocation2 + $0xd0] sm:$0x3] %vm879_vm1, %v8989_v0  ;;  %907 = vst.msk [vmem:[#allocation2 + $0xe8] sm:$0x3] %vm879_vm1, %v8989_v0 }
  0x2c   : > { %910 = vst.msk [vmem:[#allocation2 + $0x100] sm:$0x3] %vm879_vm1, %v8989_v0  ;;  %913 = vst.msk [vmem:[#allocation2 + $0x118] sm:$0x3] %vm879_vm1, %v8989_v0 }
  0x2d   : > { %916 = vst.msk [vmem:[#allocation2 + $0x130] sm:$0x3] %vm879_vm1, %v8989_v0  ;;  %919 = vst.msk [vmem:[#allocation2 + $0x148] sm:$0x3] %vm879_vm1, %v8989_v0  ;;  %8747 = vmatpush3.bf16.msra.mxu0 %v8744_v43 }
  0x2e   : > { %922 = vst.msk [vmem:[#allocation2 + $0x160] sm:$0x3] %vm879_vm1, %v8989_v0  ;;  %925 = vst.msk [vmem:[#allocation2 + $0x178] sm:$0x3] %vm879_vm1, %v8989_v0  ;;  %v1223_v6 = vld [vmem:[#allocation2 + $0xa] sm:$0xff]  ;;  %8583 = vmatprep.subr.msk.mxu0 %vm2708_vm2, %v2610_v45 }
  0x2f   : > { %928 = vst.msk [vmem:[#allocation2 + $0x190] sm:$0x3] %vm879_vm1, %v8989_v0  ;;  %931 = vst.msk [vmem:[#allocation2 + $0x1a8] sm:$0x3] %vm879_vm1, %v8989_v0  ;;  %v1030_v7 = vld [vmem:[#allocation2 + $0x9] sm:$0xff]  ;;  %1288 = vrot.lane.b32.xlu1 %v1223_v6, %s12519_s0  ;;  %vm3939_vm1 = vcmask 326912  }
  0x30   : > { %933 = vst.msk [vmem:[#allocation2 + $0x19] sm:$0xff] %vm876_vm0, %v844_v1  ;;  %934 = vst.msk [vmem:[#allocation2 + $0x21] sm:$0xff] %vm876_vm0, %v845_v2  ;;  %1095 = vrot.lane.b32.xlu0 %v1030_v7, %s8991_s10 }
  0x31   : > { %935 = vst.msk [vmem:[#allocation2 + $0x31] sm:$0xff] %vm876_vm0, %v846_v3  ;;  %936 = vst.msk [vmem:[#allocation2 + $0x39] sm:$0xff] %vm876_vm0, %v847_v8  ;;  %8584 = vmatpush3.msk.msra.mxu0 %vm2708_vm2, %v2610_v45  ;;  %vm4132_vm2 = vcmask 392512  }
  0x32   : > { %937 = vst.msk [vmem:[#allocation2 + $0x49] sm:$0xff] %vm876_vm0, %v848_v9  ;;  %938 = vst.msk [vmem:[#allocation2 + $0x51] sm:$0xff] %vm876_vm0, %v849_v10 }
  0x33   : > { %939 = vst.msk [vmem:[#allocation2 + $0x61] sm:$0xff] %vm876_vm0, %v850_v11  ;;  %940 = vst.msk [vmem:[#allocation2 + $0x69] sm:$0xff] %vm876_vm0, %v851_v12 }
  0x34   : > { %997 = vst.msk [vmem:[#allocation3] sm:$0xff] %vm876_vm0, %v965_v13  ;;  %998 = vst.msk [vmem:[#allocation3 + $0x8] sm:$0xff] %vm876_vm0, %v966_v14 }
  0x35   : > { %941 = vst.msk [vmem:[#allocation2 + $0x79] sm:$0xff] %vm876_vm0, %v852_v15  ;;  %942 = vst.msk [vmem:[#allocation2 + $0x81] sm:$0xff] %vm876_vm0, %v853_v16 }
  0x36   : > { %943 = vst.msk [vmem:[#allocation2 + $0x91] sm:$0xff] %vm876_vm0, %v854_v30  ;;  %944 = vst.msk [vmem:[#allocation2 + $0x99] sm:$0xff] %vm876_vm0, %v855_v32 }
  0x37   : > { %v1416_v17 = vld [vmem:[#allocation2 + $0x20] sm:$0xff]  ;;  %v1415_v18 = vld [vmem:[#allocation2 + $0x18] sm:$0xff]  ;;  %945 = vst.msk [vmem:[#allocation2 + $0xa9] sm:$0xff] %vm876_vm0, %v856_v46  ;;  %946 = vst.msk [vmem:[#allocation2 + $0xb1] sm:$0xff] %vm876_vm0, %v857_v48 }
  0x38   : > { %999 = vst.msk [vmem:[#allocation3 + $0x10] sm:$0xff] %vm876_vm0, %v1415_v18  ;;  %1000 = vst.msk [vmem:[#allocation3 + $0x18] sm:$0xff] %vm876_vm0, %v1416_v17  ;;  %1481 = vrot.lane.b32.xlu1 %v1416_v17, %s12517_s29  ;;  %1479 = vrot.lane.b32.xlu0 %v1415_v18, %s12517_s29  ;;  %v1995_v19 = vld [vmem:[#allocation2 + $0x30] sm:$0xff]  ;;  %v1996_v20 = vld [vmem:[#allocation2 + $0x38] sm:$0xff] }
  0x39   : > { %v1608_v21 = vld [vmem:[#allocation2 + $0x19] sm:$0xff]  ;;  %1001 = vst.msk [vmem:[#allocation3 + $0x20] sm:$0xff] %vm876_vm0, %v1995_v19  ;;  %1002 = vst.msk [vmem:[#allocation3 + $0x28] sm:$0xff] %vm876_vm0, %v1996_v20  ;;  %v9307_v22 = vld [vmem:[#allocation2 + $0x48] sm:$0xff] }
  0x3a   : > { %v9309_v23 = vld [vmem:[#allocation2 + $0x50] sm:$0xff]  ;;  %1003 = vst.msk [vmem:[#allocation3 + $0x30] sm:$0xff] %vm876_vm0, %v9307_v22  ;;  %v9317_v24 = vld [vmem:[#allocation2 + $0x60] sm:$0xff]  ;;  %v9319_v25 = vld [vmem:[#allocation2 + $0x68] sm:$0xff] }
  0x3b   : > { %1004 = vst.msk [vmem:[#allocation3 + $0x38] sm:$0xff] %vm876_vm0, %v9309_v23  ;;  %v1609_v26 = vld [vmem:[#allocation2 + $0x21] sm:$0xff]  ;;  %1005 = vst.msk [vmem:[#allocation3 + $0x40] sm:$0xff] %vm876_vm0, %v9317_v24  ;;  %v2188_v34 = vld [vmem:[#allocation2 + $0x31] sm:$0xff] }
  0x3c   : > { %1672 = vrot.lane.b32.xlu0 %v1608_v21, %s12525_s1  ;;  %1097 = vrot.lane.b32.xlu1 %v1608_v21, %s8991_s10  ;;  %v1801_v27 = vld [vmem:[#allocation2 + $0x1a] sm:$0xff]  ;;  %1006 = vst.msk [vmem:[#allocation3 + $0x48] sm:$0xff] %vm876_vm0, %v9319_v25  ;;  %v1802_v31 = vld [vmem:[#allocation2 + $0x22] sm:$0xff]  ;;  %v2381_v39 = vld [vmem:[#allocation2 + $0x32] sm:$0xff] }
  0x3d   : > { %v9325_v28 = vld [vmem:[#allocation2 + $0x78] sm:$0xff]  ;;  %v9327_v29 = vld [vmem:[#allocation2 + $0x80] sm:$0xff]  ;;  %v9342_v33 = vld [vmem:[#allocation2 + $0x90] sm:$0xff]  ;;  %947 = vst.msk [vmem:[#allocation2 + $0xc1] sm:$0xff] %vm876_vm0, %v858_v54 }
  0x3e   : > { %1007 = vst.msk [vmem:[#allocation3 + $0x50] sm:$0xff] %vm876_vm0, %v9325_v28  ;;  %1008 = vst.msk [vmem:[#allocation3 + $0x58] sm:$0xff] %vm876_vm0, %v9327_v29  ;;  %v9349_v35 = vld [vmem:[#allocation2 + $0x98] sm:$0xff]  ;;  %v9382_v47 = vld [vmem:[#allocation2 + $0xa8] sm:$0xff] }
  0x3f   : > { %1009 = vst.msk [vmem:[#allocation3 + $0x60] sm:$0xff] %vm876_vm0, %v9342_v33  ;;  %1010 = vst.msk [vmem:[#allocation3 + $0x68] sm:$0xff] %vm876_vm0, %v9349_v35  ;;  %v2189_v38 = vld [vmem:[#allocation2 + $0x39] sm:$0xff]  ;;  %v2190_v49 = vld [vmem:[#allocation2 + $0x49] sm:$0xff] }
  0x40   : > { %1674 = vrot.lane.b32.xlu0 %v1609_v26, %s12525_s1  ;;  %1865 = vrot.lane.b32.xlu1 %v1801_v27, %s12523_s6  ;;  %v2382_v44 = vld [vmem:[#allocation2 + $0x3a] sm:$0xff]  ;;  %1011 = vst.msk [vmem:[#allocation3 + $0x70] sm:$0xff] %vm876_vm0, %v9382_v47  ;;  %v9394_v50 = vld [vmem:[#allocation2 + $0xb0] sm:$0xff]  ;;  %948 = vst.msk [vmem:[#allocation2 + $0xc9] sm:$0xff] %vm876_vm0, %v859_v56 }
  0x41   : > { %1012 = vst.msk [vmem:[#allocation3 + $0x78] sm:$0xff] %vm876_vm0, %v9394_v50  ;;  %v2191_v51 = vld [vmem:[#allocation2 + $0x51] sm:$0xff]  ;;  %v2192_v57 = vld [vmem:[#allocation2 + $0x61] sm:$0xff]  ;;  %v2193_v59 = vld [vmem:[#allocation2 + $0x69] sm:$0xff] }
  0x42   : > { %v2383_v52 = vld [vmem:[#allocation2 + $0x4a] sm:$0xff]  ;;  %v2384_v53 = vld [vmem:[#allocation2 + $0x52] sm:$0xff]  ;;  %v2385_v60 = vld [vmem:[#allocation2 + $0x62] sm:$0xff]  ;;  %949 = vst.msk [vmem:[#allocation2 + $0xd9] sm:$0xff] %vm876_vm0, %v860_v62 }
  0x43   : > { %v2386_v61 = vld [vmem:[#allocation2 + $0x6a] sm:$0xff]  ;;  %950 = vst.msk [vmem:[#allocation2 + $0xe1] sm:$0xff] %vm876_vm0, %v861_v5  ;;  %v2194_v8 = vld [vmem:[#allocation2 + $0x79] sm:$0xff]  ;;  %v2195_v14 = vld [vmem:[#allocation2 + $0x81] sm:$0xff] }
  0x44   : > { %1099 = vrot.lane.b32.xlu0 %v1609_v26, %s8991_s10  ;;  %1290 = vrot.lane.b32.xlu1 %v1801_v27, %s12519_s0  ;;  %v9414_v55 = vld [vmem:[#allocation2 + $0xc0] sm:$0xff]  ;;  %v862_v27 = vld [vmem:[%s9273_s28 + $0x90] sm:$0xff]  ;;  %3053 = vst.msk [vmem:[#allocation4 + $0x20] sm:$0xff] %vm3047_vm12, %v8989_v0  ;;  %3048 = vst.msk [vmem:[#allocation4] sm:$0xff] %vm3047_vm12, %v8989_v0 }
  0x45   : > { %1013 = vst.msk [vmem:[#allocation3 + $0x80] sm:$0xff] %vm876_vm0, %v9414_v55  ;;  %v2387_v15 = vld [vmem:[#allocation2 + $0x7a] sm:$0xff]  ;;  %951 = vst.msk [vmem:[#allocation2 + $0xf1] sm:$0xff] %vm876_vm0, %v862_v27  ;;  %v2389_v41 = vld [vmem:[#allocation2 + $0x92] sm:$0xff] }
  0x46   : > { %v2197_v40 = vld [vmem:[#allocation2 + $0x99] sm:$0xff]  ;;  %v2198_v62 = vld [vmem:[#allocation2 + $0xa9] sm:$0xff]  ;;  %3054 = vst.msk [vmem:[#allocation4 + $0x28] sm:$0x3] %vm3050_vm13, %v8989_v0  ;;  %3051 = vst.msk [vmem:[#allocation4 + $0x10] sm:$0x3] %vm3050_vm13, %v8989_v0 }
  0x47   : > { %v9426_v58 = vld [vmem:[#allocation2 + $0xc8] sm:$0xff]  ;;  %3049 = vst.msk [vmem:[#allocation4 + $0x8] sm:$0xff] %vm3047_vm12, %v8989_v0  ;;  %3052 = vst.msk [vmem:[#allocation4 + $0x18] sm:$0xff] %vm3047_vm12, %v8989_v0 }
  0x48   : > { %1867 = vrot.lane.b32.xlu0 %v1802_v31, %s12523_s6  ;;  %2059 = vrot.lane.b32.xlu1 %v1995_v19, %s12515_s11  ;;  %1014 = vst.msk [vmem:[#allocation3 + $0x88] sm:$0xff] %vm876_vm0, %v9426_v58 }
  0x49   : > { %v9449_v4 = vld [vmem:[#allocation2 + $0xd8] sm:$0xff]  ;;  %3055 = vst.msk [vmem:[#allocation4 + $0x30] sm:$0xff] %vm3047_vm12, %v8989_v0  ;;  %3056 = vst.msk [vmem:[#allocation4 + $0x38] sm:$0xff] %vm3047_vm12, %v8989_v0 }
  0x4a   : > { %1015 = vst.msk [vmem:[#allocation3 + $0x90] sm:$0xff] %vm876_vm0, %v9449_v4  ;;  %v9466_v11 = vld [vmem:[#allocation2 + $0xe0] sm:$0xff] }
  0x4b   : > { %1016 = vst.msk [vmem:[#allocation3 + $0x98] sm:$0xff] %vm876_vm0, %v9466_v11 }
  0x4c   : > { %1292 = vrot.lane.b32.xlu0 %v1802_v31, %s12519_s0  ;;  %1483 = vrot.lane.b32.xlu1 %v1995_v19, %s12517_s29  ;;  %s12563_s0 = smov 8   ;;  %v2196_v31 = vld [vmem:[#allocation2 + $0x91] sm:$0xff]  ;;  %3057 = vst.msk [vmem:[#allocation4 + $0x40] sm:$0x3] %vm3050_vm13, %v8989_v0  ;;  %3060 = vst.msk [vmem:[#allocation4 + $0x58] sm:$0x3] %vm3050_vm13, %v8989_v0 }
  0x4d   : > { %v9508_v36 = vld [vmem:[#allocation2 + $0xf0] sm:$0xff]  ;;  %3058 = vst.msk [vmem:[#allocation4 + $0x48] sm:$0xff] %vm3047_vm12, %v8989_v0  ;;  %3059 = vst.msk [vmem:[#allocation4 + $0x50] sm:$0xff] %vm3047_vm12, %v8989_v0 }
  0x4e   : > { %1017 = vst.msk [vmem:[#allocation3 + $0xa0] sm:$0xff] %vm876_vm0, %v9508_v36 }
  0x4f   : > { %3061 = vst.msk [vmem:[#allocation4 + $0x60] sm:$0xff] %vm3047_vm12, %v8989_v0  ;;  %3062 = vst.msk [vmem:[#allocation4 + $0x68] sm:$0xff] %vm3047_vm12, %v8989_v0 }
  0x50   : > { %2061 = vrot.lane.b32.xlu0 %v1996_v20, %s12515_s11  ;;  %2252 = vrot.lane.b32.xlu1 %v2188_v34, %s12521_s2  ;;  %s12527_s11 = smov 32   ;;  %3063 = vst.msk [vmem:[#allocation4 + $0x70] sm:$0x3] %vm3050_vm13, %v8989_v0  ;;  %3066 = vst.msk [vmem:[#allocation4 + $0x88] sm:$0x3] %vm3050_vm13, %v8989_v0 }
  0x51   : > { %3064 = vst.msk [vmem:[#allocation4 + $0x78] sm:$0xff] %vm3047_vm12, %v8989_v0  ;;  %3065 = vst.msk [vmem:[#allocation4 + $0x80] sm:$0xff] %vm3047_vm12, %v8989_v0 }
  0x52   : > { %3067 = vst.msk [vmem:[#allocation4 + $0x90] sm:$0xff] %vm3047_vm12, %v8989_v0  ;;  %3068 = vst.msk [vmem:[#allocation4 + $0x98] sm:$0xff] %vm3047_vm12, %v8989_v0 }
  0x53   : > { %3069 = vst.msk [vmem:[#allocation4 + $0xa0] sm:$0x3] %vm3050_vm13, %v8989_v0  ;;  %3072 = vst.msk [vmem:[#allocation4 + $0xb8] sm:$0x3] %vm3050_vm13, %v8989_v0 }
  0x54   : > { %1485 = vrot.lane.b32.xlu0 %v1996_v20, %s12517_s29  ;;  %1676 = vrot.lane.b32.xlu1 %v2188_v34, %s12525_s1  ;;  %s12564_s29 = smov 24   ;;  %v2388_v20 = vld [vmem:[#allocation2 + $0x82] sm:$0xff]  ;;  %3070 = vst.msk [vmem:[#allocation4 + $0xa8] sm:$0xff] %vm3047_vm12, %v8989_v0  ;;  %3071 = vst.msk [vmem:[#allocation4 + $0xb0] sm:$0xff] %vm3047_vm12, %v8989_v0 }
  0x55   : > { %3073 = vst.msk [vmem:[#allocation4 + $0xc0] sm:$0xff] %vm3047_vm12, %v8989_v0  ;;  %3074 = vst.msk [vmem:[#allocation4 + $0xc8] sm:$0xff] %vm3047_vm12, %v8989_v0 }
  0x56   : > { %3075 = vst.msk [vmem:[#allocation4 + $0xd0] sm:$0x3] %vm3050_vm13, %v8989_v0  ;;  %3078 = vst.msk [vmem:[#allocation4 + $0xe8] sm:$0x3] %vm3050_vm13, %v8989_v0 }
  0x57   : > { %3076 = vst.msk [vmem:[#allocation4 + $0xd8] sm:$0xff] %vm3047_vm12, %v8989_v0  ;;  %3077 = vst.msk [vmem:[#allocation4 + $0xe0] sm:$0xff] %vm3047_vm12, %v8989_v0 }
  0x58   : > { %2254 = vrot.lane.b32.xlu0 %v2189_v38, %s12521_s2  ;;  %2445 = vrot.lane.b32.xlu1 %v2381_v39, %s12527_s11  ;;  %3079 = vst.msk [vmem:[#allocation4 + $0xf0] sm:$0xff] %vm3047_vm12, %v8989_v0  ;;  %3080 = vst.msk [vmem:[#allocation4 + $0xf8] sm:$0xff] %vm3047_vm12, %v8989_v0 }
  0x59   : > { %3081 = vst.msk [vmem:[#allocation4 + $0x100] sm:$0x3] %vm3050_vm13, %v8989_v0  ;;  %3084 = vst.msk [vmem:[#allocation4 + $0x118] sm:$0x3] %vm3050_vm13, %v8989_v0 }
  0x5a   : > { %3082 = vst.msk [vmem:[#allocation4 + $0x108] sm:$0xff] %vm3047_vm12, %v8989_v0  ;;  %3083 = vst.msk [vmem:[#allocation4 + $0x110] sm:$0xff] %vm3047_vm12, %v8989_v0 }
  0x5b   : > { %3085 = vst.msk [vmem:[#allocation4 + $0x120] sm:$0xff] %vm3047_vm12, %v8989_v0  ;;  %3086 = vst.msk [vmem:[#allocation4 + $0x128] sm:$0xff] %vm3047_vm12, %v8989_v0 }
  0x5c   : > { %1101 = vrot.lane.b32.xlu0 %v2188_v34, %s8991_s10  ;;  %1678 = vrot.lane.b32.xlu1 %v2189_v38, %s12525_s1  ;;  %3087 = vst.msk [vmem:[#allocation4 + $0x130] sm:$0x3] %vm3050_vm13, %v8989_v0  ;;  %3090 = vst.msk [vmem:[#allocation4 + $0x148] sm:$0x3] %vm3050_vm13, %v8989_v0 }
  0x5d   : > { %3088 = vst.msk [vmem:[#allocation4 + $0x138] sm:$0xff] %vm3047_vm12, %v8989_v0  ;;  %3089 = vst.msk [vmem:[#allocation4 + $0x140] sm:$0xff] %vm3047_vm12, %v8989_v0 }
  0x5e   : > { %3091 = vst.msk [vmem:[#allocation4 + $0x150] sm:$0xff] %vm3047_vm12, %v8989_v0  ;;  %3092 = vst.msk [vmem:[#allocation4 + $0x158] sm:$0xff] %vm3047_vm12, %v8989_v0 }
  0x5f   : > { %3093 = vst.msk [vmem:[#allocation4 + $0x160] sm:$0x3] %vm3050_vm13, %v8989_v0  ;;  %3096 = vst.msk [vmem:[#allocation4 + $0x178] sm:$0x3] %vm3050_vm13, %v8989_v0 }
  0x60   : > { %1869 = vrot.lane.b32.xlu0 %v2381_v39, %s12523_s6  ;;  %2447 = vrot.lane.b32.xlu1 %v2382_v44, %s12527_s11  ;;  %3094 = vst.msk [vmem:[#allocation4 + $0x168] sm:$0xff] %vm3047_vm12, %v8989_v0  ;;  %3095 = vst.msk [vmem:[#allocation4 + $0x170] sm:$0xff] %vm3047_vm12, %v8989_v0 }
  0x61   : > { %3097 = vst.msk [vmem:[#allocation4 + $0x180] sm:$0xff] %vm3047_vm12, %v8989_v0  ;;  %3098 = vst.msk [vmem:[#allocation4 + $0x188] sm:$0xff] %vm3047_vm12, %v8989_v0 }
  0x62   : > { %3099 = vst.msk [vmem:[#allocation4 + $0x190] sm:$0x3] %vm3050_vm13, %v8989_v0  ;;  %3102 = vst.msk [vmem:[#allocation4 + $0x1a8] sm:$0x3] %vm3050_vm13, %v8989_v0 }
  0x63   : > { %3100 = vst.msk [vmem:[#allocation4 + $0x198] sm:$0xff] %vm3047_vm12, %v8989_v0  ;;  %3101 = vst.msk [vmem:[#allocation4 + $0x1a0] sm:$0xff] %vm3047_vm12, %v8989_v0 }
  0x64   : > { %1103 = vrot.lane.b32.xlu0 %v2189_v38, %s8991_s10  ;;  %1294 = vrot.lane.b32.xlu1 %v2381_v39, %s12563_s0  ;;  %5733 = vst.msk [vmem:[#allocation7] sm:$0xff] %vm3047_vm12, %v8989_v0  ;;  %5735 = vst.msk [vmem:[#allocation7 + $0x10] sm:$0xff] %vm3047_vm12, %v8989_v0 }
  0x65   : > { %5734 = vst.msk [vmem:[#allocation7 + $0x8] sm:$0x3] %vm3050_vm13, %v8989_v0  ;;  %5736 = vst.msk [vmem:[#allocation7 + $0x18] sm:$0x3] %vm3050_vm13, %v8989_v0 }
  0x66   : > { %5737 = vst.msk [vmem:[#allocation7 + $0x20] sm:$0xff] %vm3047_vm12, %v8989_v0  ;;  %5739 = vst.msk [vmem:[#allocation7 + $0x30] sm:$0xff] %vm3047_vm12, %v8989_v0 }
  0x67   : > { %5738 = vst.msk [vmem:[#allocation7 + $0x28] sm:$0x3] %vm3050_vm13, %v8989_v0  ;;  %5740 = vst.msk [vmem:[#allocation7 + $0x38] sm:$0x3] %vm3050_vm13, %v8989_v0 }
  0x68   : > { %1871 = vrot.lane.b32.xlu0 %v2382_v44, %s12523_s6  ;;  %2063 = vrot.lane.b32.xlu1 %v9307_v22, %s12564_s29  ;;  %5741 = vst.msk [vmem:[#allocation7 + $0x40] sm:$0xff] %vm3047_vm12, %v8989_v0  ;;  %5743 = vst.msk [vmem:[#allocation7 + $0x50] sm:$0xff] %vm3047_vm12, %v8989_v0 }
  0x69   : > { %5742 = vst.msk [vmem:[#allocation7 + $0x48] sm:$0x3] %vm3050_vm13, %v8989_v0  ;;  %5744 = vst.msk [vmem:[#allocation7 + $0x58] sm:$0x3] %vm3050_vm13, %v8989_v0 }
  0x6a   : > { %5745 = vst.msk [vmem:[#allocation7 + $0x60] sm:$0xff] %vm3047_vm12, %v8989_v0  ;;  %5747 = vst.msk [vmem:[#allocation7 + $0x70] sm:$0xff] %vm3047_vm12, %v8989_v0 }
  0x6b   : > { %5746 = vst.msk [vmem:[#allocation7 + $0x68] sm:$0x3] %vm3050_vm13, %v8989_v0  ;;  %5748 = vst.msk [vmem:[#allocation7 + $0x78] sm:$0x3] %vm3050_vm13, %v8989_v0 }
  0x6c   : > { %1296 = vrot.lane.b32.xlu0 %v2382_v44, %s12563_s0  ;;  %1487 = vrot.lane.b32.xlu1 %v9307_v22, %s12565_s3  ;;  %5749 = vst.msk [vmem:[#allocation7 + $0x80] sm:$0xff] %vm3047_vm12, %v8989_v0  ;;  %5751 = vst.msk [vmem:[#allocation7 + $0x90] sm:$0xff] %vm3047_vm12, %v8989_v0 }
  0x6d   : > { %5750 = vst.msk [vmem:[#allocation7 + $0x88] sm:$0x3] %vm3050_vm13, %v8989_v0  ;;  %5752 = vst.msk [vmem:[#allocation7 + $0x98] sm:$0x3] %vm3050_vm13, %v8989_v0 }
  0x70   : > { %2065 = vrot.lane.b32.xlu0 %v9309_v23, %s12564_s29  ;;  %2256 = vrot.lane.b32.xlu1 %v2190_v49, %s12521_s2 }
  0x74   : > { %1489 = vrot.lane.b32.xlu0 %v9309_v23, %s12565_s3  ;;  %1680 = vrot.lane.b32.xlu1 %v2190_v49, %s12525_s1 }
  0x78   : > { %2258 = vrot.lane.b32.xlu0 %v2191_v51, %s12521_s2  ;;  %2449 = vrot.lane.b32.xlu1 %v2383_v52, %s12527_s11 }
  0x7c   : > { %1105 = vrot.lane.b32.xlu0 %v2190_v49, %s8991_s10  ;;  %1682 = vrot.lane.b32.xlu1 %v2191_v51, %s12525_s1 }
  0x80   : > { %1873 = vrot.lane.b32.xlu0 %v2383_v52, %s12523_s6  ;;  %2451 = vrot.lane.b32.xlu1 %v2384_v53, %s12527_s11 }
  0x84   : > { %1107 = vrot.lane.b32.xlu0 %v2191_v51, %s8991_s10  ;;  %1298 = vrot.lane.b32.xlu1 %v2383_v52, %s12563_s0 }
  0x88   : > { %1875 = vrot.lane.b32.xlu0 %v2384_v53, %s12523_s6  ;;  %2067 = vrot.lane.b32.xlu1 %v9317_v24, %s12564_s29 }
  0x8c   : > { %1300 = vrot.lane.b32.xlu0 %v2384_v53, %s12563_s0  ;;  %1491 = vrot.lane.b32.xlu1 %v9317_v24, %s12565_s3  ;;  %v864_v53 = vld [vmem:[%s9273_s28 + $0xa0] sm:$0xff] }
  0x8d   : > { %953 = vst.msk [vmem:[#allocation2 + $0x109] sm:$0xff] %vm876_vm0, %v864_v53 }
  0x8f   : > { %v1287_v63 = vpop.permute.xlu1 %1286 }
  0x90   : > { %2069 = vrot.lane.b32.xlu0 %v9319_v25, %s12564_s29  ;;  %2260 = vrot.lane.b32.xlu1 %v2192_v57, %s12521_s2  ;;  %v1094_v1 = vpop.permute.xlu0 %1093 }
  0x91   : > { %1190 = vst.msk [vmem:[#allocation3] sm:$0xff] %vm1189_vm3, %v1094_v1 }
  0x92   : > { %1383 = vst.msk [vmem:[#allocation3] sm:$0xff] %vm1382_vm4, %v1287_v63 }
  0x94   : > { %1493 = vrot.lane.b32.xlu0 %v9319_v25, %s12565_s3  ;;  %1684 = vrot.lane.b32.xlu1 %v2192_v57, %s12525_s1 }
  0x98   : > { %2262 = vrot.lane.b32.xlu0 %v2193_v59, %s12521_s2  ;;  %2453 = vrot.lane.b32.xlu1 %v2385_v60, %s12527_s11 }
  0x9c   : > { %1109 = vrot.lane.b32.xlu0 %v2192_v57, %s8991_s10  ;;  %1686 = vrot.lane.b32.xlu1 %v2193_v59, %s12525_s1  ;;  %v865_v57 = vld [vmem:[%s9273_s28 + $0xa8] sm:$0xff] }
  0x9d   : > { %954 = vst.msk [vmem:[#allocation2 + $0x111] sm:$0xff] %vm876_vm0, %v865_v57  ;;  %v9671_v57 = vld [vmem:[#allocation2 + $0xda] sm:$0xff] }
  0xa0   : > { %1877 = vrot.lane.b32.xlu0 %v2385_v60, %s12523_s6  ;;  %2455 = vrot.lane.b32.xlu1 %v2386_v61, %s12527_s11 }
  0xa1   : > { %v1289_v2 = vpop.permute.xlu1 %1288 }
  0xa2   : > { %v1096_v3 = vpop.permute.xlu0 %1095 }
  0xa3   : > { %1191 = vst.msk [vmem:[#allocation3 + $0x8] sm:$0xff] %vm1189_vm3, %v1096_v3 }
  0xa4   : > { %1111 = vrot.lane.b32.xlu0 %v2193_v59, %s8991_s10  ;;  %1302 = vrot.lane.b32.xlu1 %v2385_v60, %s12563_s0  ;;  %1384 = vst.msk [vmem:[#allocation3 + $0x8] sm:$0xff] %vm1382_vm4, %v1289_v2  ;;  %v9567_v2 = vld [vmem:[#allocation2 + $0x110] sm:$0xff] }
  0xa5   : > { %1020 = vst.msk [vmem:[#allocation3 + $0xb8] sm:$0xff] %vm876_vm0, %v9567_v2 }
  0xa8   : > { %1879 = vrot.lane.b32.xlu0 %v2386_v61, %s12523_s6  ;;  %2071 = vrot.lane.b32.xlu1 %v9325_v28, %s12564_s29 }
  0xaa   : > { %v1482_v6 = vpop.permute.xlu1 %1481  ;;  %v1480_v7 = vpop.permute.xlu0 %1479 }
  0xab   : > { %1577 = vst.msk [vmem:[#allocation3 + $0x8] sm:$0xff] %vm1575_vm5, %v1482_v6  ;;  %1576 = vst.msk [vmem:[#allocation3] sm:$0xff] %vm1575_vm5, %v1480_v7  ;;  %v2391_v7 = vld [vmem:[#allocation2 + $0xaa] sm:$0xff] }
  0xac   : > { %1304 = vrot.lane.b32.xlu0 %v2386_v61, %s12563_s0  ;;  %1495 = vrot.lane.b32.xlu1 %v9325_v28, %s12565_s3  ;;  %v863_v28 = vld [vmem:[%s9273_s28 + $0x98] sm:$0xff]  ;;  %v9552_v61 = vld [vmem:[#allocation2 + $0x108] sm:$0xff] }
  0xad   : > { %952 = vst.msk [vmem:[#allocation2 + $0xf9] sm:$0xff] %vm876_vm0, %v863_v28  ;;  %1019 = vst.msk [vmem:[#allocation3 + $0xb0] sm:$0xff] %vm876_vm0, %v9552_v61  ;;  %v2393_v28 = vld [vmem:[#allocation2 + $0xc2] sm:$0xff] }
  0xae   : > { %v1673_v9 = vpop.permute.xlu0 %1672  ;;  %v1098_v10 = vpop.permute.xlu1 %1097 }
  0xaf   : > { %1769 = vst.msk [vmem:[#allocation3] sm:$0xff] %vm1768_vm6, %v1673_v9 }
  0xb0   : > { %1192 = vst.msk [vmem:[#allocation3 + $0x10] sm:$0xff] %vm1189_vm3, %v1098_v10  ;;  %2073 = vrot.lane.b32.xlu0 %v9327_v29, %s12564_s29  ;;  %2264 = vrot.lane.b32.xlu1 %v2194_v8, %s12521_s2 }
  0xb2   : > { %v1675_v12 = vpop.permute.xlu0 %1674  ;;  %v1866_v13 = vpop.permute.xlu1 %1865 }
  0xb3   : > { %1770 = vst.msk [vmem:[#allocation3 + $0x8] sm:$0xff] %vm1768_vm6, %v1675_v12 }
  0xb4   : > { %1962 = vst.msk [vmem:[#allocation3] sm:$0xff] %vm1961_vm7, %v1866_v13  ;;  %1497 = vrot.lane.b32.xlu0 %v9327_v29, %s12565_s3  ;;  %1688 = vrot.lane.b32.xlu1 %v2194_v8, %s12525_s1  ;;  %v9512_v37 = vld [vmem:[#allocation2 + $0xf8] sm:$0xff] }
  0xb5   : > { %1018 = vst.msk [vmem:[#allocation3 + $0xa8] sm:$0xff] %vm876_vm0, %v9512_v37 }
  0xb6   : > { %v1100_v16 = vpop.permute.xlu0 %1099  ;;  %v1291_v17 = vpop.permute.xlu1 %1290 }
  0xb7   : > { %1193 = vst.msk [vmem:[#allocation3 + $0x18] sm:$0xff] %vm1189_vm3, %v1100_v16 }
  0xb8   : > { %1385 = vst.msk [vmem:[#allocation3 + $0x10] sm:$0xff] %vm1382_vm4, %v1291_v17  ;;  %2266 = vrot.lane.b32.xlu0 %v2195_v14, %s12521_s2  ;;  %2457 = vrot.lane.b32.xlu1 %v2387_v15, %s12527_s11 }
  0xba   : > { %v1868_v18 = vpop.permute.xlu0 %1867  ;;  %v2060_v19 = vpop.permute.xlu1 %2059 }
  0xbb   : > { %1963 = vst.msk [vmem:[#allocation3 + $0x8] sm:$0xff] %vm1961_vm7, %v1868_v18 }
  0xbc   : > { %2156 = vst.msk [vmem:[#allocation3] sm:$0xff] %vm2155_vm8, %v2060_v19  ;;  %1113 = vrot.lane.b32.xlu0 %v2194_v8, %s8991_s10  ;;  %1690 = vrot.lane.b32.xlu1 %v2195_v14, %s12525_s1 }
  0xbe   : > { %v1293_v21 = vpop.permute.xlu0 %1292  ;;  %v1484_v22 = vpop.permute.xlu1 %1483 }
  0xbf   : > { %1386 = vst.msk [vmem:[#allocation3 + $0x18] sm:$0xff] %vm1382_vm4, %v1293_v21 }
  0xc0   : > { %1578 = vst.msk [vmem:[#allocation3 + $0x10] sm:$0xff] %vm1575_vm5, %v1484_v22  ;;  %1881 = vrot.lane.b32.xlu0 %v2387_v15, %s12523_s6  ;;  %2459 = vrot.lane.b32.xlu1 %v2388_v20, %s12527_s11  ;;  %v2200_v22 = vld [vmem:[#allocation2 + $0xc1] sm:$0xff] }
  0xc2   : > { %v2062_v23 = vpop.permute.xlu0 %2061  ;;  %v2253_v24 = vpop.permute.xlu1 %2252 }
  0xc3   : > { %2157 = vst.msk [vmem:[#allocation3 + $0x8] sm:$0xff] %vm2155_vm8, %v2062_v23 }
  0xc4   : > { %2349 = vst.msk [vmem:[#allocation3] sm:$0xff] %vm2348_vm9, %v2253_v24  ;;  %1115 = vrot.lane.b32.xlu0 %v2195_v14, %s8991_s10  ;;  %1306 = vrot.lane.b32.xlu1 %v2387_v15, %s12563_s0 }
  0xc6   : > { %v1486_v25 = vpop.permute.xlu0 %1485  ;;  %v1677_v26 = vpop.permute.xlu1 %1676 }
  0xc7   : > { %1579 = vst.msk [vmem:[#allocation3 + $0x18] sm:$0xff] %vm1575_vm5, %v1486_v25 }
  0xc8   : > { %1771 = vst.msk [vmem:[#allocation3 + $0x10] sm:$0xff] %vm1768_vm6, %v1677_v26  ;;  %1883 = vrot.lane.b32.xlu0 %v2388_v20, %s12523_s6  ;;  %2075 = vrot.lane.b32.xlu1 %v9342_v33, %s12564_s29 }
  0xca   : > { %v2255_v29 = vpop.permute.xlu0 %2254  ;;  %v2446_v30 = vpop.permute.xlu1 %2445 }
  0xcb   : > { %2350 = vst.msk [vmem:[#allocation3 + $0x8] sm:$0xff] %vm2348_vm9, %v2255_v29 }
  0xcc   : > { %2542 = vst.msk [vmem:[#allocation3] sm:$0xff] %vm2541_vm10, %v2446_v30  ;;  %1308 = vrot.lane.b32.xlu0 %v2388_v20, %s12563_s0  ;;  %1499 = vrot.lane.b32.xlu1 %v9342_v33, %s12565_s3 }
  0xce   : > { %v1102_v32 = vpop.permute.xlu0 %1101  ;;  %v1679_v34 = vpop.permute.xlu1 %1678 }
  0xcf   : > { %1194 = vst.msk [vmem:[#allocation3 + $0x20] sm:$0xff] %vm1189_vm3, %v1102_v32 }
  0xd0   : > { %1772 = vst.msk [vmem:[#allocation3 + $0x18] sm:$0xff] %vm1768_vm6, %v1679_v34  ;;  %2077 = vrot.lane.b32.xlu0 %v9349_v35, %s12564_s29  ;;  %2268 = vrot.lane.b32.xlu1 %v2196_v31, %s12521_s2 }
  0xd2   : > { %v1870_v33 = vpop.permute.xlu0 %1869  ;;  %v2448_v38 = vpop.permute.xlu1 %2447 }
  0xd3   : > { %v2574_v39 = vld [vmem:[#allocation3] sm:$0xff]  ;;  %1964 = vst.msk [vmem:[#allocation3 + $0x10] sm:$0xff] %vm1961_vm7, %v1870_v33 }
  0xd4   : > { %2543 = vst.msk [vmem:[#allocation3 + $0x8] sm:$0xff] %vm2541_vm10, %v2448_v38  ;;  %8585 = vmatprep.mubr.msk.f32.mxu0 %vm2611_vm11, %v2574_v39  ;;  %1501 = vrot.lane.b32.xlu0 %v9349_v35, %s12565_s3  ;;  %v2390_v35 = vld [vmem:[#allocation2 + $0x9a] sm:$0xff] }
  0xd5   : > { %1692 = vrot.lane.b32.xlu1 %v2196_v31, %s12525_s1 }
  0xd6   : > { %v1104_v42 = vpop.permute.xlu0 %1103  ;;  %v1295_v43 = vpop.permute.xlu1 %1294 }
  0xd7   : > { %1195 = vst.msk [vmem:[#allocation3 + $0x28] sm:$0xff] %vm1189_vm3, %v1104_v42 }
  0xd8   : > { %1387 = vst.msk [vmem:[#allocation3 + $0x20] sm:$0xff] %vm1382_vm4, %v1295_v43  ;;  %2270 = vrot.lane.b32.xlu0 %v2197_v40, %s12521_s2 }
  0xd9   : > { %2461 = vrot.lane.b32.xlu1 %v2389_v41, %s12527_s11 }
  0xda   : > { %v1872_v44 = vpop.permute.xlu0 %1871  ;;  %v2064_v45 = vpop.permute.xlu1 %2063 }
  0xdb   : > { %v2575_v46 = vld [vmem:[#allocation3 + $0x8] sm:$0xff]  ;;  %1965 = vst.msk [vmem:[#allocation3 + $0x18] sm:$0xff] %vm1961_vm7, %v1872_v44 }
  0xdc   : > { %2158 = vst.msk [vmem:[#allocation3 + $0x10] sm:$0xff] %vm2155_vm8, %v2064_v45  ;;  %8586 = vmatmul.mubr.msk.f32.vlgmr.msra.gmra.mrb[0].mxu0 %vm2611_vm11, %v2575_v46  ;;  %1117 = vrot.lane.b32.xlu0 %v2196_v31, %s8991_s10  ;;  %v867_v44 = vld [vmem:[%s9273_s28 + $0xb8] sm:$0xff] }
  0xdd   : > { %1694 = vrot.lane.b32.xlu1 %v2197_v40, %s12525_s1  ;;  %956 = vst.msk [vmem:[#allocation2 + $0x129] sm:$0xff] %vm876_vm0, %v867_v44 }
  0xde   : > { %v1297_v48 = vpop.permute.xlu0 %1296  ;;  %v1488_v49 = vpop.permute.xlu1 %1487 }
  0xdf   : > { %1388 = vst.msk [vmem:[#allocation3 + $0x28] sm:$0xff] %vm1382_vm4, %v1297_v48  ;;  %v9650_v48 = vld [vmem:[#allocation2 + $0xd9] sm:$0xff] }
  0xe0   : > { %1580 = vst.msk [vmem:[#allocation3 + $0x20] sm:$0xff] %vm1575_vm5, %v1488_v49  ;;  %1885 = vrot.lane.b32.xlu0 %v2389_v41, %s12523_s6 }
  0xe1   : > { %2463 = vrot.lane.b32.xlu1 %v2390_v35, %s12527_s11 }
  0xe2   : > { %v2066_v51 = vpop.permute.xlu0 %2065  ;;  %v2257_v52 = vpop.permute.xlu1 %2256 }
  0xe3   : > { %2159 = vst.msk [vmem:[#allocation3 + $0x18] sm:$0xff] %vm2155_vm8, %v2066_v51 }
  0xe4   : > { %2351 = vst.msk [vmem:[#allocation3 + $0x10] sm:$0xff] %vm2348_vm9, %v2257_v52  ;;  %1119 = vrot.lane.b32.xlu0 %v2197_v40, %s8991_s10 }
  0xe5   : > { %1310 = vrot.lane.b32.xlu1 %v2389_v41, %s12563_s0  ;;  %v866_v41 = vld [vmem:[%s9273_s28 + $0xb0] sm:$0xff] }
  0xe6   : > { %v1490_v54 = vpop.permute.xlu0 %1489  ;;  %v1681_v56 = vpop.permute.xlu1 %1680  ;;  %955 = vst.msk [vmem:[#allocation2 + $0x121] sm:$0xff] %vm876_vm0, %v866_v41 }
  0xe7   : > { %1581 = vst.msk [vmem:[#allocation3 + $0x28] sm:$0xff] %vm1575_vm5, %v1490_v54 }
  0xe8   : > { %1773 = vst.msk [vmem:[#allocation3 + $0x20] sm:$0xff] %vm1768_vm6, %v1681_v56  ;;  %1887 = vrot.lane.b32.xlu0 %v2390_v35, %s12523_s6 }
  0xe9   : > { %2079 = vrot.lane.b32.xlu1 %v9382_v47, %s12564_s29 }
  0xea   : > { %v2259_v59 = vpop.permute.xlu0 %2258  ;;  %v2450_v60 = vpop.permute.xlu1 %2449 }
  0xeb   : > { %2352 = vst.msk [vmem:[#allocation3 + $0x18] sm:$0xff] %vm2348_vm9, %v2259_v59 }
  0xec   : > { %2544 = vst.msk [vmem:[#allocation3 + $0x10] sm:$0xff] %vm2541_vm10, %v2450_v60  ;;  %1312 = vrot.lane.b32.xlu0 %v2390_v35, %s12563_s0 }
  0xed   : > { %1503 = vrot.lane.b32.xlu1 %v9382_v47, %s12565_s3  ;;  %v2199_v47 = vld [vmem:[#allocation2 + $0xb1] sm:$0xff]  ;;  %v9640_v35 = vld [vmem:[#allocation2 + $0x120] sm:$0xff]  ;;  %v9658_v52 = vld [vmem:[#allocation2 + $0x128] sm:$0xff] }
  0xee   : > { %v1106_v63 = vpop.permute.xlu0 %1105  ;;  %v1683_v1 = vpop.permute.xlu1 %1682  ;;  %1021 = vst.msk [vmem:[#allocation3 + $0xc0] sm:$0xff] %vm876_vm0, %v9640_v35  ;;  %1022 = vst.msk [vmem:[#allocation3 + $0xc8] sm:$0xff] %vm876_vm0, %v9658_v52 }
  0xef   : > { %1196 = vst.msk [vmem:[#allocation3 + $0x30] sm:$0xff] %vm1189_vm3, %v1106_v63 }
  0xf0   : > { %1774 = vst.msk [vmem:[#allocation3 + $0x28] sm:$0xff] %vm1768_vm6, %v1683_v1  ;;  %2081 = vrot.lane.b32.xlu0 %v9394_v50, %s12564_s29  ;;  %v2396_v1 = vld [vmem:[#allocation2 + $0xe2] sm:$0xff] }
  0xf1   : > { %2272 = vrot.lane.b32.xlu1 %v2198_v62, %s12521_s2 }
  0xf2   : > { %v1874_v3 = vpop.permute.xlu0 %1873  ;;  %v2452_v5 = vpop.permute.xlu1 %2451 }
  0xf3   : > { %v2576_v6 = vld [vmem:[#allocation3 + $0x10] sm:$0xff]  ;;  %1966 = vst.msk [vmem:[#allocation3 + $0x20] sm:$0xff] %vm1961_vm7, %v1874_v3 }
  0xf4   : > { %2545 = vst.msk [vmem:[#allocation3 + $0x18] sm:$0xff] %vm2541_vm10, %v2452_v5  ;;  %8588 = vmatprep.mubr.msk.f32.mxu0 %vm2611_vm11, %v2576_v6  ;;  %1505 = vrot.lane.b32.xlu0 %v9394_v50, %s12565_s3  ;;  %v2392_v50 = vld [vmem:[#allocation2 + $0xb2] sm:$0xff] }
  0xf5   : > { %1696 = vrot.lane.b32.xlu1 %v2198_v62, %s12525_s1 }
  0xf6   : > { %v1108_v8 = vpop.permute.xlu0 %1107  ;;  %v1299_v9 = vpop.permute.xlu1 %1298 }
  0xf7   : > { %1197 = vst.msk [vmem:[#allocation3 + $0x38] sm:$0xff] %vm1189_vm3, %v1108_v8 }
  0xf8   : > { %1389 = vst.msk [vmem:[#allocation3 + $0x30] sm:$0xff] %vm1382_vm4, %v1299_v9  ;;  %2274 = vrot.lane.b32.xlu0 %v2199_v47, %s12521_s2 }
  0xf9   : > { %2465 = vrot.lane.b32.xlu1 %v2391_v7, %s12527_s11 }
  0xfa   : > { %v1876_v10 = vpop.permute.xlu0 %1875  ;;  %v2068_v12 = vpop.permute.xlu1 %2067 }
  0xfb   : > { %v2577_v13 = vld [vmem:[#allocation3 + $0x18] sm:$0xff]  ;;  %1967 = vst.msk [vmem:[#allocation3 + $0x28] sm:$0xff] %vm1961_vm7, %v1876_v10 }
  0xfc   : > { %2160 = vst.msk [vmem:[#allocation3 + $0x20] sm:$0xff] %vm2155_vm8, %v2068_v12  ;;  %8589 = vmatmul.mubr.msk.f32.gmra.mrb[2].mxu0 %vm2611_vm11, %v2577_v13  ;;  %1121 = vrot.lane.b32.xlu0 %v2198_v62, %s8991_s10  ;;  %v9855_v12 = vld [vmem:[#allocation2 + $0xf1] sm:$0xff] }
  0xfd   : > { %1698 = vrot.lane.b32.xlu1 %v2199_v47, %s12525_s1 }
  0xfe   : > { %v1301_v14 = vpop.permute.xlu0 %1300  ;;  %v1492_v15 = vpop.permute.xlu1 %1491 }
  0xff   : > { %1390 = vst.msk [vmem:[#allocation3 + $0x38] sm:$0xff] %vm1382_vm4, %v1301_v14 }
 0x100   : > { %1582 = vst.msk [vmem:[#allocation3 + $0x30] sm:$0xff] %vm1575_vm5, %v1492_v15  ;;  %1889 = vrot.lane.b32.xlu0 %v2391_v7, %s12523_s6 }
 0x101   : > { %2467 = vrot.lane.b32.xlu1 %v2392_v50, %s12527_s11 }
 0x102   : > { %v2070_v16 = vpop.permute.xlu0 %2069  ;;  %v2261_v17 = vpop.permute.xlu1 %2260 }
 0x103   : > { %2161 = vst.msk [vmem:[#allocation3 + $0x28] sm:$0xff] %vm2155_vm8, %v2070_v16 }
 0x104   : > { %2353 = vst.msk [vmem:[#allocation3 + $0x20] sm:$0xff] %vm2348_vm9, %v2261_v17  ;;  %1123 = vrot.lane.b32.xlu0 %v2199_v47, %s8991_s10  ;;  %v9870_v17 = vld [vmem:[#allocation2 + $0xf2] sm:$0xff] }
 0x105   : > { %1314 = vrot.lane.b32.xlu1 %v2391_v7, %s12563_s0 }
 0x106   : > { %v1494_v18 = vpop.permute.xlu0 %1493  ;;  %v1685_v19 = vpop.permute.xlu1 %1684 }
 0x107   : > { %1583 = vst.msk [vmem:[#allocation3 + $0x38] sm:$0xff] %vm1575_vm5, %v1494_v18 }
 0x108   : > { %1775 = vst.msk [vmem:[#allocation3 + $0x30] sm:$0xff] %vm1768_vm6, %v1685_v19  ;;  %1891 = vrot.lane.b32.xlu0 %v2392_v50, %s12523_s6 }
 0x109   : > { %2083 = vrot.lane.b32.xlu1 %v9414_v55, %s12564_s29 }
 0x10a   : > { %v2263_v20 = vpop.permute.xlu0 %2262  ;;  %v2454_v21 = vpop.permute.xlu1 %2453 }
 0x10b   : > { %2354 = vst.msk [vmem:[#allocation3 + $0x28] sm:$0xff] %vm2348_vm9, %v2263_v20 }
 0x10c   : > { %2546 = vst.msk [vmem:[#allocation3 + $0x20] sm:$0xff] %vm2541_vm10, %v2454_v21  ;;  %1316 = vrot.lane.b32.xlu0 %v2392_v50, %s12563_s0 }
 0x10d   : > { %1507 = vrot.lane.b32.xlu1 %v9414_v55, %s12565_s3  ;;  %v2201_v55 = vld [vmem:[#allocation2 + $0xc9] sm:$0xff] }
 0x10e   : > { %v1110_v23 = vpop.permute.xlu0 %1109  ;;  %v1687_v24 = vpop.permute.xlu1 %1686 }
 0x10f   : > { %1198 = vst.msk [vmem:[#allocation3 + $0x40] sm:$0xff] %vm1189_vm3, %v1110_v23 }
 0x110   : > { %1776 = vst.msk [vmem:[#allocation3 + $0x38] sm:$0xff] %vm1768_vm6, %v1687_v24  ;;  %2085 = vrot.lane.b32.xlu0 %v9426_v58, %s12564_s29 }
 0x111   : > { %2276 = vrot.lane.b32.xlu1 %v2200_v22, %s12521_s2 }
 0x112   : > { %v1878_v25 = vpop.permute.xlu0 %1877  ;;  %v2456_v26 = vpop.permute.xlu1 %2455 }
 0x113   : > { %v2578_v27 = vld [vmem:[#allocation3 + $0x20] sm:$0xff]  ;;  %1968 = vst.msk [vmem:[#allocation3 + $0x30] sm:$0xff] %vm1961_vm7, %v1878_v25 }
 0x114   : > { %2547 = vst.msk [vmem:[#allocation3 + $0x28] sm:$0xff] %vm2541_vm10, %v2456_v26  ;;  %8591 = vmatprep.mubr.msk.f32.mxu0 %vm2611_vm11, %v2578_v27  ;;  %1509 = vrot.lane.b32.xlu0 %v9426_v58, %s12565_s3  ;;  %v2394_v58 = vld [vmem:[#allocation2 + $0xca] sm:$0xff]  ;;  %v868_v27 = vld [vmem:[%s9273_s28 + $0xc0] sm:$0xff] }
 0x115   : > { %1700 = vrot.lane.b32.xlu1 %v2200_v22, %s12525_s1  ;;  %957 = vst.msk [vmem:[#allocation2 + $0x139] sm:$0xff] %vm876_vm0, %v868_v27 }
 0x116   : > { %v1112_v29 = vpop.permute.xlu0 %1111  ;;  %v1303_v30 = vpop.permute.xlu1 %1302 }
 0x117   : > { %1199 = vst.msk [vmem:[#allocation3 + $0x48] sm:$0xff] %vm1189_vm3, %v1112_v29 }
 0x118   : > { %1391 = vst.msk [vmem:[#allocation3 + $0x40] sm:$0xff] %vm1382_vm4, %v1303_v30  ;;  %2278 = vrot.lane.b32.xlu0 %v2201_v55, %s12521_s2 }
 0x119   : > { %2469 = vrot.lane.b32.xlu1 %v2393_v28, %s12527_s11 }
 0x11a   : > { %v1880_v31 = vpop.permute.xlu0 %1879  ;;  %v2072_v32 = vpop.permute.xlu1 %2071 }
 0x11b   : > { %v2579_v34 = vld [vmem:[#allocation3 + $0x28] sm:$0xff]  ;;  %1969 = vst.msk [vmem:[#allocation3 + $0x38] sm:$0xff] %vm1961_vm7, %v1880_v31  ;;  %v869_v31 = vld [vmem:[%s9273_s28 + $0xc8] sm:$0xff] }
 0x11c   : > { %2162 = vst.msk [vmem:[#allocation3 + $0x30] sm:$0xff] %vm2155_vm8, %v2072_v32  ;;  %8592 = vmatmul.mubr.msk.f32.gmra.mrb[4].mxu0 %vm2611_vm11, %v2579_v34  ;;  %1125 = vrot.lane.b32.xlu0 %v2200_v22, %s8991_s10  ;;  %v2398_v22 = vld [vmem:[#allocation2 + $0xfa] sm:$0xff]  ;;  %v9907_v32 = vld [vmem:[#allocation2 + $0x10a] sm:$0xff] }
 0x11d   : > { %1702 = vrot.lane.b32.xlu1 %v2201_v55, %s12525_s1  ;;  %958 = vst.msk [vmem:[#allocation2 + $0x141] sm:$0xff] %vm876_vm0, %v869_v31 }
 0x11e   : > { %v1305_v33 = vpop.permute.xlu0 %1304  ;;  %v1496_v38 = vpop.permute.xlu1 %1495 }
 0x11f   : > { %1392 = vst.msk [vmem:[#allocation3 + $0x48] sm:$0xff] %vm1382_vm4, %v1305_v33  ;;  %v9909_v33 = vld [vmem:[#allocation2 + $0x138] sm:$0xff] }
 0x120   : > { %1584 = vst.msk [vmem:[#allocation3 + $0x40] sm:$0xff] %vm1575_vm5, %v1496_v38  ;;  %1893 = vrot.lane.b32.xlu0 %v2393_v28, %s12523_s6  ;;  %v9919_v38 = vld [vmem:[#allocation2 + $0x112] sm:$0xff] }
 0x121   : > { %2471 = vrot.lane.b32.xlu1 %v2394_v58, %s12527_s11  ;;  %1023 = vst.msk [vmem:[#allocation3 + $0xd0] sm:$0xff] %vm876_vm0, %v9909_v33 }
 0x122   : > { %v2074_v39 = vpop.permute.xlu0 %2073  ;;  %v2265_v40 = vpop.permute.xlu1 %2264 }
 0x123   : > { %2163 = vst.msk [vmem:[#allocation3 + $0x38] sm:$0xff] %vm2155_vm8, %v2074_v39 }
 0x124   : > { %2355 = vst.msk [vmem:[#allocation3 + $0x30] sm:$0xff] %vm2348_vm9, %v2265_v40  ;;  %1127 = vrot.lane.b32.xlu0 %v2201_v55, %s8991_s10  ;;  %v9895_v55 = vld [vmem:[#allocation2 + $0x109] sm:$0xff]  ;;  %v9923_v41 = vld [vmem:[#allocation2 + $0x140] sm:$0xff] }
 0x125   : > { %1318 = vrot.lane.b32.xlu1 %v2393_v28, %s12563_s0  ;;  %v9897_v28 = vld [vmem:[#allocation2 + $0x111] sm:$0xff]  ;;  %1024 = vst.msk [vmem:[#allocation3 + $0xd8] sm:$0xff] %vm876_vm0, %v9923_v41 }
 0x126   : > { %v1498_v42 = vpop.permute.xlu0 %1497  ;;  %v1689_v43 = vpop.permute.xlu1 %1688 }
 0x127   : > { %1585 = vst.msk [vmem:[#allocation3 + $0x48] sm:$0xff] %vm1575_vm5, %v1498_v42 }
 0x128   : > { %1777 = vst.msk [vmem:[#allocation3 + $0x40] sm:$0xff] %vm1768_vm6, %v1689_v43  ;;  %1895 = vrot.lane.b32.xlu0 %v2394_v58, %s12523_s6 }
 0x129   : > { %2087 = vrot.lane.b32.xlu1 %v9449_v4, %s12564_s29 }
 0x12a   : > { %v2267_v45 = vpop.permute.xlu0 %2266  ;;  %v2458_v46 = vpop.permute.xlu1 %2457 }
 0x12b   : > { %2356 = vst.msk [vmem:[#allocation3 + $0x38] sm:$0xff] %vm2348_vm9, %v2267_v45 }
 0x12c   : > { %2548 = vst.msk [vmem:[#allocation3 + $0x30] sm:$0xff] %vm2541_vm10, %v2458_v46  ;;  %1320 = vrot.lane.b32.xlu0 %v2394_v58, %s12563_s0 }
 0x12d   : > { %1511 = vrot.lane.b32.xlu1 %v9449_v4, %s12565_s3  ;;  %v9669_v4 = vld [vmem:[#allocation2 + $0xe1] sm:$0xff] }
 0x12e   : > { %v1114_v49 = vpop.permute.xlu0 %1113  ;;  %v1691_v51 = vpop.permute.xlu1 %1690 }
 0x12f   : > { %1200 = vst.msk [vmem:[#allocation3 + $0x50] sm:$0xff] %vm1189_vm3, %v1114_v49 }
 0x130   : > { %1778 = vst.msk [vmem:[#allocation3 + $0x48] sm:$0xff] %vm1768_vm6, %v1691_v51  ;;  %2089 = vrot.lane.b32.xlu0 %v9466_v11, %s12564_s29 }
 0x131   : > { %2280 = vrot.lane.b32.xlu1 %v9650_v48, %s12521_s2 }
 0x132   : > { %v1882_v53 = vpop.permute.xlu0 %1881  ;;  %v2460_v54 = vpop.permute.xlu1 %2459 }
 0x133   : > { %v2580_v56 = vld [vmem:[#allocation3 + $0x30] sm:$0xff]  ;;  %1970 = vst.msk [vmem:[#allocation3 + $0x40] sm:$0xff] %vm1961_vm7, %v1882_v53 }
 0x134   : > { %2549 = vst.msk [vmem:[#allocation3 + $0x38] sm:$0xff] %vm2541_vm10, %v2460_v54  ;;  %8594 = vmatprep.mubr.msk.f32.mxu0 %vm2611_vm11, %v2580_v56  ;;  %1513 = vrot.lane.b32.xlu0 %v9466_v11, %s12565_s3  ;;  %v9961_v56 = vld [vmem:[#allocation2 + $0x121] sm:$0xff] }
 0x135   : > { %1704 = vrot.lane.b32.xlu1 %v9650_v48, %s12525_s1 }
 0x136   : > { %v1116_v11 = vpop.permute.xlu0 %1115  ;;  %v1307_v59 = vpop.permute.xlu1 %1306 }
 0x137   : > { %1201 = vst.msk [vmem:[#allocation3 + $0x58] sm:$0xff] %vm1189_vm3, %v1116_v11 }
 0x138   : > { %1393 = vst.msk [vmem:[#allocation3 + $0x50] sm:$0xff] %vm1382_vm4, %v1307_v59  ;;  %2282 = vrot.lane.b32.xlu0 %v9669_v4, %s12521_s2  ;;  %v9971_v59 = vld [vmem:[#allocation2 + $0x122] sm:$0xff] }
 0x139   : > { %2473 = vrot.lane.b32.xlu1 %v9671_v57, %s12527_s11 }
 0x13a   : > { %v1884_v60 = vpop.permute.xlu0 %1883  ;;  %v2076_v62 = vpop.permute.xlu1 %2075 }
 0x13b   : > { %v2581_v63 = vld [vmem:[#allocation3 + $0x38] sm:$0xff]  ;;  %1971 = vst.msk [vmem:[#allocation3 + $0x48] sm:$0xff] %vm1961_vm7, %v1884_v60 }
 0x13c   : > { %2164 = vst.msk [vmem:[#allocation3 + $0x40] sm:$0xff] %vm2155_vm8, %v2076_v62  ;;  %8595 = vmatmul.mubr.msk.f32.gmra.mrb[6].mxu0 %vm2611_vm11, %v2581_v63  ;;  %1129 = vrot.lane.b32.xlu0 %v9650_v48, %s8991_s10  ;;  %v9979_v63 = vld [vmem:[#allocation2 + $0x12a] sm:$0xff] }
 0x13d   : > { %1706 = vrot.lane.b32.xlu1 %v9669_v4, %s12525_s1 }
 0x13e   : > { %v1309_v3 = vpop.permute.xlu0 %1308  ;;  %v1500_v5 = vpop.permute.xlu1 %1499 }
 0x13f   : > { %1394 = vst.msk [vmem:[#allocation3 + $0x58] sm:$0xff] %vm1382_vm4, %v1309_v3 }
 0x140   : > { %1586 = vst.msk [vmem:[#allocation3 + $0x50] sm:$0xff] %vm1575_vm5, %v1500_v5  ;;  %1897 = vrot.lane.b32.xlu0 %v9671_v57, %s12523_s6 }
 0x141   : > { %2475 = vrot.lane.b32.xlu1 %v2396_v1, %s12527_s11 }
 0x142   : > { %v2078_v6 = vpop.permute.xlu0 %2077  ;;  %v2269_v47 = vpop.permute.xlu1 %2268 }
 0x143   : > { %2165 = vst.msk [vmem:[#allocation3 + $0x48] sm:$0xff] %vm2155_vm8, %v2078_v6 }
 0x144   : > { %2357 = vst.msk [vmem:[#allocation3 + $0x40] sm:$0xff] %vm2348_vm9, %v2269_v47  ;;  %1131 = vrot.lane.b32.xlu0 %v9669_v4, %s8991_s10  ;;  %v9963_v4 = vld [vmem:[#allocation2 + $0x129] sm:$0xff] }
 0x145   : > { %1322 = vrot.lane.b32.xlu1 %v9671_v57, %s12563_s0 }
 0x146   : > { %v1502_v7 = vpop.permute.xlu0 %1501 }
 0x147   : > { %v1693_v8 = vpop.permute.xlu1 %1692  ;;  %1587 = vst.msk [vmem:[#allocation3 + $0x58] sm:$0xff] %vm1575_vm5, %v1502_v7 }
 0x148   : > { %1779 = vst.msk [vmem:[#allocation3 + $0x50] sm:$0xff] %vm1768_vm6, %v1693_v8  ;;  %1899 = vrot.lane.b32.xlu0 %v2396_v1, %s12523_s6 }
 0x149   : > { %2091 = vrot.lane.b32.xlu1 %v9508_v36, %s12564_s29 }
 0x14a   : > { %v2271_v9 = vpop.permute.xlu0 %2270 }
 0x14b   : > { %v2462_v10 = vpop.permute.xlu1 %2461  ;;  %2358 = vst.msk [vmem:[#allocation3 + $0x48] sm:$0xff] %vm2348_vm9, %v2271_v9  ;;  %v870_v9 = vld [vmem:[%s9273_s28 + $0xd0] sm:$0xff] }
 0x14c   : > { %2550 = vst.msk [vmem:[#allocation3 + $0x40] sm:$0xff] %vm2541_vm10, %v2462_v10  ;;  %1324 = vrot.lane.b32.xlu0 %v2396_v1, %s12563_s0  ;;  %v871_v10 = vld [vmem:[%s9273_s28 + $0xd8] sm:$0xff] }
 0x14d   : > { %1515 = vrot.lane.b32.xlu1 %v9508_v36, %s12565_s3  ;;  %v2205_v36 = vld [vmem:[#allocation2 + $0xf9] sm:$0xff]  ;;  %959 = vst.msk [vmem:[#allocation2 + $0x151] sm:$0xff] %vm876_vm0, %v870_v9  ;;  %960 = vst.msk [vmem:[#allocation2 + $0x159] sm:$0xff] %vm876_vm0, %v871_v10 }
 0x14e   : > { %v1118_v13 = vpop.permute.xlu0 %1117 }
 0x14f   : > { %v1695_v50 = vpop.permute.xlu1 %1694  ;;  %1202 = vst.msk [vmem:[#allocation3 + $0x60] sm:$0xff] %vm1189_vm3, %v1118_v13 }
 0x150   : > { %1780 = vst.msk [vmem:[#allocation3 + $0x58] sm:$0xff] %vm1768_vm6, %v1695_v50  ;;  %2093 = vrot.lane.b32.xlu0 %v9512_v37, %s12564_s29 }
 0x151   : > { %2284 = vrot.lane.b32.xlu1 %v9855_v12, %s12521_s2 }
 0x152   : > { %v1886_v14 = vpop.permute.xlu0 %1885 }
 0x153   : > { %v2464_v15 = vpop.permute.xlu1 %2463  ;;  %v2582_v16 = vld [vmem:[#allocation3 + $0x40] sm:$0xff]  ;;  %1972 = vst.msk [vmem:[#allocation3 + $0x50] sm:$0xff] %vm1961_vm7, %v1886_v14 }
 0x154   : > { %2551 = vst.msk [vmem:[#allocation3 + $0x48] sm:$0xff] %vm2541_vm10, %v2464_v15  ;;  %8597 = vmatprep.mubr.msk.f32.mxu0 %vm2611_vm11, %v2582_v16  ;;  %1517 = vrot.lane.b32.xlu0 %v9512_v37, %s12565_s3  ;;  %v10011_v15 = vld [vmem:[#allocation2 + $0x150] sm:$0xff] }
 0x155   : > { %1708 = vrot.lane.b32.xlu1 %v9855_v12, %s12525_s1  ;;  %1025 = vst.msk [vmem:[#allocation3 + $0xe0] sm:$0xff] %vm876_vm0, %v10011_v15 }
 0x156   : > { %v1120_v18 = vpop.permute.xlu0 %1119 }
 0x157   : > { %v1311_v19 = vpop.permute.xlu1 %1310  ;;  %1203 = vst.msk [vmem:[#allocation3 + $0x68] sm:$0xff] %vm1189_vm3, %v1120_v18  ;;  %v10033_v18 = vld [vmem:[#allocation2 + $0x141] sm:$0xff] }
 0x158   : > { %1395 = vst.msk [vmem:[#allocation3 + $0x60] sm:$0xff] %vm1382_vm4, %v1311_v19  ;;  %2286 = vrot.lane.b32.xlu0 %v2205_v36, %s12521_s2 }
 0x159   : > { %2477 = vrot.lane.b32.xlu1 %v9870_v17, %s12527_s11 }
 0x15a   : > { %v1888_v20 = vpop.permute.xlu0 %1887 }
 0x15b   : > { %v2080_v21 = vpop.permute.xlu1 %2079  ;;  %v2583_v37 = vld [vmem:[#allocation3 + $0x48] sm:$0xff]  ;;  %1973 = vst.msk [vmem:[#allocation3 + $0x58] sm:$0xff] %vm1961_vm7, %v1888_v20 }
 0x15c   : > { %2166 = vst.msk [vmem:[#allocation3 + $0x50] sm:$0xff] %vm2155_vm8, %v2080_v21  ;;  %8598 = vmatmul.mubr.msk.f32.gmra.mrb[8].mxu0 %vm2611_vm11, %v2583_v37  ;;  %1710 = vrot.lane.b32.xlu0 %v2205_v36, %s12525_s1  ;;  %v10041_v21 = vld [vmem:[#allocation2 + $0x13a] sm:$0xff] }
 0x15d   : > { %1901 = vrot.lane.b32.xlu1 %v9870_v17, %s12523_s6 }
 0x15e   : > { %v1313_v23 = vpop.permute.xlu0 %1312 }
 0x15f   : > { %v1504_v24 = vpop.permute.xlu1 %1503  ;;  %1396 = vst.msk [vmem:[#allocation3 + $0x68] sm:$0xff] %vm1382_vm4, %v1313_v23  ;;  %v10052_v23 = vld [vmem:[%s12566_s5] ss:$0 sm:$0xff] }
 0x160   : > { %1588 = vst.msk [vmem:[#allocation3 + $0x60] sm:$0xff] %vm1575_vm5, %v1504_v24  ;;  %2479 = vrot.lane.b32.xlu0 %v2398_v22, %s12527_s11  ;;  %v10054_v24 = vld [vmem:[#allocation2 + $0x142] sm:$0xff] }
 0x161   : > { %1903 = vrot.lane.b32.xlu1 %v2398_v22, %s12523_s6 }
 0x162   : > { %v2082_v25 = vpop.permute.xlu0 %2081 }
 0x163   : > { %v2273_v26 = vpop.permute.xlu1 %2272  ;;  %2167 = vst.msk [vmem:[#allocation3 + $0x58] sm:$0xff] %vm2155_vm8, %v2082_v25 }
 0x164   : > { %2359 = vst.msk [vmem:[#allocation3 + $0x50] sm:$0xff] %vm2348_vm9, %v2273_v26  ;;  %2095 = vrot.lane.b32.xlu0 %v9552_v61, %s12564_s29 }
 0x165   : > { %2097 = vrot.lane.b32.xlu1 %v9567_v2, %s12564_s29 }
 0x166   : > { %v1506_v29 = vpop.permute.xlu0 %1505 }
 0x167   : > { %v1697_v30 = vpop.permute.xlu1 %1696  ;;  %1589 = vst.msk [vmem:[#allocation3 + $0x68] sm:$0xff] %vm1575_vm5, %v1506_v29 }
 0x168   : > { %1781 = vst.msk [vmem:[#allocation3 + $0x60] sm:$0xff] %vm1768_vm6, %v1697_v30  ;;  %2288 = vrot.lane.b32.xlu0 %v9895_v55, %s12521_s2 }
 0x169   : > { %2290 = vrot.lane.b32.xlu1 %v9897_v28, %s12521_s2 }
 0x16a   : > { %v2275_v34 = vpop.permute.xlu0 %2274 }
 0x16b   : > { %v2466_v58 = vpop.permute.xlu1 %2465  ;;  %2360 = vst.msk [vmem:[#allocation3 + $0x58] sm:$0xff] %vm2348_vm9, %v2275_v34 }
 0x16c   : > { %2552 = vst.msk [vmem:[#allocation3 + $0x50] sm:$0xff] %vm2541_vm10, %v2466_v58  ;;  %2481 = vrot.lane.b32.xlu0 %v9907_v32, %s12527_s11 }
 0x16d   : > { %1133 = vrot.lane.b32.xlu1 %v9855_v12, %s8991_s10 }
 0x16e   : > { %v1122_v39 = vpop.permute.xlu0 %1121 }
 0x16f   : > { %v1699_v40 = vpop.permute.xlu1 %1698  ;;  %1204 = vst.msk [vmem:[#allocation3 + $0x70] sm:$0xff] %vm1189_vm3, %v1122_v39 }
 0x170   : > { %1782 = vst.msk [vmem:[#allocation3 + $0x68] sm:$0xff] %vm1768_vm6, %v1699_v40  ;;  %2483 = vrot.lane.b32.xlu0 %v9919_v38, %s12527_s11 }
 0x171   : > { %1135 = vrot.lane.b32.xlu1 %v2205_v36, %s8991_s10 }
 0x172   : > { %v1890_v42 = vpop.permute.xlu0 %1889 }
 0x173   : > { %v2468_v43 = vpop.permute.xlu1 %2467  ;;  %v2584_v44 = vld [vmem:[#allocation3 + $0x50] sm:$0xff]  ;;  %1974 = vst.msk [vmem:[#allocation3 + $0x60] sm:$0xff] %vm1961_vm7, %v1890_v42 }
 0x174   : > { %2553 = vst.msk [vmem:[#allocation3 + $0x58] sm:$0xff] %vm2541_vm10, %v2468_v43  ;;  %8600 = vmatprep.mubr.msk.f32.mxu0 %vm2611_vm11, %v2584_v44  ;;  %1326 = vrot.lane.b32.xlu0 %v9870_v17, %s12563_s0  ;;  %v10031_v17 = vld [vmem:[#allocation2 + $0x139] sm:$0xff] }
 0x175   : > { %1328 = vrot.lane.b32.xlu1 %v2398_v22, %s12563_s0  ;;  %v872_v44 = vld [vmem:[%s9273_s28 + $0xe0] sm:$0xff] }
 0x176   : > { %v1124_v45 = vpop.permute.xlu0 %1123  ;;  %961 = vst.msk [vmem:[#allocation2 + $0x169] sm:$0xff] %vm876_vm0, %v872_v44 }
 0x177   : > { %v1315_v46 = vpop.permute.xlu1 %1314  ;;  %1205 = vst.msk [vmem:[#allocation3 + $0x78] sm:$0xff] %vm1189_vm3, %v1124_v45  ;;  %v873_v45 = vld [vmem:[%s9273_s28 + $0xe8] sm:$0xff] }
 0x178   : > { %1397 = vst.msk [vmem:[#allocation3 + $0x70] sm:$0xff] %vm1382_vm4, %v1315_v46  ;;  %1519 = vrot.lane.b32.xlu0 %v9552_v61, %s12565_s3 }
 0x179   : > { %1521 = vrot.lane.b32.xlu1 %v9567_v2, %s12565_s3  ;;  %962 = vst.msk [vmem:[#allocation2 + $0x171] sm:$0xff] %vm876_vm0, %v873_v45 }
 0x17a   : > { %v1892_v48 = vpop.permute.xlu0 %1891 }
 0x17b   : > { %v2084_v49 = vpop.permute.xlu1 %2083  ;;  %v2585_v51 = vld [vmem:[#allocation3 + $0x58] sm:$0xff]  ;;  %1975 = vst.msk [vmem:[#allocation3 + $0x68] sm:$0xff] %vm1961_vm7, %v1892_v48 }
 0x17c   : > { %2168 = vst.msk [vmem:[#allocation3 + $0x60] sm:$0xff] %vm2155_vm8, %v2084_v49  ;;  %8601 = vmatmul.mubr.msk.f32.gmra.mrb[10].mxu0 %vm2611_vm11, %v2585_v51  ;;  %1712 = vrot.lane.b32.xlu0 %v9895_v55, %s12525_s1 }
 0x17d   : > { %1714 = vrot.lane.b32.xlu1 %v9897_v28, %s12525_s1 }
 0x17e   : > { %v1317_v53 = vpop.permute.xlu0 %1316 }
 0x17f   : > { %v1508_v61 = vpop.permute.xlu1 %1507  ;;  %1398 = vst.msk [vmem:[#allocation3 + $0x78] sm:$0xff] %vm1382_vm4, %v1317_v53 }
 0x180   : > { %1590 = vst.msk [vmem:[#allocation3 + $0x70] sm:$0xff] %vm1575_vm5, %v1508_v61  ;;  %1905 = vrot.lane.b32.xlu0 %v9907_v32, %s12523_s6  ;;  %v10097_v53 = vld [vmem:[#allocation2 + $0x170] sm:$0xff] }
 0x181   : > { %1907 = vrot.lane.b32.xlu1 %v9919_v38, %s12523_s6  ;;  %1028 = vst.msk [vmem:[#allocation3 + $0xf8] sm:$0xff] %vm876_vm0, %v10097_v53 }
 0x182   : > { %v2086_v2 = vpop.permute.xlu0 %2085 }
 0x183   : > { %v2277_v54 = vpop.permute.xlu1 %2276  ;;  %2169 = vst.msk [vmem:[#allocation3 + $0x68] sm:$0xff] %vm2155_vm8, %v2086_v2 }
 0x184   : > { %2361 = vst.msk [vmem:[#allocation3 + $0x60] sm:$0xff] %vm2348_vm9, %v2277_v54  ;;  %2099 = vrot.lane.b32.xlu0 %v9640_v35, %s12564_s29 }
 0x185   : > { %2101 = vrot.lane.b32.xlu1 %v9658_v52, %s12564_s29 }
 0x186   : > { %v1510_v57 = vpop.permute.xlu0 %1509 }
 0x187   : > { %v1701_v11 = vpop.permute.xlu1 %1700  ;;  %1591 = vst.msk [vmem:[#allocation3 + $0x78] sm:$0xff] %vm1575_vm5, %v1510_v57  ;;  %v10127_v57 = vld [vmem:[#allocation2 + $0x159] sm:$0xff] }
 0x188   : > { %1783 = vst.msk [vmem:[#allocation3 + $0x70] sm:$0xff] %vm1768_vm6, %v1701_v11  ;;  %2292 = vrot.lane.b32.xlu0 %v9961_v56, %s12521_s2 }
 0x189   : > { %2294 = vrot.lane.b32.xlu1 %v9963_v4, %s12521_s2 }
 0x18a   : > { %v2279_v60 = vpop.permute.xlu0 %2278 }
 0x18b   : > { %v2470_v62 = vpop.permute.xlu1 %2469  ;;  %2362 = vst.msk [vmem:[#allocation3 + $0x68] sm:$0xff] %vm2348_vm9, %v2279_v60  ;;  %v10135_v60 = vld [vmem:[#allocation2 + $0x152] sm:$0xff] }
 0x18c   : > { %2554 = vst.msk [vmem:[#allocation3 + $0x60] sm:$0xff] %vm2541_vm10, %v2470_v62  ;;  %2485 = vrot.lane.b32.xlu0 %v9971_v59, %s12527_s11 }
 0x18d   : > { %1137 = vrot.lane.b32.xlu1 %v9895_v55, %s8991_s10 }
 0x18e   : > { %v1126_v1 = vpop.permute.xlu0 %1125 }
 0x18f   : > { %v1703_v3 = vpop.permute.xlu1 %1702  ;;  %1206 = vst.msk [vmem:[#allocation3 + $0x80] sm:$0xff] %vm1189_vm3, %v1126_v1  ;;  %v10143_v1 = vld [vmem:[#allocation2 + $0x15a] sm:$0xff] }
 0x190   : > { %1784 = vst.msk [vmem:[#allocation3 + $0x78] sm:$0xff] %vm1768_vm6, %v1703_v3  ;;  %2487 = vrot.lane.b32.xlu0 %v9979_v63, %s12527_s11 }
 0x191   : > { %1139 = vrot.lane.b32.xlu1 %v9897_v28, %s8991_s10 }
 0x192   : > { %v1894_v5 = vpop.permute.xlu0 %1893 }
 0x193   : > { %v2472_v6 = vpop.permute.xlu1 %2471  ;;  %v2586_v47 = vld [vmem:[#allocation3 + $0x60] sm:$0xff]  ;;  %1976 = vst.msk [vmem:[#allocation3 + $0x70] sm:$0xff] %vm1961_vm7, %v1894_v5 }
 0x194   : > { %2555 = vst.msk [vmem:[#allocation3 + $0x68] sm:$0xff] %vm2541_vm10, %v2472_v6  ;;  %8603 = vmatprep.mubr.msk.f32.mxu0 %vm2611_vm11, %v2586_v47  ;;  %1330 = vrot.lane.b32.xlu0 %v9907_v32, %s12563_s0 }
 0x195   : > { %1332 = vrot.lane.b32.xlu1 %v9919_v38, %s12563_s0 }
 0x196   : > { %v1128_v7 = vpop.permute.xlu0 %1127 }
 0x197   : > { %v1319_v8 = vpop.permute.xlu1 %1318  ;;  %1207 = vst.msk [vmem:[#allocation3 + $0x88] sm:$0xff] %vm1189_vm3, %v1128_v7 }
 0x198   : > { %1399 = vst.msk [vmem:[#allocation3 + $0x80] sm:$0xff] %vm1382_vm4, %v1319_v8  ;;  %1523 = vrot.lane.b32.xlu0 %v9640_v35, %s12565_s3 }
 0x199   : > { %1525 = vrot.lane.b32.xlu1 %v9658_v52, %s12565_s3  ;;  %v10013_v52 = vld [vmem:[#allocation2 + $0x158] sm:$0xff] }
 0x19a   : > { %v1896_v12 = vpop.permute.xlu0 %1895  ;;  %1026 = vst.msk [vmem:[#allocation3 + $0xe8] sm:$0xff] %vm876_vm0, %v10013_v52 }
 0x19b   : > { %v2088_v13 = vpop.permute.xlu1 %2087  ;;  %v2587_v50 = vld [vmem:[#allocation3 + $0x68] sm:$0xff]  ;;  %1977 = vst.msk [vmem:[#allocation3 + $0x78] sm:$0xff] %vm1961_vm7, %v1896_v12 }
 0x19c   : > { %2170 = vst.msk [vmem:[#allocation3 + $0x70] sm:$0xff] %vm2155_vm8, %v2088_v13  ;;  %8604 = vmatmul.mubr.msk.f32.gmra.mrb[12].mxu0 %vm2611_vm11, %v2587_v50  ;;  %1716 = vrot.lane.b32.xlu0 %v9961_v56, %s12525_s1 }
 0x19d   : > { %1718 = vrot.lane.b32.xlu1 %v9963_v4, %s12525_s1  ;;  %s12567_s1 = sld [smem:[#allocation20_spill]] }
 0x19e   : > { %v1321_v14 = vpop.permute.xlu0 %1320 }
 0x19f   : > { %v1512_v35 = vpop.permute.xlu1 %1511  ;;  %1400 = vst.msk [vmem:[#allocation3 + $0x88] sm:$0xff] %vm1382_vm4, %v1321_v14 }
 0x1a0   : > { %1592 = vst.msk [vmem:[#allocation3 + $0x80] sm:$0xff] %vm1575_vm5, %v1512_v35  ;;  %1909 = vrot.lane.b32.xlu0 %v9971_v59, %s12523_s6 }
 0x1a1   : > { %1911 = vrot.lane.b32.xlu1 %v9979_v63, %s12523_s6  ;;  %s12568_s6 = smov 16  }
 0x1a2   : > { %v2090_v16 = vpop.permute.xlu0 %2089 }
 0x1a3   : > { %v2281_v36 = vpop.permute.xlu1 %2280  ;;  %2171 = vst.msk [vmem:[#allocation3 + $0x78] sm:$0xff] %vm2155_vm8, %v2090_v16  ;;  %v10061_v55 = vld [vmem:[%s12567_s1] ss:$0 sm:$0xff] }
 0x1a4   : > { %2363 = vst.msk [vmem:[#allocation3 + $0x70] sm:$0xff] %vm2348_vm9, %v2281_v36  ;;  %2103 = vrot.lane.b32.xlu0 %v9909_v33, %s12564_s29  ;;  %v874_v36 = vld [vmem:[%s9273_s28 + $0xf0] sm:$0xff] }
 0x1a5   : > { %2105 = vrot.lane.b32.xlu1 %v9923_v41, %s12564_s29  ;;  %963 = vst.msk [vmem:[#allocation2 + $0x181] sm:$0xff] %vm876_vm0, %v874_v36 }
 0x1a6   : > { %v1514_v19 = vpop.permute.xlu0 %1513 }
 0x1a7   : > { %v1705_v20 = vpop.permute.xlu1 %1704  ;;  %1593 = vst.msk [vmem:[#allocation3 + $0x88] sm:$0xff] %vm1575_vm5, %v1514_v19 }
 0x1a8   : > { %1785 = vst.msk [vmem:[#allocation3 + $0x80] sm:$0xff] %vm1768_vm6, %v1705_v20  ;;  %2296 = vrot.lane.b32.xlu0 %v10031_v17, %s12521_s2 }
 0x1a9   : > { %2298 = vrot.lane.b32.xlu1 %v10033_v18, %s12521_s2  ;;  %s12569_s2 = smov 20  }
 0x1aa   : > { %v2283_v37 = vpop.permute.xlu0 %2282 }
 0x1ab   : > { %v2474_v22 = vpop.permute.xlu1 %2473  ;;  %2364 = vst.msk [vmem:[#allocation3 + $0x78] sm:$0xff] %vm2348_vm9, %v2283_v37 }
 0x1ac   : > { %2556 = vst.msk [vmem:[#allocation3 + $0x70] sm:$0xff] %vm2541_vm10, %v2474_v22  ;;  %2489 = vrot.lane.b32.xlu0 %v10041_v21, %s12527_s11 }
 0x1ad   : > { %1141 = vrot.lane.b32.xlu1 %v9961_v56, %s8991_s10 }
 0x1ae   : > { %v1130_v25 = vpop.permute.xlu0 %1129 }
 0x1af   : > { %v1707_v26 = vpop.permute.xlu1 %1706  ;;  %1208 = vst.msk [vmem:[#allocation3 + $0x90] sm:$0xff] %vm1189_vm3, %v1130_v25  ;;  %v8587_v27 = vpop.f32.mrb[0].mxu0 }
 0x1b0   : > { %1786 = vst.msk [vmem:[#allocation3 + $0x88] sm:$0xff] %vm1768_vm6, %v1707_v26  ;;  %v2945_v28 = vmul.f32 %v8587_v27, %v10052_v23  ;;  %v2778_v29 = vpop.f32.mrb[1].mxu0  ;;  %2491 = vrot.lane.b32.xlu0 %v10054_v24, %s12527_s11  ;;  %v10201_v26 = vld [vmem:[#allocation2 + $0x171] sm:$0xff]  ;;  %v10203_v27 = vld [vmem:[#allocation2 + $0x169] sm:$0xff] }
 0x1b1   : > { %1143 = vrot.lane.b32.xlu1 %v9963_v4, %s8991_s10  ;;  %v2944_v30 = vmul.f32 %v10052_v23, %v2778_v29  ;;  %v10125_v4 = vld [vmem:[#allocation2 + $0x151] sm:$0xff] }
 0x1b2   : > { %v1898_v31 = vpop.permute.xlu0 %1897  ;;  %v2984_v34 = vadd.f32 %v10061_v55, %v2945_v28 }
 0x1b3   : > { %v2476_v32 = vpop.permute.xlu1 %2475  ;;  %v2588_v58 = vld [vmem:[#allocation3 + $0x70] sm:$0xff]  ;;  %1978 = vst.msk [vmem:[#allocation3 + $0x80] sm:$0xff] %vm1961_vm7, %v1898_v31  ;;  %v2983_v38 = vadd.f32 %v10061_v55, %v2944_v30  ;;  %v10212_v31 = vld [vmem:[#allocation2 + $0x16a] sm:$0xff] }
 0x1b4   : > { %2557 = vst.msk [vmem:[#allocation3 + $0x78] sm:$0xff] %vm2541_vm10, %v2476_v32  ;;  %8606 = vmatprep.mubr.msk.f32.mxu0 %vm2611_vm11, %v2588_v58  ;;  %v3016_v39 = vmax.f32 %v2984_v34, 0.0  ;;  %1334 = vrot.lane.b32.xlu0 %v9971_v59, %s12563_s0 }
 0x1b5   : > { %1336 = vrot.lane.b32.xlu1 %v9979_v63, %s12563_s0  ;;  %v3015_v40 = vmax.f32 %v2983_v38, 0.0  ;;  %v10221_v38 = vld [vmem:[#allocation2 + $0x172] sm:$0xff] }
 0x1b6   : > { %3105 = vst.msk [vmem:[#allocation4 + $0x21] sm:$0xff] %vm3047_vm12, %v3016_v39  ;;  %v1132_v42 = vpop.permute.xlu0 %1131 }
 0x1b7   : > { %v1323_v43 = vpop.permute.xlu1 %1322  ;;  %3104 = vst.msk [vmem:[#allocation4 + $0x19] sm:$0xff] %vm3047_vm12, %v3015_v40 }
 0x1b8   : > { %1209 = vst.msk [vmem:[#allocation3 + $0x98] sm:$0xff] %vm1189_vm3, %v1132_v42  ;;  %1527 = vrot.lane.b32.xlu0 %v9909_v33, %s12565_s3 }
 0x1b9   : > { %1401 = vst.msk [vmem:[#allocation3 + $0x90] sm:$0xff] %vm1382_vm4, %v1323_v43  ;;  %1529 = vrot.lane.b32.xlu1 %v9923_v41, %s12565_s3  ;;  %v10099_v41 = vld [vmem:[#allocation2 + $0x168] sm:$0xff] }
 0x1ba   : > { %v1900_v46 = vpop.permute.xlu0 %1899  ;;  %1027 = vst.msk [vmem:[#allocation3 + $0xf0] sm:$0xff] %vm876_vm0, %v10099_v41 }
 0x1bb   : > { %v2589_v48 = vld [vmem:[#allocation3 + $0x78] sm:$0xff]  ;;  %v2092_v49 = vpop.permute.xlu1 %2091  ;;  %1979 = vst.msk [vmem:[#allocation3 + $0x88] sm:$0xff] %vm1961_vm7, %v1900_v46 }
 0x1bc   : > { %8607 = vmatmul.mubr.msk.f32.gmra.mrb[14].mxu0 %vm2611_vm11, %v2589_v48  ;;  %2172 = vst.msk [vmem:[#allocation3 + $0x80] sm:$0xff] %vm2155_vm8, %v2092_v49  ;;  %1720 = vrot.lane.b32.xlu0 %v10031_v17, %s12568_s6 }
 0x1bd   : > { %1722 = vrot.lane.b32.xlu1 %v10033_v18, %s12568_s6 }
 0x1be   : > { %v1325_v51 = vpop.permute.xlu0 %1324  ;;  %v10101_v61 = vld [vmem:[#allocation4 + $0x20] sm:$0xff]  ;;  %v10105_v2 = vld [vmem:[#allocation4 + $0x18] sm:$0xff] }
 0x1bf   : > { %v1516_v33 = vpop.permute.xlu1 %1515  ;;  %1402 = vst.msk [vmem:[#allocation3 + $0x98] sm:$0xff] %vm1382_vm4, %v1325_v51 }
 0x1c0   : > { %1594 = vst.msk [vmem:[#allocation3 + $0x90] sm:$0xff] %vm1575_vm5, %v1516_v33  ;;  %1913 = vrot.lane.b32.xlu0 %v10041_v21, %s12569_s2 }
 0x1c1   : > { %3171 = vst.msk [vmem:[#allocation5 + $0x18] sm:$0xff] %vm3047_vm12, %v10101_v61  ;;  %1915 = vrot.lane.b32.xlu1 %v10054_v24, %s12569_s2  ;;  %3170 = vst.msk [vmem:[#allocation5 + $0x10] sm:$0xff] %vm3047_vm12, %v10105_v2 }
 0x1c2   : > { %v2094_v54 = vpop.permute.xlu0 %2093 }
 0x1c3   : > { %v2285_v56 = vpop.permute.xlu1 %2284  ;;  %2173 = vst.msk [vmem:[#allocation3 + $0x88] sm:$0xff] %vm2155_vm8, %v2094_v54 }
 0x1c4   : > { %2365 = vst.msk [vmem:[#allocation3 + $0x80] sm:$0xff] %vm2348_vm9, %v2285_v56  ;;  %2107 = vrot.lane.b32.xlu0 %v10011_v15, %s12564_s29 }
 0x1c5   : > { %2109 = vrot.lane.b32.xlu1 %v10013_v52, %s12564_s29 }
 0x1c6   : > { %v1518_v11 = vpop.permute.xlu0 %1517 }
 0x1c7   : > { %v1709_v59 = vpop.permute.xlu1 %1708  ;;  %1595 = vst.msk [vmem:[#allocation3 + $0x98] sm:$0xff] %vm1575_vm5, %v1518_v11 }
 0x1c8   : > { %1787 = vst.msk [vmem:[#allocation3 + $0x90] sm:$0xff] %vm1768_vm6, %v1709_v59  ;;  %2300 = vrot.lane.b32.xlu0 %v10125_v4, %s12570_s8 }
 0x1c9   : > { %2302 = vrot.lane.b32.xlu1 %v10127_v57, %s12570_s8 }
 0x1ca   : > { %v2287_v62 = vpop.permute.xlu0 %2286 }
 0x1cb   : > { %v2478_v63 = vpop.permute.xlu1 %2477  ;;  %2366 = vst.msk [vmem:[#allocation3 + $0x88] sm:$0xff] %vm2348_vm9, %v2287_v62 }
 0x1cc   : > { %2558 = vst.msk [vmem:[#allocation3 + $0x80] sm:$0xff] %vm2541_vm10, %v2478_v63  ;;  %2493 = vrot.lane.b32.xlu0 %v10135_v60, %s12527_s11  ;;  %v2023_v63 = vld [vmem:[#allocation2 + $0x180] sm:$0xff] }
 0x1cd   : > { %1145 = vrot.lane.b32.xlu1 %v10031_v17, %s8991_s10 }
 0x1ce   : > { %v1711_v3 = vpop.permute.xlu0 %1710 }
 0x1cf   : > { %v8590_v5 = vpop.f32.mrb[2].mxu0  ;;  %1788 = vst.msk [vmem:[#allocation3 + $0x98] sm:$0xff] %vm1768_vm6, %v1711_v3  ;;  %v1902_v7 = vpop.permute.xlu1 %1901 }
 0x1d0   : > { %v2947_v6 = vmul.f32 %v8590_v5, %v10052_v23  ;;  %v2788_v47 = vpop.f32.mrb[3].mxu0  ;;  %1980 = vst.msk [vmem:[#allocation3 + $0x90] sm:$0xff] %vm1961_vm7, %v1902_v7  ;;  %2495 = vrot.lane.b32.xlu0 %v10143_v1, %s12527_s11 }
 0x1d1   : > { %v2946_v8 = vmul.f32 %v10052_v23, %v2788_v47  ;;  %1147 = vrot.lane.b32.xlu1 %v10033_v18, %s8991_s10  ;;  %v875_v18 = vld [vmem:[%s9273_s28 + $0xf8] sm:$0xff]  ;;  %s12529_s28 = smov 56  }
 0x1d2   : > { %v2986_v9 = vadd.f32 %v10061_v55, %v2947_v6  ;;  %v2480_v10 = vpop.permute.xlu0 %2479  ;;  %964 = vst.msk [vmem:[#allocation2 + $0x189] sm:$0xff] %vm876_vm0, %v875_v18  ;;  %v2216_v6 = vld [vmem:[#allocation2 + $0x181] sm:$0xff]  ;;  %vm3746_vm0 = vcmask 261312  }
 0x1d3   : > { %v2985_v12 = vadd.f32 %v10061_v55, %v2946_v8  ;;  %v2590_v13 = vld [vmem:[#allocation3 + $0x80] sm:$0xff]  ;;  %2559 = vst.msk [vmem:[#allocation3 + $0x88] sm:$0xff] %vm2541_vm10, %v2480_v10  ;;  %v1904_v14 = vpop.permute.xlu1 %1903 }
 0x1d4   : > { %v3018_v50 = vmax.f32 %v2986_v9, 0.0  ;;  %8609 = vmatprep.mubr.msk.f32.mxu0 %vm2611_vm11, %v2590_v13  ;;  %1981 = vst.msk [vmem:[#allocation3 + $0x98] sm:$0xff] %vm1961_vm7, %v1904_v14  ;;  %1338 = vrot.lane.b32.xlu0 %v10041_v21, %s12563_s0 }
 0x1d5   : > { %v3017_v35 = vmax.f32 %v2985_v12, 0.0  ;;  %1340 = vrot.lane.b32.xlu1 %v10054_v24, %s12563_s0 }
 0x1d6   : > { %3107 = vst.msk [vmem:[#allocation4 + $0x39] sm:$0xff] %vm3047_vm12, %v3018_v50  ;;  %v2096_v16 = vpop.permute.xlu0 %2095 }
 0x1d7   : > { %3106 = vst.msk [vmem:[#allocation4 + $0x31] sm:$0xff] %vm3047_vm12, %v3017_v35  ;;  %v2098_v17 = vpop.permute.xlu1 %2097 }
 0x1d8   : > { %2174 = vst.msk [vmem:[#allocation3 + $0x90] sm:$0xff] %vm2155_vm8, %v2096_v16  ;;  %2175 = vst.msk [vmem:[#allocation3 + $0x98] sm:$0xff] %vm2155_vm8, %v2098_v17  ;;  %1531 = vrot.lane.b32.xlu0 %v10011_v15, %s12565_s3 }
 0x1d9   : > { %1533 = vrot.lane.b32.xlu1 %v10013_v52, %s12565_s3  ;;  %v2024_v62 = vld [vmem:[#allocation2 + $0x188] sm:$0xff] }
 0x1da   : > { %v2591_v19 = vld [vmem:[#allocation3 + $0x88] sm:$0xff]  ;;  %v2289_v20 = vpop.permute.xlu0 %2288  ;;  %v2217_v5 = vld [vmem:[#allocation2 + $0x189] sm:$0xff] }
 0x1db   : > { %8610 = vmatmul.mubr.msk.f32.gmra.mrb[16].mxu0 %vm2611_vm11, %v2591_v19  ;;  %2367 = vst.msk [vmem:[#allocation3 + $0x90] sm:$0xff] %vm2348_vm9, %v2289_v20  ;;  %v2291_v21 = vpop.permute.xlu1 %2290  ;;  %v2409_v9 = vld [vmem:[#allocation2 + $0x182] sm:$0xff]  ;;  %v2410_v50 = vld [vmem:[#allocation2 + $0x18a] sm:$0xff] }
 0x1dc   : > { %2368 = vst.msk [vmem:[#allocation3 + $0x98] sm:$0xff] %vm2348_vm9, %v2291_v21  ;;  %1724 = vrot.lane.b32.xlu0 %v10125_v4, %s12568_s6 }
 0x1dd   : > { %1726 = vrot.lane.b32.xlu1 %v10127_v57, %s12568_s6 }
 0x1de   : > { %v10181_v52 = vld [vmem:[#allocation4 + $0x38] sm:$0xff]  ;;  %v10183_v15 = vld [vmem:[#allocation4 + $0x30] sm:$0xff]  ;;  %v2482_v37 = vpop.permute.xlu0 %2481 }
 0x1df   : > { %3173 = vst.msk [vmem:[#allocation5 + $0x28] sm:$0xff] %vm3047_vm12, %v10181_v52  ;;  %3172 = vst.msk [vmem:[#allocation5 + $0x20] sm:$0xff] %vm3047_vm12, %v10183_v15  ;;  %v1134_v22 = vpop.permute.xlu1 %1133 }
 0x1e0   : > { %2560 = vst.msk [vmem:[#allocation3 + $0x90] sm:$0xff] %vm2541_vm10, %v2482_v37  ;;  %1917 = vrot.lane.b32.xlu0 %v10135_v60, %s12569_s2 }
 0x1e1   : > { %1210 = vst.msk [vmem:[#allocation3 + $0xa0] sm:$0xff] %vm1189_vm3, %v1134_v22  ;;  %1919 = vrot.lane.b32.xlu1 %v10143_v1, %s12569_s2 }
 0x1e2   : > { %v2484_v24 = vpop.permute.xlu0 %2483 }
 0x1e3   : > { %2561 = vst.msk [vmem:[#allocation3 + $0x98] sm:$0xff] %vm2541_vm10, %v2484_v24  ;;  %v1136_v25 = vpop.permute.xlu1 %1135 }
 0x1e4   : > { %1211 = vst.msk [vmem:[#allocation3 + $0xa8] sm:$0xff] %vm1189_vm3, %v1136_v25  ;;  %2111 = vrot.lane.b32.xlu0 %v10099_v41, %s12564_s29 }
 0x1e5   : > { %2113 = vrot.lane.b32.xlu1 %v10097_v53, %s12564_s29 }
 0x1e6   : > { %v1327_v29 = vpop.permute.xlu0 %1326 }
 0x1e7   : > { %v2592_v28 = vld [vmem:[#allocation3 + $0x90] sm:$0xff]  ;;  %1403 = vst.msk [vmem:[#allocation3 + $0xa0] sm:$0xff] %vm1382_vm4, %v1327_v29  ;;  %v1329_v30 = vpop.permute.xlu1 %1328 }
 0x1e8   : > { %8612 = vmatprep.mubr.msk.f32.mxu0 %vm2611_vm11, %v2592_v28  ;;  %1404 = vst.msk [vmem:[#allocation3 + $0xa8] sm:$0xff] %vm1382_vm4, %v1329_v30  ;;  %2304 = vrot.lane.b32.xlu0 %v10203_v27, %s12570_s8 }
 0x1e9   : > { %2306 = vrot.lane.b32.xlu1 %v10201_v26, %s12570_s8 }
 0x1ea   : > { %v2593_v32 = vld [vmem:[#allocation3 + $0x98] sm:$0xff]  ;;  %v1520_v34 = vpop.permute.xlu0 %1519 }
 0x1eb   : > { %8613 = vmatmul.mubr.msk.f32.gmra.mrb[18].mxu0 %vm2611_vm11, %v2593_v32  ;;  %1596 = vst.msk [vmem:[#allocation3 + $0xa0] sm:$0xff] %vm1575_vm5, %v1520_v34  ;;  %v1522_v58 = vpop.permute.xlu1 %1521  ;;  %v2026_v34 = vld [vmem:[#allocation2 + $0x1a0] sm:$0xff] }
 0x1ec   : > { %1597 = vst.msk [vmem:[#allocation3 + $0xa8] sm:$0xff] %vm1575_vm5, %v1522_v58  ;;  %2497 = vrot.lane.b32.xlu0 %v10212_v31, %s12527_s11  ;;  %v2025_v58 = vld [vmem:[#allocation2 + $0x198] sm:$0xff] }
 0x1ed   : > { %1149 = vrot.lane.b32.xlu1 %v10125_v4, %s8991_s10 }
 0x1ee   : > { %v1713_v40 = vpop.permute.xlu0 %1712 }
 0x1ef   : > { %v8593_v39 = vpop.f32.mrb[4].mxu0  ;;  %1789 = vst.msk [vmem:[#allocation3 + $0xa0] sm:$0xff] %vm1768_vm6, %v1713_v40  ;;  %v1715_v44 = vpop.permute.xlu1 %1714  ;;  %v2219_v40 = vld [vmem:[#allocation2 + $0x1a1] sm:$0xff] }
 0x1f0   : > { %v2949_v42 = vmul.f32 %v8593_v39, %v10052_v23  ;;  %v2798_v43 = vpop.f32.mrb[5].mxu0  ;;  %1790 = vst.msk [vmem:[#allocation3 + $0xa8] sm:$0xff] %vm1768_vm6, %v1715_v44  ;;  %2499 = vrot.lane.b32.xlu0 %v10221_v38, %s12527_s11 }
 0x1f1   : > { %v2948_v45 = vmul.f32 %v10052_v23, %v2798_v43  ;;  %1151 = vrot.lane.b32.xlu1 %v10127_v57, %s8991_s10 }
 0x1f2   : > { %v2988_v46 = vadd.f32 %v10061_v55, %v2949_v42  ;;  %v1906_v49 = vpop.permute.xlu0 %1905  ;;  %v2218_v42 = vld [vmem:[#allocation2 + $0x199] sm:$0xff] }
 0x1f3   : > { %v2987_v48 = vadd.f32 %v10061_v55, %v2948_v45  ;;  %1982 = vst.msk [vmem:[#allocation3 + $0xa0] sm:$0xff] %vm1961_vm7, %v1906_v49  ;;  %v1908_v33 = vpop.permute.xlu1 %1907 }
 0x1f4   : > { %v3020_v51 = vmax.f32 %v2988_v46, 0.0  ;;  %1983 = vst.msk [vmem:[#allocation3 + $0xa8] sm:$0xff] %vm1961_vm7, %v1908_v33  ;;  %1342 = vrot.lane.b32.xlu0 %v10135_v60, %s12563_s0  ;;  %v2412_v46 = vld [vmem:[#allocation2 + $0x1a2] sm:$0xff] }
 0x1f5   : > { %v3019_v54 = vmax.f32 %v2987_v48, 0.0  ;;  %1344 = vrot.lane.b32.xlu1 %v10143_v1, %s12563_s0  ;;  %v2411_v48 = vld [vmem:[#allocation2 + $0x19a] sm:$0xff] }
 0x1f6   : > { %3109 = vst.msk [vmem:[#allocation4 + $0x51] sm:$0xff] %vm3047_vm12, %v3020_v51  ;;  %v2100_v56 = vpop.permute.xlu0 %2099 }
 0x1f7   : > { %3108 = vst.msk [vmem:[#allocation4 + $0x49] sm:$0xff] %vm3047_vm12, %v3019_v54  ;;  %v2102_v4 = vpop.permute.xlu1 %2101 }
 0x1f8   : > { %2176 = vst.msk [vmem:[#allocation3 + $0xa0] sm:$0xff] %vm2155_vm8, %v2100_v56  ;;  %2177 = vst.msk [vmem:[#allocation3 + $0xa8] sm:$0xff] %vm2155_vm8, %v2102_v4  ;;  %1535 = vrot.lane.b32.xlu0 %v10099_v41, %s12565_s3 }
 0x1f9   : > { %1537 = vrot.lane.b32.xlu1 %v10097_v53, %s12565_s3 }
 0x1fa   : > { %v2293_v57 = vpop.permute.xlu0 %2292 }
 0x1fb   : > { %2369 = vst.msk [vmem:[#allocation3 + $0xa0] sm:$0xff] %vm2348_vm9, %v2293_v57  ;;  %v2295_v11 = vpop.permute.xlu1 %2294 }
 0x1fc   : > { %2370 = vst.msk [vmem:[#allocation3 + $0xa8] sm:$0xff] %vm2348_vm9, %v2295_v11  ;;  %1728 = vrot.lane.b32.xlu0 %v10203_v27, %s12568_s6 }
 0x1fd   : > { %1730 = vrot.lane.b32.xlu1 %v10201_v26, %s12568_s6 }
 0x1fe   : > { %v10253_v59 = vld [vmem:[#allocation4 + $0x50] sm:$0xff]  ;;  %v10255_v60 = vld [vmem:[#allocation4 + $0x48] sm:$0xff]  ;;  %v2486_v53 = vpop.permute.xlu0 %2485 }
 0x1ff   : > { %3175 = vst.msk [vmem:[#allocation5 + $0x38] sm:$0xff] %vm3047_vm12, %v10253_v59  ;;  %3174 = vst.msk [vmem:[#allocation5 + $0x30] sm:$0xff] %vm3047_vm12, %v10255_v60  ;;  %v1138_v41 = vpop.permute.xlu1 %1137 }
 0x200   : > { %2562 = vst.msk [vmem:[#allocation3 + $0xa0] sm:$0xff] %vm2541_vm10, %v2486_v53  ;;  %1921 = vrot.lane.b32.xlu0 %v10212_v31, %s12569_s2 }
 0x201   : > { %1212 = vst.msk [vmem:[#allocation3 + $0xb0] sm:$0xff] %vm1189_vm3, %v1138_v41  ;;  %1923 = vrot.lane.b32.xlu1 %v10221_v38, %s12569_s2 }
 0x202   : > { %v2488_v1 = vpop.permute.xlu0 %2487 }
 0x203   : > { %2563 = vst.msk [vmem:[#allocation3 + $0xa8] sm:$0xff] %vm2541_vm10, %v2488_v1  ;;  %v1140_v3 = vpop.permute.xlu1 %1139 }
 0x204   : > { %1213 = vst.msk [vmem:[#allocation3 + $0xb8] sm:$0xff] %vm1189_vm3, %v1140_v3  ;;  %2115 = vrot.lane.b32.xlu0 %v2023_v63, %s12564_s29 }
 0x205   : > { %2117 = vrot.lane.b32.xlu1 %v2024_v62, %s12564_s29 }
 0x206   : > { %v1331_v7 = vpop.permute.xlu0 %1330 }
 0x207   : > { %v2594_v47 = vld [vmem:[#allocation3 + $0xa0] sm:$0xff]  ;;  %1405 = vst.msk [vmem:[#allocation3 + $0xb0] sm:$0xff] %vm1382_vm4, %v1331_v7  ;;  %v1333_v8 = vpop.permute.xlu1 %1332 }
 0x208   : > { %8615 = vmatprep.mubr.msk.f32.mxu0 %vm2611_vm11, %v2594_v47  ;;  %1406 = vst.msk [vmem:[#allocation3 + $0xb8] sm:$0xff] %vm1382_vm4, %v1333_v8  ;;  %2308 = vrot.lane.b32.xlu0 %v2216_v6, %s12570_s8 }
 0x209   : > { %2310 = vrot.lane.b32.xlu1 %v2217_v5, %s12570_s8 }
 0x20a   : > { %v2595_v10 = vld [vmem:[#allocation3 + $0xa8] sm:$0xff]  ;;  %v1524_v12 = vpop.permute.xlu0 %1523 }
 0x20b   : > { %8616 = vmatmul.mubr.msk.f32.gmra.mrb[20].mxu0 %vm2611_vm11, %v2595_v10  ;;  %1598 = vst.msk [vmem:[#allocation3 + $0xb0] sm:$0xff] %vm1575_vm5, %v1524_v12  ;;  %v1526_v13 = vpop.permute.xlu1 %1525 }
 0x20c   : > { %1599 = vst.msk [vmem:[#allocation3 + $0xb8] sm:$0xff] %vm1575_vm5, %v1526_v13  ;;  %2501 = vrot.lane.b32.xlu0 %v2409_v9, %s12527_s11 }
 0x20d   : > { %1153 = vrot.lane.b32.xlu1 %v10203_v27, %s8991_s10 }
 0x20e   : > { %v1717_v35 = vpop.permute.xlu0 %1716 }
 0x20f   : > { %v8596_v14 = vpop.f32.mrb[6].mxu0  ;;  %1791 = vst.msk [vmem:[#allocation3 + $0xb0] sm:$0xff] %vm1768_vm6, %v1717_v35  ;;  %v1719_v17 = vpop.permute.xlu1 %1718 }
 0x210   : > { %v2951_v16 = vmul.f32 %v8596_v14, %v10052_v23  ;;  %v2808_v36 = vpop.f32.mrb[7].mxu0  ;;  %1792 = vst.msk [vmem:[#allocation3 + $0xb8] sm:$0xff] %vm1768_vm6, %v1719_v17  ;;  %2503 = vrot.lane.b32.xlu0 %v2410_v50, %s12527_s11 }
 0x211   : > { %v2950_v18 = vmul.f32 %v10052_v23, %v2808_v36  ;;  %1155 = vrot.lane.b32.xlu1 %v10201_v26, %s8991_s10  ;;  %s12535_s10 = smov 64  }
 0x212   : > { %v2990_v19 = vadd.f32 %v10061_v55, %v2951_v16  ;;  %v1910_v21 = vpop.permute.xlu0 %1909 }
 0x213   : > { %v2989_v20 = vadd.f32 %v10061_v55, %v2950_v18  ;;  %1984 = vst.msk [vmem:[#allocation3 + $0xb0] sm:$0xff] %vm1961_vm7, %v1910_v21  ;;  %v1912_v22 = vpop.permute.xlu1 %1911 }
 0x214   : > { %v3022_v37 = vmax.f32 %v2990_v19, 0.0  ;;  %1985 = vst.msk [vmem:[#allocation3 + $0xb8] sm:$0xff] %vm1961_vm7, %v1912_v22  ;;  %1346 = vrot.lane.b32.xlu0 %v10212_v31, %s12563_s0 }
 0x215   : > { %v3021_v24 = vmax.f32 %v2989_v20, 0.0  ;;  %1348 = vrot.lane.b32.xlu1 %v10221_v38, %s12563_s0 }
 0x216   : > { %3111 = vst.msk [vmem:[#allocation4 + $0x69] sm:$0xff] %vm3047_vm12, %v3022_v37  ;;  %v2104_v25 = vpop.permute.xlu0 %2103 }
 0x217   : > { %3110 = vst.msk [vmem:[#allocation4 + $0x61] sm:$0xff] %vm3047_vm12, %v3021_v24  ;;  %v2106_v26 = vpop.permute.xlu1 %2105 }
 0x218   : > { %2178 = vst.msk [vmem:[#allocation3 + $0xb0] sm:$0xff] %vm2155_vm8, %v2104_v25  ;;  %2179 = vst.msk [vmem:[#allocation3 + $0xb8] sm:$0xff] %vm2155_vm8, %v2106_v26  ;;  %1539 = vrot.lane.b32.xlu0 %v2023_v63, %s12565_s3 }
 0x219   : > { %1541 = vrot.lane.b32.xlu1 %v2024_v62, %s12565_s3  ;;  %s12584_s3 = smov 64  }
 0x21a   : > { %v2297_v27 = vpop.permute.xlu0 %2296 }
 0x21b   : > { %2371 = vst.msk [vmem:[#allocation3 + $0xb0] sm:$0xff] %vm2348_vm9, %v2297_v27  ;;  %v2299_v28 = vpop.permute.xlu1 %2298 }
 0x21c   : > { %2372 = vst.msk [vmem:[#allocation3 + $0xb8] sm:$0xff] %vm2348_vm9, %v2299_v28  ;;  %1732 = vrot.lane.b32.xlu0 %v2216_v6, %s12568_s6 }
 0x21d   : > { %1734 = vrot.lane.b32.xlu1 %v2217_v5, %s12568_s6 }
 0x21e   : > { %v10307_v29 = vld [vmem:[#allocation4 + $0x68] sm:$0xff]  ;;  %v10309_v30 = vld [vmem:[#allocation4 + $0x60] sm:$0xff]  ;;  %v2490_v31 = vpop.permute.xlu0 %2489 }
 0x21f   : > { %3177 = vst.msk [vmem:[#allocation5 + $0x48] sm:$0xff] %vm3047_vm12, %v10307_v29  ;;  %3176 = vst.msk [vmem:[#allocation5 + $0x40] sm:$0xff] %vm3047_vm12, %v10309_v30  ;;  %v1142_v32 = vpop.permute.xlu1 %1141 }
 0x220   : > { %2564 = vst.msk [vmem:[#allocation3 + $0xb0] sm:$0xff] %vm2541_vm10, %v2490_v31  ;;  %1925 = vrot.lane.b32.xlu0 %v2409_v9, %s12569_s2 }
 0x221   : > { %1214 = vst.msk [vmem:[#allocation3 + $0xc0] sm:$0xff] %vm1189_vm3, %v1142_v32  ;;  %1927 = vrot.lane.b32.xlu1 %v2410_v50, %s12569_s2  ;;  %s12531_s2 = smov 40  }
 0x222   : > { %v2492_v38 = vpop.permute.xlu0 %2491 }
 0x223   : > { %2565 = vst.msk [vmem:[#allocation3 + $0xb8] sm:$0xff] %vm2541_vm10, %v2492_v38  ;;  %v1144_v39 = vpop.permute.xlu1 %1143 }
 0x224   : > { %1215 = vst.msk [vmem:[#allocation3 + $0xc8] sm:$0xff] %vm1189_vm3, %v1144_v39  ;;  %2119 = vrot.lane.b32.xlu0 %v2025_v58, %s12564_s29 }
 0x225   : > { %2121 = vrot.lane.b32.xlu1 %v2026_v34, %s12564_s29 }
 0x226   : > { %v1335_v44 = vpop.permute.xlu0 %1334 }
 0x227   : > { %v2596_v43 = vld [vmem:[#allocation3 + $0xb0] sm:$0xff]  ;;  %1407 = vst.msk [vmem:[#allocation3 + $0xc0] sm:$0xff] %vm1382_vm4, %v1335_v44  ;;  %v1337_v45 = vpop.permute.xlu1 %1336 }
 0x228   : > { %8618 = vmatprep.mubr.msk.f32.mxu0 %vm2611_vm11, %v2596_v43  ;;  %1408 = vst.msk [vmem:[#allocation3 + $0xc8] sm:$0xff] %vm1382_vm4, %v1337_v45  ;;  %2312 = vrot.lane.b32.xlu0 %v2218_v42, %s12570_s8 }
 0x229   : > { %2314 = vrot.lane.b32.xlu1 %v2219_v40, %s12570_s8  ;;  %s12533_s8 = smov 48  }
 0x22a   : > { %v2597_v49 = vld [vmem:[#allocation3 + $0xb8] sm:$0xff]  ;;  %v1528_v51 = vpop.permute.xlu0 %1527 }
 0x22b   : > { %8619 = vmatmul.mubr.msk.f32.gmra.mrb[22].mxu0 %vm2611_vm11, %v2597_v49  ;;  %1600 = vst.msk [vmem:[#allocation3 + $0xc0] sm:$0xff] %vm1575_vm5, %v1528_v51  ;;  %v1530_v33 = vpop.permute.xlu1 %1529 }
 0x22c   : > { %1601 = vst.msk [vmem:[#allocation3 + $0xc8] sm:$0xff] %vm1575_vm5, %v1530_v33  ;;  %2505 = vrot.lane.b32.xlu0 %v2411_v48, %s12527_s11 }
 0x22d   : > { %2507 = vrot.lane.b32.xlu1 %v2412_v46, %s12527_s11 }
 0x22e   : > { %v1721_v56 = vpop.permute.xlu0 %1720 }
 0x22f   : > { %v8599_v54 = vpop.f32.mrb[8].mxu0  ;;  %1793 = vst.msk [vmem:[#allocation3 + $0xc0] sm:$0xff] %vm1768_vm6, %v1721_v56  ;;  %v1723_v11 = vpop.permute.xlu1 %1722 }
 0x230   : > { %v2953_v4 = vmul.f32 %v8599_v54, %v10052_v23  ;;  %v2818_v57 = vpop.f32.mrb[9].mxu0  ;;  %1794 = vst.msk [vmem:[#allocation3 + $0xc8] sm:$0xff] %vm1768_vm6, %v1723_v11 }
 0x231   : > { %v2952_v53 = vmul.f32 %v10052_v23, %v2818_v57 }
 0x232   : > { %v2992_v41 = vadd.f32 %v10061_v55, %v2953_v4  ;;  %v1914_v63 = vpop.permute.xlu0 %1913 }
 0x233   : > { %v2991_v62 = vadd.f32 %v10061_v55, %v2952_v53  ;;  %1986 = vst.msk [vmem:[#allocation3 + $0xc0] sm:$0xff] %vm1961_vm7, %v1914_v63  ;;  %v1916_v3 = vpop.permute.xlu1 %1915 }
 0x234   : > { %v3024_v1 = vmax.f32 %v2992_v41, 0.0  ;;  %1987 = vst.msk [vmem:[#allocation3 + $0xc8] sm:$0xff] %vm1961_vm7, %v1916_v3 }
 0x235   : > { %v3023_v5 = vmax.f32 %v2991_v62, 0.0 }
 0x236   : > { %3113 = vst.msk [vmem:[#allocation4 + $0x81] sm:$0xff] %vm3047_vm12, %v3024_v1  ;;  %v2108_v6 = vpop.permute.xlu0 %2107 }
 0x237   : > { %3112 = vst.msk [vmem:[#allocation4 + $0x79] sm:$0xff] %vm3047_vm12, %v3023_v5  ;;  %v2110_v47 = vpop.permute.xlu1 %2109 }
 0x238   : > { %2180 = vst.msk [vmem:[#allocation3 + $0xc0] sm:$0xff] %vm2155_vm8, %v2108_v6  ;;  %2181 = vst.msk [vmem:[#allocation3 + $0xc8] sm:$0xff] %vm2155_vm8, %v2110_v47 }
 0x23a   : > { %v2301_v7 = vpop.permute.xlu0 %2300 }
 0x23b   : > { %2373 = vst.msk [vmem:[#allocation3 + $0xc0] sm:$0xff] %vm2348_vm9, %v2301_v7  ;;  %v2303_v8 = vpop.permute.xlu1 %2302 }
 0x23c   : > { %2374 = vst.msk [vmem:[#allocation3 + $0xc8] sm:$0xff] %vm2348_vm9, %v2303_v8 }
 0x23e   : > { %v10347_v9 = vld [vmem:[#allocation4 + $0x80] sm:$0xff]  ;;  %v10349_v10 = vld [vmem:[#allocation4 + $0x78] sm:$0xff]  ;;  %v2494_v12 = vpop.permute.xlu0 %2493 }
 0x23f   : > { %3179 = vst.msk [vmem:[#allocation5 + $0x58] sm:$0xff] %vm3047_vm12, %v10347_v9  ;;  %3178 = vst.msk [vmem:[#allocation5 + $0x50] sm:$0xff] %vm3047_vm12, %v10349_v10  ;;  %v1146_v13 = vpop.permute.xlu1 %1145 }
 0x240   : > { %2566 = vst.msk [vmem:[#allocation3 + $0xc0] sm:$0xff] %vm2541_vm10, %v2494_v12 }
 0x241   : > { %1216 = vst.msk [vmem:[#allocation3 + $0xd0] sm:$0xff] %vm1189_vm3, %v1146_v13 }
 0x242   : > { %v2496_v50 = vpop.permute.xlu0 %2495 }
 0x243   : > { %2567 = vst.msk [vmem:[#allocation3 + $0xc8] sm:$0xff] %vm2541_vm10, %v2496_v50  ;;  %v1148_v14 = vpop.permute.xlu1 %1147 }
 0x244   : > { %1217 = vst.msk [vmem:[#allocation3 + $0xd8] sm:$0xff] %vm1189_vm3, %v1148_v14 }
 0x246   : > { %v1339_v16 = vpop.permute.xlu0 %1338 }
 0x247   : > { %v2598_v35 = vld [vmem:[#allocation3 + $0xc0] sm:$0xff]  ;;  %v1341_v36 = vpop.permute.xlu1 %1340  ;;  %1409 = vst.msk [vmem:[#allocation3 + $0xd0] sm:$0xff] %vm1382_vm4, %v1339_v16 }
 0x248   : > { %8621 = vmatprep.mubr.msk.f32.mxu0 %vm2611_vm11, %v2598_v35  ;;  %1410 = vst.msk [vmem:[#allocation3 + $0xd8] sm:$0xff] %vm1382_vm4, %v1341_v36 }
 0x24a   : > { %v2599_v17 = vld [vmem:[#allocation3 + $0xc8] sm:$0xff]  ;;  %v1532_v18 = vpop.permute.xlu0 %1531 }
 0x24b   : > { %8622 = vmatmul.mubr.msk.f32.gmra.mrb[24].mxu0 %vm2611_vm11, %v2599_v17  ;;  %v1534_v19 = vpop.permute.xlu1 %1533  ;;  %1602 = vst.msk [vmem:[#allocation3 + $0xd0] sm:$0xff] %vm1575_vm5, %v1532_v18 }
 0x24c   : > { %1603 = vst.msk [vmem:[#allocation3 + $0xd8] sm:$0xff] %vm1575_vm5, %v1534_v19 }
 0x24e   : > { %v1725_v21 = vpop.permute.xlu0 %1724 }
 0x24f   : > { %v8602_v20 = vpop.f32.mrb[10].mxu0  ;;  %v1727_v24 = vpop.permute.xlu1 %1726  ;;  %1795 = vst.msk [vmem:[#allocation3 + $0xd0] sm:$0xff] %vm1768_vm6, %v1725_v21 }
 0x250   : > { %v2955_v37 = vmul.f32 %v8602_v20, %v10052_v23  ;;  %v2828_v22 = vpop.f32.mrb[11].mxu0  ;;  %1796 = vst.msk [vmem:[#allocation3 + $0xd8] sm:$0xff] %vm1768_vm6, %v1727_v24 }
 0x251   : > { %v2954_v25 = vmul.f32 %v10052_v23, %v2828_v22 }
 0x252   : > { %v2994_v26 = vadd.f32 %v10061_v55, %v2955_v37  ;;  %v1918_v28 = vpop.permute.xlu0 %1917 }
 0x253   : > { %v2993_v27 = vadd.f32 %v10061_v55, %v2954_v25  ;;  %v1920_v32 = vpop.permute.xlu1 %1919  ;;  %1988 = vst.msk [vmem:[#allocation3 + $0xd0] sm:$0xff] %vm1961_vm7, %v1918_v28 }
 0x254   : > { %v3026_v31 = vmax.f32 %v2994_v26, 0.0  ;;  %1989 = vst.msk [vmem:[#allocation3 + $0xd8] sm:$0xff] %vm1961_vm7, %v1920_v32 }
 0x255   : > { %v3025_v34 = vmax.f32 %v2993_v27, 0.0 }
 0x256   : > { %3115 = vst.msk [vmem:[#allocation4 + $0x99] sm:$0xff] %vm3047_vm12, %v3026_v31  ;;  %v2112_v58 = vpop.permute.xlu0 %2111 }
 0x257   : > { %3114 = vst.msk [vmem:[#allocation4 + $0x91] sm:$0xff] %vm3047_vm12, %v3025_v34  ;;  %v2114_v38 = vpop.permute.xlu1 %2113 }
 0x258   : > { %2182 = vst.msk [vmem:[#allocation3 + $0xd0] sm:$0xff] %vm2155_vm8, %v2112_v58  ;;  %2183 = vst.msk [vmem:[#allocation3 + $0xd8] sm:$0xff] %vm2155_vm8, %v2114_v38 }
 0x25a   : > { %v2305_v39 = vpop.permute.xlu0 %2304 }
 0x25b   : > { %v2307_v40 = vpop.permute.xlu1 %2306  ;;  %2375 = vst.msk [vmem:[#allocation3 + $0xd0] sm:$0xff] %vm2348_vm9, %v2305_v39  ;;  %v3137_v39 = vld [vmem:[#allocation4 + $0x8] sm:$0xff] }
 0x25c   : > { %2376 = vst.msk [vmem:[#allocation3 + $0xd8] sm:$0xff] %vm2348_vm9, %v2307_v40 }
 0x25d   : > { %3169 = vst.msk [vmem:[#allocation5 + $0x8] sm:$0xff] %vm3047_vm12, %v3137_v39  ;;  %v3973_v39 = vld [vmem:[#allocation4 + $0x22] sm:$0xff] }
 0x25e   : > { %v10379_v42 = vld [vmem:[#allocation4 + $0x98] sm:$0xff]  ;;  %v10381_v43 = vld [vmem:[#allocation4 + $0x90] sm:$0xff]  ;;  %v2498_v44 = vpop.permute.xlu0 %2497 }
 0x25f   : > { %3181 = vst.msk [vmem:[#allocation5 + $0x68] sm:$0xff] %vm3047_vm12, %v10379_v42  ;;  %3180 = vst.msk [vmem:[#allocation5 + $0x60] sm:$0xff] %vm3047_vm12, %v10381_v43  ;;  %v1150_v45 = vpop.permute.xlu1 %1149 }
 0x260   : > { %2568 = vst.msk [vmem:[#allocation3 + $0xd0] sm:$0xff] %vm2541_vm10, %v2498_v44 }
 0x261   : > { %1218 = vst.msk [vmem:[#allocation3 + $0xe0] sm:$0xff] %vm1189_vm3, %v1150_v45 }
 0x262   : > { %v2500_v46 = vpop.permute.xlu0 %2499 }
 0x263   : > { %v1152_v48 = vpop.permute.xlu1 %1151  ;;  %2569 = vst.msk [vmem:[#allocation3 + $0xd8] sm:$0xff] %vm2541_vm10, %v2500_v46  ;;  %v3136_v46 = vld [vmem:[#allocation4] sm:$0xff] }
 0x264   : > { %1219 = vst.msk [vmem:[#allocation3 + $0xe8] sm:$0xff] %vm1189_vm3, %v1152_v48 }
 0x265   : > { %3168 = vst.msk [vmem:[#allocation5] sm:$0xff] %vm3047_vm12, %v3136_v46 }
 0x266   : > { %v1343_v49 = vpop.permute.xlu0 %1342 }
 0x267   : > { %v2600_v51 = vld [vmem:[#allocation3 + $0xd0] sm:$0xff]  ;;  %v1345_v33 = vpop.permute.xlu1 %1344  ;;  %1411 = vst.msk [vmem:[#allocation3 + $0xe0] sm:$0xff] %vm1382_vm4, %v1343_v49 }
 0x268   : > { %8624 = vmatprep.mubr.msk.f32.mxu0 %vm2611_vm11, %v2600_v51  ;;  %1412 = vst.msk [vmem:[#allocation3 + $0xe8] sm:$0xff] %vm1382_vm4, %v1345_v33 }
 0x26a   : > { %v1536_v54 = vpop.permute.xlu0 %1535  ;;  %v2601_v56 = vld [vmem:[#allocation3 + $0xd8] sm:$0xff] }
 0x26b   : > { %v1538_v4 = vpop.permute.xlu1 %1537  ;;  %1604 = vst.msk [vmem:[#allocation3 + $0xe0] sm:$0xff] %vm1575_vm5, %v1536_v54  ;;  %8625 = vmatmul.mubr.msk.f32.gmra.mrb[26].mxu0 %vm2611_vm11, %v2601_v56 }
 0x26c   : > { %1605 = vst.msk [vmem:[#allocation3 + $0xe8] sm:$0xff] %vm1575_vm5, %v1538_v4  ;;  %v3201_v4 = vld [vmem:[#allocation4 + $0x9] sm:$0xff] }
 0x26e   : > { %v1729_v11 = vpop.permute.xlu0 %1728 }
 0x26f   : > { %v8605_v57 = vpop.f32.mrb[12].mxu0  ;;  %v1731_v62 = vpop.permute.xlu1 %1730  ;;  %1797 = vst.msk [vmem:[#allocation3 + $0xe0] sm:$0xff] %vm1768_vm6, %v1729_v11 }
 0x270   : > { %v2957_v53 = vmul.f32 %v8605_v57, %v10052_v23  ;;  %v2838_v41 = vpop.f32.mrb[13].mxu0  ;;  %1798 = vst.msk [vmem:[#allocation3 + $0xe8] sm:$0xff] %vm1768_vm6, %v1731_v62 }
 0x271   : > { %v2956_v63 = vmul.f32 %v10052_v23, %v2838_v41 }
 0x272   : > { %v2996_v1 = vadd.f32 %v10061_v55, %v2957_v53  ;;  %v1922_v5 = vpop.permute.xlu0 %1921  ;;  %v3200_v53 = vld [vmem:[#allocation4 + $0x1] sm:$0xff] }
 0x273   : > { %v2995_v3 = vadd.f32 %v10061_v55, %v2956_v63  ;;  %v1924_v47 = vpop.permute.xlu1 %1923  ;;  %1990 = vst.msk [vmem:[#allocation3 + $0xe0] sm:$0xff] %vm1961_vm7, %v1922_v5  ;;  %v3393_v5 = vld [vmem:[#allocation4 + $0x2] sm:$0xff] }
 0x274   : > { %v3028_v6 = vmax.f32 %v2996_v1, 0.0  ;;  %1991 = vst.msk [vmem:[#allocation3 + $0xe8] sm:$0xff] %vm1961_vm7, %v1924_v47  ;;  %v3394_v1 = vld [vmem:[#allocation4 + $0xa] sm:$0xff] }
 0x275   : > { %v3027_v7 = vmax.f32 %v2995_v3, 0.0 }
 0x276   : > { %3117 = vst.msk [vmem:[#allocation4 + $0xb1] sm:$0xff] %vm3047_vm12, %v3028_v6  ;;  %v2116_v8 = vpop.permute.xlu0 %2115 }
 0x277   : > { %3116 = vst.msk [vmem:[#allocation4 + $0xa9] sm:$0xff] %vm3047_vm12, %v3027_v7  ;;  %v2118_v12 = vpop.permute.xlu1 %2117  ;;  %v10462_v7 = vld [vmem:[%s12566_s5] ss:$0 sm:$0xff]  ;;  %s12582_s5 = smov 32  }
 0x278   : > { %2184 = vst.msk [vmem:[#allocation3 + $0xe0] sm:$0xff] %vm2155_vm8, %v2116_v8  ;;  %2185 = vst.msk [vmem:[#allocation3 + $0xe8] sm:$0xff] %vm2155_vm8, %v2118_v12 }
 0x27a   : > { %v2309_v13 = vpop.permute.xlu0 %2308 }
 0x27b   : > { %v2311_v50 = vpop.permute.xlu1 %2310  ;;  %2377 = vst.msk [vmem:[#allocation3 + $0xe0] sm:$0xff] %vm2348_vm9, %v2309_v13 }
 0x27c   : > { %2378 = vst.msk [vmem:[#allocation3 + $0xe8] sm:$0xff] %vm2348_vm9, %v2311_v50 }
 0x27e   : > { %v10411_v14 = vld [vmem:[#allocation4 + $0xb0] sm:$0xff]  ;;  %v10413_v35 = vld [vmem:[#allocation4 + $0xa8] sm:$0xff]  ;;  %v2502_v16 = vpop.permute.xlu0 %2501 }
 0x27f   : > { %3183 = vst.msk [vmem:[#allocation5 + $0x78] sm:$0xff] %vm3047_vm12, %v10411_v14  ;;  %3182 = vst.msk [vmem:[#allocation5 + $0x70] sm:$0xff] %vm3047_vm12, %v10413_v35  ;;  %v1154_v36 = vpop.permute.xlu1 %1153 }
 0x280   : > { %2570 = vst.msk [vmem:[#allocation3 + $0xe0] sm:$0xff] %vm2541_vm10, %v2502_v16 }
 0x281   : > { %1220 = vst.msk [vmem:[#allocation3 + $0xf0] sm:$0xff] %vm1189_vm3, %v1154_v36 }
 0x282   : > { %v2504_v17 = vpop.permute.xlu0 %2503 }
 0x283   : > { %v1156_v18 = vpop.permute.xlu1 %1155  ;;  %2571 = vst.msk [vmem:[#allocation3 + $0xe8] sm:$0xff] %vm2541_vm10, %v2504_v17 }
 0x284   : > { %1221 = vst.msk [vmem:[#allocation3 + $0xf8] sm:$0xff] %vm1189_vm3, %v1156_v18  ;;  %vm4326_vm3 = vcmask 458112  }
 0x286   : > { %v1347_v19 = vpop.permute.xlu0 %1346 }
 0x287   : > { %v2602_v20 = vld [vmem:[#allocation3 + $0xe0] sm:$0xff]  ;;  %v1349_v21 = vpop.permute.xlu1 %1348  ;;  %1413 = vst.msk [vmem:[#allocation3 + $0xf0] sm:$0xff] %vm1382_vm4, %v1347_v19 }
 0x288   : > { %8627 = vmatprep.mubr.msk.f32.mxu0 %vm2611_vm11, %v2602_v20  ;;  %1414 = vst.msk [vmem:[#allocation3 + $0xf8] sm:$0xff] %vm1382_vm4, %v1349_v21  ;;  %vm4519_vm4 = vcmask 523712  }
 0x28a   : > { %v1540_v37 = vpop.permute.xlu0 %1539  ;;  %v2603_v22 = vld [vmem:[#allocation3 + $0xe8] sm:$0xff] }
 0x28b   : > { %v1542_v24 = vpop.permute.xlu1 %1541  ;;  %1606 = vst.msk [vmem:[#allocation3 + $0xf0] sm:$0xff] %vm1575_vm5, %v1540_v37  ;;  %8628 = vmatmul.mubr.msk.f32.gmra.mrb[28].mxu0 %vm2611_vm11, %v2603_v22  ;;  %v10479_v22 = vld [vmem:[%s12567_s1] ss:$0 sm:$0xff]  ;;  %s12579_s1 = smov 48  }
 0x28c   : > { %1607 = vst.msk [vmem:[#allocation3 + $0xf8] sm:$0xff] %vm1575_vm5, %v1542_v24  ;;  %vm4712_vm5 = vcmask 589312  }
 0x28e   : > { %v1733_v26 = vpop.permute.xlu0 %1732 }
 0x28f   : > { %v8608_v25 = vpop.f32.mrb[14].mxu0  ;;  %v1735_v31 = vpop.permute.xlu1 %1734  ;;  %1799 = vst.msk [vmem:[#allocation3 + $0xf0] sm:$0xff] %vm1768_vm6, %v1733_v26 }
 0x290   : > { %v2959_v27 = vmul.f32 %v8608_v25, %v10052_v23  ;;  %v2848_v28 = vpop.f32.mrb[15].mxu0  ;;  %1800 = vst.msk [vmem:[#allocation3 + $0xf8] sm:$0xff] %vm1768_vm6, %v1735_v31  ;;  %vm4778_vm6 = vcmask 588800  }
 0x291   : > { %v2958_v32 = vmul.f32 %v10052_v23, %v2848_v28 }
 0x292   : > { %v2998_v34 = vadd.f32 %v10061_v55, %v2959_v27  ;;  %v1926_v38 = vpop.permute.xlu0 %1925 }
 0x293   : > { %v2997_v58 = vadd.f32 %v10061_v55, %v2958_v32  ;;  %v1928_v44 = vpop.permute.xlu1 %1927  ;;  %1992 = vst.msk [vmem:[#allocation3 + $0xf0] sm:$0xff] %vm1961_vm7, %v1926_v38  ;;  %v3780_v32 = vld [vmem:[#allocation4 + $0x21] sm:$0xff] }
 0x294   : > { %v3030_v40 = vmax.f32 %v2998_v34, 0.0  ;;  %1993 = vst.msk [vmem:[#allocation3 + $0xf8] sm:$0xff] %vm1961_vm7, %v1928_v44  ;;  %v3779_v34 = vld [vmem:[#allocation4 + $0x19] sm:$0xff]  ;;  %vm10754_vm7 = vmpackc.low %vm4778_vm6, %vm4778_vm6 }
 0x295   : > { %v3029_v45 = vmax.f32 %v2997_v58, 0.0 }
 0x296   : > { %3119 = vst.msk [vmem:[#allocation4 + $0xc9] sm:$0xff] %vm3047_vm12, %v3030_v40  ;;  %v2120_v23 = vpop.permute.xlu0 %2119  ;;  %v3972_v40 = vld [vmem:[#allocation4 + $0x1a] sm:$0xff] }
 0x297   : > { %3118 = vst.msk [vmem:[#allocation4 + $0xc1] sm:$0xff] %vm3047_vm12, %v3029_v45  ;;  %v2122_v48 = vpop.permute.xlu1 %2121 }
 0x298   : > { %2186 = vst.msk [vmem:[#allocation3 + $0xf0] sm:$0xff] %vm2155_vm8, %v2120_v23  ;;  %2187 = vst.msk [vmem:[#allocation3 + $0xf8] sm:$0xff] %vm2155_vm8, %v2122_v48  ;;  %vm5603_vm8 = vcmask 261120  }
 0x29a   : > { %v2313_v49 = vpop.permute.xlu0 %2312 }
 0x29b   : > { %v2315_v51 = vpop.permute.xlu1 %2314  ;;  %2379 = vst.msk [vmem:[#allocation3 + $0xf0] sm:$0xff] %vm2348_vm9, %v2313_v49 }
 0x29c   : > { %2380 = vst.msk [vmem:[#allocation3 + $0xf8] sm:$0xff] %vm2348_vm9, %v2315_v51  ;;  %v10515_v51 = vld [vmem:[#allocation4 + $0x39] sm:$0xff]  ;;  %vm6347_vm9 = vcmask 130048  }
 0x29d   : > { %v3217_v33 = vld [vmem:[#allocation4 + $0xc9] sm:$0xff]  ;;  %6353 = vst.msk [vmem:[#allocation9 + $0x20] sm:$0xff] %vm6347_vm9, %v8989_v0  ;;  %6348 = vst.msk [vmem:[#allocation9] sm:$0xff] %vm6347_vm9, %v8989_v0 }
 0x29e   : > { %3298 = vrot.lane.b32.xlu1 %v3217_v33, %s12563_s0  ;;  %v3216_v54 = vld [vmem:[#allocation4 + $0xc1] sm:$0xff]  ;;  %v2506_v57 = vpop.permute.xlu0 %2505  ;;  %v3410_v62 = vld [vmem:[#allocation4 + $0xca] sm:$0xff]  ;;  %6351 = vst.msk [vmem:[#allocation9 + $0x10] sm:$0xff] %vm6347_vm9, %v8989_v0  ;;  %6355 = vst.msk [vmem:[#allocation9 + $0x30] sm:$0xff] %vm6347_vm9, %v8989_v0 }
 0x29f   : > { %v3153_v56 = vld [vmem:[#allocation4 + $0xc8] sm:$0xff]  ;;  %3296 = vrot.lane.b32.xlu0 %v3216_v54, %s12563_s0  ;;  %v3152_v11 = vld [vmem:[#allocation4 + $0xc0] sm:$0xff]  ;;  %v2508_v41 = vpop.permute.xlu1 %2507  ;;  %2572 = vst.msk [vmem:[#allocation3 + $0xf0] sm:$0xff] %vm2541_vm10, %v2506_v57  ;;  %v10517_v33 = vld [vmem:[#allocation4 + $0x31] sm:$0xff] }
 0x2a0   : > { %3185 = vst.msk [vmem:[#allocation5 + $0x88] sm:$0xff] %vm3047_vm12, %v3153_v56  ;;  %3184 = vst.msk [vmem:[#allocation5 + $0x80] sm:$0xff] %vm3047_vm12, %v3152_v11  ;;  %v3409_v63 = vld [vmem:[#allocation4 + $0xc2] sm:$0xff] }
 0x2a1   : > { %2573 = vst.msk [vmem:[#allocation3 + $0xf8] sm:$0xff] %vm2541_vm10, %v2508_v41  ;;  %v10537_v41 = vld [vmem:[#allocation4 + $0x3a] sm:$0xff]  ;;  %vm6349_vm10 = vcmask 123904   ;;  %vm12007_vm13 = vmpackc.low %vm6347_vm9, %vm6347_vm9 }
 0x2a2   : > { %3266 = vrot.lane.b32.xlu1 %v3201_v4, %s12563_s0  ;;  %6354 = vst.msk [vmem:[#allocation9 + $0x28] sm:$0x3] %vm6349_vm10, %v8989_v0  ;;  %6350 = vst.msk [vmem:[#allocation9 + $0x8] sm:$0x3] %vm6349_vm10, %v8989_v0 }
 0x2a3   : > { %3264 = vrot.lane.b32.xlu0 %v3200_v53, %s12563_s0  ;;  %6352 = vst.msk [vmem:[#allocation9 + $0x18] sm:$0x3] %vm6349_vm10, %v8989_v0  ;;  %6356 = vst.msk [vmem:[#allocation9 + $0x38] sm:$0x3] %vm6349_vm10, %v8989_v0 }
 0x2a4   : > { %6357 = vst.msk [vmem:[#allocation9 + $0x40] sm:$0xff] %vm6347_vm9, %v8989_v0  ;;  %6359 = vst.msk [vmem:[#allocation9 + $0x50] sm:$0xff] %vm6347_vm9, %v8989_v0 }
 0x2a5   : > { %6358 = vst.msk [vmem:[#allocation9 + $0x48] sm:$0x3] %vm6349_vm10, %v8989_v0  ;;  %6360 = vst.msk [vmem:[#allocation9 + $0x58] sm:$0x3] %vm6349_vm10, %v8989_v0 }
 0x2a6   : > { %3491 = vrot.lane.b32.xlu1 %v3410_v62, %s12568_s6  ;;  %v2604_v3 = vld [vmem:[#allocation3 + $0xf0] sm:$0xff]  ;;  %6361 = vst.msk [vmem:[#allocation9 + $0x60] sm:$0xff] %vm6347_vm9, %v8989_v0  ;;  %6363 = vst.msk [vmem:[#allocation9 + $0x70] sm:$0xff] %vm6347_vm9, %v8989_v0 }
 0x2a7   : > { %3489 = vrot.lane.b32.xlu0 %v3409_v63, %s12568_s6  ;;  %8630 = vmatprep.mubr.msk.f32.mxu0 %vm2611_vm11, %v2604_v3  ;;  %v10539_v62 = vld [vmem:[#allocation4 + $0x32] sm:$0xff]  ;;  %6362 = vst.msk [vmem:[#allocation9 + $0x68] sm:$0x3] %vm6349_vm10, %v8989_v0  ;;  %6364 = vst.msk [vmem:[#allocation9 + $0x78] sm:$0x3] %vm6349_vm10, %v8989_v0 }
 0x2a8   : > { %v2605_v6 = vld [vmem:[#allocation3 + $0xf8] sm:$0xff]  ;;  %6365 = vst.msk [vmem:[#allocation9 + $0x80] sm:$0xff] %vm6347_vm9, %v8989_v0  ;;  %6367 = vst.msk [vmem:[#allocation9 + $0x90] sm:$0xff] %vm6347_vm9, %v8989_v0 }
 0x2a9   : > { %8631 = vmatmul.mubr.msk.f32.gmra.mrb[30].mxu0 %vm2611_vm11, %v2605_v6  ;;  %6366 = vst.msk [vmem:[#allocation9 + $0x88] sm:$0x3] %vm6349_vm10, %v8989_v0  ;;  %6368 = vst.msk [vmem:[#allocation9 + $0x98] sm:$0x3] %vm6349_vm10, %v8989_v0  ;;  %vm6434_vm11 = vcmask 261248   ;;  %vm7694_vm10 = vcmask 257024  }
 0x2aa   : > { %3459 = vrot.lane.b32.xlu1 %v3394_v1, %s12568_s6 }
 0x2ab   : > { %3457 = vrot.lane.b32.xlu0 %v3393_v5, %s12568_s6 }
 0x2ae   : > { %v8611_v47 = vpop.f32.mrb[16].mxu0 }
 0x2af   : > { %v2961_v8 = vmul.f32 %v10462_v7, %v8611_v47  ;;  %v2858_v12 = vpop.f32.mrb[17].mxu0 }
 0x2b0   : > { %v2960_v13 = vmul.f32 %v10462_v7, %v2858_v12 }
 0x2b1   : > { %v3000_v50 = vadd.f32 %v10061_v55, %v2961_v8 }
 0x2b2   : > { %v2999_v16 = vadd.f32 %v10061_v55, %v2960_v13 }
 0x2b3   : > { %v3032_v36 = vmax.f32 %v3000_v50, 0.0 }
 0x2b4   : > { %v3031_v17 = vmax.f32 %v2999_v16, 0.0 }
 0x2b5   : > { %3121 = vst.msk [vmem:[#allocation4 + $0xe1] sm:$0xff] %vm3047_vm12, %v3032_v36 }
 0x2b6   : > { %3120 = vst.msk [vmem:[#allocation4 + $0xd9] sm:$0xff] %vm3047_vm12, %v3031_v17 }
 0x2bc   : > { %v3796_v28 = vld [vmem:[#allocation4 + $0xe1] sm:$0xff] }
 0x2bd   : > { %v3603_v18 = vld [vmem:[#allocation4 + $0xe0] sm:$0xff]  ;;  %v3602_v19 = vld [vmem:[#allocation4 + $0xd8] sm:$0xff] }
 0x2be   : > { %3684 = vrot.lane.b32.xlu1 %v3603_v18, %s12564_s29  ;;  %3682 = vrot.lane.b32.xlu0 %v3602_v19, %s12564_s29  ;;  %v8614_v20 = vpop.f32.mrb[18].mxu0  ;;  %3187 = vst.msk [vmem:[#allocation5 + $0x98] sm:$0xff] %vm3047_vm12, %v3603_v18  ;;  %3186 = vst.msk [vmem:[#allocation5 + $0x90] sm:$0xff] %vm3047_vm12, %v3602_v19  ;;  %v3795_v31 = vld [vmem:[#allocation4 + $0xd9] sm:$0xff] }
 0x2bf   : > { %v2963_v21 = vmul.f32 %v10462_v7, %v8614_v20  ;;  %v2868_v55 = vpop.f32.mrb[19].mxu0 }
 0x2c0   : > { %v2962_v37 = vmul.f32 %v10462_v7, %v2868_v55 }
 0x2c1   : > { %v3002_v24 = vadd.f32 %v10479_v22, %v2963_v21 }
 0x2c2   : > { %3652 = vrot.lane.b32.xlu1 %v10101_v61, %s12564_s29  ;;  %3650 = vrot.lane.b32.xlu0 %v10105_v2, %s12564_s29  ;;  %v3001_v25 = vadd.f32 %v10479_v22, %v2962_v37  ;;  %v3989_v61 = vld [vmem:[#allocation4 + $0xe2] sm:$0xff]  ;;  %v3988_v2 = vld [vmem:[#allocation4 + $0xda] sm:$0xff] }
 0x2c3   : > { %v3034_v26 = vmax.f32 %v3002_v24, 0.0 }
 0x2c4   : > { %v3033_v27 = vmax.f32 %v3001_v25, 0.0 }
 0x2c5   : > { %3123 = vst.msk [vmem:[#allocation4 + $0xf9] sm:$0xff] %vm3047_vm12, %v3034_v26 }
 0x2c6   : > { %3877 = vrot.lane.b32.xlu1 %v3796_v28, %s12527_s11  ;;  %3875 = vrot.lane.b32.xlu0 %v3795_v31, %s12527_s11  ;;  %3122 = vst.msk [vmem:[#allocation4 + $0xf1] sm:$0xff] %vm3047_vm12, %v3033_v27 }
 0x2ca   : > { %3845 = vrot.lane.b32.xlu1 %v3780_v32, %s12527_s11  ;;  %3843 = vrot.lane.b32.xlu0 %v3779_v34, %s12527_s11 }
 0x2cc   : > { %v10505_v44 = vld [vmem:[#allocation4 + $0xf9] sm:$0xff] }
 0x2cd   : > { %v4183_v58 = vld [vmem:[#allocation4 + $0xf8] sm:$0xff]  ;;  %v4182_v38 = vld [vmem:[#allocation4 + $0xf0] sm:$0xff] }
 0x2ce   : > { %4070 = vrot.lane.b32.xlu1 %v3989_v61, %s12531_s2  ;;  %4068 = vrot.lane.b32.xlu0 %v3988_v2, %s12531_s2  ;;  %3189 = vst.msk [vmem:[#allocation5 + $0xa8] sm:$0xff] %vm3047_vm12, %v4183_v58  ;;  %3188 = vst.msk [vmem:[#allocation5 + $0xa0] sm:$0xff] %vm3047_vm12, %v4182_v38  ;;  %v10507_v45 = vld [vmem:[#allocation4 + $0xf1] sm:$0xff]  ;;  %v10525_v11 = vld [vmem:[#allocation4 + $0xfa] sm:$0xff] }
 0x2cf   : > { %v10527_v53 = vld [vmem:[#allocation4 + $0xf2] sm:$0xff] }
 0x2d2   : > { %4038 = vrot.lane.b32.xlu1 %v3973_v39, %s12531_s2  ;;  %4036 = vrot.lane.b32.xlu0 %v3972_v40, %s12531_s2 }
 0x2d6   : > { %4264 = vrot.lane.b32.xlu1 %v4183_v58, %s12533_s8  ;;  %4262 = vrot.lane.b32.xlu0 %v4182_v38, %s12533_s8 }
 0x2da   : > { %4232 = vrot.lane.b32.xlu1 %v10181_v52, %s12533_s8  ;;  %4230 = vrot.lane.b32.xlu0 %v10183_v15, %s12533_s8 }
 0x2de   : > { %4457 = vrot.lane.b32.xlu1 %v10505_v44, %s12529_s28  ;;  %4455 = vrot.lane.b32.xlu0 %v10507_v45, %s12529_s28  ;;  %v8617_v46 = vpop.f32.mrb[20].mxu0 }
 0x2df   : > { %v2965_v23 = vmul.f32 %v10462_v7, %v8617_v46  ;;  %v2878_v48 = vpop.f32.mrb[21].mxu0  ;;  %v10647_v46 = vld [vmem:[#allocation4 + $0x4a] sm:$0xff] }
 0x2e0   : > { %v2964_v49 = vmul.f32 %v10462_v7, %v2878_v48 }
 0x2e1   : > { %v3004_v54 = vadd.f32 %v10479_v22, %v2965_v23 }
 0x2e2   : > { %4425 = vrot.lane.b32.xlu1 %v10515_v51, %s12529_s28  ;;  %4423 = vrot.lane.b32.xlu0 %v10517_v33, %s12529_s28  ;;  %v3003_v56 = vadd.f32 %v10479_v22, %v2964_v49 }
 0x2e3   : > { %v3036_v4 = vmax.f32 %v3004_v54, 0.0 }
 0x2e4   : > { %v3035_v57 = vmax.f32 %v3003_v56, 0.0 }
 0x2e5   : > { %3125 = vst.msk [vmem:[#allocation4 + $0x111] sm:$0xff] %vm3047_vm12, %v3036_v4 }
 0x2e6   : > { %4650 = vrot.lane.b32.xlu1 %v10525_v11, %s12535_s10  ;;  %4648 = vrot.lane.b32.xlu0 %v10527_v53, %s12535_s10  ;;  %3124 = vst.msk [vmem:[#allocation4 + $0x109] sm:$0xff] %vm3047_vm12, %v3035_v57 }
 0x2ea   : > { %3302 = vrot.lane.b32.xlu1 %v3796_v28, %s12563_s0  ;;  %3300 = vrot.lane.b32.xlu0 %v3795_v31, %s12563_s0  ;;  %v10621_v31 = vld [vmem:[#allocation4 + $0x51] sm:$0xff] }
 0x2ec   : > { %v10610_v37 = vld [vmem:[#allocation4 + $0x111] sm:$0xff] }
 0x2ed   : > { %v10541_v63 = vld [vmem:[#allocation4 + $0x110] sm:$0xff]  ;;  %v10543_v1 = vld [vmem:[#allocation4 + $0x108] sm:$0xff] }
 0x2ee   : > { %4618 = vrot.lane.b32.xlu1 %v10537_v41, %s12535_s10  ;;  %4616 = vrot.lane.b32.xlu0 %v10539_v62, %s12535_s10  ;;  %3191 = vst.msk [vmem:[#allocation5 + $0xb8] sm:$0xff] %vm3047_vm12, %v10541_v63  ;;  %3190 = vst.msk [vmem:[#allocation5 + $0xb0] sm:$0xff] %vm3047_vm12, %v10543_v1  ;;  %v10612_v24 = vld [vmem:[#allocation4 + $0x109] sm:$0xff] }
 0x2f2   : > { %3270 = vrot.lane.b32.xlu1 %v3780_v32, %s12563_s0  ;;  %3268 = vrot.lane.b32.xlu0 %v3779_v34, %s12563_s0  ;;  %v10623_v32 = vld [vmem:[#allocation4 + $0x49] sm:$0xff] }
 0x2f6   : > { %3495 = vrot.lane.b32.xlu1 %v3989_v61, %s12568_s6  ;;  %3493 = vrot.lane.b32.xlu0 %v3988_v2, %s12568_s6 }
 0x2fa   : > { %3463 = vrot.lane.b32.xlu1 %v3973_v39, %s12568_s6  ;;  %3461 = vrot.lane.b32.xlu0 %v3972_v40, %s12568_s6  ;;  %v10633_v39 = vld [vmem:[#allocation4 + $0x10a] sm:$0xff]  ;;  %v10645_v40 = vld [vmem:[#allocation4 + $0x52] sm:$0xff] }
 0x2fe   : > { %3688 = vrot.lane.b32.xlu1 %v4183_v58, %s12564_s29  ;;  %3686 = vrot.lane.b32.xlu0 %v4182_v38, %s12564_s29  ;;  %v8620_v3 = vpop.f32.mrb[22].mxu0  ;;  %v10631_v38 = vld [vmem:[#allocation4 + $0x112] sm:$0xff] }
 0x2ff   : > { %v2967_v5 = vmul.f32 %v10462_v7, %v8620_v3  ;;  %v2888_v6 = vpop.f32.mrb[23].mxu0 }
 0x300   : > { %v2966_v47 = vmul.f32 %v10462_v7, %v2888_v6 }
 0x301   : > { %v3006_v8 = vadd.f32 %v10479_v22, %v2967_v5 }
 0x302   : > { %3656 = vrot.lane.b32.xlu1 %v10181_v52, %s12564_s29  ;;  %3654 = vrot.lane.b32.xlu0 %v10183_v15, %s12564_s29  ;;  %v3005_v12 = vadd.f32 %v10479_v22, %v2966_v47 }
 0x303   : > { %v3038_v13 = vmax.f32 %v3006_v8, 0.0 }
 0x304   : > { %v3037_v50 = vmax.f32 %v3005_v12, 0.0 }
 0x305   : > { %3127 = vst.msk [vmem:[#allocation4 + $0x129] sm:$0xff] %vm3047_vm12, %v3038_v13 }
 0x306   : > { %3881 = vrot.lane.b32.xlu1 %v10505_v44, %s12527_s11  ;;  %3879 = vrot.lane.b32.xlu0 %v10507_v45, %s12527_s11  ;;  %3126 = vst.msk [vmem:[#allocation4 + $0x121] sm:$0xff] %vm3047_vm12, %v3037_v50 }
 0x30a   : > { %3849 = vrot.lane.b32.xlu1 %v10515_v51, %s12527_s11  ;;  %3847 = vrot.lane.b32.xlu0 %v10517_v33, %s12527_s11 }
 0x30d   : > { %v10579_v52 = vld [vmem:[#allocation4 + $0x128] sm:$0xff]  ;;  %v10581_v15 = vld [vmem:[#allocation4 + $0x120] sm:$0xff] }
 0x30e   : > { %4074 = vrot.lane.b32.xlu1 %v10525_v11, %s12531_s2  ;;  %4072 = vrot.lane.b32.xlu0 %v10527_v53, %s12531_s2  ;;  %3193 = vst.msk [vmem:[#allocation5 + $0xc8] sm:$0xff] %vm3047_vm12, %v10579_v52  ;;  %3192 = vst.msk [vmem:[#allocation5 + $0xc0] sm:$0xff] %vm3047_vm12, %v10581_v15 }
 0x310   : > { %v3299_v16 = vpop.permute.xlu1 %3298 }
 0x311   : > { %3378 = vst.msk [vmem:[#allocation5 + $0x88] sm:$0xff] %vm3360_vm14, %v3299_v16  ;;  %v3297_v36 = vpop.permute.xlu0 %3296 }
 0x312   : > { %3377 = vst.msk [vmem:[#allocation5 + $0x80] sm:$0xff] %vm3360_vm14, %v3297_v36  ;;  %4042 = vrot.lane.b32.xlu1 %v10537_v41, %s12531_s2  ;;  %4040 = vrot.lane.b32.xlu0 %v10539_v62, %s12531_s2 }
 0x314   : > { %v3267_v17 = vpop.permute.xlu1 %3266 }
 0x315   : > { %3362 = vst.msk [vmem:[#allocation5 + $0x8] sm:$0xff] %vm3360_vm14, %v3267_v17  ;;  %v3265_v18 = vpop.permute.xlu0 %3264 }
 0x316   : > { %3361 = vst.msk [vmem:[#allocation5] sm:$0xff] %vm3360_vm14, %v3265_v18  ;;  %4268 = vrot.lane.b32.xlu1 %v10541_v63, %s12533_s8  ;;  %4266 = vrot.lane.b32.xlu0 %v10543_v1, %s12533_s8 }
 0x318   : > { %v3492_v19 = vpop.permute.xlu1 %3491 }
 0x319   : > { %3571 = vst.msk [vmem:[#allocation5 + $0x88] sm:$0xff] %vm3553_vm15, %v3492_v19  ;;  %v3490_v20 = vpop.permute.xlu0 %3489 }
 0x31a   : > { %3570 = vst.msk [vmem:[#allocation5 + $0x80] sm:$0xff] %vm3553_vm15, %v3490_v20  ;;  %4236 = vrot.lane.b32.xlu1 %v10253_v59, %s12533_s8  ;;  %4234 = vrot.lane.b32.xlu0 %v10255_v60, %s12533_s8 }
 0x31c   : > { %v3460_v21 = vpop.permute.xlu1 %3459 }
 0x31d   : > { %3555 = vst.msk [vmem:[#allocation5 + $0x8] sm:$0xff] %vm3553_vm15, %v3460_v21  ;;  %v3458_v55 = vpop.permute.xlu0 %3457 }
 0x31e   : > { %3554 = vst.msk [vmem:[#allocation5] sm:$0xff] %vm3553_vm15, %v3458_v55  ;;  %4461 = vrot.lane.b32.xlu1 %v10610_v37, %s12529_s28  ;;  %4459 = vrot.lane.b32.xlu0 %v10612_v24, %s12529_s28  ;;  %v8623_v25 = vpop.f32.mrb[24].mxu0 }
 0x31f   : > { %v2969_v26 = vmul.f32 %v10462_v7, %v8623_v25  ;;  %v2898_v27 = vpop.f32.mrb[25].mxu0 }
 0x320   : > { %v2968_v28 = vmul.f32 %v10462_v7, %v2898_v27  ;;  %v10745_v27 = vld [vmem:[#allocation4 + $0x121] sm:$0xff] }
 0x321   : > { %v3008_v34 = vadd.f32 %v10479_v22, %v2969_v26  ;;  %v10743_v26 = vld [vmem:[#allocation4 + $0x129] sm:$0xff] }
 0x322   : > { %4429 = vrot.lane.b32.xlu1 %v10621_v31, %s12529_s28  ;;  %4427 = vrot.lane.b32.xlu0 %v10623_v32, %s12529_s28  ;;  %v3007_v61 = vadd.f32 %v10479_v22, %v2968_v28 }
 0x323   : > { %v3040_v2 = vmax.f32 %v3008_v34, 0.0 }
 0x324   : > { %v3039_v58 = vmax.f32 %v3007_v61, 0.0 }
 0x325   : > { %3129 = vst.msk [vmem:[#allocation4 + $0x141] sm:$0xff] %vm3047_vm12, %v3040_v2 }
 0x326   : > { %4654 = vrot.lane.b32.xlu1 %v10631_v38, %s12535_s10  ;;  %4652 = vrot.lane.b32.xlu0 %v10633_v39, %s12535_s10  ;;  %3128 = vst.msk [vmem:[#allocation4 + $0x139] sm:$0xff] %vm3047_vm12, %v3039_v58 }
 0x32a   : > { %3306 = vrot.lane.b32.xlu1 %v10505_v44, %s12563_s0  ;;  %3304 = vrot.lane.b32.xlu0 %v10507_v45, %s12563_s0 }
 0x32d   : > { %v10649_v23 = vld [vmem:[#allocation4 + $0x140] sm:$0xff]  ;;  %v10651_v48 = vld [vmem:[#allocation4 + $0x138] sm:$0xff] }
 0x32e   : > { %4622 = vrot.lane.b32.xlu1 %v10645_v40, %s12535_s10  ;;  %4620 = vrot.lane.b32.xlu0 %v10647_v46, %s12535_s10  ;;  %3195 = vst.msk [vmem:[#allocation5 + $0xd8] sm:$0xff] %vm3047_vm12, %v10649_v23  ;;  %3194 = vst.msk [vmem:[#allocation5 + $0xd0] sm:$0xff] %vm3047_vm12, %v10651_v48 }
 0x330   : > { %v3685_v44 = vpop.permute.xlu1 %3684  ;;  %v3683_v45 = vpop.permute.xlu0 %3682 }
 0x331   : > { %3764 = vst.msk [vmem:[#allocation5 + $0x88] sm:$0xff] %vm3746_vm0, %v3685_v44  ;;  %3763 = vst.msk [vmem:[#allocation5 + $0x80] sm:$0xff] %vm3746_vm0, %v3683_v45 }
 0x332   : > { %3274 = vrot.lane.b32.xlu1 %v10515_v51, %s12563_s0  ;;  %3272 = vrot.lane.b32.xlu0 %v10517_v33, %s12563_s0 }
 0x334   : > { %v3653_v49 = vpop.permute.xlu1 %3652  ;;  %v3651_v54 = vpop.permute.xlu0 %3650 }
 0x335   : > { %3748 = vst.msk [vmem:[#allocation5 + $0x8] sm:$0xff] %vm3746_vm0, %v3653_v49  ;;  %3747 = vst.msk [vmem:[#allocation5] sm:$0xff] %vm3746_vm0, %v3651_v54 }
 0x336   : > { %3499 = vrot.lane.b32.xlu1 %v10525_v11, %s12568_s6  ;;  %3497 = vrot.lane.b32.xlu0 %v10527_v53, %s12568_s6 }
 0x338   : > { %v3878_v56 = vpop.permute.xlu1 %3877  ;;  %v3876_v4 = vpop.permute.xlu0 %3875 }
 0x339   : > { %3957 = vst.msk [vmem:[#allocation5 + $0x88] sm:$0xff] %vm3939_vm1, %v3878_v56  ;;  %3956 = vst.msk [vmem:[#allocation5 + $0x80] sm:$0xff] %vm3939_vm1, %v3876_v4  ;;  %v10761_v56 = vld [vmem:[#allocation4 + $0x69] sm:$0xff]  ;;  %v10763_v4 = vld [vmem:[#allocation4 + $0x61] sm:$0xff] }
 0x33a   : > { %3467 = vrot.lane.b32.xlu1 %v10537_v41, %s12568_s6  ;;  %3465 = vrot.lane.b32.xlu0 %v10539_v62, %s12568_s6 }
 0x33c   : > { %v3846_v51 = vpop.permute.xlu1 %3845  ;;  %v3844_v33 = vpop.permute.xlu0 %3843 }
 0x33d   : > { %3941 = vst.msk [vmem:[#allocation5 + $0x8] sm:$0xff] %vm3939_vm1, %v3846_v51  ;;  %3940 = vst.msk [vmem:[#allocation5] sm:$0xff] %vm3939_vm1, %v3844_v33 }
 0x33e   : > { %3692 = vrot.lane.b32.xlu1 %v10541_v63, %s12564_s29  ;;  %3690 = vrot.lane.b32.xlu0 %v10543_v1, %s12564_s29  ;;  %v8626_v57 = vpop.f32.mrb[26].mxu0 }
 0x33f   : > { %v2971_v11 = vmul.f32 %v10462_v7, %v8626_v57  ;;  %v2908_v53 = vpop.f32.mrb[27].mxu0 }
 0x340   : > { %v4071_v41 = vpop.permute.xlu1 %4070  ;;  %v4069_v3 = vpop.permute.xlu0 %4068  ;;  %v2970_v62 = vmul.f32 %v10462_v7, %v2908_v53 }
 0x341   : > { %4150 = vst.msk [vmem:[#allocation5 + $0x88] sm:$0xff] %vm4132_vm2, %v4071_v41  ;;  %4149 = vst.msk [vmem:[#allocation5 + $0x80] sm:$0xff] %vm4132_vm2, %v4069_v3  ;;  %v3010_v5 = vadd.f32 %v10479_v22, %v2971_v11 }
 0x342   : > { %3660 = vrot.lane.b32.xlu1 %v10253_v59, %s12564_s29  ;;  %3658 = vrot.lane.b32.xlu0 %v10255_v60, %s12564_s29  ;;  %v3009_v63 = vadd.f32 %v10479_v22, %v2970_v62  ;;  %v10775_v62 = vld [vmem:[#allocation4 + $0x12a] sm:$0xff] }
 0x343   : > { %v3042_v1 = vmax.f32 %v3010_v5, 0.0  ;;  %v10777_v5 = vld [vmem:[#allocation4 + $0x122] sm:$0xff] }
 0x344   : > { %v4039_v6 = vpop.permute.xlu1 %4038  ;;  %v4037_v47 = vpop.permute.xlu0 %4036  ;;  %v3041_v8 = vmax.f32 %v3009_v63, 0.0 }
 0x345   : > { %4134 = vst.msk [vmem:[#allocation5 + $0x8] sm:$0xff] %vm4132_vm2, %v4039_v6  ;;  %4133 = vst.msk [vmem:[#allocation5] sm:$0xff] %vm4132_vm2, %v4037_v47 }
 0x346   : > { %3131 = vst.msk [vmem:[#allocation4 + $0x159] sm:$0xff] %vm3047_vm12, %v3042_v1  ;;  %3885 = vrot.lane.b32.xlu1 %v10610_v37, %s12527_s11  ;;  %3883 = vrot.lane.b32.xlu0 %v10612_v24, %s12527_s11  ;;  %3130 = vst.msk [vmem:[#allocation4 + $0x151] sm:$0xff] %vm3047_vm12, %v3041_v8 }
 0x348   : > { %v4265_v59 = vpop.permute.xlu1 %4264  ;;  %v4263_v60 = vpop.permute.xlu0 %4262 }
 0x349   : > { %4344 = vst.msk [vmem:[#allocation5 + $0x88] sm:$0xff] %vm4326_vm3, %v4265_v59  ;;  %4343 = vst.msk [vmem:[#allocation5 + $0x80] sm:$0xff] %vm4326_vm3, %v4263_v60 }
 0x34a   : > { %3853 = vrot.lane.b32.xlu1 %v10621_v31, %s12527_s11  ;;  %3851 = vrot.lane.b32.xlu0 %v10623_v32, %s12527_s11 }
 0x34c   : > { %v4233_v12 = vpop.permute.xlu1 %4232  ;;  %v4231_v13 = vpop.permute.xlu0 %4230 }
 0x34d   : > { %4328 = vst.msk [vmem:[#allocation5 + $0x8] sm:$0xff] %vm4326_vm3, %v4233_v12  ;;  %4327 = vst.msk [vmem:[#allocation5] sm:$0xff] %vm4326_vm3, %v4231_v13  ;;  %v10711_v50 = vld [vmem:[#allocation4 + $0x158] sm:$0xff]  ;;  %v10713_v16 = vld [vmem:[#allocation4 + $0x150] sm:$0xff] }
 0x34e   : > { %4078 = vrot.lane.b32.xlu1 %v10631_v38, %s12531_s2  ;;  %4076 = vrot.lane.b32.xlu0 %v10633_v39, %s12531_s2  ;;  %3197 = vst.msk [vmem:[#allocation5 + $0xe8] sm:$0xff] %vm3047_vm12, %v10711_v50  ;;  %3196 = vst.msk [vmem:[#allocation5 + $0xe0] sm:$0xff] %vm3047_vm12, %v10713_v16  ;;  %v10793_v12 = vld [vmem:[#allocation4 + $0x6a] sm:$0xff]  ;;  %v10797_v13 = vld [vmem:[#allocation4 + $0x62] sm:$0xff] }
 0x350   : > { %v4458_v36 = vpop.permute.xlu1 %4457  ;;  %v4456_v17 = vpop.permute.xlu0 %4455 }
 0x351   : > { %4537 = vst.msk [vmem:[#allocation5 + $0x88] sm:$0xff] %vm4519_vm4, %v4458_v36  ;;  %4536 = vst.msk [vmem:[#allocation5 + $0x80] sm:$0xff] %vm4519_vm4, %v4456_v17 }
 0x352   : > { %4046 = vrot.lane.b32.xlu1 %v10645_v40, %s12531_s2  ;;  %4044 = vrot.lane.b32.xlu0 %v10647_v46, %s12531_s2 }
 0x354   : > { %v4426_v18 = vpop.permute.xlu1 %4425  ;;  %v4424_v19 = vpop.permute.xlu0 %4423 }
 0x355   : > { %4521 = vst.msk [vmem:[#allocation5 + $0x8] sm:$0xff] %vm4519_vm4, %v4426_v18  ;;  %4520 = vst.msk [vmem:[#allocation5] sm:$0xff] %vm4519_vm4, %v4424_v19 }
 0x356   : > { %4272 = vrot.lane.b32.xlu1 %v10579_v52, %s12533_s8  ;;  %4270 = vrot.lane.b32.xlu0 %v10581_v15, %s12533_s8 }
 0x358   : > { %v4651_v20 = vpop.permute.xlu1 %4650  ;;  %v4649_v21 = vpop.permute.xlu0 %4648 }
 0x359   : > { %4730 = vst.msk [vmem:[#allocation5 + $0x88] sm:$0xff] %vm4712_vm5, %v4651_v20  ;;  %4729 = vst.msk [vmem:[#allocation5 + $0x80] sm:$0xff] %vm4712_vm5, %v4649_v21 }
 0x35a   : > { %4240 = vrot.lane.b32.xlu1 %v10307_v29, %s12533_s8  ;;  %4238 = vrot.lane.b32.xlu0 %v10309_v30, %s12533_s8 }
 0x35c   : > { %v3303_v55 = vpop.permute.xlu1 %3302  ;;  %v3301_v25 = vpop.permute.xlu0 %3300 }
 0x35d   : > { %3380 = vst.msk [vmem:[#allocation5 + $0x98] sm:$0xff] %vm3360_vm14, %v3303_v55  ;;  %3379 = vst.msk [vmem:[#allocation5 + $0x90] sm:$0xff] %vm3360_vm14, %v3301_v25 }
 0x35e   : > { %4465 = vrot.lane.b32.xlu1 %v10743_v26, %s12529_s28  ;;  %4463 = vrot.lane.b32.xlu0 %v10745_v27, %s12529_s28  ;;  %v8629_v28 = vpop.f32.mrb[28].mxu0 }
 0x35f   : > { %v2973_v34 = vmul.f32 %v10462_v7, %v8629_v28  ;;  %v2918_v61 = vpop.f32.mrb[29].mxu0 }
 0x360   : > { %v4619_v2 = vpop.permute.xlu1 %4618  ;;  %v4617_v58 = vpop.permute.xlu0 %4616  ;;  %v4762_v44 = vld [vmem:[#allocation5 + $0x80] sm:$0xff]  ;;  %v4763_v45 = vld [vmem:[#allocation5 + $0x88] sm:$0xff]  ;;  %v2972_v54 = vmul.f32 %v10462_v7, %v2918_v61 }
 0x361   : > { %4714 = vst.msk [vmem:[#allocation5 + $0x8] sm:$0xff] %vm4712_vm5, %v4619_v2  ;;  %4713 = vst.msk [vmem:[#allocation5] sm:$0xff] %vm4712_vm5, %v4617_v58  ;;  %v8748_v51 = vpack.c.bf16 %v4763_v45, %v4762_v44  ;;  %v3012_v33 = vadd.f32 %v10479_v22, %v2973_v34 }
 0x362   : > { %4433 = vrot.lane.b32.xlu1 %v10761_v56, %s12529_s28  ;;  %4431 = vrot.lane.b32.xlu0 %v10763_v4, %s12529_s28  ;;  %v3011_v57 = vadd.f32 %v10479_v22, %v2972_v54 }
 0x363   : > { %8750 = vmatprep.subr.msk.bf16.mxu1 %vm10754_vm7, %v8748_v51  ;;  %v3044_v11 = vmax.f32 %v3012_v33, 0.0 }
 0x364   : > { %v3271_v53 = vpop.permute.xlu1 %3270  ;;  %v3269_v41 = vpop.permute.xlu0 %3268  ;;  %v3043_v3 = vmax.f32 %v3011_v57, 0.0 }
 0x365   : > { %3364 = vst.msk [vmem:[#allocation5 + $0x18] sm:$0xff] %vm3360_vm14, %v3271_v53  ;;  %3363 = vst.msk [vmem:[#allocation5 + $0x10] sm:$0xff] %vm3360_vm14, %v3269_v41  ;;  %v10885_v53 = vld [vmem:[#allocation4 + $0x141] sm:$0xff]  ;;  %v10887_v41 = vld [vmem:[#allocation4 + $0x139] sm:$0xff] }
 0x366   : > { %3133 = vst.msk [vmem:[#allocation4 + $0x171] sm:$0xff] %vm3047_vm12, %v3044_v11  ;;  %4658 = vrot.lane.b32.xlu1 %v10775_v62, %s12535_s10  ;;  %4656 = vrot.lane.b32.xlu0 %v10777_v5, %s12535_s10  ;;  %3132 = vst.msk [vmem:[#allocation4 + $0x169] sm:$0xff] %vm3047_vm12, %v3043_v3 }
 0x368   : > { %v3496_v63 = vpop.permute.xlu1 %3495  ;;  %v3494_v1 = vpop.permute.xlu0 %3493  ;;  %v4746_v6 = vld [vmem:[#allocation5] sm:$0xff]  ;;  %v4747_v47 = vld [vmem:[#allocation5 + $0x8] sm:$0xff] }
 0x369   : > { %3573 = vst.msk [vmem:[#allocation5 + $0x98] sm:$0xff] %vm3553_vm15, %v3496_v63  ;;  %3572 = vst.msk [vmem:[#allocation5 + $0x90] sm:$0xff] %vm3553_vm15, %v3494_v1  ;;  %v8751_v8 = vpack.c.bf16 %v4747_v47, %v4746_v6  ;;  %v10895_v47 = vld [vmem:[#allocation4 + $0x81] sm:$0xff] }
 0x36a   : > { %3310 = vrot.lane.b32.xlu1 %v10610_v37, %s12563_s0  ;;  %3308 = vrot.lane.b32.xlu0 %v10612_v24, %s12563_s0 }
 0x36b   : > { %8753 = vmatpush3.bf16.xpose.msk.msra.mxu1 %vm10754_vm7, %v8751_v8  ;;  %v10897_v8 = vld [vmem:[#allocation4 + $0x79] sm:$0xff] }
 0x36c   : > { %v3464_v59 = vpop.permute.xlu1 %3463  ;;  %v3462_v60 = vpop.permute.xlu0 %3461 }
 0x36d   : > { %3557 = vst.msk [vmem:[#allocation5 + $0x18] sm:$0xff] %vm3553_vm15, %v3464_v59  ;;  %3556 = vst.msk [vmem:[#allocation5 + $0x10] sm:$0xff] %vm3553_vm15, %v3462_v60  ;;  %v10799_v36 = vld [vmem:[#allocation4 + $0x170] sm:$0xff]  ;;  %v10801_v17 = vld [vmem:[#allocation4 + $0x168] sm:$0xff] }
 0x36e   : > { %4626 = vrot.lane.b32.xlu1 %v10793_v12, %s12535_s10  ;;  %4624 = vrot.lane.b32.xlu0 %v10797_v13, %s12535_s10  ;;  %3199 = vst.msk [vmem:[#allocation5 + $0xf8] sm:$0xff] %vm3047_vm12, %v10799_v36  ;;  %3198 = vst.msk [vmem:[#allocation5 + $0xf0] sm:$0xff] %vm3047_vm12, %v10801_v17 }
 0x370   : > { %v3689_v37 = vpop.permute.xlu1 %3688  ;;  %v3687_v24 = vpop.permute.xlu0 %3686 }
 0x371   : > { %3766 = vst.msk [vmem:[#allocation5 + $0x98] sm:$0xff] %vm3746_vm0, %v3689_v37  ;;  %3765 = vst.msk [vmem:[#allocation5 + $0x90] sm:$0xff] %vm3746_vm0, %v3687_v24  ;;  %v10907_v24 = vld [vmem:[#allocation4 + $0x142] sm:$0xff] }
 0x372   : > { %3278 = vrot.lane.b32.xlu1 %v10621_v31, %s12563_s0  ;;  %3276 = vrot.lane.b32.xlu0 %v10623_v32, %s12563_s0 }
 0x374   : > { %v3657_v18 = vpop.permute.xlu1 %3656  ;;  %v3655_v19 = vpop.permute.xlu0 %3654 }
 0x375   : > { %3750 = vst.msk [vmem:[#allocation5 + $0x18] sm:$0xff] %vm3746_vm0, %v3657_v18  ;;  %3749 = vst.msk [vmem:[#allocation5 + $0x10] sm:$0xff] %vm3746_vm0, %v3655_v19  ;;  %v10909_v18 = vld [vmem:[#allocation4 + $0x13a] sm:$0xff] }
 0x376   : > { %3503 = vrot.lane.b32.xlu1 %v10631_v38, %s12568_s6  ;;  %3501 = vrot.lane.b32.xlu0 %v10633_v39, %s12568_s6 }
 0x378   : > { %v3882_v20 = vpop.permute.xlu1 %3881  ;;  %v3880_v21 = vpop.permute.xlu0 %3879 }
 0x379   : > { %3959 = vst.msk [vmem:[#allocation5 + $0x98] sm:$0xff] %vm3939_vm1, %v3882_v20  ;;  %3958 = vst.msk [vmem:[#allocation5 + $0x90] sm:$0xff] %vm3939_vm1, %v3880_v21 }
 0x37a   : > { %3471 = vrot.lane.b32.xlu1 %v10645_v40, %s12568_s6  ;;  %3469 = vrot.lane.b32.xlu0 %v10647_v46, %s12568_s6 }
 0x37c   : > { %v8632_v31 = vpop.f32.mrb[30].mxu0  ;;  %v3850_v32 = vpop.permute.xlu1 %3849 }
 0x37d   : > { %v3848_v55 = vpop.permute.xlu0 %3847  ;;  %v2975_v38 = vmul.f32 %v10462_v7, %v8632_v31  ;;  %3943 = vst.msk [vmem:[#allocation5 + $0x18] sm:$0xff] %vm3939_vm1, %v3850_v32  ;;  %v2928_v39 = vpop.f32.mrb[31].mxu0 }
 0x37e   : > { %3942 = vst.msk [vmem:[#allocation5 + $0x10] sm:$0xff] %vm3939_vm1, %v3848_v55  ;;  %3696 = vrot.lane.b32.xlu1 %v10579_v52, %s12564_s29  ;;  %3694 = vrot.lane.b32.xlu0 %v10581_v15, %s12564_s29  ;;  %v2974_v46 = vmul.f32 %v10462_v7, %v2928_v39  ;;  %v10925_v39 = vld [vmem:[#allocation4 + $0x82] sm:$0xff] }
 0x37f   : > { %v3014_v40 = vadd.f32 %v10479_v22, %v2975_v38 }
 0x380   : > { %v4075_v25 = vpop.permute.xlu1 %4074  ;;  %v3013_v61 = vadd.f32 %v10479_v22, %v2974_v46 }
 0x381   : > { %v4073_v28 = vpop.permute.xlu0 %4072  ;;  %v3046_v34 = vmax.f32 %v3014_v40, 0.0  ;;  %4152 = vst.msk [vmem:[#allocation5 + $0x98] sm:$0xff] %vm4132_vm2, %v4075_v25  ;;  %v10927_v40 = vld [vmem:[#allocation4 + $0x7a] sm:$0xff] }
 0x382   : > { %4151 = vst.msk [vmem:[#allocation5 + $0x90] sm:$0xff] %vm4132_vm2, %v4073_v28  ;;  %3664 = vrot.lane.b32.xlu1 %v10307_v29, %s12564_s29  ;;  %3662 = vrot.lane.b32.xlu0 %v10309_v30, %s12564_s29  ;;  %v3045_v52 = vmax.f32 %v3013_v61, 0.0 }
 0x383   : > { %3135 = vst.msk [vmem:[#allocation4 + $0x189] sm:$0xff] %vm3047_vm12, %v3046_v34 }
 0x384   : > { %v4043_v15 = vpop.permute.xlu1 %4042  ;;  %3134 = vst.msk [vmem:[#allocation4 + $0x181] sm:$0xff] %vm3047_vm12, %v3045_v52 }
 0x385   : > { %v4041_v7 = vpop.permute.xlu0 %4040  ;;  %4136 = vst.msk [vmem:[#allocation5 + $0x18] sm:$0xff] %vm4132_vm2, %v4043_v15 }
 0x386   : > { %4135 = vst.msk [vmem:[#allocation5 + $0x10] sm:$0xff] %vm4132_vm2, %v4041_v7  ;;  %3889 = vrot.lane.b32.xlu1 %v10743_v26, %s12527_s11  ;;  %3887 = vrot.lane.b32.xlu0 %v10745_v27, %s12527_s11 }
 0x388   : > { %v4269_v29 = vpop.permute.xlu1 %4268 }
 0x389   : > { %v4267_v22 = vpop.permute.xlu0 %4266  ;;  %4346 = vst.msk [vmem:[#allocation5 + $0x98] sm:$0xff] %vm4326_vm3, %v4269_v29 }
 0x38a   : > { %4345 = vst.msk [vmem:[#allocation5 + $0x90] sm:$0xff] %vm4326_vm3, %v4267_v22  ;;  %3857 = vrot.lane.b32.xlu1 %v10761_v56, %s12527_s11  ;;  %3855 = vrot.lane.b32.xlu0 %v10763_v4, %s12527_s11 }
 0x38c   : > { %v4237_v30 = vpop.permute.xlu1 %4236 }
 0x38d   : > { %v4235_v2 = vpop.permute.xlu0 %4234  ;;  %4330 = vst.msk [vmem:[#allocation5 + $0x18] sm:$0xff] %vm4326_vm3, %v4237_v30 }
 0x38e   : > { %4329 = vst.msk [vmem:[#allocation5 + $0x10] sm:$0xff] %vm4326_vm3, %v4235_v2  ;;  %4082 = vrot.lane.b32.xlu1 %v10775_v62, %s12531_s2  ;;  %4080 = vrot.lane.b32.xlu0 %v10777_v5, %s12531_s2 }
 0x390   : > { %v4462_v58 = vpop.permute.xlu1 %4461 }
 0x391   : > { %v4460_v44 = vpop.permute.xlu0 %4459  ;;  %4539 = vst.msk [vmem:[#allocation5 + $0x98] sm:$0xff] %vm4519_vm4, %v4462_v58  ;;  %v11001_v58 = vld [vmem:[#allocation4 + $0x159] sm:$0xff] }
 0x392   : > { %4538 = vst.msk [vmem:[#allocation5 + $0x90] sm:$0xff] %vm4519_vm4, %v4460_v44  ;;  %4050 = vrot.lane.b32.xlu1 %v10793_v12, %s12531_s2  ;;  %4048 = vrot.lane.b32.xlu0 %v10797_v13, %s12531_s2  ;;  %v11003_v44 = vld [vmem:[#allocation4 + $0x151] sm:$0xff] }
 0x394   : > { %v4430_v45 = vpop.permute.xlu1 %4429 }
 0x395   : > { %v4428_v54 = vpop.permute.xlu0 %4427  ;;  %4523 = vst.msk [vmem:[#allocation5 + $0x18] sm:$0xff] %vm4519_vm4, %v4430_v45 }
 0x396   : > { %4522 = vst.msk [vmem:[#allocation5 + $0x10] sm:$0xff] %vm4519_vm4, %v4428_v54  ;;  %4276 = vrot.lane.b32.xlu1 %v10649_v23, %s12533_s8  ;;  %4274 = vrot.lane.b32.xlu0 %v10651_v48, %s12533_s8 }
 0x398   : > { %v4655_v51 = vpop.permute.xlu1 %4654 }
 0x399   : > { %v4653_v33 = vpop.permute.xlu0 %4652  ;;  %4732 = vst.msk [vmem:[#allocation5 + $0x98] sm:$0xff] %vm4712_vm5, %v4655_v51 }
 0x39a   : > { %4731 = vst.msk [vmem:[#allocation5 + $0x90] sm:$0xff] %vm4712_vm5, %v4653_v33  ;;  %4244 = vrot.lane.b32.xlu1 %v10347_v9, %s12533_s8  ;;  %4242 = vrot.lane.b32.xlu0 %v10349_v10, %s12533_s8 }
 0x39c   : > { %v3307_v57 = vpop.permute.xlu1 %3306 }
 0x39d   : > { %v3305_v11 = vpop.permute.xlu0 %3304  ;;  %3382 = vst.msk [vmem:[#allocation5 + $0xa8] sm:$0xff] %vm3360_vm14, %v3307_v57  ;;  %v11011_v57 = vld [vmem:[#allocation4 + $0x99] sm:$0xff] }
 0x39e   : > { %3381 = vst.msk [vmem:[#allocation5 + $0xa0] sm:$0xff] %vm3360_vm14, %v3305_v11  ;;  %4469 = vrot.lane.b32.xlu1 %v10885_v53, %s12529_s28  ;;  %4467 = vrot.lane.b32.xlu0 %v10887_v41, %s12529_s28  ;;  %v11013_v11 = vld [vmem:[#allocation4 + $0x91] sm:$0xff] }
 0x3a0   : > { %v4623_v3 = vpop.permute.xlu1 %4622  ;;  %v4765_v6 = vld [vmem:[#allocation5 + $0x98] sm:$0xff] }
 0x3a1   : > { %v4621_v63 = vpop.permute.xlu0 %4620  ;;  %v4764_v1 = vld [vmem:[#allocation5 + $0x90] sm:$0xff]  ;;  %4716 = vst.msk [vmem:[#allocation5 + $0x18] sm:$0xff] %vm4712_vm5, %v4623_v3 }
 0x3a2   : > { %4715 = vst.msk [vmem:[#allocation5 + $0x10] sm:$0xff] %vm4712_vm5, %v4621_v63  ;;  %v8754_v59 = vpack.c.bf16 %v4765_v6, %v4764_v1  ;;  %4437 = vrot.lane.b32.xlu1 %v10895_v47, %s12529_s28  ;;  %4435 = vrot.lane.b32.xlu0 %v10897_v8, %s12529_s28  ;;  %v11023_v6 = vld [vmem:[#allocation4 + $0x15a] sm:$0xff] }
 0x3a4   : > { %8756 = vmatprep.subr.msk.bf16.mxu1 %vm10754_vm7, %v8754_v59  ;;  %v3275_v60 = vpop.permute.xlu1 %3274  ;;  %v11025_v59 = vld [vmem:[#allocation4 + $0x152] sm:$0xff] }
 0x3a5   : > { %v3273_v37 = vpop.permute.xlu0 %3272  ;;  %3366 = vst.msk [vmem:[#allocation5 + $0x28] sm:$0xff] %vm3360_vm14, %v3275_v60 }
 0x3a6   : > { %3365 = vst.msk [vmem:[#allocation5 + $0x20] sm:$0xff] %vm3360_vm14, %v3273_v37  ;;  %4662 = vrot.lane.b32.xlu1 %v10907_v24, %s12535_s10  ;;  %4660 = vrot.lane.b32.xlu0 %v10909_v18, %s12535_s10 }
 0x3a8   : > { %v3500_v19 = vpop.permute.xlu1 %3499  ;;  %v4749_v31 = vld [vmem:[#allocation5 + $0x18] sm:$0xff] }
 0x3a9   : > { %v3498_v20 = vpop.permute.xlu0 %3497  ;;  %v4748_v21 = vld [vmem:[#allocation5 + $0x10] sm:$0xff]  ;;  %3575 = vst.msk [vmem:[#allocation5 + $0xa8] sm:$0xff] %vm3553_vm15, %v3500_v19 }
 0x3aa   : > { %3574 = vst.msk [vmem:[#allocation5 + $0xa0] sm:$0xff] %vm3553_vm15, %v3498_v20  ;;  %v8757_v32 = vpack.c.bf16 %v4749_v31, %v4748_v21  ;;  %3314 = vrot.lane.b32.xlu1 %v10743_v26, %s12563_s0  ;;  %3312 = vrot.lane.b32.xlu0 %v10745_v27, %s12563_s0 }
 0x3ac   : > { %8759 = vmatpush3.bf16.xpose.msk.msra.mxu1 %vm10754_vm7, %v8757_v32  ;;  %v3468_v55 = vpop.permute.xlu1 %3467 }
 0x3ad   : > { %v3466_v38 = vpop.permute.xlu0 %3465  ;;  %3559 = vst.msk [vmem:[#allocation5 + $0x28] sm:$0xff] %vm3553_vm15, %v3468_v55  ;;  %v11041_v55 = vld [vmem:[#allocation4 + $0x9a] sm:$0xff] }
 0x3ae   : > { %3558 = vst.msk [vmem:[#allocation5 + $0x20] sm:$0xff] %vm3553_vm15, %v3466_v38  ;;  %4630 = vrot.lane.b32.xlu1 %v10925_v39, %s12535_s10  ;;  %4628 = vrot.lane.b32.xlu0 %v10927_v40, %s12535_s10  ;;  %v11043_v38 = vld [vmem:[#allocation4 + $0x92] sm:$0xff] }
 0x3b0   : > { %v3693_v26 = vpop.permute.xlu1 %3692 }
 0x3b1   : > { %v3691_v27 = vpop.permute.xlu0 %3690  ;;  %3768 = vst.msk [vmem:[#allocation5 + $0xa8] sm:$0xff] %vm3746_vm0, %v3693_v26 }
 0x3b2   : > { %3767 = vst.msk [vmem:[#allocation5 + $0xa0] sm:$0xff] %vm3746_vm0, %v3691_v27  ;;  %3282 = vrot.lane.b32.xlu1 %v10761_v56, %s12563_s0  ;;  %3280 = vrot.lane.b32.xlu0 %v10763_v4, %s12563_s0 }
 0x3b4   : > { %v3661_v46 = vpop.permute.xlu1 %3660 }
 0x3b5   : > { %v3659_v25 = vpop.permute.xlu0 %3658  ;;  %3752 = vst.msk [vmem:[#allocation5 + $0x28] sm:$0xff] %vm3746_vm0, %v3661_v46 }
 0x3b6   : > { %3751 = vst.msk [vmem:[#allocation5 + $0x20] sm:$0xff] %vm3746_vm0, %v3659_v25  ;;  %3507 = vrot.lane.b32.xlu1 %v10775_v62, %s12568_s6  ;;  %3505 = vrot.lane.b32.xlu0 %v10777_v5, %s12568_s6 }
 0x3b8   : > { %v3886_v28 = vpop.permute.xlu1 %3885 }
 0x3b9   : > { %v3884_v34 = vpop.permute.xlu0 %3883  ;;  %3961 = vst.msk [vmem:[#allocation5 + $0xa8] sm:$0xff] %vm3939_vm1, %v3886_v28 }
 0x3ba   : > { %3960 = vst.msk [vmem:[#allocation5 + $0xa0] sm:$0xff] %vm3939_vm1, %v3884_v34  ;;  %3475 = vrot.lane.b32.xlu1 %v10793_v12, %s12568_s6  ;;  %3473 = vrot.lane.b32.xlu0 %v10797_v13, %s12568_s6 }
 0x3bc   : > { %v3854_v56 = vpop.permute.xlu1 %3853 }
 0x3bd   : > { %v3852_v4 = vpop.permute.xlu0 %3851  ;;  %3945 = vst.msk [vmem:[#allocation5 + $0x28] sm:$0xff] %vm3939_vm1, %v3854_v56 }
 0x3be   : > { %3944 = vst.msk [vmem:[#allocation5 + $0x20] sm:$0xff] %vm3939_vm1, %v3852_v4  ;;  %3700 = vrot.lane.b32.xlu1 %v10649_v23, %s12564_s29  ;;  %3698 = vrot.lane.b32.xlu0 %v10651_v48, %s12564_s29 }
 0x3c0   : > { %v4079_v62 = vpop.permute.xlu1 %4078 }
 0x3c1   : > { %v4077_v5 = vpop.permute.xlu0 %4076  ;;  %4154 = vst.msk [vmem:[#allocation5 + $0xa8] sm:$0xff] %vm4132_vm2, %v4079_v62 }
 0x3c2   : > { %4153 = vst.msk [vmem:[#allocation5 + $0xa0] sm:$0xff] %vm4132_vm2, %v4077_v5  ;;  %3668 = vrot.lane.b32.xlu1 %v10347_v9, %s12564_s29  ;;  %3666 = vrot.lane.b32.xlu0 %v10349_v10, %s12564_s29 }
 0x3c4   : > { %v4047_v12 = vpop.permute.xlu1 %4046 }
 0x3c5   : > { %v4045_v13 = vpop.permute.xlu0 %4044  ;;  %4138 = vst.msk [vmem:[#allocation5 + $0x28] sm:$0xff] %vm4132_vm2, %v4047_v12 }
 0x3c6   : > { %4137 = vst.msk [vmem:[#allocation5 + $0x20] sm:$0xff] %vm4132_vm2, %v4045_v13  ;;  %3893 = vrot.lane.b32.xlu1 %v10885_v53, %s12527_s11  ;;  %3891 = vrot.lane.b32.xlu0 %v10887_v41, %s12527_s11 }
 0x3c8   : > { %v4273_v23 = vpop.permute.xlu1 %4272 }
 0x3c9   : > { %v4271_v48 = vpop.permute.xlu0 %4270  ;;  %4348 = vst.msk [vmem:[#allocation5 + $0xa8] sm:$0xff] %vm4326_vm3, %v4273_v23  ;;  %v11117_v23 = vld [vmem:[#allocation4 + $0x171] sm:$0xff] }
 0x3ca   : > { %4347 = vst.msk [vmem:[#allocation5 + $0xa0] sm:$0xff] %vm4326_vm3, %v4271_v48  ;;  %3861 = vrot.lane.b32.xlu1 %v10895_v47, %s12527_s11  ;;  %3859 = vrot.lane.b32.xlu0 %v10897_v8, %s12527_s11  ;;  %v11119_v48 = vld [vmem:[#allocation4 + $0x169] sm:$0xff] }
 0x3cc   : > { %v4241_v9 = vpop.permute.xlu1 %4240 }
 0x3cd   : > { %v4239_v10 = vpop.permute.xlu0 %4238  ;;  %4332 = vst.msk [vmem:[#allocation5 + $0x28] sm:$0xff] %vm4326_vm3, %v4241_v9 }
 0x3ce   : > { %4331 = vst.msk [vmem:[#allocation5 + $0x20] sm:$0xff] %vm4326_vm3, %v4239_v10  ;;  %4086 = vrot.lane.b32.xlu1 %v10907_v24, %s12531_s2  ;;  %4084 = vrot.lane.b32.xlu0 %v10909_v18, %s12531_s2 }
 0x3d0   : > { %v4466_v61 = vpop.permute.xlu1 %4465 }
 0x3d1   : > { %v4464_v52 = vpop.permute.xlu0 %4463  ;;  %4541 = vst.msk [vmem:[#allocation5 + $0xa8] sm:$0xff] %vm4519_vm4, %v4466_v61 }
 0x3d2   : > { %4540 = vst.msk [vmem:[#allocation5 + $0xa0] sm:$0xff] %vm4519_vm4, %v4464_v52  ;;  %4054 = vrot.lane.b32.xlu1 %v10925_v39, %s12531_s2  ;;  %4052 = vrot.lane.b32.xlu0 %v10927_v40, %s12531_s2 }
 0x3d4   : > { %v4434_v15 = vpop.permute.xlu1 %4433 }
 0x3d5   : > { %v4432_v7 = vpop.permute.xlu0 %4431  ;;  %4525 = vst.msk [vmem:[#allocation5 + $0x28] sm:$0xff] %vm4519_vm4, %v4434_v15  ;;  %v11127_v15 = vld [vmem:[#allocation4 + $0xb1] sm:$0xff] }
 0x3d6   : > { %4524 = vst.msk [vmem:[#allocation5 + $0x20] sm:$0xff] %vm4519_vm4, %v4432_v7  ;;  %4280 = vrot.lane.b32.xlu1 %v10711_v50, %s12533_s8  ;;  %4278 = vrot.lane.b32.xlu0 %v10713_v16, %s12533_s8  ;;  %v11129_v7 = vld [vmem:[#allocation4 + $0xa9] sm:$0xff] }
 0x3d8   : > { %v4659_v29 = vpop.permute.xlu1 %4658 }
 0x3d9   : > { %v4657_v22 = vpop.permute.xlu0 %4656  ;;  %4734 = vst.msk [vmem:[#allocation5 + $0xa8] sm:$0xff] %vm4712_vm5, %v4659_v29 }
 0x3da   : > { %4733 = vst.msk [vmem:[#allocation5 + $0xa0] sm:$0xff] %vm4712_vm5, %v4657_v22  ;;  %4248 = vrot.lane.b32.xlu1 %v10379_v42, %s12533_s8  ;;  %4246 = vrot.lane.b32.xlu0 %v10381_v43, %s12533_s8 }
 0x3dc   : > { %v3311_v30 = vpop.permute.xlu1 %3310 }
 0x3dd   : > { %v3309_v2 = vpop.permute.xlu0 %3308  ;;  %3384 = vst.msk [vmem:[#allocation5 + $0xb8] sm:$0xff] %vm3360_vm14, %v3311_v30 }
 0x3de   : > { %3383 = vst.msk [vmem:[#allocation5 + $0xb0] sm:$0xff] %vm3360_vm14, %v3309_v2  ;;  %4473 = vrot.lane.b32.xlu1 %v11001_v58, %s12529_s28  ;;  %4471 = vrot.lane.b32.xlu0 %v11003_v44, %s12529_s28  ;;  %v11139_v2 = vld [vmem:[#allocation4 + $0x172] sm:$0xff] }
 0x3e0   : > { %v4627_v45 = vpop.permute.xlu1 %4626  ;;  %v4767_v33 = vld [vmem:[#allocation5 + $0xa8] sm:$0xff] }
 0x3e1   : > { %v4625_v54 = vpop.permute.xlu0 %4624  ;;  %v4766_v51 = vld [vmem:[#allocation5 + $0xa0] sm:$0xff]  ;;  %4718 = vst.msk [vmem:[#allocation5 + $0x28] sm:$0xff] %vm4712_vm5, %v4627_v45 }
 0x3e2   : > { %4717 = vst.msk [vmem:[#allocation5 + $0x20] sm:$0xff] %vm4712_vm5, %v4625_v54  ;;  %v8760_v3 = vpack.c.bf16 %v4767_v33, %v4766_v51  ;;  %4441 = vrot.lane.b32.xlu1 %v11011_v57, %s12529_s28  ;;  %4439 = vrot.lane.b32.xlu0 %v11013_v11, %s12529_s28  ;;  %v11141_v45 = vld [vmem:[#allocation4 + $0x16a] sm:$0xff] }
 0x3e4   : > { %8762 = vmatprep.subr.msk.bf16.mxu1 %vm10754_vm7, %v8760_v3  ;;  %v3279_v63 = vpop.permute.xlu1 %3278 }
 0x3e5   : > { %v3277_v1 = vpop.permute.xlu0 %3276  ;;  %3368 = vst.msk [vmem:[#allocation5 + $0x38] sm:$0xff] %vm3360_vm14, %v3279_v63 }
 0x3e6   : > { %3367 = vst.msk [vmem:[#allocation5 + $0x30] sm:$0xff] %vm3360_vm14, %v3277_v1  ;;  %4666 = vrot.lane.b32.xlu1 %v11023_v6, %s12535_s10  ;;  %4664 = vrot.lane.b32.xlu0 %v11025_v59, %s12535_s10 }
 0x3e8   : > { %v3504_v60 = vpop.permute.xlu1 %3503  ;;  %v4751_v20 = vld [vmem:[#allocation5 + $0x28] sm:$0xff] }
 0x3e9   : > { %v3502_v37 = vpop.permute.xlu0 %3501  ;;  %v4750_v19 = vld [vmem:[#allocation5 + $0x20] sm:$0xff]  ;;  %3577 = vst.msk [vmem:[#allocation5 + $0xb8] sm:$0xff] %vm3553_vm15, %v3504_v60 }
 0x3ea   : > { %3576 = vst.msk [vmem:[#allocation5 + $0xb0] sm:$0xff] %vm3553_vm15, %v3502_v37  ;;  %v8763_v21 = vpack.c.bf16 %v4751_v20, %v4750_v19  ;;  %3318 = vrot.lane.b32.xlu1 %v10885_v53, %s12563_s0  ;;  %3316 = vrot.lane.b32.xlu0 %v10887_v41, %s12563_s0  ;;  %v11157_v37 = vld [vmem:[#allocation4 + $0xb2] sm:$0xff]  ;;  %v11159_v19 = vld [vmem:[#allocation4 + $0xaa] sm:$0xff] }
 0x3ec   : > { %8765 = vmatpush3.bf16.xpose.msk.msra.mxu1 %vm10754_vm7, %v8763_v21  ;;  %v3472_v31 = vpop.permute.xlu1 %3471 }
 0x3ed   : > { %v3470_v32 = vpop.permute.xlu0 %3469  ;;  %3561 = vst.msk [vmem:[#allocation5 + $0x38] sm:$0xff] %vm3553_vm15, %v3472_v31 }
 0x3ee   : > { %3560 = vst.msk [vmem:[#allocation5 + $0x30] sm:$0xff] %vm3553_vm15, %v3470_v32  ;;  %4634 = vrot.lane.b32.xlu1 %v11041_v55, %s12535_s10  ;;  %4632 = vrot.lane.b32.xlu0 %v11043_v38, %s12535_s10 }
 0x3f0   : > { %v3697_v53 = vpop.permute.xlu1 %3696 }
 0x3f1   : > { %v3695_v41 = vpop.permute.xlu0 %3694  ;;  %3770 = vst.msk [vmem:[#allocation5 + $0xb8] sm:$0xff] %vm3746_vm0, %v3697_v53 }
 0x3f2   : > { %3769 = vst.msk [vmem:[#allocation5 + $0xb0] sm:$0xff] %vm3746_vm0, %v3695_v41  ;;  %3286 = vrot.lane.b32.xlu1 %v10895_v47, %s12563_s0  ;;  %3284 = vrot.lane.b32.xlu0 %v10897_v8, %s12563_s0 }
 0x3f4   : > { %v3665_v26 = vpop.permute.xlu1 %3664 }
 0x3f5   : > { %v3663_v27 = vpop.permute.xlu0 %3662  ;;  %3754 = vst.msk [vmem:[#allocation5 + $0x38] sm:$0xff] %vm3746_vm0, %v3665_v26 }
 0x3f6   : > { %3753 = vst.msk [vmem:[#allocation5 + $0x30] sm:$0xff] %vm3746_vm0, %v3663_v27  ;;  %3511 = vrot.lane.b32.xlu1 %v10907_v24, %s12568_s6  ;;  %3509 = vrot.lane.b32.xlu0 %v10909_v18, %s12568_s6 }
 0x3f8   : > { %v3890_v46 = vpop.permute.xlu1 %3889 }
 0x3f9   : > { %v3888_v25 = vpop.permute.xlu0 %3887  ;;  %3963 = vst.msk [vmem:[#allocation5 + $0xb8] sm:$0xff] %vm3939_vm1, %v3890_v46  ;;  %v11221_v46 = vld [vmem:[#allocation4 + $0x188] sm:$0xff] }
 0x3fa   : > { %3962 = vst.msk [vmem:[#allocation5 + $0xb0] sm:$0xff] %vm3939_vm1, %v3888_v25  ;;  %3479 = vrot.lane.b32.xlu1 %v10925_v39, %s12568_s6  ;;  %3477 = vrot.lane.b32.xlu0 %v10927_v40, %s12568_s6  ;;  %v11223_v25 = vld [vmem:[#allocation4 + $0x180] sm:$0xff] }
 0x3fc   : > { %v3858_v47 = vpop.permute.xlu1 %3857 }
 0x3fd   : > { %v3856_v8 = vpop.permute.xlu0 %3855  ;;  %3947 = vst.msk [vmem:[#allocation5 + $0x38] sm:$0xff] %vm3939_vm1, %v3858_v47 }
 0x3fe   : > { %3946 = vst.msk [vmem:[#allocation5 + $0x30] sm:$0xff] %vm3939_vm1, %v3856_v8  ;;  %3704 = vrot.lane.b32.xlu1 %v10711_v50, %s12564_s29  ;;  %3702 = vrot.lane.b32.xlu0 %v10713_v16, %s12564_s29 }
 0x400   : > { %v4083_v24 = vpop.permute.xlu1 %4082 }
 0x401   : > { %v4081_v18 = vpop.permute.xlu0 %4080  ;;  %4156 = vst.msk [vmem:[#allocation5 + $0xb8] sm:$0xff] %vm4132_vm2, %v4083_v24  ;;  %v11231_v24 = vld [vmem:[#allocation4 + $0xc8] sm:$0xff] }
 0x402   : > { %4155 = vst.msk [vmem:[#allocation5 + $0xb0] sm:$0xff] %vm4132_vm2, %v4081_v18  ;;  %3672 = vrot.lane.b32.xlu1 %v10379_v42, %s12564_s29  ;;  %3670 = vrot.lane.b32.xlu0 %v10381_v43, %s12564_s29  ;;  %v11233_v18 = vld [vmem:[#allocation4 + $0xc0] sm:$0xff] }
 0x404   : > { %v4051_v39 = vpop.permute.xlu1 %4050 }
 0x405   : > { %v4049_v40 = vpop.permute.xlu0 %4048  ;;  %4140 = vst.msk [vmem:[#allocation5 + $0x38] sm:$0xff] %vm4132_vm2, %v4051_v39 }
 0x406   : > { %4139 = vst.msk [vmem:[#allocation5 + $0x30] sm:$0xff] %vm4132_vm2, %v4049_v40  ;;  %3897 = vrot.lane.b32.xlu1 %v11001_v58, %s12527_s11  ;;  %3895 = vrot.lane.b32.xlu0 %v11003_v44, %s12527_s11 }
 0x408   : > { %v4277_v50 = vpop.permute.xlu1 %4276 }
 0x409   : > { %v4275_v16 = vpop.permute.xlu0 %4274  ;;  %4350 = vst.msk [vmem:[#allocation5 + $0xb8] sm:$0xff] %vm4326_vm3, %v4277_v50  ;;  %v11241_v50 = vld [vmem:[#allocation4 + $0x189] sm:$0xff] }
 0x40a   : > { %4349 = vst.msk [vmem:[#allocation5 + $0xb0] sm:$0xff] %vm4326_vm3, %v4275_v16  ;;  %3865 = vrot.lane.b32.xlu1 %v11011_v57, %s12527_s11  ;;  %3863 = vrot.lane.b32.xlu0 %v11013_v11, %s12527_s11  ;;  %v11243_v16 = vld [vmem:[#allocation4 + $0x181] sm:$0xff] }
 0x40c   : > { %v4245_v42 = vpop.permute.xlu1 %4244 }
 0x40d   : > { %v4243_v43 = vpop.permute.xlu0 %4242  ;;  %4334 = vst.msk [vmem:[#allocation5 + $0x38] sm:$0xff] %vm4326_vm3, %v4245_v42 }
 0x40e   : > { %4333 = vst.msk [vmem:[#allocation5 + $0x30] sm:$0xff] %vm4326_vm3, %v4243_v43  ;;  %4090 = vrot.lane.b32.xlu1 %v11023_v6, %s12531_s2  ;;  %4088 = vrot.lane.b32.xlu0 %v11025_v59, %s12531_s2 }
 0x410   : > { %v4470_v28 = vpop.permute.xlu1 %4469 }
 0x411   : > { %v4468_v34 = vpop.permute.xlu0 %4467  ;;  %4543 = vst.msk [vmem:[#allocation5 + $0xb8] sm:$0xff] %vm4519_vm4, %v4470_v28 }
 0x412   : > { %4542 = vst.msk [vmem:[#allocation5 + $0xb0] sm:$0xff] %vm4519_vm4, %v4468_v34  ;;  %4058 = vrot.lane.b32.xlu1 %v11041_v55, %s12531_s2  ;;  %4056 = vrot.lane.b32.xlu0 %v11043_v38, %s12531_s2 }
 0x414   : > { %v4438_v56 = vpop.permute.xlu1 %4437 }
 0x415   : > { %v4436_v4 = vpop.permute.xlu0 %4435  ;;  %4527 = vst.msk [vmem:[#allocation5 + $0x38] sm:$0xff] %vm4519_vm4, %v4438_v56  ;;  %v11251_v56 = vld [vmem:[#allocation4 + $0xc9] sm:$0xff] }
 0x416   : > { %4526 = vst.msk [vmem:[#allocation5 + $0x30] sm:$0xff] %vm4519_vm4, %v4436_v4  ;;  %4284 = vrot.lane.b32.xlu1 %v10799_v36, %s12533_s8  ;;  %4282 = vrot.lane.b32.xlu0 %v10801_v17, %s12533_s8  ;;  %v11253_v4 = vld [vmem:[#allocation4 + $0xc1] sm:$0xff] }
 0x418   : > { %v4663_v62 = vpop.permute.xlu1 %4662 }
 0x419   : > { %v4661_v5 = vpop.permute.xlu0 %4660  ;;  %4736 = vst.msk [vmem:[#allocation5 + $0xb8] sm:$0xff] %vm4712_vm5, %v4663_v62 }
 0x41a   : > { %4735 = vst.msk [vmem:[#allocation5 + $0xb0] sm:$0xff] %vm4712_vm5, %v4661_v5  ;;  %4252 = vrot.lane.b32.xlu1 %v10411_v14, %s12533_s8  ;;  %4250 = vrot.lane.b32.xlu0 %v10413_v35, %s12533_s8 }
 0x41c   : > { %v3315_v12 = vpop.permute.xlu1 %3314 }
 0x41d   : > { %v3313_v13 = vpop.permute.xlu0 %3312  ;;  %3386 = vst.msk [vmem:[#allocation5 + $0xc8] sm:$0xff] %vm3360_vm14, %v3315_v12 }
 0x41e   : > { %3385 = vst.msk [vmem:[#allocation5 + $0xc0] sm:$0xff] %vm3360_vm14, %v3313_v13  ;;  %4477 = vrot.lane.b32.xlu1 %v11117_v23, %s12529_s28  ;;  %4475 = vrot.lane.b32.xlu0 %v11119_v48, %s12529_s28  ;;  %v11263_v13 = vld [vmem:[#allocation4 + $0x18a] sm:$0xff] }
 0x420   : > { %v4631_v9 = vpop.permute.xlu1 %4630  ;;  %v4769_v52 = vld [vmem:[#allocation5 + $0xb8] sm:$0xff] }
 0x421   : > { %v4629_v10 = vpop.permute.xlu0 %4628  ;;  %v4768_v61 = vld [vmem:[#allocation5 + $0xb0] sm:$0xff]  ;;  %4720 = vst.msk [vmem:[#allocation5 + $0x38] sm:$0xff] %vm4712_vm5, %v4631_v9 }
 0x422   : > { %4719 = vst.msk [vmem:[#allocation5 + $0x30] sm:$0xff] %vm4712_vm5, %v4629_v10  ;;  %v8766_v29 = vpack.c.bf16 %v4769_v52, %v4768_v61  ;;  %4445 = vrot.lane.b32.xlu1 %v11127_v15, %s12529_s28  ;;  %4443 = vrot.lane.b32.xlu0 %v11129_v7, %s12529_s28  ;;  %v11265_v9 = vld [vmem:[#allocation4 + $0x182] sm:$0xff] }
 0x424   : > { %8768 = vmatprep.subr.msk.bf16.mxu1 %vm10754_vm7, %v8766_v29  ;;  %v3283_v22 = vpop.permute.xlu1 %3282 }
 0x425   : > { %v3281_v30 = vpop.permute.xlu0 %3280  ;;  %3370 = vst.msk [vmem:[#allocation5 + $0x48] sm:$0xff] %vm3360_vm14, %v3283_v22 }
 0x426   : > { %3369 = vst.msk [vmem:[#allocation5 + $0x40] sm:$0xff] %vm3360_vm14, %v3281_v30  ;;  %4670 = vrot.lane.b32.xlu1 %v11139_v2, %s12535_s10  ;;  %4668 = vrot.lane.b32.xlu0 %v11141_v45, %s12535_s10 }
 0x428   : > { %v3508_v54 = vpop.permute.xlu1 %3507  ;;  %v4753_v3 = vld [vmem:[#allocation5 + $0x38] sm:$0xff] }
 0x429   : > { %v3506_v51 = vpop.permute.xlu0 %3505  ;;  %v4752_v33 = vld [vmem:[#allocation5 + $0x30] sm:$0xff]  ;;  %3579 = vst.msk [vmem:[#allocation5 + $0xc8] sm:$0xff] %vm3553_vm15, %v3508_v54 }
 0x42a   : > { %3578 = vst.msk [vmem:[#allocation5 + $0xc0] sm:$0xff] %vm3553_vm15, %v3506_v51  ;;  %v8769_v63 = vpack.c.bf16 %v4753_v3, %v4752_v33  ;;  %3322 = vrot.lane.b32.xlu1 %v11001_v58, %s12563_s0  ;;  %3320 = vrot.lane.b32.xlu0 %v11003_v44, %s12563_s0  ;;  %v4565_v51 = vld [vmem:[#allocation4 + $0xca] sm:$0xff]  ;;  %v4564_v33 = vld [vmem:[#allocation4 + $0xc2] sm:$0xff] }
 0x42c   : > { %8771 = vmatpush3.bf16.xpose.msk.msra.mxu1 %vm10754_vm7, %v8769_v63  ;;  %v3476_v1 = vpop.permute.xlu1 %3475 }
 0x42d   : > { %v3474_v60 = vpop.permute.xlu0 %3473  ;;  %3563 = vst.msk [vmem:[#allocation5 + $0x48] sm:$0xff] %vm3553_vm15, %v3476_v1 }
 0x42e   : > { %3562 = vst.msk [vmem:[#allocation5 + $0x40] sm:$0xff] %vm3553_vm15, %v3474_v60  ;;  %4638 = vrot.lane.b32.xlu1 %v11157_v37, %s12535_s10  ;;  %4636 = vrot.lane.b32.xlu0 %v11159_v19, %s12535_s10 }
 0x430   : > { %v3701_v58 = vpop.permute.xlu1 %3700 }
 0x431   : > { %v3699_v44 = vpop.permute.xlu0 %3698  ;;  %3772 = vst.msk [vmem:[#allocation5 + $0xc8] sm:$0xff] %vm3746_vm0, %v3701_v58 }
 0x432   : > { %3771 = vst.msk [vmem:[#allocation5 + $0xc0] sm:$0xff] %vm3746_vm0, %v3699_v44  ;;  %3290 = vrot.lane.b32.xlu1 %v11011_v57, %s12563_s0  ;;  %3288 = vrot.lane.b32.xlu0 %v11013_v11, %s12563_s0 }
 0x434   : > { %v3669_v20 = vpop.permute.xlu1 %3668 }
 0x435   : > { %v3667_v21 = vpop.permute.xlu0 %3666  ;;  %3756 = vst.msk [vmem:[#allocation5 + $0x48] sm:$0xff] %vm3746_vm0, %v3669_v20 }
 0x436   : > { %3755 = vst.msk [vmem:[#allocation5 + $0x40] sm:$0xff] %vm3746_vm0, %v3667_v21  ;;  %3515 = vrot.lane.b32.xlu1 %v11023_v6, %s12568_s6  ;;  %3513 = vrot.lane.b32.xlu0 %v11025_v59, %s12568_s6 }
 0x438   : > { %v3894_v31 = vpop.permute.xlu1 %3893 }
 0x439   : > { %v3892_v32 = vpop.permute.xlu0 %3891  ;;  %3965 = vst.msk [vmem:[#allocation5 + $0xc8] sm:$0xff] %vm3939_vm1, %v3894_v31 }
 0x43a   : > { %3964 = vst.msk [vmem:[#allocation5 + $0xc0] sm:$0xff] %vm3939_vm1, %v3892_v32  ;;  %3483 = vrot.lane.b32.xlu1 %v11041_v55, %s12568_s6  ;;  %3481 = vrot.lane.b32.xlu0 %v11043_v38, %s12568_s6 }
 0x43c   : > { %v3862_v57 = vpop.permute.xlu1 %3861 }
 0x43d   : > { %v3860_v11 = vpop.permute.xlu0 %3859  ;;  %3949 = vst.msk [vmem:[#allocation5 + $0x48] sm:$0xff] %vm3939_vm1, %v3862_v57  ;;  %v4197_v57 = vld [vmem:[#allocation4 + $0x1a0] sm:$0xff] }
 0x43e   : > { %3948 = vst.msk [vmem:[#allocation5 + $0x40] sm:$0xff] %vm3939_vm1, %v3860_v11  ;;  %3708 = vrot.lane.b32.xlu1 %v10799_v36, %s12564_s29  ;;  %3706 = vrot.lane.b32.xlu0 %v10801_v17, %s12564_s29  ;;  %v4196_v11 = vld [vmem:[#allocation4 + $0x198] sm:$0xff] }
 0x440   : > { %v4087_v6 = vpop.permute.xlu1 %4086 }
 0x441   : > { %v4085_v59 = vpop.permute.xlu0 %4084  ;;  %4158 = vst.msk [vmem:[#allocation5 + $0xc8] sm:$0xff] %vm4132_vm2, %v4087_v6 }
 0x442   : > { %4157 = vst.msk [vmem:[#allocation5 + $0xc0] sm:$0xff] %vm4132_vm2, %v4085_v59  ;;  %3676 = vrot.lane.b32.xlu1 %v10411_v14, %s12564_s29  ;;  %3674 = vrot.lane.b32.xlu0 %v10413_v35, %s12564_s29 }
 0x444   : > { %v4055_v55 = vpop.permute.xlu1 %4054 }
 0x445   : > { %v4053_v38 = vpop.permute.xlu0 %4052  ;;  %4142 = vst.msk [vmem:[#allocation5 + $0x48] sm:$0xff] %vm4132_vm2, %v4055_v55 }
 0x446   : > { %4141 = vst.msk [vmem:[#allocation5 + $0x40] sm:$0xff] %vm4132_vm2, %v4053_v38  ;;  %3901 = vrot.lane.b32.xlu1 %v11117_v23, %s12527_s11  ;;  %3899 = vrot.lane.b32.xlu0 %v11119_v48, %s12527_s11 }
 0x448   : > { %v4281_v36 = vpop.permute.xlu1 %4280 }
 0x449   : > { %v4279_v17 = vpop.permute.xlu0 %4278  ;;  %4352 = vst.msk [vmem:[#allocation5 + $0xc8] sm:$0xff] %vm4326_vm3, %v4281_v36  ;;  %v4181_v36 = vld [vmem:[#allocation4 + $0xe0] sm:$0xff] }
 0x44a   : > { %4351 = vst.msk [vmem:[#allocation5 + $0xc0] sm:$0xff] %vm4326_vm3, %v4279_v17  ;;  %3869 = vrot.lane.b32.xlu1 %v11127_v15, %s12527_s11  ;;  %3867 = vrot.lane.b32.xlu0 %v11129_v7, %s12527_s11  ;;  %v4180_v17 = vld [vmem:[#allocation4 + $0xd8] sm:$0xff] }
 0x44c   : > { %v4249_v14 = vpop.permute.xlu1 %4248 }
 0x44d   : > { %v4247_v35 = vpop.permute.xlu0 %4246  ;;  %4336 = vst.msk [vmem:[#allocation5 + $0x48] sm:$0xff] %vm4326_vm3, %v4249_v14  ;;  %v4390_v14 = vld [vmem:[#allocation4 + $0x1a1] sm:$0xff] }
 0x44e   : > { %4335 = vst.msk [vmem:[#allocation5 + $0x40] sm:$0xff] %vm4326_vm3, %v4247_v35  ;;  %4094 = vrot.lane.b32.xlu1 %v11139_v2, %s12531_s2  ;;  %4092 = vrot.lane.b32.xlu0 %v11141_v45, %s12531_s2  ;;  %v4389_v35 = vld [vmem:[#allocation4 + $0x199] sm:$0xff] }
 0x450   : > { %v4474_v53 = vpop.permute.xlu1 %4473 }
 0x451   : > { %v4472_v41 = vpop.permute.xlu0 %4471  ;;  %4545 = vst.msk [vmem:[#allocation5 + $0xc8] sm:$0xff] %vm4519_vm4, %v4474_v53 }
 0x452   : > { %4544 = vst.msk [vmem:[#allocation5 + $0xc0] sm:$0xff] %vm4519_vm4, %v4472_v41  ;;  %4062 = vrot.lane.b32.xlu1 %v11157_v37, %s12531_s2  ;;  %4060 = vrot.lane.b32.xlu0 %v11159_v19, %s12531_s2 }
 0x454   : > { %v4442_v26 = vpop.permute.xlu1 %4441 }
 0x455   : > { %v4440_v27 = vpop.permute.xlu0 %4439  ;;  %4529 = vst.msk [vmem:[#allocation5 + $0x48] sm:$0xff] %vm4519_vm4, %v4442_v26 }
 0x456   : > { %4528 = vst.msk [vmem:[#allocation5 + $0x40] sm:$0xff] %vm4519_vm4, %v4440_v27  ;;  %4288 = vrot.lane.b32.xlu1 %v11221_v46, %s12533_s8  ;;  %4286 = vrot.lane.b32.xlu0 %v11223_v25, %s12533_s8 }
 0x458   : > { %v4667_v47 = vpop.permute.xlu1 %4666 }
 0x459   : > { %v4665_v8 = vpop.permute.xlu0 %4664  ;;  %4738 = vst.msk [vmem:[#allocation5 + $0xc8] sm:$0xff] %vm4712_vm5, %v4667_v47  ;;  %v4374_v47 = vld [vmem:[#allocation4 + $0xe1] sm:$0xff] }
 0x45a   : > { %4737 = vst.msk [vmem:[#allocation5 + $0xc0] sm:$0xff] %vm4712_vm5, %v4665_v8  ;;  %4256 = vrot.lane.b32.xlu1 %v11231_v24, %s12533_s8  ;;  %4254 = vrot.lane.b32.xlu0 %v11233_v18, %s12533_s8  ;;  %v4373_v8 = vld [vmem:[#allocation4 + $0xd9] sm:$0xff] }
 0x45c   : > { %v3319_v39 = vpop.permute.xlu1 %3318 }
 0x45d   : > { %v3317_v40 = vpop.permute.xlu0 %3316  ;;  %3388 = vst.msk [vmem:[#allocation5 + $0xd8] sm:$0xff] %vm3360_vm14, %v3319_v39  ;;  %v4582_v39 = vld [vmem:[#allocation4 + $0x19a] sm:$0xff] }
 0x45e   : > { %3387 = vst.msk [vmem:[#allocation5 + $0xd0] sm:$0xff] %vm3360_vm14, %v3317_v40  ;;  %4481 = vrot.lane.b32.xlu1 %v11241_v50, %s12529_s28  ;;  %4479 = vrot.lane.b32.xlu0 %v11243_v16, %s12529_s28 }
 0x460   : > { %v4635_v42 = vpop.permute.xlu1 %4634  ;;  %v4771_v34 = vld [vmem:[#allocation5 + $0xc8] sm:$0xff] }
 0x461   : > { %v4633_v43 = vpop.permute.xlu0 %4632  ;;  %v4770_v28 = vld [vmem:[#allocation5 + $0xc0] sm:$0xff]  ;;  %4722 = vst.msk [vmem:[#allocation5 + $0x48] sm:$0xff] %vm4712_vm5, %v4635_v42 }
 0x462   : > { %4721 = vst.msk [vmem:[#allocation5 + $0x40] sm:$0xff] %vm4712_vm5, %v4633_v43  ;;  %v8772_v62 = vpack.c.bf16 %v4771_v34, %v4770_v28  ;;  %4449 = vrot.lane.b32.xlu1 %v11251_v56, %s12529_s28  ;;  %4447 = vrot.lane.b32.xlu0 %v11253_v4, %s12529_s28 }
 0x464   : > { %8774 = vmatprep.subr.msk.bf16.mxu1 %vm10754_vm7, %v8772_v62  ;;  %v3287_v5 = vpop.permute.xlu1 %3286 }
 0x465   : > { %v3285_v12 = vpop.permute.xlu0 %3284  ;;  %3372 = vst.msk [vmem:[#allocation5 + $0x58] sm:$0xff] %vm3360_vm14, %v3287_v5 }
 0x466   : > { %3371 = vst.msk [vmem:[#allocation5 + $0x50] sm:$0xff] %vm3360_vm14, %v3285_v12  ;;  %4674 = vrot.lane.b32.xlu1 %v11263_v13, %s12535_s10  ;;  %4672 = vrot.lane.b32.xlu0 %v11265_v9, %s12535_s10 }
 0x468   : > { %v3512_v10 = vpop.permute.xlu1 %3511  ;;  %v4755_v29 = vld [vmem:[#allocation5 + $0x48] sm:$0xff] }
 0x469   : > { %v3510_v61 = vpop.permute.xlu0 %3509  ;;  %v4754_v52 = vld [vmem:[#allocation5 + $0x40] sm:$0xff]  ;;  %3581 = vst.msk [vmem:[#allocation5 + $0xd8] sm:$0xff] %vm3553_vm15, %v3512_v10  ;;  %v9002_v10 = vmov 0  }
 0x46a   : > { %3580 = vst.msk [vmem:[#allocation5 + $0xd0] sm:$0xff] %vm3553_vm15, %v3510_v61  ;;  %v8775_v22 = vpack.c.bf16 %v4755_v29, %v4754_v52  ;;  %3326 = vrot.lane.b32.xlu1 %v11117_v23, %s12563_s0  ;;  %3324 = vrot.lane.b32.xlu0 %v11119_v48, %s12563_s0 }
 0x46b   : > { %8943 = vset.pattern.permute.xlu0 %v9002_v10  ;;  %8944 = vset.pattern.permute.xlu1 %v9002_v10 }
 0x46c   : > { %8777 = vmatpush3.bf16.xpose.msk.msra.mxu1 %vm10754_vm7, %v8775_v22  ;;  %v3480_v30 = vpop.permute.xlu1 %3479 }
 0x46d   : > { %v3478_v54 = vpop.permute.xlu0 %3477  ;;  %3565 = vst.msk [vmem:[#allocation5 + $0x58] sm:$0xff] %vm3553_vm15, %v3480_v30 }
 0x46e   : > { %3564 = vst.msk [vmem:[#allocation5 + $0x50] sm:$0xff] %vm3553_vm15, %v3478_v54  ;;  %4642 = vrot.lane.b32.xlu1 %v4565_v51, %s12535_s10  ;;  %4640 = vrot.lane.b32.xlu0 %v4564_v33, %s12535_s10 }
 0x470   : > { %v3705_v3 = vpop.permute.xlu1 %3704 }
 0x471   : > { %v3703_v23 = vpop.permute.xlu0 %3702  ;;  %3774 = vst.msk [vmem:[#allocation5 + $0xd8] sm:$0xff] %vm3746_vm0, %v3705_v3 }
 0x472   : > { %3773 = vst.msk [vmem:[#allocation5 + $0xd0] sm:$0xff] %vm3746_vm0, %v3703_v23  ;;  %3294 = vrot.lane.b32.xlu1 %v11127_v15, %s12563_s0  ;;  %3292 = vrot.lane.b32.xlu0 %v11129_v7, %s12563_s0 }
 0x474   : > { %v3673_v48 = vpop.permute.xlu1 %3672 }
 0x475   : > { %v3671_v63 = vpop.permute.xlu0 %3670  ;;  %3758 = vst.msk [vmem:[#allocation5 + $0x58] sm:$0xff] %vm3746_vm0, %v3673_v48 }
 0x476   : > { %3757 = vst.msk [vmem:[#allocation5 + $0x50] sm:$0xff] %vm3746_vm0, %v3671_v63  ;;  %3519 = vrot.lane.b32.xlu1 %v11139_v2, %s12568_s6  ;;  %3517 = vrot.lane.b32.xlu0 %v11141_v45, %s12568_s6 }
 0x478   : > { %v3898_v1 = vpop.permute.xlu1 %3897 }
 0x479   : > { %v3896_v60 = vpop.permute.xlu0 %3895  ;;  %3967 = vst.msk [vmem:[#allocation5 + $0xd8] sm:$0xff] %vm3939_vm1, %v3898_v1 }
 0x47a   : > { %3966 = vst.msk [vmem:[#allocation5 + $0xd0] sm:$0xff] %vm3939_vm1, %v3896_v60  ;;  %3487 = vrot.lane.b32.xlu1 %v11157_v37, %s12568_s6  ;;  %3485 = vrot.lane.b32.xlu0 %v11159_v19, %s12568_s6 }
 0x47c   : > { %v3866_v15 = vpop.permute.xlu1 %3865 }
 0x47d   : > { %v3864_v7 = vpop.permute.xlu0 %3863  ;;  %3951 = vst.msk [vmem:[#allocation5 + $0x58] sm:$0xff] %vm3939_vm1, %v3866_v15 }
 0x47e   : > { %3950 = vst.msk [vmem:[#allocation5 + $0x50] sm:$0xff] %vm3939_vm1, %v3864_v7  ;;  %3712 = vrot.lane.b32.xlu1 %v11221_v46, %s12564_s29  ;;  %3710 = vrot.lane.b32.xlu0 %v11223_v25, %s12564_s29 }
 0x480   : > { %v4091_v2 = vpop.permute.xlu1 %4090 }
 0x481   : > { %v4089_v45 = vpop.permute.xlu0 %4088  ;;  %4160 = vst.msk [vmem:[#allocation5 + $0xd8] sm:$0xff] %vm4132_vm2, %v4091_v2 }
 0x482   : > { %4159 = vst.msk [vmem:[#allocation5 + $0xd0] sm:$0xff] %vm4132_vm2, %v4089_v45  ;;  %3680 = vrot.lane.b32.xlu1 %v11231_v24, %s12564_s29  ;;  %3678 = vrot.lane.b32.xlu0 %v11233_v18, %s12564_s29  ;;  %v4583_v18 = vld [vmem:[#allocation4 + $0x1a2] sm:$0xff] }
 0x484   : > { %v4059_v37 = vpop.permute.xlu1 %4058 }
 0x485   : > { %v4057_v19 = vpop.permute.xlu0 %4056  ;;  %4144 = vst.msk [vmem:[#allocation5 + $0x58] sm:$0xff] %vm4132_vm2, %v4059_v37 }
 0x486   : > { %4143 = vst.msk [vmem:[#allocation5 + $0x50] sm:$0xff] %vm4132_vm2, %v4057_v19  ;;  %3905 = vrot.lane.b32.xlu1 %v11241_v50, %s12527_s11  ;;  %3903 = vrot.lane.b32.xlu0 %v11243_v16, %s12527_s11 }
 0x488   : > { %v4285_v58 = vpop.permute.xlu1 %4284 }
 0x489   : > { %v4283_v44 = vpop.permute.xlu0 %4282  ;;  %4354 = vst.msk [vmem:[#allocation5 + $0xd8] sm:$0xff] %vm4326_vm3, %v4285_v58 }
 0x48a   : > { %4353 = vst.msk [vmem:[#allocation5 + $0xd0] sm:$0xff] %vm4326_vm3, %v4283_v44  ;;  %3873 = vrot.lane.b32.xlu1 %v11251_v56, %s12527_s11  ;;  %3871 = vrot.lane.b32.xlu0 %v11253_v4, %s12527_s11  ;;  %s12573_s11 = sld [smem:[#allocation21_spill]]  ;;  %v4567_v56 = vld [vmem:[#allocation4 + $0xe2] sm:$0xff]  ;;  %v4566_v4 = vld [vmem:[#allocation4 + $0xda] sm:$0xff] }
 0x48c   : > { %v4253_v20 = vpop.permute.xlu1 %4252 }
 0x48d   : > { %v4251_v21 = vpop.permute.xlu0 %4250  ;;  %4338 = vst.msk [vmem:[#allocation5 + $0x58] sm:$0xff] %vm4326_vm3, %v4253_v20 }
 0x48e   : > { %4337 = vst.msk [vmem:[#allocation5 + $0x50] sm:$0xff] %vm4326_vm3, %v4251_v21  ;;  %4098 = vrot.lane.b32.xlu1 %v11263_v13, %s12531_s2  ;;  %4096 = vrot.lane.b32.xlu0 %v11265_v9, %s12531_s2  ;;  %v4949_v13 = vld [vmem:[%s12574_s9] sm:$0xff]  ;;  %s12539_s9 = sshll.u32 %s12596_s4, 4 }
 0x490   : > { %v4478_v31 = vpop.permute.xlu1 %4477  ;;  %v11360_v16 = vld [vmem:[%s12573_s11] sm:$0xff]  ;;  %s12583_s11 = smov 56  }
 0x491   : > { %v4476_v32 = vpop.permute.xlu0 %4475  ;;  %4547 = vst.msk [vmem:[#allocation5 + $0xd8] sm:$0xff] %vm4519_vm4, %v4478_v31  ;;  %8512 = vmatprep.mubr.msk.f32.mxu1 %vm4778_vm6, %v11360_v16 }
 0x492   : > { %4546 = vst.msk [vmem:[#allocation5 + $0xd0] sm:$0xff] %vm4519_vm4, %v4476_v32  ;;  %4066 = vrot.lane.b32.xlu1 %v4565_v51, %s12531_s2  ;;  %4064 = vrot.lane.b32.xlu0 %v4564_v33, %s12531_s2  ;;  %s833_s2 = scalar_lea.vmem %s12577_s25, %s12539_s9  ;;  %s12585_s9 = sld [smem:[#allocation27_spill]] }
 0x494   : > { %v4446_v6 = vpop.permute.xlu1 %4445 }
 0x495   : > { %v4444_v59 = vpop.permute.xlu0 %4443  ;;  %4531 = vst.msk [vmem:[#allocation5 + $0x58] sm:$0xff] %vm4519_vm4, %v4446_v6 }
 0x496   : > { %4530 = vst.msk [vmem:[#allocation5 + $0x50] sm:$0xff] %vm4519_vm4, %v4444_v59  ;;  %4292 = vrot.lane.b32.xlu1 %v4197_v57, %s12533_s8  ;;  %4290 = vrot.lane.b32.xlu0 %v4196_v11, %s12533_s8 }
 0x498   : > { %v4671_v55 = vpop.permute.xlu1 %4670 }
 0x499   : > { %v4669_v38 = vpop.permute.xlu0 %4668  ;;  %4740 = vst.msk [vmem:[#allocation5 + $0xd8] sm:$0xff] %vm4712_vm5, %v4671_v55 }
 0x49a   : > { %4739 = vst.msk [vmem:[#allocation5 + $0xd0] sm:$0xff] %vm4712_vm5, %v4669_v38  ;;  %4260 = vrot.lane.b32.xlu1 %v4181_v36, %s12533_s8  ;;  %4258 = vrot.lane.b32.xlu0 %v4180_v17, %s12533_s8  ;;  %s12575_s8 = sld [smem:[#allocation23_spill]] }
 0x49c   : > { %v3323_v53 = vpop.permute.xlu1 %3322 }
 0x49d   : > { %v3321_v41 = vpop.permute.xlu0 %3320  ;;  %3390 = vst.msk [vmem:[#allocation5 + $0xe8] sm:$0xff] %vm3360_vm14, %v3323_v53 }
 0x49e   : > { %3389 = vst.msk [vmem:[#allocation5 + $0xe0] sm:$0xff] %vm3360_vm14, %v3321_v41  ;;  %4485 = vrot.lane.b32.xlu1 %v4390_v14, %s12529_s28  ;;  %4483 = vrot.lane.b32.xlu0 %v4389_v35, %s12529_s28 }
 0x4a0   : > { %v4639_v26 = vpop.permute.xlu1 %4638  ;;  %v4773_v25 = vld [vmem:[#allocation5 + $0xd8] sm:$0xff]  ;;  %v4957_v9 = vld [vmem:[%s12575_s8] sm:$0xff]  ;;  %s12581_s8 = smov 40  }
 0x4a1   : > { %v4637_v27 = vpop.permute.xlu0 %4636  ;;  %v4772_v46 = vld [vmem:[#allocation5 + $0xd0] sm:$0xff]  ;;  %4724 = vst.msk [vmem:[#allocation5 + $0x58] sm:$0xff] %vm4712_vm5, %v4639_v26 }
 0x4a2   : > { %4723 = vst.msk [vmem:[#allocation5 + $0x50] sm:$0xff] %vm4712_vm5, %v4637_v27  ;;  %v8778_v24 = vpack.c.bf16 %v4773_v25, %v4772_v46  ;;  %4453 = vrot.lane.b32.xlu1 %v4374_v47, %s12529_s28  ;;  %4451 = vrot.lane.b32.xlu0 %v4373_v8, %s12529_s28  ;;  %s12576_s28 = sld [smem:[#allocation24_spill]] }
 0x4a4   : > { %8780 = vmatprep.subr.msk.bf16.mxu1 %vm10754_vm7, %v8778_v24  ;;  %v3291_v40 = vpop.permute.xlu1 %3290 }
 0x4a5   : > { %v3289_v50 = vpop.permute.xlu0 %3288  ;;  %3374 = vst.msk [vmem:[#allocation5 + $0x68] sm:$0xff] %vm3360_vm14, %v3291_v40 }
 0x4a6   : > { %3373 = vst.msk [vmem:[#allocation5 + $0x60] sm:$0xff] %vm3360_vm14, %v3289_v50  ;;  %4678 = vrot.lane.b32.xlu1 %v4583_v18, %s12535_s10  ;;  %4676 = vrot.lane.b32.xlu0 %v4582_v39, %s12535_s10 }
 0x4a8   : > { %v3516_v42 = vpop.permute.xlu1 %3515  ;;  %v4757_v34 = vld [vmem:[#allocation5 + $0x58] sm:$0xff] }
 0x4a9   : > { %v3514_v43 = vpop.permute.xlu0 %3513  ;;  %v4756_v28 = vld [vmem:[#allocation5 + $0x50] sm:$0xff]  ;;  %3583 = vst.msk [vmem:[#allocation5 + $0xe8] sm:$0xff] %vm3553_vm15, %v3516_v42 }
 0x4aa   : > { %3582 = vst.msk [vmem:[#allocation5 + $0xe0] sm:$0xff] %vm3553_vm15, %v3514_v43  ;;  %v8781_v62 = vpack.c.bf16 %v4757_v34, %v4756_v28  ;;  %4646 = vrot.lane.b32.xlu1 %v4567_v56, %s12535_s10  ;;  %4644 = vrot.lane.b32.xlu0 %v4566_v4, %s12535_s10  ;;  %s12578_s10 = sld [smem:[#allocation25_spill]] }
 0x4ac   : > { %8783 = vmatpush3.bf16.xpose.msk.msra.mxu1 %vm10754_vm7, %v8781_v62  ;;  %v3484_v5 = vpop.permute.xlu1 %3483 }
 0x4ad   : > { %v3482_v12 = vpop.permute.xlu0 %3481  ;;  %3567 = vst.msk [vmem:[#allocation5 + $0x68] sm:$0xff] %vm3553_vm15, %v3484_v5 }
 0x4ae   : > { %3566 = vst.msk [vmem:[#allocation5 + $0x60] sm:$0xff] %vm3553_vm15, %v3482_v12  ;;  %4952 = vperm.xlu0 %8943, %v4949_v13   ;;  %4960 = vperm.xlu1 %8944, %v4957_v9  }
 0x4b0   : > { %v3709_v61 = vpop.permute.xlu1 %3708 }
 0x4b1   : > { %v3707_v52 = vpop.permute.xlu0 %3706  ;;  %3776 = vst.msk [vmem:[#allocation5 + $0xe8] sm:$0xff] %vm3746_vm0, %v3709_v61 }
 0x4b2   : > { %3775 = vst.msk [vmem:[#allocation5 + $0xe0] sm:$0xff] %vm3746_vm0, %v3707_v52 }
 0x4b4   : > { %v3677_v29 = vpop.permute.xlu1 %3676 }
 0x4b5   : > { %v3675_v22 = vpop.permute.xlu0 %3674  ;;  %3760 = vst.msk [vmem:[#allocation5 + $0x68] sm:$0xff] %vm3746_vm0, %v3677_v29 }
 0x4b6   : > { %3759 = vst.msk [vmem:[#allocation5 + $0x60] sm:$0xff] %vm3746_vm0, %v3675_v22 }
 0x4b8   : > { %v3902_v30 = vpop.permute.xlu1 %3901 }
 0x4b9   : > { %v3900_v54 = vpop.permute.xlu0 %3899  ;;  %3969 = vst.msk [vmem:[#allocation5 + $0xe8] sm:$0xff] %vm3939_vm1, %v3902_v30 }
 0x4ba   : > { %3968 = vst.msk [vmem:[#allocation5 + $0xe0] sm:$0xff] %vm3939_vm1, %v3900_v54 }
 0x4bc   : > { %v3870_v51 = vpop.permute.xlu1 %3869 }
 0x4bd   : > { %v3868_v33 = vpop.permute.xlu0 %3867  ;;  %3953 = vst.msk [vmem:[#allocation5 + $0x68] sm:$0xff] %vm3939_vm1, %v3870_v51 }
 0x4be   : > { %3952 = vst.msk [vmem:[#allocation5 + $0x60] sm:$0xff] %vm3939_vm1, %v3868_v33  ;;  %v4970_v33 = vld [vmem:[%s12576_s28 + $0x8] sm:$0xff] }
 0x4c0   : > { %v4095_v3 = vpop.permute.xlu1 %4094 }
 0x4c1   : > { %v4093_v23 = vpop.permute.xlu0 %4092  ;;  %4162 = vst.msk [vmem:[#allocation5 + $0xe8] sm:$0xff] %vm4132_vm2, %v4095_v3  ;;  %v8326_v3 = vld [vmem:[%s12576_s28 + $0x88] sm:$0xff] }
 0x4c2   : > { %4161 = vst.msk [vmem:[#allocation5 + $0xe0] sm:$0xff] %vm4132_vm2, %v4093_v23  ;;  %5179 = vmatprep.mubr.f32.mxu0 %v8326_v3  ;;  %v8351_v3 = vld [vmem:[%s12576_s28 + $0x150] sm:$0xff] }
 0x4c4   : > { %v4063_v48 = vpop.permute.xlu1 %4062 }
 0x4c5   : > { %v4061_v63 = vpop.permute.xlu0 %4060  ;;  %4146 = vst.msk [vmem:[#allocation5 + $0x68] sm:$0xff] %vm4132_vm2, %v4063_v48 }
 0x4c6   : > { %4145 = vst.msk [vmem:[#allocation5 + $0x60] sm:$0xff] %vm4132_vm2, %v4061_v63 }
 0x4c8   : > { %v4289_v1 = vpop.permute.xlu1 %4288 }
 0x4c9   : > { %v4287_v60 = vpop.permute.xlu0 %4286  ;;  %4356 = vst.msk [vmem:[#allocation5 + $0xe8] sm:$0xff] %vm4326_vm3, %v4289_v1 }
 0x4ca   : > { %4355 = vst.msk [vmem:[#allocation5 + $0xe0] sm:$0xff] %vm4326_vm3, %v4287_v60 }
 0x4cc   : > { %v4257_v15 = vpop.permute.xlu1 %4256 }
 0x4cd   : > { %v4255_v7 = vpop.permute.xlu0 %4254  ;;  %4340 = vst.msk [vmem:[#allocation5 + $0x68] sm:$0xff] %vm4326_vm3, %v4257_v15 }
 0x4ce   : > { %4339 = vst.msk [vmem:[#allocation5 + $0x60] sm:$0xff] %vm4326_vm3, %v4255_v7 }
 0x4d0   : > { %v4482_v2 = vpop.permute.xlu1 %4481 }
 0x4d1   : > { %v4480_v45 = vpop.permute.xlu0 %4479  ;;  %4549 = vst.msk [vmem:[#allocation5 + $0xe8] sm:$0xff] %vm4519_vm4, %v4482_v2 }
 0x4d2   : > { %4548 = vst.msk [vmem:[#allocation5 + $0xe0] sm:$0xff] %vm4519_vm4, %v4480_v45  ;;  %v4969_v45 = vld [vmem:[%s12576_s28] sm:$0xff] }
 0x4d4   : > { %v4450_v37 = vpop.permute.xlu1 %4449 }
 0x4d5   : > { %v4448_v19 = vpop.permute.xlu0 %4447  ;;  %4533 = vst.msk [vmem:[#allocation5 + $0x68] sm:$0xff] %vm4519_vm4, %v4450_v37  ;;  %v8325_v37 = vld [vmem:[%s12576_s28 + $0x80] sm:$0xff] }
 0x4d6   : > { %4532 = vst.msk [vmem:[#allocation5 + $0x60] sm:$0xff] %vm4519_vm4, %v4448_v19  ;;  %v4972_v19 = vld [vmem:[%s12576_s28 + $0x18] sm:$0xff] }
 0x4d8   : > { %v4675_v58 = vpop.permute.xlu1 %4674 }
 0x4d9   : > { %v4673_v44 = vpop.permute.xlu0 %4672  ;;  %4742 = vst.msk [vmem:[#allocation5 + $0xe8] sm:$0xff] %vm4712_vm5, %v4675_v58  ;;  %v8328_v58 = vld [vmem:[%s12576_s28 + $0x98] sm:$0xff] }
 0x4da   : > { %4741 = vst.msk [vmem:[#allocation5 + $0xe0] sm:$0xff] %vm4712_vm5, %v4673_v44  ;;  %v4971_v44 = vld [vmem:[%s12576_s28 + $0x10] sm:$0xff] }
 0x4dc   : > { %v3327_v20 = vpop.permute.xlu1 %3326 }
 0x4dd   : > { %v3325_v21 = vpop.permute.xlu0 %3324  ;;  %3392 = vst.msk [vmem:[#allocation5 + $0xf8] sm:$0xff] %vm3360_vm14, %v3327_v20  ;;  %v8327_v20 = vld [vmem:[%s12576_s28 + $0x90] sm:$0xff] }
 0x4de   : > { %3391 = vst.msk [vmem:[#allocation5 + $0xf0] sm:$0xff] %vm3360_vm14, %v3325_v21  ;;  %v4974_v21 = vld [vmem:[%s12576_s28 + $0x28] sm:$0xff] }
 0x4e0   : > { %v4643_v31 = vpop.permute.xlu1 %4642  ;;  %v4775_v11 = vld [vmem:[#allocation5 + $0xe8] sm:$0xff] }
 0x4e1   : > { %v4641_v32 = vpop.permute.xlu0 %4640  ;;  %v4774_v57 = vld [vmem:[#allocation5 + $0xe0] sm:$0xff]  ;;  %4726 = vst.msk [vmem:[#allocation5 + $0x68] sm:$0xff] %vm4712_vm5, %v4643_v31  ;;  %v8330_v31 = vld [vmem:[%s12576_s28 + $0xa8] sm:$0xff] }
 0x4e2   : > { %4725 = vst.msk [vmem:[#allocation5 + $0x60] sm:$0xff] %vm4712_vm5, %v4641_v32  ;;  %v8784_v6 = vpack.c.bf16 %v4775_v11, %v4774_v57  ;;  %v4973_v32 = vld [vmem:[%s12576_s28 + $0x20] sm:$0xff]  ;;  %v4976_v11 = vld [vmem:[%s12576_s28 + $0x38] sm:$0xff] }
 0x4e3   : > { %v8329_v57 = vld [vmem:[%s12576_s28 + $0xa0] sm:$0xff] }
 0x4e4   : > { %8786 = vmatprep.subr.msk.bf16.mxu1 %vm10754_vm7, %v8784_v6  ;;  %v3295_v59 = vpop.permute.xlu1 %3294  ;;  %v8332_v6 = vld [vmem:[%s12576_s28 + $0xb8] sm:$0xff] }
 0x4e5   : > { %v3293_v55 = vpop.permute.xlu0 %3292  ;;  %3376 = vst.msk [vmem:[#allocation5 + $0x78] sm:$0xff] %vm3360_vm14, %v3295_v59  ;;  %v4975_v59 = vld [vmem:[%s12576_s28 + $0x30] sm:$0xff] }
 0x4e6   : > { %3375 = vst.msk [vmem:[#allocation5 + $0x70] sm:$0xff] %vm3360_vm14, %v3293_v55  ;;  %v8331_v55 = vld [vmem:[%s12576_s28 + $0xb0] sm:$0xff] }
 0x4e8   : > { %v3520_v38 = vpop.permute.xlu1 %3519  ;;  %v4759_v14 = vld [vmem:[#allocation5 + $0x68] sm:$0xff] }
 0x4e9   : > { %v3518_v36 = vpop.permute.xlu0 %3517  ;;  %v4758_v17 = vld [vmem:[#allocation5 + $0x60] sm:$0xff]  ;;  %3585 = vst.msk [vmem:[#allocation5 + $0xf8] sm:$0xff] %vm3553_vm15, %v3520_v38  ;;  %v4978_v38 = vld [vmem:[%s12576_s28 + $0x48] sm:$0xff] }
 0x4ea   : > { %3584 = vst.msk [vmem:[#allocation5 + $0xf0] sm:$0xff] %vm3553_vm15, %v3518_v36  ;;  %v8787_v35 = vpack.c.bf16 %v4759_v14, %v4758_v17  ;;  %v8334_v36 = vld [vmem:[%s12576_s28 + $0xc8] sm:$0xff]  ;;  %v4977_v17 = vld [vmem:[%s12576_s28 + $0x40] sm:$0xff] }
 0x4eb   : > { %v8333_v14 = vld [vmem:[%s12576_s28 + $0xc0] sm:$0xff] }
 0x4ec   : > { %8789 = vmatpush3.bf16.xpose.msk.msra.mxu1 %vm10754_vm7, %v8787_v35  ;;  %v3488_v53 = vpop.permute.xlu1 %3487  ;;  %v4980_v35 = vld [vmem:[%s12576_s28 + $0x58] sm:$0xff] }
 0x4ed   : > { %v3486_v41 = vpop.permute.xlu0 %3485  ;;  %3569 = vst.msk [vmem:[#allocation5 + $0x78] sm:$0xff] %vm3553_vm15, %v3488_v53  ;;  %v8336_v53 = vld [vmem:[%s12576_s28 + $0xd8] sm:$0xff] }
 0x4ee   : > { %3568 = vst.msk [vmem:[#allocation5 + $0x70] sm:$0xff] %vm3553_vm15, %v3486_v41  ;;  %v4979_v41 = vld [vmem:[%s12576_s28 + $0x50] sm:$0xff] }
 0x4f0   : > { %v3713_v26 = vpop.permute.xlu1 %3712 }
 0x4f1   : > { %v3711_v27 = vpop.permute.xlu0 %3710  ;;  %3778 = vst.msk [vmem:[#allocation5 + $0xf8] sm:$0xff] %vm3746_vm0, %v3713_v26  ;;  %v8335_v26 = vld [vmem:[%s12576_s28 + $0xd0] sm:$0xff] }
 0x4f2   : > { %3777 = vst.msk [vmem:[#allocation5 + $0xf0] sm:$0xff] %vm3746_vm0, %v3711_v27  ;;  %v4982_v27 = vld [vmem:[%s12576_s28 + $0x68] sm:$0xff] }
 0x4f4   : > { %v3681_v46 = vpop.permute.xlu1 %3680 }
 0x4f5   : > { %v3679_v25 = vpop.permute.xlu0 %3678  ;;  %3762 = vst.msk [vmem:[#allocation5 + $0x78] sm:$0xff] %vm3746_vm0, %v3681_v46  ;;  %v8338_v46 = vld [vmem:[%s12576_s28 + $0xe8] sm:$0xff] }
 0x4f6   : > { %3761 = vst.msk [vmem:[#allocation5 + $0x70] sm:$0xff] %vm3746_vm0, %v3679_v25  ;;  %v4981_v25 = vld [vmem:[%s12576_s28 + $0x60] sm:$0xff] }
 0x4f8   : > { %v3906_v47 = vpop.permute.xlu1 %3905 }
 0x4f9   : > { %v3904_v8 = vpop.permute.xlu0 %3903  ;;  %3971 = vst.msk [vmem:[#allocation5 + $0xf8] sm:$0xff] %vm3939_vm1, %v3906_v47  ;;  %v8337_v47 = vld [vmem:[%s12576_s28 + $0xe0] sm:$0xff] }
 0x4fa   : > { %3970 = vst.msk [vmem:[#allocation5 + $0xf0] sm:$0xff] %vm3939_vm1, %v3904_v8  ;;  %v4984_v8 = vld [vmem:[%s12576_s28 + $0x78] sm:$0xff] }
 0x4fc   : > { %v3874_v24 = vpop.permute.xlu1 %3873 }
 0x4fd   : > { %v3872_v18 = vpop.permute.xlu0 %3871  ;;  %3955 = vst.msk [vmem:[#allocation5 + $0x78] sm:$0xff] %vm3939_vm1, %v3874_v24  ;;  %v8340_v24 = vld [vmem:[%s12576_s28 + $0xf8] sm:$0xff] }
 0x4fe   : > { %3954 = vst.msk [vmem:[#allocation5 + $0x70] sm:$0xff] %vm3939_vm1, %v3872_v18  ;;  %v4983_v18 = vld [vmem:[%s12576_s28 + $0x70] sm:$0xff] }
 0x500   : > { %v4099_v39 = vpop.permute.xlu1 %4098 }
 0x501   : > { %v4097_v40 = vpop.permute.xlu0 %4096  ;;  %4164 = vst.msk [vmem:[#allocation5 + $0xf8] sm:$0xff] %vm4132_vm2, %v4099_v39  ;;  %v8339_v39 = vld [vmem:[%s12576_s28 + $0xf0] sm:$0xff] }
 0x502   : > { %4163 = vst.msk [vmem:[#allocation5 + $0xf0] sm:$0xff] %vm4132_vm2, %v4097_v40  ;;  %v8342_v40 = vld [vmem:[%s12576_s28 + $0x108] sm:$0xff] }
 0x504   : > { %v4067_v50 = vpop.permute.xlu1 %4066 }
 0x505   : > { %v4065_v42 = vpop.permute.xlu0 %4064  ;;  %4148 = vst.msk [vmem:[#allocation5 + $0x78] sm:$0xff] %vm4132_vm2, %v4067_v50  ;;  %v8358_v50 = vld [vmem:[%s12576_s28 + $0x188] sm:$0xff] }
 0x506   : > { %4147 = vst.msk [vmem:[#allocation5 + $0x70] sm:$0xff] %vm4132_vm2, %v4065_v42  ;;  %v8341_v42 = vld [vmem:[%s12576_s28 + $0x100] sm:$0xff] }
 0x508   : > { %v4293_v43 = vpop.permute.xlu1 %4292 }
 0x509   : > { %v4291_v28 = vpop.permute.xlu0 %4290  ;;  %4358 = vst.msk [vmem:[#allocation5 + $0xf8] sm:$0xff] %vm4326_vm3, %v4293_v43  ;;  %v8357_v43 = vld [vmem:[%s12576_s28 + $0x180] sm:$0xff] }
 0x50a   : > { %4357 = vst.msk [vmem:[#allocation5 + $0xf0] sm:$0xff] %vm4326_vm3, %v4291_v28  ;;  %v8344_v28 = vld [vmem:[%s12576_s28 + $0x118] sm:$0xff] }
 0x50c   : > { %v4261_v34 = vpop.permute.xlu1 %4260 }
 0x50d   : > { %v4259_v56 = vpop.permute.xlu0 %4258  ;;  %4342 = vst.msk [vmem:[#allocation5 + $0x78] sm:$0xff] %vm4326_vm3, %v4261_v34  ;;  %v8360_v34 = vld [vmem:[%s12576_s28 + $0x198] sm:$0xff] }
 0x50e   : > { %4341 = vst.msk [vmem:[#allocation5 + $0x70] sm:$0xff] %vm4326_vm3, %v4259_v56  ;;  %v8343_v56 = vld [vmem:[%s12576_s28 + $0x110] sm:$0xff] }
 0x510   : > { %v4486_v4 = vpop.permute.xlu1 %4485 }
 0x511   : > { %v4484_v62 = vpop.permute.xlu0 %4483  ;;  %4551 = vst.msk [vmem:[#allocation5 + $0xf8] sm:$0xff] %vm4519_vm4, %v4486_v4  ;;  %v8359_v4 = vld [vmem:[%s12576_s28 + $0x190] sm:$0xff] }
 0x512   : > { %4550 = vst.msk [vmem:[#allocation5 + $0xf0] sm:$0xff] %vm4519_vm4, %v4484_v62  ;;  %v8346_v62 = vld [vmem:[%s12576_s28 + $0x128] sm:$0xff] }
 0x514   : > { %v4454_v5 = vpop.permute.xlu1 %4453 }
 0x515   : > { %v4452_v12 = vpop.permute.xlu0 %4451  ;;  %4535 = vst.msk [vmem:[#allocation5 + $0x78] sm:$0xff] %vm4519_vm4, %v4454_v5  ;;  %v8362_v5 = vld [vmem:[%s12576_s28 + $0x1a8] sm:$0xff] }
 0x516   : > { %4534 = vst.msk [vmem:[#allocation5 + $0x70] sm:$0xff] %vm4519_vm4, %v4452_v12  ;;  %v8345_v12 = vld [vmem:[%s12576_s28 + $0x120] sm:$0xff] }
 0x518   : > { %v4679_v13 = vpop.permute.xlu1 %4678 }
 0x519   : > { %v4677_v9 = vpop.permute.xlu0 %4676  ;;  %4744 = vst.msk [vmem:[#allocation5 + $0xf8] sm:$0xff] %vm4712_vm5, %v4679_v13  ;;  %v8361_v13 = vld [vmem:[%s12576_s28 + $0x1a0] sm:$0xff] }
 0x51a   : > { %4743 = vst.msk [vmem:[#allocation5 + $0xf0] sm:$0xff] %vm4712_vm5, %v4677_v9  ;;  %v8348_v9 = vld [vmem:[%s12576_s28 + $0x138] sm:$0xff] }
 0x51c   : > { %v4647_v10 = vpop.permute.xlu1 %4646 }
 0x51d   : > { %v4645_v61 = vpop.permute.xlu0 %4644  ;;  %4728 = vst.msk [vmem:[#allocation5 + $0x78] sm:$0xff] %vm4712_vm5, %v4647_v10  ;;  %v8364_v10 = vld [vmem:[%s12576_s28 + $0x1b8] sm:$0xff] }
 0x51e   : > { %4727 = vst.msk [vmem:[#allocation5 + $0x70] sm:$0xff] %vm4712_vm5, %v4645_v61  ;;  %v8347_v61 = vld [vmem:[%s12576_s28 + $0x130] sm:$0xff] }
 0x520   : > { %v4777_v29 = vld [vmem:[#allocation5 + $0xf8] sm:$0xff] }
 0x521   : > { %v4776_v52 = vld [vmem:[#allocation5 + $0xf0] sm:$0xff] }
 0x522   : > { %v8790_v22 = vpack.c.bf16 %v4777_v29, %v4776_v52  ;;  %v8363_v52 = vld [vmem:[%s12576_s28 + $0x1b0] sm:$0xff]  ;;  %v8350_v29 = vld [vmem:[%s12576_s28 + $0x148] sm:$0xff] }
 0x524   : > { %8792 = vmatprep.subr.msk.bf16.mxu1 %vm10754_vm7, %v8790_v22  ;;  %v4761_v54 = vld [vmem:[#allocation5 + $0x78] sm:$0xff]  ;;  %v8366_v22 = vld [vmem:[%s12576_s28 + $0x1c8] sm:$0xff] }
 0x525   : > { %v4760_v30 = vld [vmem:[#allocation5 + $0x70] sm:$0xff] }
 0x526   : > { %v8793_v51 = vpack.c.bf16 %v4761_v54, %v4760_v30  ;;  %v8349_v30 = vld [vmem:[%s12576_s28 + $0x140] sm:$0xff] }
 0x527   : > { %v8365_v54 = vld [vmem:[%s12576_s28 + $0x1c0] sm:$0xff] }
 0x528   : > { %8795 = vmatpush3.bf16.xpose.msk.msra.mxu1 %vm10754_vm7, %v8793_v51  ;;  %v8352_v51 = vld [vmem:[%s12576_s28 + $0x158] sm:$0xff]  ;;  %vm7686_vm7 = vcmask 259072  }
 0x529   : > { %7687 = vst.msk [vmem:[#allocation14] sm:$0x3f] %vm7686_vm7, %v8989_v0  ;;  %7688 = vst.msk [vmem:[#allocation14 + $0x8] sm:$0x3f] %vm7686_vm7, %v8989_v0 }
 0x52a   : > { %7689 = vst.msk [vmem:[#allocation14 + $0x10] sm:$0x3f] %vm7686_vm7, %v8989_v0  ;;  %7692 = vst.msk [vmem:[#allocation14 + $0x28] sm:$0x3f] %vm7686_vm7, %v8989_v0 }
 0x52b   : > { %7690 = vst.msk [vmem:[#allocation14 + $0x18] sm:$0x3f] %vm7686_vm7, %v8989_v0  ;;  %7691 = vst.msk [vmem:[#allocation14 + $0x20] sm:$0x3f] %vm7686_vm7, %v8989_v0 }
 0x52d   : > { %v4953_v23 = vpop.permute.xlu0 %4952  ;;  %v4961_v63 = vpop.permute.xlu1 %4960 }
 0x52f   : > { %8513 = vmatmul.mubr.msk.f32.vlgmr.msra.gmra.mrb[0].mxu1 %vm4778_vm6, %v11360_v16 }
 0x530   : > { %5049 = vmatprep.mubr.f32.mxu1 %v4970_v33  ;;  %v8368_v33 = vld [vmem:[%s12576_s28 + $0x1d8] sm:$0xff] }
 0x602   : > { %v4944_v48 = vpop.f32.mrb[0].mxu1 }
 0x603   : > { %v4955_v1 = vmul.f32 %v4953_v23, %v4944_v48  ;;  %v4946_v49 = vpop.f32.mrb[1].mxu1  ;;  %v8354_v48 = vld [vmem:[%s12576_s28 + $0x168] sm:$0xff] }
 0x604   : > { %v4956_v60 = vmul.f32 %v4953_v23, %v4946_v49  ;;  %v8367_v23 = vld [vmem:[%s12576_s28 + $0x1d0] sm:$0xff]  ;;  %v8369_v49 = vld [vmem:[%s12576_s28 + $0x1e0] sm:$0xff] }
 0x605   : > { %v4963_v15 = vadd.f32 %v4961_v63, %v4955_v1  ;;  %v8353_v1 = vld [vmem:[%s12576_s28 + $0x160] sm:$0xff] }
 0x606   : > { %v4964_v7 = vadd.f32 %v4961_v63, %v4956_v60  ;;  %v8370_v63 = vld [vmem:[%s12576_s28 + $0x1e8] sm:$0xff]  ;;  %v8356_v60 = vld [vmem:[%s12576_s28 + $0x178] sm:$0xff] }
 0x607   : > { %v4965_v16 = vmax.f32 %v4963_v15, 0.0  ;;  %v8372_v15 = vld [vmem:[%s12576_s28 + $0x1f8] sm:$0xff] }
 0x608   : > { %v4966_v2 = vmax.f32 %v4964_v7, 0.0  ;;  %v8355_v7 = vld [vmem:[%s12576_s28 + $0x170] sm:$0xff] }
 0x609   : > { %4967 = vst [vmem:[%s833_s2] sm:$0xff] %v4965_v16 }
 0x60a   : > { %4985 = vmatprep.subr.mxu1 %v4966_v2  ;;  %5115 = vmatprep.subr.mxu0 %v4966_v2  ;;  %4968 = vst [vmem:[%s833_s2 + $0x8] sm:$0xff] %v4966_v2  ;;  %s12580_s2 = sld [smem:[#allocation26_spill]] }
 0x60b   : > { %4986 = vmatpush1.xpose.msra.mxu1 %v4965_v16  ;;  %5116 = vmatpush1.xpose.msra.mxu0 %v4965_v16 }
 0x60c   : > { %5277 = vmatprep.subr.mxu1 %v4966_v2  ;;  %5439 = vmatprep.subr.mxu0 %v4966_v2 }
 0x60e   : > { %5050 = vmatmul.mubr.f32.vlgmr.msra.gmra.mrb[2].mxu1 %v4969_v45  ;;  %5180 = vmatmul.mubr.f32.vlgmr.msra.gmra.mrb[32].mxu0 %v8325_v37 }
 0x60f   : > { %5278 = vmatpush1.xpose.msra.mxu1 %v4965_v16  ;;  %5440 = vmatpush1.xpose.msra.mxu0 %v4965_v16  ;;  %v8371_v16 = vld [vmem:[%s12576_s28 + $0x1f0] sm:$0xff]  ;;  %s9005_s28 = smov 80  }
 0x610   : > { %5054 = vmatprep.mubr.f32.mxu1 %v4972_v19  ;;  %5184 = vmatprep.mubr.f32.mxu0 %v8328_v58 }
 0x612   : > { %5055 = vmatmul.mubr.f32.gmra.mrb[4].mxu1 %v4971_v44  ;;  %5185 = vmatmul.mubr.f32.gmra.mrb[34].mxu0 %v8327_v20 }
 0x613   : > { %5059 = vmatprep.mubr.f32.mxu1 %v4974_v21  ;;  %5189 = vmatprep.mubr.f32.mxu0 %v8330_v31 }
 0x616   : > { %5060 = vmatmul.mubr.f32.gmra.mrb[6].mxu1 %v4973_v32  ;;  %5190 = vmatmul.mubr.f32.gmra.mrb[36].mxu0 %v8329_v57 }
 0x617   : > { %5064 = vmatprep.mubr.f32.mxu1 %v4976_v11  ;;  %5194 = vmatprep.mubr.f32.mxu0 %v8332_v6 }
 0x61a   : > { %5065 = vmatmul.mubr.f32.gmra.mrb[8].mxu1 %v4975_v59  ;;  %5195 = vmatmul.mubr.f32.gmra.mrb[38].mxu0 %v8331_v55 }
 0x61b   : > { %5069 = vmatprep.mubr.f32.mxu1 %v4978_v38  ;;  %5199 = vmatprep.mubr.f32.mxu0 %v8334_v36 }
 0x61e   : > { %5070 = vmatmul.mubr.f32.gmra.mrb[10].mxu1 %v4977_v17  ;;  %5200 = vmatmul.mubr.f32.gmra.mrb[40].mxu0 %v8333_v14 }
 0x61f   : > { %5074 = vmatprep.mubr.f32.mxu1 %v4980_v35  ;;  %5204 = vmatprep.mubr.f32.mxu0 %v8336_v53 }
 0x622   : > { %5075 = vmatmul.mubr.f32.gmra.mrb[12].mxu1 %v4979_v41  ;;  %5205 = vmatmul.mubr.f32.gmra.mrb[42].mxu0 %v8335_v26 }
 0x623   : > { %5079 = vmatprep.mubr.f32.mxu1 %v4982_v27  ;;  %5209 = vmatprep.mubr.f32.mxu0 %v8338_v46 }
 0x626   : > { %5080 = vmatmul.mubr.f32.gmra.mrb[14].mxu1 %v4981_v25  ;;  %5210 = vmatmul.mubr.f32.gmra.mrb[44].mxu0 %v8337_v47 }
 0x627   : > { %5084 = vmatprep.mubr.f32.mxu1 %v4984_v8  ;;  %5214 = vmatprep.mubr.f32.mxu0 %v8340_v24 }
 0x62a   : > { %5085 = vmatmul.mubr.f32.gmra.mrb[16].mxu1 %v4983_v18  ;;  %5215 = vmatmul.mubr.f32.gmra.mrb[46].mxu0 %v8339_v39  ;;  %v5592_v39 = vld [vmem:[%s12578_s10] sm:$0xff] }
 0x62b   : > { %5341 = vmatprep.mubr.f32.mxu1 %v8342_v40  ;;  %5503 = vmatprep.mubr.f32.mxu0 %v8358_v50  ;;  %v5593_v40 = vld [vmem:[%s12578_s10 + $0x8] sm:$0xff]  ;;  %v5594_v50 = vld [vmem:[%s12578_s10 + $0x10] sm:$0xff] }
 0x62e   : > { %5342 = vmatmul.mubr.f32.vlgmr.msra.gmra.mrb[18].mxu1 %v8341_v42  ;;  %5504 = vmatmul.mubr.f32.vlgmr.msra.gmra.mrb[48].mxu0 %v8357_v43 }
 0x62f   : > { %5346 = vmatprep.mubr.f32.mxu1 %v8344_v28  ;;  %5508 = vmatprep.mubr.f32.mxu0 %v8360_v34  ;;  %v8796_v28 = vpack.c.bf16 %v5593_v40, %v5592_v39  ;;  %v5595_v34 = vld [vmem:[%s12578_s10 + $0x18] sm:$0xff] }
 0x631   : > { %8797 = vmatprep.subr.bf16.mxu1 %v8796_v28 }
 0x632   : > { %5347 = vmatmul.mubr.f32.gmra.mrb[20].mxu1 %v8343_v56  ;;  %5509 = vmatmul.mubr.f32.gmra.mrb[50].mxu0 %v8359_v4  ;;  %v8800_v56 = vpack.c.bf16 %v5595_v34, %v5594_v50 }
 0x633   : > { %5351 = vmatprep.mubr.f32.mxu1 %v8346_v62  ;;  %5513 = vmatprep.mubr.f32.mxu0 %v8362_v5 }
 0x634   : > { %8799 = vmatpush3.bf16.msra.mxu1 %v8796_v28 }
 0x635   : > { %8801 = vmatprep.subr.bf16.mxu1 %v8800_v56 }
 0x636   : > { %5352 = vmatmul.mubr.f32.gmra.mrb[22].mxu1 %v8345_v12  ;;  %5514 = vmatmul.mubr.f32.gmra.mrb[52].mxu0 %v8361_v13 }
 0x637   : > { %5356 = vmatprep.mubr.f32.mxu1 %v8348_v9  ;;  %5518 = vmatprep.mubr.f32.mxu0 %v8364_v10 }
 0x638   : > { %8803 = vmatpush3.bf16.msra.mxu1 %v8800_v56 }
 0x63a   : > { %5357 = vmatmul.mubr.f32.gmra.mrb[24].mxu1 %v8347_v61  ;;  %5519 = vmatmul.mubr.f32.gmra.mrb[54].mxu0 %v8363_v52 }
 0x63b   : > { %5361 = vmatprep.mubr.f32.mxu1 %v8350_v29  ;;  %5523 = vmatprep.mubr.f32.mxu0 %v8366_v22 }
 0x63e   : > { %5362 = vmatmul.mubr.f32.gmra.mrb[26].mxu1 %v8349_v30  ;;  %5524 = vmatmul.mubr.f32.gmra.mrb[56].mxu0 %v8365_v54 }
 0x63f   : > { %5366 = vmatprep.mubr.f32.mxu1 %v8352_v51  ;;  %5528 = vmatprep.mubr.f32.mxu0 %v8368_v33 }
 0x642   : > { %5367 = vmatmul.mubr.f32.gmra.mrb[28].mxu1 %v8351_v3  ;;  %5529 = vmatmul.mubr.f32.gmra.mrb[58].mxu0 %v8367_v23 }
 0x643   : > { %5371 = vmatprep.mubr.f32.mxu1 %v8354_v48  ;;  %5533 = vmatprep.mubr.f32.mxu0 %v8370_v63 }
 0x646   : > { %5372 = vmatmul.mubr.f32.gmra.mrb[30].mxu1 %v8353_v1  ;;  %5534 = vmatmul.mubr.f32.gmra.mrb[60].mxu0 %v8369_v49 }
 0x647   : > { %5376 = vmatprep.mubr.f32.mxu1 %v8356_v60  ;;  %5538 = vmatprep.mubr.f32.mxu0 %v8372_v15 }
 0x64a   : > { %5377 = vmatmul.mubr.f32.gmra.mrb[32].mxu1 %v8355_v7  ;;  %5539 = vmatmul.mubr.f32.gmra.mrb[62].mxu0 %v8371_v16 }
 0x6e1   : > { %v5051_v2 = vpop.f32.mrb[2].mxu1  ;;  %v5181_v45 = vpop.f32.mrb[32].mxu0 }
 0x6e2   : > { %5090 = vst.msk [vmem:[#allocation6] sm:$0xff] %vm3047_vm12, %v5051_v2  ;;  %v5053_v37 = vpop.f32.mrb[3].mxu1  ;;  %v5183_v19 = vpop.f32.mrb[33].mxu0  ;;  %5228 = vrot.lane.b32.xlu1 %v5181_v45, %s12563_s0 }
 0x6e5   : > { %v5056_v58 = vpop.f32.mrb[4].mxu1  ;;  %v5186_v44 = vpop.f32.mrb[34].mxu0 }
 0x6e6   : > { %5091 = vst.msk [vmem:[#allocation6 + $0x8] sm:$0xff] %vm3047_vm12, %v5056_v58  ;;  %5230 = vrot.lane.b32.xlu0 %v5186_v44, %s12563_s0  ;;  %v5058_v20 = vpop.f32.mrb[5].mxu1  ;;  %v5188_v21 = vpop.f32.mrb[35].mxu0 }
 0x6e9   : > { %v5061_v31 = vpop.f32.mrb[6].mxu1  ;;  %v5191_v32 = vpop.f32.mrb[36].mxu0 }
 0x6ea   : > { %5092 = vst.msk [vmem:[#allocation6 + $0x10] sm:$0xff] %vm3047_vm12, %v5061_v31  ;;  %v5063_v57 = vpop.f32.mrb[7].mxu1  ;;  %v5193_v11 = vpop.f32.mrb[37].mxu0  ;;  %5232 = vrot.lane.b32.xlu1 %v5191_v32, %s12563_s0 }
 0x6ed   : > { %v5066_v6 = vpop.f32.mrb[8].mxu1  ;;  %v5196_v59 = vpop.f32.mrb[38].mxu0 }
 0x6ee   : > { %5093 = vst.msk [vmem:[#allocation6 + $0x18] sm:$0xff] %vm3047_vm12, %v5066_v6  ;;  %5234 = vrot.lane.b32.xlu0 %v5196_v59, %s12563_s0  ;;  %v5068_v55 = vpop.f32.mrb[9].mxu1  ;;  %v5198_v38 = vpop.f32.mrb[39].mxu0 }
 0x6f1   : > { %v5071_v36 = vpop.f32.mrb[10].mxu1  ;;  %v5201_v17 = vpop.f32.mrb[40].mxu0 }
 0x6f2   : > { %5094 = vst.msk [vmem:[#allocation6 + $0x20] sm:$0xff] %vm3047_vm12, %v5071_v36  ;;  %v5073_v14 = vpop.f32.mrb[11].mxu1  ;;  %v5203_v35 = vpop.f32.mrb[41].mxu0  ;;  %5236 = vrot.lane.b32.xlu1 %v5201_v17, %s12563_s0 }
 0x6f5   : > { %v5076_v53 = vpop.f32.mrb[12].mxu1  ;;  %v5206_v41 = vpop.f32.mrb[42].mxu0 }
 0x6f6   : > { %5095 = vst.msk [vmem:[#allocation6 + $0x28] sm:$0xff] %vm3047_vm12, %v5076_v53  ;;  %5238 = vrot.lane.b32.xlu0 %v5206_v41, %s12563_s0  ;;  %v5078_v26 = vpop.f32.mrb[13].mxu1  ;;  %v5208_v27 = vpop.f32.mrb[43].mxu0 }
 0x6f9   : > { %v5081_v46 = vpop.f32.mrb[14].mxu1  ;;  %v5211_v25 = vpop.f32.mrb[44].mxu0 }
 0x6fa   : > { %5096 = vst.msk [vmem:[#allocation6 + $0x30] sm:$0xff] %vm3047_vm12, %v5081_v46  ;;  %v5083_v47 = vpop.f32.mrb[15].mxu1  ;;  %v5213_v8 = vpop.f32.mrb[45].mxu0  ;;  %5240 = vrot.lane.b32.xlu1 %v5211_v25, %s12563_s0 }
 0x6fd   : > { %v5086_v24 = vpop.f32.mrb[16].mxu1  ;;  %v5216_v18 = vpop.f32.mrb[46].mxu0 }
 0x6fe   : > { %5097 = vst.msk [vmem:[#allocation6 + $0x38] sm:$0xff] %vm3047_vm12, %v5086_v24  ;;  %5242 = vrot.lane.b32.xlu0 %v5216_v18, %s12563_s0  ;;  %v5088_v42 = vpop.f32.mrb[17].mxu1  ;;  %v5218_v43 = vpop.f32.mrb[47].mxu0 }
 0x701   : > { %v5343_v4 = vpop.f32.mrb[18].mxu1  ;;  %v5505_v62 = vpop.f32.mrb[48].mxu0 }
 0x702   : > { %v5345_v5 = vpop.f32.mrb[19].mxu1  ;;  %5390 = vrot.lane.b32.xlu1 %v5343_v4, %s12568_s6  ;;  %v5507_v12 = vpop.f32.mrb[49].mxu0 }
 0x703   : > { %v6026_v5 = vld [vmem:[#allocation7 + $0x90] sm:$0xff]  ;;  %v5826_v12 = vld [vmem:[#allocation7 + $0x2] sm:$0xff] }
 0x705   : > { %v5348_v13 = vpop.f32.mrb[20].mxu1  ;;  %v5510_v9 = vpop.f32.mrb[50].mxu0 }
 0x706   : > { %5392 = vrot.lane.b32.xlu0 %v5348_v13, %s12568_s6  ;;  %5552 = vrot.lane.b32.xlu1 %v5505_v62, %s12564_s29  ;;  %v5350_v10 = vpop.f32.mrb[21].mxu1  ;;  %v5512_v61 = vpop.f32.mrb[51].mxu0  ;;  %v5778_v62 = vld [vmem:[#allocation7 + $0x1] sm:$0xff] }
 0x707   : > { %v5762_v13 = vld [vmem:[#allocation7] sm:$0xff] }
 0x708   : > { %5770 = vst.msk [vmem:[#allocation8] sm:$0xff] %vm3047_vm12, %v5762_v13  ;;  %v8373_v61 = vld [vmem:[%s12580_s2] ss:$0 sm:$0xff]  ;;  %s9003_s2 = smov 96  }
 0x709   : > { %v5353_v52 = vpop.f32.mrb[22].mxu1  ;;  %v5515_v29 = vpop.f32.mrb[52].mxu0 }
 0x70a   : > { %5554 = vrot.lane.b32.xlu0 %v5510_v9, %s12564_s29  ;;  %v5355_v22 = vpop.f32.mrb[23].mxu1  ;;  %5394 = vrot.lane.b32.xlu1 %v5353_v52, %s12568_s6  ;;  %v5517_v30 = vpop.f32.mrb[53].mxu0 }
 0x70d   : > { %v5358_v54 = vpop.f32.mrb[24].mxu1  ;;  %v5520_v51 = vpop.f32.mrb[54].mxu0 }
 0x70e   : > { %5396 = vrot.lane.b32.xlu0 %v5358_v54, %s12568_s6  ;;  %5556 = vrot.lane.b32.xlu1 %v5515_v29, %s12564_s29  ;;  %v5360_v33 = vpop.f32.mrb[25].mxu1  ;;  %v5522_v3 = vpop.f32.mrb[55].mxu0 }
 0x711   : > { %v5363_v23 = vpop.f32.mrb[26].mxu1  ;;  %v5525_v48 = vpop.f32.mrb[56].mxu0 }
 0x712   : > { %5558 = vrot.lane.b32.xlu0 %v5520_v51, %s12564_s29  ;;  %v5365_v63 = vpop.f32.mrb[27].mxu1  ;;  %5398 = vrot.lane.b32.xlu1 %v5363_v23, %s12568_s6  ;;  %v5527_v1 = vpop.f32.mrb[57].mxu0 }
 0x715   : > { %v5368_v49 = vpop.f32.mrb[28].mxu1  ;;  %v5530_v60 = vpop.f32.mrb[58].mxu0 }
 0x716   : > { %5400 = vrot.lane.b32.xlu0 %v5368_v49, %s12568_s6  ;;  %5560 = vrot.lane.b32.xlu1 %v5525_v48, %s12564_s29  ;;  %v5370_v15 = vpop.f32.mrb[29].mxu1  ;;  %v5532_v7 = vpop.f32.mrb[59].mxu0 }
 0x719   : > { %v5373_v16 = vpop.f32.mrb[30].mxu1  ;;  %v5535_v2 = vpop.f32.mrb[60].mxu0 }
 0x71a   : > { %5562 = vrot.lane.b32.xlu0 %v5530_v60, %s12564_s29  ;;  %v5375_v45 = vpop.f32.mrb[31].mxu1  ;;  %5402 = vrot.lane.b32.xlu1 %v5373_v16, %s12568_s6  ;;  %v5537_v37 = vpop.f32.mrb[61].mxu0 }
 0x71d   : > { %v5378_v19 = vpop.f32.mrb[32].mxu1  ;;  %v5540_v58 = vpop.f32.mrb[62].mxu0 }
 0x71e   : > { %5404 = vrot.lane.b32.xlu0 %v5378_v19, %s12568_s6  ;;  %5564 = vrot.lane.b32.xlu1 %v5535_v2, %s12564_s29  ;;  %v5380_v44 = vpop.f32.mrb[33].mxu1  ;;  %v5542_v20 = vpop.f32.mrb[63].mxu0 }
 0x722   : > { %5566 = vrot.lane.b32.xlu0 %v5540_v58, %s12564_s29  ;;  %5794 = vrot.lane.b32.xlu1 %v5778_v62, %s12563_s0 }
 0x726   : > { %6049 = vrot.lane.b32.xlu0 %v6026_v5, %s12579_s1  ;;  %5842 = vrot.lane.b32.xlu1 %v5826_v12, %s12568_s6  ;;  %v6122_v5 = vld [vmem:[#allocation7 + $0x92] sm:$0xff] }
 0x754   : > { %v5229_v21 = vpop.permute.xlu1 %5228 }
 0x755   : > { %5252 = vst.msk [vmem:[#allocation6] sm:$0xff] %vm3360_vm14, %v5229_v21 }
 0x758   : > { %v5231_v31 = vpop.permute.xlu0 %5230 }
 0x759   : > { %5253 = vst.msk [vmem:[#allocation6 + $0x8] sm:$0xff] %vm3360_vm14, %v5231_v31 }
 0x75c   : > { %v5233_v32 = vpop.permute.xlu1 %5232 }
 0x75d   : > { %5254 = vst.msk [vmem:[#allocation6 + $0x10] sm:$0xff] %vm3360_vm14, %v5233_v32 }
 0x760   : > { %v5235_v57 = vpop.permute.xlu0 %5234 }
 0x761   : > { %5255 = vst.msk [vmem:[#allocation6 + $0x18] sm:$0xff] %vm3360_vm14, %v5235_v57 }
 0x764   : > { %v5237_v11 = vpop.permute.xlu1 %5236 }
 0x765   : > { %5256 = vst.msk [vmem:[#allocation6 + $0x20] sm:$0xff] %vm3360_vm14, %v5237_v11 }
 0x768   : > { %v5239_v6 = vpop.permute.xlu0 %5238 }
 0x769   : > { %5257 = vst.msk [vmem:[#allocation6 + $0x28] sm:$0xff] %vm3360_vm14, %v5239_v6  ;;  %v6171_v6 = vld [vmem:[%s12585_s9] sm:$0xff] }
 0x76c   : > { %v5241_v59 = vpop.permute.xlu1 %5240 }
 0x76d   : > { %5258 = vst.msk [vmem:[#allocation6 + $0x30] sm:$0xff] %vm3360_vm14, %v5241_v59  ;;  %v6172_v59 = vld [vmem:[%s12585_s9 + $0x8] sm:$0xff] }
 0x770   : > { %v5243_v55 = vpop.permute.xlu0 %5242 }
 0x771   : > { %5259 = vst.msk [vmem:[#allocation6 + $0x38] sm:$0xff] %vm3360_vm14, %v5243_v55  ;;  %v8804_v55 = vpack.c.bf16 %v6172_v59, %v6171_v6 }
 0x773   : > { %8805 = vmatprep.subr.bf16.mxu0 %v8804_v55 }
 0x774   : > { %v5391_v38 = vpop.permute.xlu1 %5390  ;;  %8807 = vmatpush3.bf16.msra.mxu0 %v8804_v55 }
 0x775   : > { %5414 = vst.msk [vmem:[#allocation6] sm:$0xff] %vm3553_vm15, %v5391_v38  ;;  %v6173_v38 = vld [vmem:[%s12585_s9 + $0x10] sm:$0xff] }
 0x778   : > { %v5393_v36 = vpop.permute.xlu0 %5392  ;;  %v5553_v17 = vpop.permute.xlu1 %5552 }
 0x779   : > { %5415 = vst.msk [vmem:[#allocation6 + $0x8] sm:$0xff] %vm3553_vm15, %v5393_v36  ;;  %v6174_v36 = vld [vmem:[%s12585_s9 + $0x18] sm:$0xff] }
 0x77a   : > { %5576 = vst.msk [vmem:[#allocation6] sm:$0xff] %vm3746_vm0, %v5553_v17  ;;  %v8808_v17 = vpack.c.bf16 %v6174_v36, %v6173_v38 }
 0x77c   : > { %v5555_v14 = vpop.permute.xlu0 %5554  ;;  %v5395_v35 = vpop.permute.xlu1 %5394  ;;  %8809 = vmatprep.subr.bf16.mxu0 %v8808_v17 }
 0x77d   : > { %5577 = vst.msk [vmem:[#allocation6 + $0x8] sm:$0xff] %vm3746_vm0, %v5555_v14  ;;  %8811 = vmatpush3.bf16.msra.mxu0 %v8808_v17 }
 0x77e   : > { %5416 = vst.msk [vmem:[#allocation6 + $0x10] sm:$0xff] %vm3553_vm15, %v5395_v35  ;;  %v6175_v35 = vld [vmem:[%s12585_s9 + $0x20] sm:$0xff] }
 0x780   : > { %v5397_v41 = vpop.permute.xlu0 %5396  ;;  %v5557_v26 = vpop.permute.xlu1 %5556 }
 0x781   : > { %v5584_v53 = vld [vmem:[#allocation6] sm:$0xff]  ;;  %5417 = vst.msk [vmem:[#allocation6 + $0x18] sm:$0xff] %vm3553_vm15, %v5397_v41 }
 0x782   : > { %8641 = vmatprep.mubr.msk.f32.mxu1 %vm5603_vm8, %v5584_v53  ;;  %5578 = vst.msk [vmem:[#allocation6 + $0x10] sm:$0xff] %vm3746_vm0, %v5557_v26  ;;  %v6176_v53 = vld [vmem:[%s12585_s9 + $0x28] sm:$0xff]  ;;  %v6177_v26 = vld [vmem:[%s12585_s9 + $0x30] sm:$0xff] }
 0x783   : > { %v8812_v41 = vpack.c.bf16 %v6176_v53, %v6175_v35 }
 0x784   : > { %v5585_v27 = vld [vmem:[#allocation6 + $0x8] sm:$0xff]  ;;  %v5559_v46 = vpop.permute.xlu0 %5558  ;;  %v5399_v25 = vpop.permute.xlu1 %5398 }
 0x785   : > { %8642 = vmatmul.mubr.msk.f32.vlgmr.msra.gmra.mrb[34].mxu1 %vm5603_vm8, %v5585_v27  ;;  %5579 = vst.msk [vmem:[#allocation6 + $0x18] sm:$0xff] %vm3746_vm0, %v5559_v46  ;;  %8813 = vmatprep.subr.bf16.mxu0 %v8812_v41  ;;  %v6178_v27 = vld [vmem:[%s12585_s9 + $0x38] sm:$0xff] }
 0x786   : > { %5418 = vst.msk [vmem:[#allocation6 + $0x20] sm:$0xff] %vm3553_vm15, %v5399_v25  ;;  %v8816_v46 = vpack.c.bf16 %v6178_v27, %v6177_v26  ;;  %8815 = vmatpush3.bf16.msra.mxu0 %v8812_v41 }
 0x788   : > { %v5401_v8 = vpop.permute.xlu0 %5400  ;;  %v5561_v24 = vpop.permute.xlu1 %5560  ;;  %8817 = vmatprep.subr.bf16.mxu0 %v8816_v46 }
 0x789   : > { %v5586_v47 = vld [vmem:[#allocation6 + $0x10] sm:$0xff]  ;;  %5419 = vst.msk [vmem:[#allocation6 + $0x28] sm:$0xff] %vm3553_vm15, %v5401_v8 }
 0x78a   : > { %8644 = vmatprep.mubr.msk.f32.mxu1 %vm5603_vm8, %v5586_v47  ;;  %5580 = vst.msk [vmem:[#allocation6 + $0x20] sm:$0xff] %vm3746_vm0, %v5561_v24  ;;  %8819 = vmatpush3.bf16.msra.mxu0 %v8816_v46  ;;  %v6179_v47 = vld [vmem:[%s12585_s9 + $0x40] sm:$0xff] }
 0x78b   : > { %8669 = vmatprep.subr.mxu0 %v6179_v47 }
 0x78c   : > { %v5587_v18 = vld [vmem:[#allocation6 + $0x18] sm:$0xff]  ;;  %v5563_v39 = vpop.permute.xlu0 %5562  ;;  %v5403_v40 = vpop.permute.xlu1 %5402 }
 0x78d   : > { %8645 = vmatmul.mubr.msk.f32.gmra.mrb[36].mxu1 %vm5603_vm8, %v5587_v18  ;;  %5581 = vst.msk [vmem:[#allocation6 + $0x28] sm:$0xff] %vm3746_vm0, %v5563_v39 }
 0x78e   : > { %5420 = vst.msk [vmem:[#allocation6 + $0x30] sm:$0xff] %vm3553_vm15, %v5403_v40  ;;  %8670 = vmatpush3.msra.mxu0 %v6179_v47 }
 0x790   : > { %v5405_v42 = vpop.permute.xlu0 %5404  ;;  %v5565_v43 = vpop.permute.xlu1 %5564 }
 0x791   : > { %v5588_v50 = vld [vmem:[#allocation6 + $0x20] sm:$0xff]  ;;  %5421 = vst.msk [vmem:[#allocation6 + $0x38] sm:$0xff] %vm3553_vm15, %v5405_v42 }
 0x792   : > { %8647 = vmatprep.mubr.msk.f32.mxu1 %vm5603_vm8, %v5588_v50  ;;  %5582 = vst.msk [vmem:[#allocation6 + $0x30] sm:$0xff] %vm3746_vm0, %v5565_v43 }
 0x794   : > { %v5589_v28 = vld [vmem:[#allocation6 + $0x28] sm:$0xff]  ;;  %v5567_v34 = vpop.permute.xlu0 %5566  ;;  %v5795_v9 = vpop.permute.xlu1 %5794 }
 0x795   : > { %8648 = vmatmul.mubr.msk.f32.gmra.mrb[38].mxu1 %vm5603_vm8, %v5589_v28  ;;  %5583 = vst.msk [vmem:[#allocation6 + $0x38] sm:$0xff] %vm3746_vm0, %v5567_v34 }
 0x796   : > { %5818 = vst.msk [vmem:[#allocation8] sm:$0xff] %vm3360_vm14, %v5795_v9 }
 0x798   : > { %v5843_v10 = vpop.permute.xlu1 %5842  ;;  %v11834_v34 = vpop.permute.xlu0 %6049 }
 0x799   : > { %v5590_v56 = vld [vmem:[#allocation6 + $0x30] sm:$0xff]  ;;  %5866 = vst.msk [vmem:[#allocation8] sm:$0xff] %vm3553_vm15, %v5843_v10 }
 0x79a   : > { %8650 = vmatprep.mubr.msk.f32.mxu1 %vm5603_vm8, %v5590_v56  ;;  %v6074_v56 = vld [vmem:[#allocation7 + $0x91] sm:$0xff] }
 0x79c   : > { %v5591_v4 = vld [vmem:[#allocation6 + $0x38] sm:$0xff] }
 0x79d   : > { %8651 = vmatmul.mubr.msk.f32.gmra.mrb[40].mxu1 %vm5603_vm8, %v5591_v4 }
 0x858   : > { %v8643_v52 = vpop.f32.mrb[34].mxu1 }
 0x859   : > { %v5700_v29 = vadd.f32 %v8643_v52, %v8373_v61  ;;  %v5694_v22 = vpop.f32.mrb[35].mxu1 }
 0x85a   : > { %v5695_v30 = vadd.f32 %v8373_v61, %v5694_v22 }
 0x85b   : > { %5755 = vst.msk [vmem:[#allocation7 + $0x21] sm:$0xff] %vm3047_vm12, %v5700_v29 }
 0x85c   : > { %5754 = vst.msk [vmem:[#allocation7 + $0x11] sm:$0xff] %vm3047_vm12, %v5695_v30 }
 0x860   : > { %v8646_v54 = vpop.f32.mrb[36].mxu1 }
 0x861   : > { %v5710_v51 = vadd.f32 %v8646_v54, %v8373_v61  ;;  %v5704_v33 = vpop.f32.mrb[37].mxu1 }
 0x862   : > { %v5971_v3 = vld [vmem:[#allocation7 + $0x22] sm:$0xff]  ;;  %v5705_v48 = vadd.f32 %v8373_v61, %v5704_v33 }
 0x863   : > { %v5875_v23 = vld [vmem:[#allocation7 + $0x20] sm:$0xff]  ;;  %5988 = vrot.lane.b32.xlu1 %v5971_v3, %s12581_s8  ;;  %v5874_v63 = vld [vmem:[#allocation7 + $0x10] sm:$0xff]  ;;  %5757 = vst.msk [vmem:[#allocation7 + $0x41] sm:$0xff] %vm3047_vm12, %v5710_v51 }
 0x864   : > { %5892 = vrot.lane.b32.xlu0 %v5875_v23, %s12564_s29  ;;  %5772 = vst.msk [vmem:[#allocation8 + $0x10] sm:$0xff] %vm3047_vm12, %v5875_v23  ;;  %5756 = vst.msk [vmem:[#allocation7 + $0x31] sm:$0xff] %vm3047_vm12, %v5705_v48  ;;  %v5923_v1 = vld [vmem:[#allocation7 + $0x21] sm:$0xff]  ;;  %v5922_v7 = vld [vmem:[#allocation7 + $0x11] sm:$0xff] }
 0x865   : > { %5771 = vst.msk [vmem:[#allocation8 + $0x8] sm:$0xff] %vm3047_vm12, %v5874_v63  ;;  %v5970_v37 = vld [vmem:[#allocation7 + $0x12] sm:$0xff] }
 0x867   : > { %5890 = vrot.lane.b32.xlu1 %v5874_v63, %s12564_s29 }
 0x868   : > { %5940 = vrot.lane.b32.xlu0 %v5923_v1, %s12582_s5  ;;  %v8649_v49 = vpop.f32.mrb[38].mxu1 }
 0x869   : > { %v5720_v60 = vadd.f32 %v8649_v49, %v8373_v61  ;;  %v5714_v15 = vpop.f32.mrb[39].mxu1 }
 0x86a   : > { %v5877_v16 = vld [vmem:[#allocation7 + $0x40] sm:$0xff]  ;;  %v5715_v2 = vadd.f32 %v8373_v61, %v5714_v15 }
 0x86b   : > { %5938 = vrot.lane.b32.xlu1 %v5922_v7, %s12582_s5  ;;  %v6020_v45 = vld [vmem:[#allocation7 + $0x30] sm:$0xff]  ;;  %5759 = vst.msk [vmem:[#allocation7 + $0x61] sm:$0xff] %vm3047_vm12, %v5720_v60  ;;  %5774 = vst.msk [vmem:[#allocation8 + $0x20] sm:$0xff] %vm3047_vm12, %v5877_v16  ;;  %v6069_v32 = vld [vmem:[#allocation7 + $0x41] sm:$0xff] }
 0x86c   : > { %5798 = vrot.lane.b32.xlu0 %v5923_v1, %s12563_s0  ;;  %5758 = vst.msk [vmem:[#allocation7 + $0x51] sm:$0xff] %vm3047_vm12, %v5715_v2  ;;  %5773 = vst.msk [vmem:[#allocation8 + $0x18] sm:$0xff] %vm3047_vm12, %v6020_v45  ;;  %v6117_v11 = vld [vmem:[#allocation7 + $0x42] sm:$0xff]  ;;  %v5781_v14 = vld [vmem:[#allocation7 + $0x31] sm:$0xff] }
 0x86d   : > { %v5829_v25 = vld [vmem:[#allocation7 + $0x32] sm:$0xff] }
 0x86f   : > { %5986 = vrot.lane.b32.xlu1 %v5970_v37, %s12581_s8 }
 0x870   : > { %6035 = vrot.lane.b32.xlu0 %v5875_v23, %s12579_s1  ;;  %v8652_v19 = vpop.f32.mrb[40].mxu1 }
 0x871   : > { %v5730_v58 = vadd.f32 %v8652_v19, %v8373_v61  ;;  %v5724_v44 = vpop.f32.mrb[41].mxu1 }
 0x872   : > { %v5879_v20 = vld [vmem:[#allocation7 + $0x60] sm:$0xff]  ;;  %v5725_v21 = vadd.f32 %v8373_v61, %v5724_v44 }
 0x873   : > { %5896 = vrot.lane.b32.xlu1 %v5877_v16, %s12564_s29  ;;  %v11747_v31 = vld [vmem:[#allocation7 + $0x50] sm:$0xff]  ;;  %5761 = vst.msk [vmem:[#allocation7 + $0x81] sm:$0xff] %vm3047_vm12, %v5730_v58  ;;  %5776 = vst.msk [vmem:[#allocation8 + $0x30] sm:$0xff] %vm3047_vm12, %v5879_v20  ;;  %v5927_v8 = vld [vmem:[#allocation7 + $0x61] sm:$0xff] }
 0x874   : > { %5846 = vrot.lane.b32.xlu0 %v5971_v3, %s12568_s6  ;;  %5760 = vst.msk [vmem:[#allocation7 + $0x71] sm:$0xff] %vm3047_vm12, %v5725_v21  ;;  %5775 = vst.msk [vmem:[#allocation8 + $0x28] sm:$0xff] %vm3047_vm12, %v11747_v31  ;;  %v5975_v24 = vld [vmem:[#allocation7 + $0x62] sm:$0xff]  ;;  %v6070_v18 = vld [vmem:[#allocation7 + $0x51] sm:$0xff] }
 0x875   : > { %v6118_v39 = vld [vmem:[#allocation7 + $0x52] sm:$0xff] }
 0x877   : > { %6039 = vrot.lane.b32.xlu1 %v5877_v16, %s12579_s1 }
 0x878   : > { %6083 = vrot.lane.b32.xlu0 %v5923_v1, %s12583_s11 }
 0x87a   : > { %v5881_v40 = vld [vmem:[#allocation7 + $0x80] sm:$0xff] }
 0x87b   : > { %6087 = vrot.lane.b32.xlu1 %v6069_v32, %s12583_s11  ;;  %v11758_v57 = vld [vmem:[#allocation7 + $0x70] sm:$0xff]  ;;  %v5929_v50 = vld [vmem:[#allocation7 + $0x81] sm:$0xff] }
 0x87c   : > { %6131 = vrot.lane.b32.xlu0 %v5971_v3, %s12584_s3  ;;  %5777 = vst.msk [vmem:[#allocation8 + $0x38] sm:$0xff] %vm3047_vm12, %v11758_v57  ;;  %v5977_v42 = vld [vmem:[#allocation7 + $0x82] sm:$0xff]  ;;  %v6120_v43 = vld [vmem:[#allocation7 + $0x72] sm:$0xff]  ;;  %vm6483_vm12 = vcmask 392448  }
 0x87d   : > { %v6072_v28 = vld [vmem:[#allocation7 + $0x71] sm:$0xff] }
 0x87f   : > { %6135 = vrot.lane.b32.xlu1 %v6117_v11, %s12584_s3 }
 0x880   : > { %5796 = vrot.lane.b32.xlu0 %v5922_v7, %s12563_s0 }
 0x883   : > { %5850 = vrot.lane.b32.xlu1 %v6117_v11, %s12568_s6 }
 0x884   : > { %5844 = vrot.lane.b32.xlu0 %v5970_v37, %s12568_s6 }
 0x887   : > { %5800 = vrot.lane.b32.xlu1 %v5781_v14, %s12563_s0 }
 0x888   : > { %5944 = vrot.lane.b32.xlu0 %v6069_v32, %s12582_s5 }
 0x88b   : > { %6037 = vrot.lane.b32.xlu1 %v6020_v45, %s12579_s1 }
 0x88c   : > { %5992 = vrot.lane.b32.xlu0 %v6117_v11, %s12581_s8 }
 0x88f   : > { %5848 = vrot.lane.b32.xlu1 %v5829_v25, %s12568_s6 }
 0x890   : > { %5802 = vrot.lane.b32.xlu0 %v6069_v32, %s12563_s0 }
 0x893   : > { %6085 = vrot.lane.b32.xlu1 %v5781_v14, %s12583_s11 }
 0x894   : > { %5894 = vrot.lane.b32.xlu0 %v6020_v45, %s12564_s29 }
 0x897   : > { %6133 = vrot.lane.b32.xlu1 %v5829_v25, %s12584_s3 }
 0x898   : > { %5942 = vrot.lane.b32.xlu0 %v5781_v14, %s12582_s5 }
 0x89b   : > { %5990 = vrot.lane.b32.xlu1 %v5829_v25, %s12581_s8 }
 0x89c   : > { %5900 = vrot.lane.b32.xlu0 %v5879_v20, %s12564_s29 }
 0x89f   : > { %6043 = vrot.lane.b32.xlu1 %v5879_v20, %s12579_s1 }
 0x8a0   : > { %5948 = vrot.lane.b32.xlu0 %v5927_v8, %s12582_s5 }
 0x8a3   : > { %6091 = vrot.lane.b32.xlu1 %v5927_v8, %s12583_s11 }
 0x8a4   : > { %5996 = vrot.lane.b32.xlu0 %v5975_v24, %s12581_s8 }
 0x8a7   : > { %6139 = vrot.lane.b32.xlu1 %v5975_v24, %s12584_s3 }
 0x8a8   : > { %5806 = vrot.lane.b32.xlu0 %v5927_v8, %s12563_s0 }
 0x8ab   : > { %5854 = vrot.lane.b32.xlu1 %v5975_v24, %s12568_s6 }
 0x8ac   : > { %6041 = vrot.lane.b32.xlu0 %v11747_v31, %s12579_s1 }
 0x8af   : > { %6137 = vrot.lane.b32.xlu1 %v6118_v39, %s12584_s3 }
 0x8b0   : > { %6089 = vrot.lane.b32.xlu0 %v6070_v18, %s12583_s11 }
 0x8b3   : > { %5898 = vrot.lane.b32.xlu1 %v11747_v31, %s12564_s29 }
 0x8b4   : > { %5804 = vrot.lane.b32.xlu0 %v6070_v18, %s12563_s0 }
 0x8b7   : > { %5946 = vrot.lane.b32.xlu1 %v6070_v18, %s12582_s5 }
 0x8b8   : > { %5852 = vrot.lane.b32.xlu0 %v6118_v39, %s12568_s6 }
 0x8bb   : > { %5994 = vrot.lane.b32.xlu1 %v6118_v39, %s12581_s8 }
 0x8bc   : > { %5904 = vrot.lane.b32.xlu0 %v5881_v40, %s12564_s29 }
 0x8bf   : > { %6047 = vrot.lane.b32.xlu1 %v5881_v40, %s12579_s1 }
 0x8c0   : > { %5952 = vrot.lane.b32.xlu0 %v5929_v50, %s12582_s5 }
 0x8c3   : > { %6095 = vrot.lane.b32.xlu1 %v5929_v50, %s12583_s11 }
 0x8c4   : > { %6000 = vrot.lane.b32.xlu0 %v5977_v42, %s12581_s8 }
 0x8c7   : > { %6141 = vrot.lane.b32.xlu1 %v6120_v43, %s12584_s3 }
 0x8c8   : > { %6045 = vrot.lane.b32.xlu0 %v11758_v57, %s12579_s1 }
 0x8cb   : > { %5902 = vrot.lane.b32.xlu1 %v11758_v57, %s12564_s29  ;;  %s838_s29 = scalar_lea.vmem %s12507_s26, %s12589_s24 }
 0x8cc   : > { %6093 = vrot.lane.b32.xlu0 %v6072_v28, %s12583_s11 }
 0x8cf   : > { %5950 = vrot.lane.b32.xlu1 %v6072_v28, %s12582_s5 }
 0x8d0   : > { %5808 = vrot.lane.b32.xlu0 %v6072_v28, %s12563_s0 }
 0x8d3   : > { %5998 = vrot.lane.b32.xlu1 %v6120_v43, %s12581_s8  ;;  %s12586_s8 = sld [smem:[#allocation28_spill]] }
 0x8d4   : > { %5856 = vrot.lane.b32.xlu0 %v6120_v43, %s12568_s6 }
 0x8d5   : > { %v5989_v4 = vpop.permute.xlu1 %5988 }
 0x8d6   : > { %v5893_v62 = vpop.permute.xlu0 %5892 }
 0x8d7   : > { %6143 = vrot.lane.b32.xlu1 %v5977_v42, %s12584_s3 }
 0x8d8   : > { %6097 = vrot.lane.b32.xlu0 %v6074_v56, %s12583_s11  ;;  %s12593_s11 = sld [smem:[#allocation31_spill]] }
 0x8d9   : > { %v5891_v13 = vpop.permute.xlu1 %5890 }
 0x8da   : > { %v5941_v12 = vpop.permute.xlu0 %5940  ;;  %5914 = vst.msk [vmem:[#allocation8] sm:$0xff] %vm3746_vm0, %v5891_v13 }
 0x8dc   : > { %6145 = vrot.lane.b32.xlu0 %v6122_v5, %s12584_s3 }
 0x8dd   : > { %v5939_v10 = vpop.permute.xlu1 %5938 }
 0x8de   : > { %v5799_v9 = vpop.permute.xlu0 %5798  ;;  %5962 = vst.msk [vmem:[#allocation8] sm:$0xff] %vm3939_vm1, %v5939_v10 }
 0x8df   : > { %5820 = vst.msk [vmem:[#allocation8 + $0x10] sm:$0xff] %vm3360_vm14, %v5799_v9 }
 0x8e1   : > { %v5987_v52 = vpop.permute.xlu1 %5986 }
 0x8e2   : > { %v6036_v61 = vpop.permute.xlu0 %6035  ;;  %6010 = vst.msk [vmem:[#allocation8] sm:$0xff] %vm4132_vm2, %v5987_v52  ;;  %v6443_v52 = vld [vmem:[#allocation9 + $0x2] sm:$0xff] }
 0x8e3   : > { %6059 = vst.msk [vmem:[#allocation8] sm:$0xff] %vm4326_vm3, %v6036_v61 }
 0x8e5   : > { %v5897_v22 = vpop.permute.xlu1 %5896 }
 0x8e6   : > { %v5847_v29 = vpop.permute.xlu0 %5846 }
 0x8e7   : > { %5868 = vst.msk [vmem:[#allocation8 + $0x10] sm:$0xff] %vm3553_vm15, %v5847_v29  ;;  %v6745_v29 = vld [vmem:[#allocation9 + $0x92] sm:$0xff] }
 0x8e8   : > { %6753 = vst.msk [vmem:[#allocation10 + $0x78] sm:$0xff] %vm6347_vm9, %v6745_v29 }
 0x8e9   : > { %v6040_v54 = vpop.permute.xlu1 %6039 }
 0x8ea   : > { %v6084_v30 = vpop.permute.xlu0 %6083 }
 0x8eb   : > { %6107 = vst.msk [vmem:[#allocation8] sm:$0xff] %vm4519_vm4, %v6084_v30 }
 0x8ed   : > { %v6088_v33 = vpop.permute.xlu1 %6087 }
 0x8ee   : > { %v6132_v51 = vpop.permute.xlu0 %6131 }
 0x8ef   : > { %6155 = vst.msk [vmem:[#allocation8] sm:$0xff] %vm4712_vm5, %v6132_v51 }
 0x8f1   : > { %v6136_v3 = vpop.permute.xlu1 %6135 }
 0x8f2   : > { %v5797_v23 = vpop.permute.xlu0 %5796 }
 0x8f3   : > { %5819 = vst.msk [vmem:[#allocation8 + $0x8] sm:$0xff] %vm3360_vm14, %v5797_v23 }
 0x8f5   : > { %v5851_v48 = vpop.permute.xlu1 %5850 }
 0x8f6   : > { %v5845_v63 = vpop.permute.xlu0 %5844  ;;  %v6163_v1 = vld [vmem:[#allocation8] sm:$0xff] }
 0x8f7   : > { %5867 = vst.msk [vmem:[#allocation8 + $0x8] sm:$0xff] %vm3553_vm15, %v5845_v63  ;;  %8671 = vmatprep.mubr.msk.f32.mxu0 %vm4778_vm6, %v6163_v1 }
 0x8f8   : > { %5915 = vst.msk [vmem:[#allocation8 + $0x8] sm:$0xff] %vm3746_vm0, %v5893_v62 }
 0x8f9   : > { %5963 = vst.msk [vmem:[#allocation8 + $0x8] sm:$0xff] %vm3939_vm1, %v5941_v12  ;;  %v5801_v49 = vpop.permute.xlu1 %5800 }
 0x8fa   : > { %6011 = vst.msk [vmem:[#allocation8 + $0x8] sm:$0xff] %vm4132_vm2, %v5989_v4  ;;  %v5945_v60 = vpop.permute.xlu0 %5944 }
 0x8fb   : > { %5821 = vst.msk [vmem:[#allocation8 + $0x18] sm:$0xff] %vm3360_vm14, %v5801_v49 }
 0x8fd   : > { %v6038_v15 = vpop.permute.xlu1 %6037 }
 0x8fe   : > { %v5993_v7 = vpop.permute.xlu0 %5992  ;;  %6060 = vst.msk [vmem:[#allocation8 + $0x8] sm:$0xff] %vm4326_vm3, %v6038_v15 }
 0x901   : > { %v5849_v16 = vpop.permute.xlu1 %5848 }
 0x902   : > { %v5803_v2 = vpop.permute.xlu0 %5802  ;;  %5869 = vst.msk [vmem:[#allocation8 + $0x18] sm:$0xff] %vm3553_vm15, %v5849_v16 }
 0x903   : > { %5822 = vst.msk [vmem:[#allocation8 + $0x20] sm:$0xff] %vm3360_vm14, %v5803_v2 }
 0x904   : > { %5917 = vst.msk [vmem:[#allocation8 + $0x18] sm:$0xff] %vm3746_vm0, %v5897_v22  ;;  %v6378_v22 = vld [vmem:[#allocation9] sm:$0xff] }
 0x905   : > { %5870 = vst.msk [vmem:[#allocation8 + $0x20] sm:$0xff] %vm3553_vm15, %v5851_v48  ;;  %v6086_v45 = vpop.permute.xlu1 %6085 }
 0x906   : > { %5965 = vst.msk [vmem:[#allocation8 + $0x18] sm:$0xff] %vm3939_vm1, %v5945_v60  ;;  %v5895_v37 = vpop.permute.xlu0 %5894 }
 0x907   : > { %6013 = vst.msk [vmem:[#allocation8 + $0x18] sm:$0xff] %vm4132_vm2, %v5993_v7 }
 0x908   : > { %6108 = vst.msk [vmem:[#allocation8 + $0x8] sm:$0xff] %vm4519_vm4, %v6086_v45 }
 0x909   : > { %5916 = vst.msk [vmem:[#allocation8 + $0x10] sm:$0xff] %vm3746_vm0, %v5895_v37  ;;  %v6134_v19 = vpop.permute.xlu1 %6133 }
 0x90a   : > { %v5943_v58 = vpop.permute.xlu0 %5942  ;;  %6156 = vst.msk [vmem:[#allocation8 + $0x8] sm:$0xff] %vm4712_vm5, %v6134_v19 }
 0x90b   : > { %5964 = vst.msk [vmem:[#allocation8 + $0x10] sm:$0xff] %vm3939_vm1, %v5943_v58 }
 0x90c   : > { %6386 = vst.msk [vmem:[#allocation10] sm:$0xff] %vm6347_vm9, %v6378_v22 }
 0x90d   : > { %v5991_v20 = vpop.permute.xlu1 %5990 }
 0x90e   : > { %v5901_v44 = vpop.permute.xlu0 %5900  ;;  %6012 = vst.msk [vmem:[#allocation8 + $0x10] sm:$0xff] %vm4132_vm2, %v5991_v20 }
 0x90f   : > { %6061 = vst.msk [vmem:[#allocation8 + $0x10] sm:$0xff] %vm4326_vm3, %v6040_v54  ;;  %v11961_v54 = vld [vmem:[%s12586_s8] ss:$0 sm:$0xff]  ;;  %s12592_s8 = sld [smem:[#allocation29_spill]] }
 0x910   : > { %6109 = vst.msk [vmem:[#allocation8 + $0x10] sm:$0xff] %vm4519_vm4, %v6088_v33  ;;  %v11966_v33 = vld [vmem:[%s12493_s12] ss:$0 sm:$0xff] }
 0x911   : > { %6157 = vst.msk [vmem:[#allocation8 + $0x10] sm:$0xff] %vm4712_vm5, %v6136_v3  ;;  %v6044_v31 = vpop.permute.xlu1 %6043  ;;  %v6164_v32 = vld [vmem:[#allocation8 + $0x8] sm:$0xff] }
 0x912   : > { %v5949_v21 = vpop.permute.xlu0 %5948  ;;  %8672 = vmatmul.mubr.msk.f32.vlgmr.msra.gmra.mrb[64].mxu0 %vm4778_vm6, %v6164_v32 }
 0x915   : > { %v6092_v11 = vpop.permute.xlu1 %6091 }
 0x916   : > { %v5997_v57 = vpop.permute.xlu0 %5996 }
 0x918   : > { %v6165_v6 = vld [vmem:[#allocation8 + $0x10] sm:$0xff] }
 0x919   : > { %v6140_v55 = vpop.permute.xlu1 %6139  ;;  %8674 = vmatprep.mubr.msk.f32.mxu0 %vm4778_vm6, %v6165_v6 }
 0x91a   : > { %v5807_v59 = vpop.permute.xlu0 %5806 }
 0x91b   : > { %5824 = vst.msk [vmem:[#allocation8 + $0x30] sm:$0xff] %vm3360_vm14, %v5807_v59 }
 0x91d   : > { %v5855_v36 = vpop.permute.xlu1 %5854 }
 0x91e   : > { %v6042_v38 = vpop.permute.xlu0 %6041  ;;  %5872 = vst.msk [vmem:[#allocation8 + $0x30] sm:$0xff] %vm3553_vm15, %v5855_v36 }
 0x91f   : > { %6062 = vst.msk [vmem:[#allocation8 + $0x18] sm:$0xff] %vm4326_vm3, %v6042_v38 }
 0x921   : > { %v6138_v14 = vpop.permute.xlu1 %6137 }
 0x922   : > { %v6090_v17 = vpop.permute.xlu0 %6089 }
 0x923   : > { %6110 = vst.msk [vmem:[#allocation8 + $0x18] sm:$0xff] %vm4519_vm4, %v6090_v17 }
 0x924   : > { %6158 = vst.msk [vmem:[#allocation8 + $0x18] sm:$0xff] %vm4712_vm5, %v6138_v14 }
 0x925   : > { %v5899_v53 = vpop.permute.xlu1 %5898 }
 0x926   : > { %v5805_v35 = vpop.permute.xlu0 %5804  ;;  %5918 = vst.msk [vmem:[#allocation8 + $0x20] sm:$0xff] %vm3746_vm0, %v5899_v53 }
 0x927   : > { %5823 = vst.msk [vmem:[#allocation8 + $0x28] sm:$0xff] %vm3360_vm14, %v5805_v35  ;;  %v6756_v35 = vld [vmem:[%s12494_s13 + $0x10] sm:$0xff] }
 0x929   : > { %v5947_v26 = vpop.permute.xlu1 %5946 }
 0x92a   : > { %v5853_v41 = vpop.permute.xlu0 %5852  ;;  %5966 = vst.msk [vmem:[#allocation8 + $0x20] sm:$0xff] %vm3939_vm1, %v5947_v26 }
 0x92b   : > { %5871 = vst.msk [vmem:[#allocation8 + $0x28] sm:$0xff] %vm3553_vm15, %v5853_v41  ;;  %v6166_v27 = vld [vmem:[#allocation8 + $0x18] sm:$0xff] }
 0x92c   : > { %5919 = vst.msk [vmem:[#allocation8 + $0x28] sm:$0xff] %vm3746_vm0, %v5901_v44  ;;  %8675 = vmatmul.mubr.msk.f32.gmra.mrb[66].mxu0 %vm4778_vm6, %v6166_v27 }
 0x92d   : > { %5967 = vst.msk [vmem:[#allocation8 + $0x28] sm:$0xff] %vm3939_vm1, %v5949_v21  ;;  %v5995_v25 = vpop.permute.xlu1 %5994 }
 0x92e   : > { %6015 = vst.msk [vmem:[#allocation8 + $0x28] sm:$0xff] %vm4132_vm2, %v5997_v57  ;;  %v5905_v46 = vpop.permute.xlu0 %5904  ;;  %6014 = vst.msk [vmem:[#allocation8 + $0x20] sm:$0xff] %vm4132_vm2, %v5995_v25 }
 0x92f   : > { %6063 = vst.msk [vmem:[#allocation8 + $0x20] sm:$0xff] %vm4326_vm3, %v6044_v31 }
 0x930   : > { %6111 = vst.msk [vmem:[#allocation8 + $0x20] sm:$0xff] %vm4519_vm4, %v6092_v11 }
 0x931   : > { %6159 = vst.msk [vmem:[#allocation8 + $0x20] sm:$0xff] %vm4712_vm5, %v6140_v55  ;;  %v6048_v8 = vpop.permute.xlu1 %6047 }
 0x932   : > { %v5953_v47 = vpop.permute.xlu0 %5952 }
 0x935   : > { %v6096_v18 = vpop.permute.xlu1 %6095 }
 0x936   : > { %v6001_v24 = vpop.permute.xlu0 %6000 }
 0x938   : > { %v6167_v39 = vld [vmem:[#allocation8 + $0x20] sm:$0xff] }
 0x939   : > { %v6142_v50 = vpop.permute.xlu1 %6141  ;;  %8677 = vmatprep.mubr.msk.f32.mxu0 %vm4778_vm6, %v6167_v39 }
 0x93a   : > { %v6046_v40 = vpop.permute.xlu0 %6045 }
 0x93b   : > { %6064 = vst.msk [vmem:[#allocation8 + $0x28] sm:$0xff] %vm4326_vm3, %v6046_v40 }
 0x93d   : > { %v5903_v43 = vpop.permute.xlu1 %5902 }
 0x93e   : > { %v6094_v42 = vpop.permute.xlu0 %6093  ;;  %5920 = vst.msk [vmem:[#allocation8 + $0x30] sm:$0xff] %vm3746_vm0, %v5903_v43 }
 0x93f   : > { %6112 = vst.msk [vmem:[#allocation8 + $0x28] sm:$0xff] %vm4519_vm4, %v6094_v42 }
 0x940   : > { %6160 = vst.msk [vmem:[#allocation8 + $0x28] sm:$0xff] %vm4712_vm5, %v6142_v50 }
 0x941   : > { %v5951_v56 = vpop.permute.xlu1 %5950 }
 0x942   : > { %v5809_v28 = vpop.permute.xlu0 %5808  ;;  %5968 = vst.msk [vmem:[#allocation8 + $0x30] sm:$0xff] %vm3939_vm1, %v5951_v56 }
 0x943   : > { %5825 = vst.msk [vmem:[#allocation8 + $0x38] sm:$0xff] %vm3360_vm14, %v5809_v28  ;;  %vm6532_vm14 = vcmask 523648  }
 0x945   : > { %v5999_v62 = vpop.permute.xlu1 %5998 }
 0x946   : > { %v5857_v4 = vpop.permute.xlu0 %5856  ;;  %6016 = vst.msk [vmem:[#allocation8 + $0x30] sm:$0xff] %vm4132_vm2, %v5999_v62 }
 0x947   : > { %5873 = vst.msk [vmem:[#allocation8 + $0x38] sm:$0xff] %vm3553_vm15, %v5857_v4  ;;  %v6168_v5 = vld [vmem:[#allocation8 + $0x28] sm:$0xff]  ;;  %vm6581_vm15 = vcmask 654848  }
 0x948   : > { %5921 = vst.msk [vmem:[#allocation8 + $0x38] sm:$0xff] %vm3746_vm0, %v5905_v46  ;;  %8678 = vmatmul.mubr.msk.f32.gmra.mrb[68].mxu0 %vm4778_vm6, %v6168_v5  ;;  %vm6630_vm0 = vcmask 786048  }
 0x949   : > { %6065 = vst.msk [vmem:[#allocation8 + $0x30] sm:$0xff] %vm4326_vm3, %v6048_v8  ;;  %v6144_v13 = vpop.permute.xlu1 %6143 }
 0x94a   : > { %5969 = vst.msk [vmem:[#allocation8 + $0x38] sm:$0xff] %vm3939_vm1, %v5953_v47  ;;  %v6098_v12 = vpop.permute.xlu0 %6097  ;;  %vm6680_vm1 = vcmask 917248  }
 0x94b   : > { %6113 = vst.msk [vmem:[#allocation8 + $0x30] sm:$0xff] %vm4519_vm4, %v6096_v18 }
 0x94c   : > { %6017 = vst.msk [vmem:[#allocation8 + $0x38] sm:$0xff] %vm4132_vm2, %v6001_v24  ;;  %vm6729_vm2 = vcmask 1048448  }
 0x94d   : > { %6066 = vst.msk [vmem:[#allocation8 + $0x38] sm:$0xff] %vm4326_vm3, %v11834_v34  ;;  %v6394_v34 = vld [vmem:[#allocation9 + $0x1] sm:$0xff]  ;;  %vm6909_vm3 = vcmask 523264  }
 0x94e   : > { %6161 = vst.msk [vmem:[#allocation8 + $0x30] sm:$0xff] %vm4712_vm5, %v6144_v13  ;;  %v6146_v9 = vpop.permute.xlu0 %6145  ;;  %6410 = vrot.lane.b32.xlu1 %v6394_v34, %s12568_s6 }
 0x94f   : > { %6114 = vst.msk [vmem:[#allocation8 + $0x38] sm:$0xff] %vm4519_vm4, %v6098_v12  ;;  %vm12171_vm4 = vmpackc.low %vm6909_vm3, %vm6909_vm3 }
 0x950   : > { %6162 = vst.msk [vmem:[#allocation8 + $0x38] sm:$0xff] %vm4712_vm5, %v6146_v9  ;;  %vm7389_vm5 = vcmask 128000  }
 0x951   : > { %7390 = vst.msk [vmem:[#allocation12] sm:$0x3f] %vm7389_vm5, %v8989_v0  ;;  %7393 = vst.msk [vmem:[#allocation12 + $0x18] sm:$0x3f] %vm7389_vm5, %v8989_v0 }
 0x952   : > { %6459 = vrot.lane.b32.xlu1 %v6443_v52, %s12582_s5  ;;  %7394 = vst.msk [vmem:[#allocation12 + $0x20] sm:$0x3f] %vm7389_vm5, %v8989_v0  ;;  %7395 = vst.msk [vmem:[#allocation12 + $0x28] sm:$0x3f] %vm7389_vm5, %v8989_v0 }
 0x953   : > { %7391 = vst.msk [vmem:[#allocation12 + $0x8] sm:$0x3f] %vm7389_vm5, %v8989_v0  ;;  %7392 = vst.msk [vmem:[#allocation12 + $0x10] sm:$0x3f] %vm7389_vm5, %v8989_v0 }
 0x955   : > { %v6169_v10 = vld [vmem:[#allocation8 + $0x30] sm:$0xff] }
 0x956   : > { %8680 = vmatprep.mubr.msk.f32.mxu0 %vm4778_vm6, %v6169_v10 }
 0x957   : > { %v6170_v61 = vld [vmem:[#allocation8 + $0x38] sm:$0xff] }
 0x958   : > { %8681 = vmatmul.mubr.msk.f32.gmra.mrb[70].mxu0 %vm4778_vm6, %v6170_v61  ;;  %vm7397_vm6 = vcmask 125952  }
 0x9c0   : > { %v6411_v30 = vpop.permute.xlu1 %6410 }
 0x9c1   : > { %6435 = vst.msk [vmem:[#allocation10] sm:$0xff] %vm6434_vm11, %v6411_v30 }
 0x9c4   : > { %v6460_v3 = vpop.permute.xlu1 %6459 }
 0x9c5   : > { %6484 = vst.msk [vmem:[#allocation10] sm:$0xff] %vm6483_vm12, %v6460_v3  ;;  %v6696_v3 = vld [vmem:[#allocation9 + $0x91] sm:$0xff] }
 0x9e5   : > { %v8673_v51 = vpop.f32.mrb[64].mxu0 }
 0x9e6   : > { %v6317_v23 = vmul.f32 %v8673_v51, %v11961_v54  ;;  %v6270_v48 = vpop.f32.mrb[65].mxu0  ;;  %v6893_v51 = vld [vmem:[%s12496_s15] sm:$0xff] }
 0x9e7   : > { %v6316_v63 = vmul.f32 %v11961_v54, %v6270_v48 }
 0x9e8   : > { %v6332_v1 = vadd.f32 %v11966_v33, %v6317_v23  ;;  %v6755_v23 = vld [vmem:[%s12494_s13 + $0x8] sm:$0xff] }
 0x9e9   : > { %v6331_v49 = vadd.f32 %v11966_v33, %v6316_v63  ;;  %8400 = vmatprep.mubr.msk.f32.mxu1 %vm6347_vm9, %v6755_v23 }
 0x9ea   : > { %v6340_v60 = vmax.f32 %v6332_v1, 0.0  ;;  %v6880_v1 = vld [vmem:[%s12495_s14 + $0x8] sm:$0xff] }
 0x9eb   : > { %v6339_v15 = vmax.f32 %v6331_v49, 0.0 }
 0x9ec   : > { %6371 = vst.msk [vmem:[#allocation9 + $0x21] sm:$0xff] %vm6347_vm9, %v6340_v60 }
 0x9ed   : > { %6370 = vst.msk [vmem:[#allocation9 + $0x11] sm:$0xff] %vm6347_vm9, %v6339_v15  ;;  %v6894_v15 = vld [vmem:[%s12496_s15 + $0x8] sm:$0xff] }
 0x9f3   : > { %v6640_v7 = vld [vmem:[#allocation9 + $0x20] sm:$0xff] }
 0x9f4   : > { %v6591_v16 = vld [vmem:[#allocation9 + $0x22] sm:$0xff]  ;;  %6656 = vrot.lane.b32.xlu1 %v6640_v7, %s9003_s2  ;;  %6510 = vrot.lane.b32.xlu0 %v6640_v7, %s12579_s1  ;;  %v6492_v2 = vld [vmem:[#allocation9 + $0x10] sm:$0xff]  ;;  %6388 = vst.msk [vmem:[#allocation10 + $0x20] sm:$0xff] %vm6347_vm9, %v6640_v7 }
 0x9f5   : > { %6746 = vst.msk [vmem:[#allocation10 + $0x8] sm:$0xff] %vm6347_vm9, %v6591_v16  ;;  %6387 = vst.msk [vmem:[#allocation10 + $0x10] sm:$0xff] %vm6347_vm9, %v6492_v2  ;;  %v6689_v45 = vld [vmem:[#allocation9 + $0x21] sm:$0xff]  ;;  %v6395_v44 = vld [vmem:[#allocation9 + $0x11] sm:$0xff] }
 0x9f6   : > { %v6444_v57 = vld [vmem:[#allocation9 + $0x12] sm:$0xff] }
 0x9f8   : > { %6705 = vrot.lane.b32.xlu1 %v6689_v45, %s9004_s7  ;;  %6559 = vrot.lane.b32.xlu0 %v6689_v45, %s12584_s3 }
 0x9fc   : > { %6608 = vrot.lane.b32.xlu0 %v6591_v16, %s9005_s28  ;;  %6414 = vrot.lane.b32.xlu1 %v6689_v45, %s12568_s6  ;;  %v6759_v17 = vld [vmem:[#allocation10 + $0x8] sm:$0xff] }
 0x9ff   : > { %v8676_v37 = vpop.f32.mrb[66].mxu0 }
 0xa00   : > { %v6319_v19 = vmul.f32 %v8676_v37, %v11961_v54  ;;  %v6280_v58 = vpop.f32.mrb[67].mxu0  ;;  %6463 = vrot.lane.b32.xlu1 %v6591_v16, %s12582_s5  ;;  %6412 = vrot.lane.b32.xlu0 %v6395_v44, %s12568_s6 }
 0xa01   : > { %v6318_v20 = vmul.f32 %v11961_v54, %v6280_v58 }
 0xa02   : > { %v6334_v21 = vadd.f32 %v11966_v33, %v6319_v19 }
 0xa03   : > { %v6333_v31 = vadd.f32 %v11966_v33, %v6318_v20 }
 0xa04   : > { %v6342_v32 = vmax.f32 %v6334_v21, 0.0  ;;  %6508 = vrot.lane.b32.xlu1 %v6492_v2, %s12579_s1  ;;  %6461 = vrot.lane.b32.xlu0 %v6444_v57, %s12582_s5 }
 0xa05   : > { %v6341_v11 = vmax.f32 %v6333_v31, 0.0 }
 0xa06   : > { %6373 = vst.msk [vmem:[#allocation9 + $0x41] sm:$0xff] %vm6347_vm9, %v6342_v32 }
 0xa07   : > { %6372 = vst.msk [vmem:[#allocation9 + $0x31] sm:$0xff] %vm6347_vm9, %v6341_v11 }
 0xa08   : > { %6557 = vrot.lane.b32.xlu1 %v6395_v44, %s12584_s3 }
 0xa0c   : > { %6606 = vrot.lane.b32.xlu1 %v6444_v57, %s9005_s28 }
 0xa0d   : > { %v6495_v6 = vld [vmem:[#allocation9 + $0x40] sm:$0xff] }
 0xa0e   : > { %v6593_v59 = vld [vmem:[#allocation9 + $0x42] sm:$0xff]  ;;  %6514 = vrot.lane.b32.xlu0 %v6495_v6, %s12579_s1  ;;  %v6739_v55 = vld [vmem:[#allocation9 + $0x32] sm:$0xff]  ;;  %6390 = vst.msk [vmem:[#allocation10 + $0x40] sm:$0xff] %vm6347_vm9, %v6495_v6 }
 0xa0f   : > { %v6641_v38 = vld [vmem:[#allocation9 + $0x30] sm:$0xff]  ;;  %6748 = vst.msk [vmem:[#allocation10 + $0x28] sm:$0xff] %vm6347_vm9, %v6593_v59  ;;  %6747 = vst.msk [vmem:[#allocation10 + $0x18] sm:$0xff] %vm6347_vm9, %v6739_v55  ;;  %v6544_v36 = vld [vmem:[#allocation9 + $0x41] sm:$0xff] }
 0xa10   : > { %6389 = vst.msk [vmem:[#allocation10 + $0x30] sm:$0xff] %vm6347_vm9, %v6641_v38  ;;  %6660 = vrot.lane.b32.xlu1 %v6495_v6, %s9003_s2  ;;  %v6690_v25 = vld [vmem:[#allocation9 + $0x31] sm:$0xff] }
 0xa12   : > { %6563 = vrot.lane.b32.xlu0 %v6544_v36, %s12584_s3 }
 0xa14   : > { %6709 = vrot.lane.b32.xlu1 %v6544_v36, %s9004_s7 }
 0xa16   : > { %6612 = vrot.lane.b32.xlu0 %v6593_v59, %s9005_s28  ;;  %v6761_v14 = vld [vmem:[#allocation10 + $0x18] sm:$0xff] }
 0xa17   : > { %v8820_v53 = vpack.c.bf16 %v6761_v14, %v6759_v17 }
 0xa18   : > { %6418 = vrot.lane.b32.xlu1 %v6544_v36, %s12568_s6 }
 0xa19   : > { %8822 = vmatprep.subr.msk.bf16.mxu1 %vm12007_vm13, %v8820_v53 }
 0xa1a   : > { %6658 = vrot.lane.b32.xlu0 %v6641_v38, %s9003_s2 }
 0xa1b   : > { %v8679_v41 = vpop.f32.mrb[68].mxu0 }
 0xa1c   : > { %v6321_v26 = vmul.f32 %v8679_v41, %v11961_v54  ;;  %v6290_v27 = vpop.f32.mrb[69].mxu0  ;;  %6467 = vrot.lane.b32.xlu1 %v6593_v59, %s12582_s5 }
 0xa1d   : > { %v6320_v46 = vmul.f32 %v11961_v54, %v6290_v27 }
 0xa1e   : > { %v6336_v47 = vadd.f32 %v11966_v33, %v6321_v26  ;;  %6707 = vrot.lane.b32.xlu0 %v6690_v25, %s9004_s7 }
 0xa1f   : > { %v6335_v8 = vadd.f32 %v11966_v33, %v6320_v46  ;;  %v6763_v46 = vld [vmem:[#allocation10 + $0x28] sm:$0xff] }
 0xa20   : > { %v6344_v24 = vmax.f32 %v6336_v47, 0.0  ;;  %6512 = vrot.lane.b32.xlu1 %v6641_v38, %s12579_s1 }
 0xa21   : > { %v6343_v18 = vmax.f32 %v6335_v8, 0.0 }
 0xa22   : > { %6375 = vst.msk [vmem:[#allocation9 + $0x61] sm:$0xff] %vm6347_vm9, %v6344_v24  ;;  %6416 = vrot.lane.b32.xlu0 %v6690_v25, %s12568_s6 }
 0xa23   : > { %6374 = vst.msk [vmem:[#allocation9 + $0x51] sm:$0xff] %vm6347_vm9, %v6343_v18 }
 0xa24   : > { %6561 = vrot.lane.b32.xlu1 %v6690_v25, %s12584_s3 }
 0xa26   : > { %6465 = vrot.lane.b32.xlu0 %v6739_v55, %s12582_s5 }
 0xa28   : > { %6610 = vrot.lane.b32.xlu1 %v6739_v55, %s9005_s28 }
 0xa29   : > { %v6497_v39 = vld [vmem:[#allocation9 + $0x60] sm:$0xff] }
 0xa2a   : > { %v6595_v40 = vld [vmem:[#allocation9 + $0x62] sm:$0xff]  ;;  %6518 = vrot.lane.b32.xlu0 %v6497_v39, %s12579_s1  ;;  %v6643_v50 = vld [vmem:[#allocation9 + $0x50] sm:$0xff]  ;;  %6392 = vst.msk [vmem:[#allocation10 + $0x60] sm:$0xff] %vm6347_vm9, %v6497_v39 }
 0xa2b   : > { %v8682_v42 = vpop.f32.mrb[70].mxu0  ;;  %v6448_v43 = vld [vmem:[#allocation9 + $0x52] sm:$0xff]  ;;  %6750 = vst.msk [vmem:[#allocation10 + $0x48] sm:$0xff] %vm6347_vm9, %v6595_v40  ;;  %6391 = vst.msk [vmem:[#allocation10 + $0x50] sm:$0xff] %vm6347_vm9, %v6643_v50  ;;  %v6546_v62 = vld [vmem:[#allocation9 + $0x61] sm:$0xff] }
 0xa2c   : > { %v6323_v28 = vmul.f32 %v8682_v42, %v11961_v54  ;;  %v6300_v56 = vpop.f32.mrb[71].mxu0  ;;  %6749 = vst.msk [vmem:[#allocation10 + $0x38] sm:$0xff] %vm6347_vm9, %v6448_v43  ;;  %6664 = vrot.lane.b32.xlu1 %v6497_v39, %s9003_s2  ;;  %v6692_v61 = vld [vmem:[#allocation9 + $0x51] sm:$0xff] }
 0xa2d   : > { %v6322_v4 = vmul.f32 %v11961_v54, %v6300_v56  ;;  %v6879_v54 = vld [vmem:[%s12495_s14] sm:$0xff] }
 0xa2e   : > { %v6338_v5 = vadd.f32 %v11966_v33, %v6323_v28  ;;  %6567 = vrot.lane.b32.xlu0 %v6546_v62, %s12584_s3 }
 0xa2f   : > { %v6337_v12 = vadd.f32 %v11966_v33, %v6322_v4  ;;  %v6647_v33 = vld [vmem:[#allocation9 + $0x90] sm:$0xff] }
 0xa30   : > { %v6346_v13 = vmax.f32 %v6338_v5, 0.0  ;;  %6713 = vrot.lane.b32.xlu1 %v6546_v62, %s9004_s7 }
 0xa31   : > { %v6345_v9 = vmax.f32 %v6337_v12, 0.0 }
 0xa32   : > { %6377 = vst.msk [vmem:[#allocation9 + $0x81] sm:$0xff] %vm6347_vm9, %v6346_v13  ;;  %6616 = vrot.lane.b32.xlu0 %v6595_v40, %s9005_s28 }
 0xa33   : > { %6376 = vst.msk [vmem:[#allocation9 + $0x71] sm:$0xff] %vm6347_vm9, %v6345_v9  ;;  %v6765_v14 = vld [vmem:[#allocation10 + $0x38] sm:$0xff] }
 0xa34   : > { %6422 = vrot.lane.b32.xlu1 %v6546_v62, %s12568_s6  ;;  %v8825_v25 = vpack.c.bf16 %v6765_v14, %v6763_v46 }
 0xa36   : > { %6662 = vrot.lane.b32.xlu0 %v6643_v50, %s9003_s2 }
 0xa38   : > { %6471 = vrot.lane.b32.xlu1 %v6595_v40, %s12582_s5 }
 0xa39   : > { %v6597_v10 = vld [vmem:[#allocation9 + $0x82] sm:$0xff] }
 0xa3a   : > { %v6498_v34 = vld [vmem:[#allocation9 + $0x70] sm:$0xff]  ;;  %6752 = vst.msk [vmem:[#allocation10 + $0x68] sm:$0xff] %vm6347_vm9, %v6597_v10  ;;  %6711 = vrot.lane.b32.xlu0 %v6692_v61, %s9004_s7  ;;  %v6499_v29 = vld [vmem:[#allocation9 + $0x80] sm:$0xff] }
 0xa3b   : > { %v6596_v52 = vld [vmem:[#allocation9 + $0x72] sm:$0xff]  ;;  %6393 = vst.msk [vmem:[#allocation10 + $0x70] sm:$0xff] %vm6347_vm9, %v6498_v34  ;;  %v6548_v22 = vld [vmem:[#allocation9 + $0x81] sm:$0xff] }
 0xa3c   : > { %6751 = vst.msk [vmem:[#allocation10 + $0x58] sm:$0xff] %vm6347_vm9, %v6596_v52  ;;  %6516 = vrot.lane.b32.xlu1 %v6643_v50, %s12579_s1  ;;  %v6547_v30 = vld [vmem:[#allocation9 + $0x71] sm:$0xff] }
 0xa3e   : > { %6420 = vrot.lane.b32.xlu0 %v6692_v61, %s12568_s6 }
 0xa40   : > { %6565 = vrot.lane.b32.xlu1 %v6692_v61, %s12584_s3  ;;  %v6767_v61 = vld [vmem:[#allocation10 + $0x48] sm:$0xff] }
 0xa42   : > { %6469 = vrot.lane.b32.xlu0 %v6448_v43, %s12582_s5 }
 0xa43   : > { %v6769_v5 = vld [vmem:[#allocation10 + $0x58] sm:$0xff] }
 0xa44   : > { %6614 = vrot.lane.b32.xlu1 %v6448_v43, %s9005_s28 }
 0xa46   : > { %6522 = vrot.lane.b32.xlu0 %v6499_v29, %s12579_s1 }
 0xa48   : > { %6668 = vrot.lane.b32.xlu1 %v6499_v29, %s9003_s2 }
 0xa4a   : > { %6571 = vrot.lane.b32.xlu0 %v6548_v22, %s12584_s3 }
 0xa4c   : > { %6520 = vrot.lane.b32.xlu1 %v6498_v34, %s12579_s1 }
 0xa4e   : > { %6620 = vrot.lane.b32.xlu0 %v6597_v10, %s9005_s28 }
 0xa50   : > { %6569 = vrot.lane.b32.xlu1 %v6547_v30, %s12584_s3 }
 0xa52   : > { %6666 = vrot.lane.b32.xlu0 %v6498_v34, %s9003_s2  ;;  %v8830_v34 = vpack.c.bf16 %v6769_v5, %v6767_v61 }
 0xa54   : > { %6618 = vrot.lane.b32.xlu1 %v6596_v52, %s9005_s28 }
 0xa56   : > { %6715 = vrot.lane.b32.xlu0 %v6547_v30, %s9004_s7 }
 0xa58   : > { %6717 = vrot.lane.b32.xlu1 %v6548_v22, %s9004_s7 }
 0xa5a   : > { %6424 = vrot.lane.b32.xlu0 %v6547_v30, %s12568_s6 }
 0xa5c   : > { %6883 = vperm.xlu1 %8944, %v6879_v54  }
 0xa5e   : > { %6473 = vrot.lane.b32.xlu0 %v6596_v52, %s12582_s5 }
 0xa60   : > { %6897 = vperm.xlu1 %8944, %v6893_v51  }
 0xa62   : > { %6670 = vrot.lane.b32.xlu0 %v6647_v33, %s9003_s2 }
 0xa66   : > { %6719 = vrot.lane.b32.xlu0 %v6696_v3, %s9004_s7  ;;  %v6657_v48 = vpop.permute.xlu1 %6656  ;;  %v6511_v63 = vpop.permute.xlu0 %6510 }
 0xa6a   : > { %6888 = vperm.xlu0 %8943, %v6880_v1   ;;  %v6706_v49 = vpop.permute.xlu1 %6705  ;;  %v6560_v60 = vpop.permute.xlu0 %6559 }
 0xa6e   : > { %6902 = vperm.xlu0 %8943, %v6894_v15   ;;  %v6609_v7 = vpop.permute.xlu0 %6608  ;;  %v6415_v16 = vpop.permute.xlu1 %6414 }
 0xa6f   : > { %6437 = vst.msk [vmem:[#allocation10 + $0x20] sm:$0xff] %vm6434_vm11, %v6415_v16 }
 0xa72   : > { %v6464_v2 = vpop.permute.xlu1 %6463  ;;  %v6413_v45 = vpop.permute.xlu0 %6412 }
 0xa73   : > { %6486 = vst.msk [vmem:[#allocation10 + $0x20] sm:$0xff] %vm6483_vm12, %v6464_v2 }
 0xa74   : > { %6436 = vst.msk [vmem:[#allocation10 + $0x10] sm:$0xff] %vm6434_vm11, %v6413_v45 }
 0xa76   : > { %v6509_v37 = vpop.permute.xlu1 %6508  ;;  %v6462_v19 = vpop.permute.xlu0 %6461 }
 0xa77   : > { %6533 = vst.msk [vmem:[#allocation10] sm:$0xff] %vm6532_vm14, %v6509_v37 }
 0xa78   : > { %6485 = vst.msk [vmem:[#allocation10 + $0x10] sm:$0xff] %vm6483_vm12, %v6462_v19 }
 0xa79   : > { %6534 = vst.msk [vmem:[#allocation10 + $0x10] sm:$0xff] %vm6532_vm14, %v6511_v63 }
 0xa7a   : > { %6583 = vst.msk [vmem:[#allocation10 + $0x10] sm:$0xff] %vm6581_vm15, %v6560_v60  ;;  %v6558_v58 = vpop.permute.xlu1 %6557  ;;  %v6773_v60 = vld [vmem:[#allocation10 + $0x78] sm:$0xff] }
 0xa7b   : > { %6632 = vst.msk [vmem:[#allocation10 + $0x10] sm:$0xff] %vm6630_vm0, %v6609_v7 }
 0xa7c   : > { %6582 = vst.msk [vmem:[#allocation10] sm:$0xff] %vm6581_vm15, %v6558_v58 }
 0xa7e   : > { %v6607_v44 = vpop.permute.xlu1 %6606 }
 0xa7f   : > { %6631 = vst.msk [vmem:[#allocation10] sm:$0xff] %vm6630_vm0, %v6607_v44 }
 0xa80   : > { %v6515_v20 = vpop.permute.xlu0 %6514  ;;  %6681 = vst.msk [vmem:[#allocation10] sm:$0xff] %vm6680_vm1, %v6657_v48 }
 0xa81   : > { %6730 = vst.msk [vmem:[#allocation10] sm:$0xff] %vm6729_vm2, %v6706_v49  ;;  %v6771_v49 = vld [vmem:[#allocation10 + $0x68] sm:$0xff] }
 0xa82   : > { %v6661_v21 = vpop.permute.xlu1 %6660  ;;  %v8835_v45 = vpack.c.bf16 %v6773_v60, %v6771_v49 }
 0xa84   : > { %v6564_v31 = vpop.permute.xlu0 %6563 }
 0xa86   : > { %v6710_v32 = vpop.permute.xlu1 %6709 }
 0xa88   : > { %v6613_v57 = vpop.permute.xlu0 %6612  ;;  %v6758_v41 = vld [vmem:[#allocation10] sm:$0xff] }
 0xa8a   : > { %v6419_v11 = vpop.permute.xlu1 %6418 }
 0xa8b   : > { %6439 = vst.msk [vmem:[#allocation10 + $0x40] sm:$0xff] %vm6434_vm11, %v6419_v11 }
 0xa8c   : > { %v6659_v6 = vpop.permute.xlu0 %6658 }
 0xa8d   : > { %6682 = vst.msk [vmem:[#allocation10 + $0x10] sm:$0xff] %vm6680_vm1, %v6659_v6 }
 0xa8e   : > { %v6468_v59 = vpop.permute.xlu1 %6467 }
 0xa8f   : > { %6488 = vst.msk [vmem:[#allocation10 + $0x40] sm:$0xff] %vm6483_vm12, %v6468_v59 }
 0xa90   : > { %v6708_v55 = vpop.permute.xlu0 %6707 }
 0xa91   : > { %6731 = vst.msk [vmem:[#allocation10 + $0x10] sm:$0xff] %vm6729_vm2, %v6708_v55 }
 0xa92   : > { %v6513_v38 = vpop.permute.xlu1 %6512 }
 0xa93   : > { %6535 = vst.msk [vmem:[#allocation10 + $0x20] sm:$0xff] %vm6532_vm14, %v6513_v38 }
 0xa94   : > { %v6417_v36 = vpop.permute.xlu0 %6416 }
 0xa95   : > { %6438 = vst.msk [vmem:[#allocation10 + $0x30] sm:$0xff] %vm6434_vm11, %v6417_v36 }
 0xa96   : > { %v6562_v17 = vpop.permute.xlu1 %6561 }
 0xa97   : > { %6584 = vst.msk [vmem:[#allocation10 + $0x20] sm:$0xff] %vm6581_vm15, %v6562_v17 }
 0xa98   : > { %v6466_v53 = vpop.permute.xlu0 %6465  ;;  %v6760_v26 = vld [vmem:[#allocation10 + $0x10] sm:$0xff] }
 0xa99   : > { %6487 = vst.msk [vmem:[#allocation10 + $0x30] sm:$0xff] %vm6483_vm12, %v6466_v53  ;;  %v8823_v27 = vpack.c.bf16 %v6760_v26, %v6758_v41 }
 0xa9a   : > { %6536 = vst.msk [vmem:[#allocation10 + $0x30] sm:$0xff] %vm6532_vm14, %v6515_v20  ;;  %v6611_v47 = vpop.permute.xlu1 %6610 }
 0xa9b   : > { %6585 = vst.msk [vmem:[#allocation10 + $0x30] sm:$0xff] %vm6581_vm15, %v6564_v31  ;;  %8824 = vmatpush1.bf16.xpose.msra.mxu1 %v8823_v27  ;;  %v6757_v31 = vld [vmem:[%s12494_s13 + $0x18] sm:$0xff] }
 0xa9c   : > { %6634 = vst.msk [vmem:[#allocation10 + $0x30] sm:$0xff] %vm6630_vm0, %v6613_v57  ;;  %6633 = vst.msk [vmem:[#allocation10 + $0x20] sm:$0xff] %vm6630_vm0, %v6611_v47  ;;  %v6519_v8 = vpop.permute.xlu0 %6518  ;;  %8827 = vmatprep.subr.msk.bf16.mxu1 %vm12007_vm13, %v8825_v25  ;;  %v8418_v57 = vld [vmem:[%s12497_s16 + $0x30] sm:$0xff] }
 0xa9d   : > { %6683 = vst.msk [vmem:[#allocation10 + $0x20] sm:$0xff] %vm6680_vm1, %v6661_v21  ;;  %v6754_v21 = vld [vmem:[%s12494_s13] sm:$0xff] }
 0xa9e   : > { %6732 = vst.msk [vmem:[#allocation10 + $0x20] sm:$0xff] %vm6729_vm2, %v6710_v32  ;;  %v6665_v24 = vpop.permute.xlu1 %6664  ;;  %v6912_v32 = vld [vmem:[%s12497_s16] sm:$0xff] }
 0xa9f   : > { %8687 = vmatprep.mubr.msk.f32.mxu0 %vm6909_vm3, %v6912_v32 }
 0xaa0   : > { %v6568_v18 = vpop.permute.xlu0 %6567 }
 0xaa2   : > { %v6714_v39 = vpop.permute.xlu1 %6713 }
 0xaa4   : > { %v6617_v40 = vpop.permute.xlu0 %6616 }
 0xaa5   : > { %v6762_v13 = vld [vmem:[#allocation10 + $0x20] sm:$0xff] }
 0xaa6   : > { %v6423_v50 = vpop.permute.xlu1 %6422 }
 0xaa7   : > { %6441 = vst.msk [vmem:[#allocation10 + $0x60] sm:$0xff] %vm6434_vm11, %v6423_v50  ;;  %v8412_v50 = vld [vmem:[%s12497_s16 + $0x20] sm:$0xff] }
 0xaa8   : > { %v6663_v42 = vpop.permute.xlu0 %6662 }
 0xaa9   : > { %6684 = vst.msk [vmem:[#allocation10 + $0x30] sm:$0xff] %vm6680_vm1, %v6663_v42  ;;  %v8413_v42 = vld [vmem:[%s12497_s16 + $0x28] sm:$0xff] }
 0xaaa   : > { %v6472_v43 = vpop.permute.xlu1 %6471 }
 0xaab   : > { %6490 = vst.msk [vmem:[#allocation10 + $0x60] sm:$0xff] %vm6483_vm12, %v6472_v43  ;;  %v7287_v43 = vld [vmem:[%s12498_s17] sm:$0xff] }
 0xaac   : > { %v6712_v28 = vpop.permute.xlu0 %6711 }
 0xaad   : > { %6733 = vst.msk [vmem:[#allocation10 + $0x30] sm:$0xff] %vm6729_vm2, %v6712_v28  ;;  %v7288_v28 = vld [vmem:[%s12498_s17 + $0x8] sm:$0xff] }
 0xaae   : > { %v6517_v56 = vpop.permute.xlu1 %6516 }
 0xaaf   : > { %6537 = vst.msk [vmem:[#allocation10 + $0x40] sm:$0xff] %vm6532_vm14, %v6517_v56  ;;  %v8864_v56 = vpack.c.bf16 %v7288_v28, %v7287_v43  ;;  %v7571_v43 = vld [vmem:[%s12500_s19 + $0x50] sm:$0xff]  ;;  %v7572_v28 = vld [vmem:[%s12500_s19 + $0x58] sm:$0xff] }
 0xab0   : > { %v6421_v4 = vpop.permute.xlu0 %6420 }
 0xab1   : > { %6440 = vst.msk [vmem:[#allocation10 + $0x50] sm:$0xff] %vm6434_vm11, %v6421_v4 }
 0xab2   : > { %v6566_v62 = vpop.permute.xlu1 %6565 }
 0xab3   : > { %6586 = vst.msk [vmem:[#allocation10 + $0x40] sm:$0xff] %vm6581_vm15, %v6566_v62 }
 0xab4   : > { %v6470_v12 = vpop.permute.xlu0 %6469  ;;  %v6764_v9 = vld [vmem:[#allocation10 + $0x30] sm:$0xff] }
 0xab5   : > { %6489 = vst.msk [vmem:[#allocation10 + $0x50] sm:$0xff] %vm6483_vm12, %v6470_v12  ;;  %v8828_v10 = vpack.c.bf16 %v6764_v9, %v6762_v13  ;;  %v7289_v13 = vld [vmem:[%s12498_s17 + $0x10] sm:$0xff]  ;;  %v7290_v9 = vld [vmem:[%s12498_s17 + $0x18] sm:$0xff] }
 0xab6   : > { %6538 = vst.msk [vmem:[#allocation10 + $0x50] sm:$0xff] %vm6532_vm14, %v6519_v8  ;;  %v6615_v52 = vpop.permute.xlu1 %6614 }
 0xab7   : > { %6587 = vst.msk [vmem:[#allocation10 + $0x50] sm:$0xff] %vm6581_vm15, %v6568_v18  ;;  %8829 = vmatpush1.bf16.xpose.msra.mxu1 %v8828_v10  ;;  %v8419_v18 = vld [vmem:[%s12497_s16 + $0x38] sm:$0xff]  ;;  %v8868_v10 = vpack.c.bf16 %v7290_v9, %v7289_v13 }
 0xab8   : > { %6636 = vst.msk [vmem:[#allocation10 + $0x50] sm:$0xff] %vm6630_vm0, %v6617_v40  ;;  %v6523_v29 = vpop.permute.xlu0 %6522  ;;  %8832 = vmatprep.subr.msk.bf16.mxu1 %vm12007_vm13, %v8830_v34  ;;  %6635 = vst.msk [vmem:[#allocation10 + $0x40] sm:$0xff] %vm6630_vm0, %v6615_v52  ;;  %v8407_v40 = vld [vmem:[%s12497_s16 + $0x18] sm:$0xff]  ;;  %v7291_v52 = vld [vmem:[%s12498_s17 + $0x20] sm:$0xff] }
 0xab9   : > { %6685 = vst.msk [vmem:[#allocation10 + $0x40] sm:$0xff] %vm6680_vm1, %v6665_v24  ;;  %v6913_v24 = vld [vmem:[%s12497_s16 + $0x8] sm:$0xff] }
 0xaba   : > { %6734 = vst.msk [vmem:[#allocation10 + $0x40] sm:$0xff] %vm6729_vm2, %v6714_v39  ;;  %v6669_v22 = vpop.permute.xlu1 %6668  ;;  %v8406_v39 = vld [vmem:[%s12497_s16 + $0x10] sm:$0xff] }
 0xabc   : > { %v6572_v30 = vpop.permute.xlu0 %6571 }
 0xabe   : > { %v6521_v54 = vpop.permute.xlu1 %6520 }
 0xabf   : > { %6539 = vst.msk [vmem:[#allocation10 + $0x60] sm:$0xff] %vm6532_vm14, %v6521_v54  ;;  %v7294_v54 = vld [vmem:[%s12498_s17 + $0x38] sm:$0xff] }
 0xac0   : > { %v6621_v51 = vpop.permute.xlu0 %6620 }
 0xac1   : > { %v6766_v7 = vld [vmem:[#allocation10 + $0x40] sm:$0xff] }
 0xac2   : > { %v6570_v33 = vpop.permute.xlu1 %6569 }
 0xac3   : > { %6588 = vst.msk [vmem:[#allocation10 + $0x60] sm:$0xff] %vm6581_vm15, %v6570_v33 }
 0xac4   : > { %v6667_v3 = vpop.permute.xlu0 %6666 }
 0xac5   : > { %6686 = vst.msk [vmem:[#allocation10 + $0x50] sm:$0xff] %vm6680_vm1, %v6667_v3 }
 0xac6   : > { %v6619_v23 = vpop.permute.xlu1 %6618 }
 0xac7   : > { %6637 = vst.msk [vmem:[#allocation10 + $0x60] sm:$0xff] %vm6630_vm0, %v6619_v23 }
 0xac8   : > { %v6716_v48 = vpop.permute.xlu0 %6715  ;;  %6687 = vst.msk [vmem:[#allocation10 + $0x60] sm:$0xff] %vm6680_vm1, %v6669_v22  ;;  %v7293_v22 = vld [vmem:[%s12498_s17 + $0x30] sm:$0xff] }
 0xac9   : > { %6735 = vst.msk [vmem:[#allocation10 + $0x50] sm:$0xff] %vm6729_vm2, %v6716_v48 }
 0xaca   : > { %v6718_v63 = vpop.permute.xlu1 %6717 }
 0xacb   : > { %6736 = vst.msk [vmem:[#allocation10 + $0x60] sm:$0xff] %vm6729_vm2, %v6718_v63 }
 0xacc   : > { %v6425_v1 = vpop.permute.xlu0 %6424 }
 0xacd   : > { %6442 = vst.msk [vmem:[#allocation10 + $0x70] sm:$0xff] %vm6434_vm11, %v6425_v1 }
 0xad0   : > { %v6474_v15 = vpop.permute.xlu0 %6473  ;;  %v6768_v16 = vld [vmem:[#allocation10 + $0x50] sm:$0xff] }
 0xad1   : > { %6491 = vst.msk [vmem:[#allocation10 + $0x70] sm:$0xff] %vm6483_vm12, %v6474_v15  ;;  %v8833_v2 = vpack.c.bf16 %v6768_v16, %v6766_v7  ;;  %v7561_v16 = vld [vmem:[%s12500_s19] sm:$0xff] }
 0xad2   : > { %6540 = vst.msk [vmem:[#allocation10 + $0x70] sm:$0xff] %vm6532_vm14, %v6523_v29  ;;  %v6770_v58 = vld [vmem:[#allocation10 + $0x60] sm:$0xff]  ;;  %v7292_v29 = vld [vmem:[%s12498_s17 + $0x28] sm:$0xff] }
 0xad3   : > { %6589 = vst.msk [vmem:[#allocation10 + $0x70] sm:$0xff] %vm6581_vm15, %v6572_v30  ;;  %8834 = vmatpush1.bf16.xpose.msra.mxu1 %v8833_v2  ;;  %v8872_v30 = vpack.c.bf16 %v7292_v29, %v7291_v52  ;;  %v7562_v2 = vld [vmem:[%s12500_s19 + $0x8] sm:$0xff] }
 0xad4   : > { %6638 = vst.msk [vmem:[#allocation10 + $0x70] sm:$0xff] %vm6630_vm0, %v6621_v51  ;;  %8837 = vmatprep.subr.msk.bf16.mxu1 %vm12007_vm13, %v8835_v45  ;;  %v6671_v37 = vpop.permute.xlu0 %6670  ;;  %v8876_v51 = vpack.c.bf16 %v7294_v54, %v7293_v22  ;;  %v7563_v45 = vld [vmem:[%s12500_s19 + $0x10] sm:$0xff]  ;;  %v7578_v54 = vld [vmem:[%s12500_s19 + $0x88] sm:$0xff]  ;;  %vm7767_vm13 = vcmask 1048320  }
 0xad5   : > { %6688 = vst.msk [vmem:[#allocation10 + $0x70] sm:$0xff] %vm6680_vm1, %v6671_v37  ;;  %v9006_v37 = vmov 0.0|0.0  }
 0xad8   : > { %v6720_v19 = vpop.permute.xlu0 %6719 }
 0xad9   : > { %6737 = vst.msk [vmem:[#allocation10 + $0x70] sm:$0xff] %vm6729_vm2, %v6720_v19  ;;  %v8881_v19 = vpack.c.bf16 %v7562_v2, %v7561_v16 }
 0xadb   : > { %v6884_v11 = vpop.permute.xlu1 %6883 }
 0xadf   : > { %v6898_v36 = vpop.permute.xlu1 %6897 }
 0xae0   : > { %v6772_v44 = vld [vmem:[#allocation10 + $0x70] sm:$0xff] }
 0xae1   : > { %v8838_v20 = vpack.c.bf16 %v6772_v44, %v6770_v58  ;;  %v7564_v58 = vld [vmem:[%s12500_s19 + $0x18] sm:$0xff] }
 0xae2   : > { %v8884_v44 = vpack.c.bf16 %v7564_v58, %v7563_v45 }
 0xae3   : > { %8839 = vmatpush1.bf16.xpose.msra.mxu1 %v8838_v20  ;;  %v8424_v20 = vld [vmem:[%s12499_s18] ss:$0 sm:$0xff] }
 0xae9   : > { %v6889_v6 = vpop.permute.xlu0 %6888 }
 0xaea   : > { %6869 = vmatmul.mubr.f32.vlgmr.msra.gmra.mrb[42].mxu1 %v6754_v21 }
 0xaeb   : > { %8401 = vmatprep.mubr.msk.f32.mxu1 %vm6347_vm9, %v6757_v31 }
 0xaed   : > { %v6903_v27 = vpop.permute.xlu0 %6902 }
 0xaee   : > { %6874 = vmatmul.mubr.f32.gmra.mrb[44].mxu1 %v6756_v35 }
 0xaef   : > { %8708 = vmatprep.mubr.msk.f32.mxu1 %vm6909_vm3, %v8418_v57  ;;  %v7565_v57 = vld [vmem:[%s12500_s19 + $0x20] sm:$0xff] }
 0xbbd   : > { %v6870_v59 = vpop.f32.mrb[42].mxu1 }
 0xbbe   : > { %v6891_v55 = vmul.f32 %v6884_v11, %v6870_v59  ;;  %v6872_v38 = vpop.f32.mrb[43].mxu1  ;;  %v7566_v11 = vld [vmem:[%s12500_s19 + $0x28] sm:$0xff] }
 0xbbf   : > { %v8887_v59 = vpack.c.bf16 %v7566_v11, %v7565_v57  ;;  %v7567_v38 = vld [vmem:[%s12500_s19 + $0x30] sm:$0xff]  ;;  %v8430_v57 = vld [vmem:[%s12502_s21] ss:$0 sm:$0xff] }
 0xbc0   : > { %v6905_v17 = vadd.f32 %v6898_v36, %v6891_v55  ;;  %v7568_v36 = vld [vmem:[%s12500_s19 + $0x38] sm:$0xff] }
 0xbc1   : > { %v6875_v14 = vpop.f32.mrb[44].mxu1 }
 0xbc2   : > { %v6907_v53 = vmax.f32 %v6905_v17, 0.0  ;;  %v6892_v41 = vmul.f32 %v6889_v6, %v6875_v14  ;;  %v6877_v26 = vpop.f32.mrb[45].mxu1  ;;  %v8890_v17 = vpack.c.bf16 %v7568_v36, %v7567_v38  ;;  %v7569_v14 = vld [vmem:[%s12500_s19 + $0x40] sm:$0xff] }
 0xbc4   : > { %6910 = vst.msk [vmem:[%s838_s29] sm:$0xff] %vm6909_vm3, %v6907_v53  ;;  %v6906_v46 = vadd.f32 %v6903_v27, %v6892_v41 }
 0xbc6   : > { %v6908_v25 = vmax.f32 %v6906_v46, 0.0 }
 0xbc8   : > { %6911 = vst.msk [vmem:[%s838_s29 + $0x8] sm:$0xff] %vm6909_vm3, %v6908_v25  ;;  %v8840_v8 = vpack.c.bf16 %v6908_v25, %v6907_v53  ;;  %v7570_v53 = vld [vmem:[%s12500_s19 + $0x48] sm:$0xff] }
 0xbc9   : > { %v8893_v41 = vpack.c.bf16 %v7570_v53, %v7569_v14 }
 0xbca   : > { %8842 = vmatprep.subr.msk.bf16.mxu0 %vm12171_vm4, %v8840_v8  ;;  %8860 = vmatprep.subr.msk.bf16.mxu1 %vm12171_vm4, %v8840_v8 }
 0xbcb   : > { %8845 = vmatpush3.bf16.xpose.msk.msra.mxu0 %vm12171_vm4, %v8840_v8  ;;  %8863 = vmatpush3.bf16.xpose.msk.msra.mxu1 %vm12171_vm4, %v8840_v8 }
 0xbcc   : > { %8848 = vmatprep.subr.msk.bf16.mxu0 %vm12171_vm4, %v8840_v8  ;;  %8880 = vmatprep.subr.bf16.mxu1 %v9006_v37 }
 0xbd2   : > { %8688 = vmatmul.mubr.msk.f32.vlgmr.msra.gmra.mrb[72].mxu0 %vm6909_vm3, %v6913_v24  ;;  %8709 = vmatmul.mubr.msk.f32.vlgmr.msra.gmra.mrb[46].mxu1 %vm6909_vm3, %v8419_v18 }
 0xbd3   : > { %8851 = vmatpush3.bf16.xpose.msk.msra.mxu0 %vm12171_vm4, %v8840_v8  ;;  %8694 = vmatprep.mubr.msk.f32.mxu0 %vm6909_vm3, %v8406_v39 }
 0xbd4   : > { %8854 = vmatprep.subr.msk.bf16.mxu0 %vm12171_vm4, %v8840_v8  ;;  %8882 = vmatpush1.bf16.msra.mxu1 %v8881_v19 }
 0xbd5   : > { %8883 = vmatprep.subr.bf16.mxu1 %v9006_v37 }
 0xbd8   : > { %8885 = vmatpush1.bf16.msra.mxu1 %v8884_v44 }
 0xbd9   : > { %8886 = vmatprep.subr.bf16.mxu1 %v9006_v37 }
 0xbda   : > { %8695 = vmatmul.mubr.msk.f32.vlgmr.msra.gmra.mrb[74].mxu0 %vm6909_vm3, %v8407_v40 }
 0xbdb   : > { %8857 = vmatpush3.bf16.xpose.msk.msra.mxu0 %vm12171_vm4, %v8840_v8  ;;  %8701 = vmatprep.mubr.msk.f32.mxu0 %vm6909_vm3, %v8412_v50 }
 0xbdc   : > { %8865 = vmatprep.subr.bf16.mxu0 %v8864_v56  ;;  %8888 = vmatpush1.bf16.msra.mxu1 %v8887_v59 }
 0xbdd   : > { %8889 = vmatprep.subr.bf16.mxu1 %v9006_v37 }
 0xbe0   : > { %8891 = vmatpush1.bf16.msra.mxu1 %v8890_v17 }
 0xbe1   : > { %8892 = vmatprep.subr.bf16.mxu1 %v9006_v37 }
 0xbe2   : > { %8702 = vmatmul.mubr.msk.f32.vlgmr.msra.gmra.mrb[76].mxu0 %vm6909_vm3, %v8413_v42 }
 0xbe3   : > { %8867 = vmatpush3.bf16.msra.mxu0 %v8864_v56  ;;  %v8896_v56 = vpack.c.bf16 %v7572_v28, %v7571_v43 }
 0xbe4   : > { %8869 = vmatprep.subr.bf16.mxu0 %v8868_v10  ;;  %8894 = vmatpush1.bf16.msra.mxu1 %v8893_v41 }
 0xbe5   : > { %8895 = vmatprep.subr.bf16.mxu1 %v9006_v37 }
 0xbe7   : > { %8871 = vmatpush3.bf16.msra.mxu0 %v8868_v10  ;;  %v7575_v10 = vld [vmem:[%s12500_s19 + $0x70] sm:$0xff] }
 0xbe8   : > { %8873 = vmatprep.subr.bf16.mxu0 %v8872_v30  ;;  %8897 = vmatpush1.bf16.msra.mxu1 %v8896_v56 }
 0xbe9   : > { %8898 = vmatprep.subr.bf16.mxu1 %v9006_v37 }
 0xbeb   : > { %8875 = vmatpush3.bf16.msra.mxu0 %v8872_v30  ;;  %v7577_v30 = vld [vmem:[%s12500_s19 + $0x80] sm:$0xff] }
 0xbec   : > { %8877 = vmatprep.subr.bf16.mxu0 %v8876_v51 }
 0xbef   : > { %8879 = vmatpush3.bf16.msra.mxu0 %v8876_v51 }
 0xca5   : > { %v8689_v4 = vpop.f32.mrb[72].mxu0  ;;  %v8710_v62 = vpop.f32.mrb[46].mxu1 }
 0xca6   : > { %7002 = vst.msk [vmem:[#allocation11 + $0x8] sm:$0xff] %vm6347_vm9, %v8689_v4  ;;  %v6992_v5 = vpop.f32.mrb[73].mxu0  ;;  %v7266_v12 = vpop.f32.mrb[47].mxu1 }
 0xca7   : > { %7001 = vst.msk [vmem:[#allocation11] sm:$0xff] %vm6347_vm9, %v6992_v5  ;;  %v7574_v5 = vld [vmem:[%s12500_s19 + $0x68] sm:$0xff] }
 0xcad   : > { %v8696_v61 = vpop.f32.mrb[74].mxu0 }
 0xcae   : > { %v7078_v34 = vpop.f32.mrb[75].mxu0  ;;  %7091 = vrot.lane.b32.xlu0 %v8696_v61, %s12568_s6  ;;  %v7576_v61 = vld [vmem:[%s12500_s19 + $0x78] sm:$0xff] }
 0xcaf   : > { %7089 = vrot.lane.b32.xlu1 %v7078_v34, %s12568_s6  ;;  %v8902_v29 = vpack.c.bf16 %v7576_v61, %v7575_v10  ;;  %v8061_v10 = vld [vmem:[%s12504_s23 + $0x10] sm:$0xff]  ;;  %v7854_v61 = vld [vmem:[%s12503_s22 + $0x8] sm:$0xff] }
 0xcb5   : > { %v8703_v33 = vpop.f32.mrb[76].mxu0 }
 0xcb6   : > { %v7172_v3 = vpop.f32.mrb[77].mxu0  ;;  %7185 = vrot.lane.b32.xlu0 %v8703_v33, %s12582_s5 }
 0xcb7   : > { %7183 = vrot.lane.b32.xlu1 %v7172_v3, %s12582_s5  ;;  %v8905_v3 = vpack.c.bf16 %v7578_v54, %v7577_v30  ;;  %v8088_v30 = vld [vmem:[%s12592_s8 + $0x8] sm:$0xff]  ;;  %v8090_v54 = vld [vmem:[%s12592_s8 + $0x18] sm:$0xff] }
 0xcba   : > { %7279 = vrot.lane.b32.xlu0 %v8710_v62, %s12579_s1  ;;  %v7573_v62 = vld [vmem:[%s12500_s19 + $0x60] sm:$0xff] }
 0xcbb   : > { %7277 = vrot.lane.b32.xlu1 %v7266_v12, %s12579_s1  ;;  %v8899_v9 = vpack.c.bf16 %v7574_v5, %v7573_v62 }
 0xcbd   : > { %8900 = vmatpush1.bf16.msra.mxu1 %v8899_v9 }
 0xcbe   : > { %8901 = vmatprep.subr.bf16.mxu1 %v9006_v37 }
 0xcc1   : > { %8903 = vmatpush1.bf16.msra.mxu1 %v8902_v29  ;;  %v8062_v29 = vld [vmem:[%s12504_s23 + $0x18] sm:$0xff] }
 0xcc2   : > { %8904 = vmatprep.subr.bf16.mxu1 %v9006_v37 }
 0xcc5   : > { %8906 = vmatpush1.bf16.msra.mxu1 %v8905_v3 }
 0xd20   : > { %v7092_v23 = vpop.permute.xlu0 %7091 }
 0xd21   : > { %v7090_v48 = vpop.permute.xlu1 %7089  ;;  %7096 = vst.msk [vmem:[#allocation11 + $0x8] sm:$0xff] %vm6434_vm11, %v7092_v23 }
 0xd22   : > { %7095 = vst.msk [vmem:[#allocation11] sm:$0xff] %vm6434_vm11, %v7090_v48 }
 0xd28   : > { %v7186_v63 = vpop.permute.xlu0 %7185 }
 0xd29   : > { %v7184_v1 = vpop.permute.xlu1 %7183  ;;  %7190 = vst.msk [vmem:[#allocation11 + $0x8] sm:$0xff] %vm6483_vm12, %v7186_v63 }
 0xd2a   : > { %7189 = vst.msk [vmem:[#allocation11] sm:$0xff] %vm6483_vm12, %v7184_v1 }
 0xd2c   : > { %v7280_v49 = vpop.permute.xlu0 %7279 }
 0xd2d   : > { %v7278_v60 = vpop.permute.xlu1 %7277  ;;  %7284 = vst.msk [vmem:[#allocation11 + $0x8] sm:$0xff] %vm6532_vm14, %v7280_v49 }
 0xd2e   : > { %7283 = vst.msk [vmem:[#allocation11] sm:$0xff] %vm6532_vm14, %v7278_v60 }
 0xd34   : > { %v7286_v7 = vld [vmem:[#allocation11 + $0x8] sm:$0xff] }
 0xd35   : > { %v7285_v15 = vld [vmem:[#allocation11] sm:$0xff] }
 0xd36   : > { %8727 = vmatprep.mubr.msk.f32.mxu0 %vm6909_vm3, %v7285_v15 }
 0xd37   : > { %8728 = vmatmul.mubr.msk.f32.vlgmr.msra.gmra.mrb[78].mxu0 %vm6909_vm3, %v7286_v7 }
 0xd38   : > { %7953 = vmatprep.mubr.f32.mxu0 %v7854_v61 }
 0xe0a   : > { %v8729_v21 = vpop.f32.mrb[78].mxu0 }
 0xe0b   : > { %v7380_v31 = vadd.f32 %v8729_v21, %v8424_v20  ;;  %v7374_v35 = vpop.f32.mrb[79].mxu0 }
 0xe0c   : > { %v7375_v32 = vadd.f32 %v8424_v20, %v7374_v35  ;;  %v8429_v35 = vld [vmem:[%s12501_s20] ss:$0 sm:$0xff] }
 0xe0d   : > { %v7386_v6 = vcombine.high %v7380_v31, %v7380_v31  ;;  %7400 = vst.msk [vmem:[#allocation12 + $0x19] sm:$0xf] %vm7397_vm6, %v7380_v31 }
 0xe0e   : > { %v7385_v55 = vcombine.high %v7375_v32, %v7375_v32  ;;  %7398 = vst.msk [vmem:[#allocation12 + $0x9] sm:$0xf] %vm7397_vm6, %v7375_v32 }
 0xe0f   : > { %7401 = vst.msk [vmem:[#allocation12 + $0x21] sm:$0xf] %vm7397_vm6, %v7386_v6 }
 0xe10   : > { %7399 = vst.msk [vmem:[#allocation12 + $0x11] sm:$0xf] %vm7397_vm6, %v7385_v55 }
 0xe14   : > { %v7544_v24 = vld [vmem:[#allocation12 + $0x1a] sm:$0xf] }
 0xe15   : > { %v8945_v26 = vld [vmem:[#allocation12 + $0x2] ss:$8 sps:$4 sm:$0xff]  }
 0xe16   : > { %v8946_v27 = vld [vmem:[#allocation12 + $0x1] ss:$8 sps:$4 sm:$0xff]   ;;  %7444 = vrot.lane.b32.xlu0 %v8945_v26, %s12582_s5 }
 0xe17   : > { %7426 = vrot.lane.b32.xlu1 %v8946_v27, %s12568_s6  ;;  %v8947_v46 = vld [vmem:[#allocation12 + $0x1a] ss:$8 sps:$4 sm:$0xff]   ;;  %v8950_v47 = vld [vmem:[#allocation12 + $0x9] ss:$8 sps:$4 sm:$0xff]  }
 0xe18   : > { %v8948_v25 = vld [vmem:[#allocation12 + $0x18] ss:$8 sps:$4 sm:$0xff]   ;;  %v8951_v18 = vld [vmem:[#allocation12 + $0xa] ss:$8 sps:$4 sm:$0xff]  }
 0xe19   : > { %v8949_v8 = vld [vmem:[#allocation12 + $0x19] ss:$8 sps:$4 sm:$0xff]   ;;  %v8952_v39 = vld [vmem:[#allocation12 + $0x8] ss:$8 sps:$4 sm:$0xff]  }
 0xe1a   : > { %7500 = vrot.lane.b32.xlu0 %v8947_v46, %s9005_s28  ;;  %v7543_v40 = vld [vmem:[#allocation12 + $0x12] sm:$0xf]  ;;  %v8959_v50 = vld [vmem:[#allocation12] ss:$8 sps:$4 sm:$0xff]   ;;  %v7842_v46 = vld [vmem:[#allocation14 + $0x2a] sm:$0xf] }
 0xe1b   : > { %7464 = vrot.lane.b32.xlu1 %v8948_v25, %s12579_s1  ;;  %v7551_v42 = vcombine.low %v7543_v40, %v7544_v24  ;;  %7414 = vst.msk [vmem:[#allocation13] sm:$0xff] %vm6347_vm9, %v8959_v50  ;;  %v8960_v4 = vld [vmem:[#allocation12 + $0x10] ss:$8 sps:$4 sm:$0xff]   ;;  %v8961_v34 = vld [vmem:[#allocation12 + $0x22] ss:$8 sps:$4 sm:$0xff]  }
 0xe1c   : > { %v8953_v12 = vld [vmem:[#allocation12 + $0x10] ss:$8 sps:$4 sm:$0xff]   ;;  %7415 = vst.msk [vmem:[#allocation13 + $0x10] sm:$0xff] %vm6347_vm9, %v8960_v4  ;;  %7556 = vst.msk [vmem:[#allocation13 + $0x18] sm:$0xff] %vm6347_vm9, %v8961_v34  ;;  %v8958_v33 = vld [vmem:[#allocation12 + $0x21] ss:$8 sps:$4 sm:$0xff]  }
 0xe1d   : > { %7555 = vst.msk [vmem:[#allocation13 + $0x8] sm:$0xff] %vm6347_vm9, %v7551_v42  ;;  %v8954_v13 = vld [vmem:[#allocation12 + $0x11] ss:$8 sps:$4 sm:$0xff]   ;;  %v8957_v23 = vld [vmem:[#allocation12 + $0x20] ss:$8 sps:$4 sm:$0xff]  }
 0xe1e   : > { %7480 = vrot.lane.b32.xlu0 %v8950_v47, %s12584_s3  ;;  %v8955_v52 = vld [vmem:[#allocation12 + $0x11] ss:$8 sps:$4 sm:$0xff]  }
 0xe1f   : > { %7482 = vrot.lane.b32.xlu1 %v8949_v8, %s12584_s3  ;;  %v8956_v22 = vld [vmem:[#allocation12 + $0x12] ss:$8 sps:$4 sm:$0xff]  }
 0xe20   : > { %v8060_v34 = vld [vmem:[%s12504_s23 + $0x8] sm:$0xff] }
 0xe22   : > { %7498 = vrot.lane.b32.xlu0 %v8951_v18, %s9005_s28 }
 0xe23   : > { %7462 = vrot.lane.b32.xlu1 %v8952_v39, %s12579_s1  ;;  %v7560_v21 = vld [vmem:[#allocation13 + $0x18] sm:$0xff] }
 0xe24   : > { %v7558_v51 = vld [vmem:[#allocation13 + $0x8] sm:$0xff] }
 0xe25   : > { %8427 = vmatprep.mubr.msk.f32.mxu1 %vm6347_vm9, %v7558_v51 }
 0xe26   : > { %7517 = vrot.lane.b32.xlu0 %v8953_v12, %s9003_s2 }
 0xe27   : > { %7428 = vrot.lane.b32.xlu1 %v8954_v13, %s12568_s6  ;;  %v8059_v13 = vld [vmem:[%s12504_s23] sm:$0xff]  ;;  %s8442_s6 = sshll.u32 %s12596_s4, 5 }
 0xe28   : > { %s843_s10 = scalar_lea.vmem %s12593_s11, %s8442_s6 }
 0xe2a   : > { %7535 = vrot.lane.b32.xlu0 %v8955_v52, %s9004_s7  ;;  %v8087_v52 = vld [vmem:[%s12592_s8] sm:$0xff] }
 0xe2b   : > { %7446 = vrot.lane.b32.xlu1 %v8956_v22, %s12582_s5  ;;  %v8089_v22 = vld [vmem:[%s12592_s8 + $0x10] sm:$0xff] }
 0xe2e   : > { %7537 = vrot.lane.b32.xlu0 %v8958_v33, %s9004_s7 }
 0xe2f   : > { %7519 = vrot.lane.b32.xlu1 %v8957_v23, %s9003_s2 }
 0xe88   : > { %v7445_v48 = vpop.permute.xlu0 %7444 }
 0xe89   : > { %v7427_v63 = vpop.permute.xlu1 %7426 }
 0xe8a   : > { %7432 = vst.msk [vmem:[#allocation13] sm:$0xff] %vm6434_vm11, %v7427_v63 }
 0xe8b   : > { %7450 = vst.msk [vmem:[#allocation13] sm:$0xff] %vm6483_vm12, %v7445_v48 }
 0xe8c   : > { %v7501_v1 = vpop.permute.xlu0 %7500 }
 0xe8d   : > { %v7465_v49 = vpop.permute.xlu1 %7464 }
 0xe90   : > { %v7481_v60 = vpop.permute.xlu0 %7480 }
 0xe91   : > { %v7483_v15 = vpop.permute.xlu1 %7482 }
 0xe94   : > { %v7499_v7 = vpop.permute.xlu0 %7498 }
 0xe95   : > { %v7463_v16 = vpop.permute.xlu1 %7462 }
 0xe96   : > { %7468 = vst.msk [vmem:[#allocation13] sm:$0xff] %vm6532_vm14, %v7463_v16 }
 0xe97   : > { %7486 = vst.msk [vmem:[#allocation13] sm:$0xff] %vm6581_vm15, %v7481_v60 }
 0xe98   : > { %7504 = vst.msk [vmem:[#allocation13] sm:$0xff] %vm6630_vm0, %v7499_v7  ;;  %v7518_v2 = vpop.permute.xlu0 %7517 }
 0xe99   : > { %7523 = vst.msk [vmem:[#allocation13] sm:$0xff] %vm6680_vm1, %v7518_v2  ;;  %v7429_v45 = vpop.permute.xlu1 %7428 }
 0xe9a   : > { %7433 = vst.msk [vmem:[#allocation13 + $0x10] sm:$0xff] %vm6434_vm11, %v7429_v45  ;;  %vm7729_vm11 = vcmask 523520  }
 0xe9c   : > { %v7536_v37 = vpop.permute.xlu0 %7535 }
 0xe9d   : > { %7541 = vst.msk [vmem:[#allocation13] sm:$0xff] %vm6729_vm2, %v7536_v37  ;;  %v7447_v19 = vpop.permute.xlu1 %7446 }
 0xe9e   : > { %7451 = vst.msk [vmem:[#allocation13 + $0x10] sm:$0xff] %vm6483_vm12, %v7447_v19  ;;  %vm7748_vm12 = vcmask 785920  }
 0xe9f   : > { %7469 = vst.msk [vmem:[#allocation13 + $0x10] sm:$0xff] %vm6532_vm14, %v7465_v49  ;;  %vm8912_vm14 = vmpackc.low %vm5603_vm8, %vm5603_vm8 }
 0xea0   : > { %7487 = vst.msk [vmem:[#allocation13 + $0x10] sm:$0xff] %vm6581_vm15, %v7483_v15  ;;  %v7538_v58 = vpop.permute.xlu0 %7537 }
 0xea1   : > { %7505 = vst.msk [vmem:[#allocation13 + $0x10] sm:$0xff] %vm6630_vm0, %v7501_v1  ;;  %v7520_v44 = vpop.permute.xlu1 %7519 }
 0xea2   : > { %7524 = vst.msk [vmem:[#allocation13 + $0x10] sm:$0xff] %vm6680_vm1, %v7520_v44 }
 0xea3   : > { %7542 = vst.msk [vmem:[#allocation13 + $0x10] sm:$0xff] %vm6729_vm2, %v7538_v58 }
 0xea4   : > { %v7557_v20 = vld [vmem:[#allocation13] sm:$0xff] }
 0xea5   : > { %7650 = vmatmul.mubr.f32.vlgmr.msra.gmra.mrb[48].mxu1 %v7557_v20 }
 0xea6   : > { %8428 = vmatprep.mubr.msk.f32.mxu1 %vm6347_vm9, %v7560_v21 }
 0xeaa   : > { %v7559_v31 = vld [vmem:[#allocation13 + $0x10] sm:$0xff] }
 0xeab   : > { %7655 = vmatmul.mubr.f32.gmra.mrb[50].mxu1 %v7559_v31 }
 0xf78   : > { %v7651_v32 = vpop.f32.mrb[48].mxu1 }
 0xf79   : > { %v7667_v11 = vmul.f32 %v8429_v35, %v7651_v32  ;;  %v7653_v6 = vpop.f32.mrb[49].mxu1  ;;  %v7857_v32 = vld [vmem:[%s12503_s22 + $0x20] sm:$0xff] }
 0xf7a   : > { %v7859_v6 = vld [vmem:[%s12503_s22 + $0x30] sm:$0xff] }
 0xf7b   : > { %v7676_v59 = vadd.f32 %v8430_v57, %v7667_v11  ;;  %v7860_v11 = vld [vmem:[%s12503_s22 + $0x38] sm:$0xff] }
 0xf7d   : > { %v7678_v55 = vmax.f32 %v7676_v59, 0.0  ;;  %v7863_v59 = vld [vmem:[%s12503_s22 + $0x50] sm:$0xff] }
 0xf7e   : > { %v7656_v38 = vpop.f32.mrb[50].mxu1 }
 0xf7f   : > { %v7682_v36 = vcombine.high %v7678_v55, %v7678_v55  ;;  %7695 = vst.msk [vmem:[#allocation14 + $0x9] sm:$0xf] %vm7694_vm10, %v7678_v55  ;;  %v7668_v17 = vmul.f32 %v8429_v35, %v7656_v38  ;;  %v7658_v14 = vpop.f32.mrb[51].mxu1  ;;  %v7853_v35 = vld [vmem:[%s12503_s22] sm:$0xff]  ;;  %v7862_v55 = vld [vmem:[%s12503_s22 + $0x48] sm:$0xff]  ;;  %v7855_v38 = vld [vmem:[%s12503_s22 + $0x10] sm:$0xff] }
 0xf80   : > { %v7864_v14 = vld [vmem:[%s12503_s22 + $0x58] sm:$0xff] }
 0xf81   : > { %7696 = vst.msk [vmem:[#allocation14 + $0x11] sm:$0xf] %vm7694_vm10, %v7682_v36  ;;  %v7677_v0 = vadd.f32 %v8430_v57, %v7668_v17  ;;  %v7856_v57 = vld [vmem:[%s12503_s22 + $0x18] sm:$0xff]  ;;  %v7858_v36 = vld [vmem:[%s12503_s22 + $0x28] sm:$0xff]  ;;  %v7861_v17 = vld [vmem:[%s12503_s22 + $0x40] sm:$0xff] }
 0xf83   : > { %v7679_v53 = vmax.f32 %v7677_v0, 0.0 }
 0xf85   : > { %v7683_v41 = vcombine.high %v7679_v53, %v7679_v53  ;;  %7697 = vst.msk [vmem:[#allocation14 + $0x19] sm:$0xf] %vm7694_vm10, %v7679_v53 }
 0xf86   : > { %v8963_v26 = vld [vmem:[#allocation14 + $0x1] ss:$8 sps:$4 sm:$0xff]  }
 0xf87   : > { %7698 = vst.msk [vmem:[#allocation14 + $0x21] sm:$0xf] %vm7694_vm10, %v7683_v41  ;;  %7723 = vrot.lane.b32.xlu1 %v8963_v26, %s12582_s5  ;;  %v8964_v27 = vld [vmem:[#allocation14 + $0x2] ss:$8 sps:$4 sm:$0xff]  }
 0xf88   : > { %v8975_v25 = vld [vmem:[#allocation14] ss:$8 sps:$4 sm:$0xff]  }
 0xf89   : > { %7711 = vst.msk [vmem:[#allocation15] sm:$0xff] %vm5603_vm8, %v8975_v25  ;;  %v8966_v18 = vld [vmem:[#allocation14 + $0xa] ss:$8 sps:$4 sm:$0xff]  }
 0xf8a   : > { %v8977_v43 = vld [vmem:[#allocation14 + $0x9] ss:$8 sps:$4 sm:$0xff]  }
 0xf8b   : > { %7742 = vrot.lane.b32.xlu1 %v8964_v27, %s12584_s3  ;;  %7782 = vst.msk [vmem:[#allocation15 + $0x8] sm:$0xff] %vm5603_vm8, %v8977_v43  ;;  %v8972_v5 = vld [vmem:[#allocation14 + $0x8] ss:$8 sps:$4 sm:$0xff]  }
 0xf8c   : > { %v8962_v47 = vld [vmem:[#allocation14 + $0x12] ss:$8 sps:$4 sm:$0xff]  }
 0xf8d   : > { %v8965_v8 = vld [vmem:[#allocation14 + $0x11] ss:$8 sps:$4 sm:$0xff]   ;;  %7851 = vst.msk [vmem:[#allocation15 + $0x10] sm:$0xff] %vm5603_vm8, %v8962_v47 }
 0xf8e   : > { %v7841_v24 = vld [vmem:[#allocation14 + $0x22] sm:$0xf]  ;;  %7725 = vrot.lane.b32.xlu0 %v8965_v8, %s12582_s5  ;;  %v8967_v40 = vld [vmem:[#allocation14 + $0x12] ss:$8 sps:$4 sm:$0xff]  }
 0xf8f   : > { %v7848_v39 = vcombine.low %v7841_v24, %v7842_v46  ;;  %7794 = vrot.lane.b32.xlu1 %v8966_v18, %s12582_s5  ;;  %v8968_v50 = vld [vmem:[#allocation14 + $0x10] ss:$8 sps:$4 sm:$0xff]   ;;  %v8971_v62 = vld [vmem:[#allocation14 + $0x20] ss:$8 sps:$4 sm:$0xff]  }
 0xf90   : > { %v8976_v42 = vld [vmem:[#allocation14 + $0x10] ss:$8 sps:$4 sm:$0xff]   ;;  %v8973_v12 = vld [vmem:[#allocation14 + $0x21] ss:$8 sps:$4 sm:$0xff]  }
 0xf91   : > { %7852 = vst.msk [vmem:[#allocation15 + $0x28] sm:$0xff] %vm5603_vm8, %v7848_v39  ;;  %v8969_v28 = vld [vmem:[#allocation14 + $0x1a] ss:$8 sps:$4 sm:$0xff]   ;;  %7712 = vst.msk [vmem:[#allocation15 + $0x18] sm:$0xff] %vm5603_vm8, %v8976_v42 }
 0xf92   : > { %7744 = vrot.lane.b32.xlu0 %v8967_v40, %s12584_s3  ;;  %v8978_v56 = vld [vmem:[#allocation14 + $0x19] ss:$8 sps:$4 sm:$0xff]  }
 0xf93   : > { %7813 = vrot.lane.b32.xlu1 %v8968_v50, %s12584_s3  ;;  %v8970_v4 = vld [vmem:[#allocation14 + $0x11] ss:$8 sps:$4 sm:$0xff]   ;;  %7783 = vst.msk [vmem:[#allocation15 + $0x20] sm:$0xff] %vm5603_vm8, %v8978_v56 }
 0xf94   : > { %v8974_v9 = vld [vmem:[#allocation14 + $0x18] ss:$8 sps:$4 sm:$0xff]  }
 0xf95   : > { %v7867_v21 = vld [vmem:[#allocation15 + $0x10] sm:$0xff] }
 0xf96   : > { %7796 = vrot.lane.b32.xlu0 %v8969_v28, %s12582_s5 }
 0xf97   : > { %7831 = vrot.lane.b32.xlu1 %v8970_v4, %s9003_s2 }
 0xf98   : > { %v7870_v19 = vld [vmem:[#allocation15 + $0x28] sm:$0xff] }
 0xf99   : > { %v8911_v31 = vpack.c.bf16 %v7870_v19, %v7867_v21 }
 0xf9a   : > { %7815 = vrot.lane.b32.xlu0 %v8971_v62, %s12584_s3 }
 0xf9b   : > { %7761 = vrot.lane.b32.xlu1 %v8972_v5, %s9003_s2 }
 0xf9e   : > { %7833 = vrot.lane.b32.xlu0 %v8973_v12, %s9003_s2 }
 0xf9f   : > { %8065 = vperm.xlu1 %8944, %v8059_v13  }
 0xfa2   : > { %7763 = vrot.lane.b32.xlu0 %v8974_v9, %s9003_s2 }
 0xfa3   : > { %8075 = vperm.xlu1 %8944, %v8061_v10  }
 0xfa6   : > { %8070 = vperm.xlu0 %8943, %v8060_v34  }
 0xfa7   : > { %8093 = vperm.xlu1 %8944, %v8087_v52  }
 0xfaa   : > { %8080 = vperm.xlu0 %8943, %v8062_v29  }
 0xfab   : > { %8103 = vperm.xlu1 %8944, %v8089_v22  }
 0xfae   : > { %8098 = vperm.xlu0 %8943, %v8088_v30  }
 0xfb2   : > { %8108 = vperm.xlu0 %8943, %v8090_v54  }
 0xff9   : > { %v7724_v51 = vpop.permute.xlu1 %7723 }
 0xffa   : > { %7730 = vst.msk [vmem:[#allocation15] sm:$0xff] %vm7729_vm11, %v7724_v51 }
 0xffd   : > { %v7743_v33 = vpop.permute.xlu1 %7742 }
 0xffe   : > { %7749 = vst.msk [vmem:[#allocation15] sm:$0xff] %vm7748_vm12, %v7743_v33 }
0x1000   : > { %v7726_v3 = vpop.permute.xlu0 %7725 }
0x1001   : > { %7731 = vst.msk [vmem:[#allocation15 + $0x18] sm:$0xff] %vm7729_vm11, %v7726_v3  ;;  %v7795_v23 = vpop.permute.xlu1 %7794 }
0x1002   : > { %7800 = vst.msk [vmem:[#allocation15 + $0x8] sm:$0xff] %vm7729_vm11, %v7795_v23 }
0x1004   : > { %v7745_v48 = vpop.permute.xlu0 %7744 }
0x1005   : > { %7750 = vst.msk [vmem:[#allocation15 + $0x18] sm:$0xff] %vm7748_vm12, %v7745_v48  ;;  %v7814_v63 = vpop.permute.xlu1 %7813 }
0x1006   : > { %7819 = vst.msk [vmem:[#allocation15 + $0x8] sm:$0xff] %vm7748_vm12, %v7814_v63 }
0x1008   : > { %v7797_v1 = vpop.permute.xlu0 %7796 }
0x1009   : > { %7801 = vst.msk [vmem:[#allocation15 + $0x20] sm:$0xff] %vm7729_vm11, %v7797_v1  ;;  %v7832_v49 = vpop.permute.xlu1 %7831 }
0x100a   : > { %7837 = vst.msk [vmem:[#allocation15 + $0x8] sm:$0xff] %vm7767_vm13, %v7832_v49 }
0x100c   : > { %v7816_v60 = vpop.permute.xlu0 %7815 }
0x100d   : > { %7820 = vst.msk [vmem:[#allocation15 + $0x20] sm:$0xff] %vm7748_vm12, %v7816_v60  ;;  %v7762_v15 = vpop.permute.xlu1 %7761 }
0x100e   : > { %7768 = vst.msk [vmem:[#allocation15] sm:$0xff] %vm7767_vm13, %v7762_v15 }
0x1010   : > { %v7834_v7 = vpop.permute.xlu0 %7833 }
0x1011   : > { %7838 = vst.msk [vmem:[#allocation15 + $0x20] sm:$0xff] %vm7767_vm13, %v7834_v7  ;;  %v7866_v2 = vld [vmem:[#allocation15 + $0x8] sm:$0xff] }
0x1014   : > { %v7764_v16 = vpop.permute.xlu0 %7763 }
0x1015   : > { %7769 = vst.msk [vmem:[#allocation15 + $0x18] sm:$0xff] %vm7767_vm13, %v7764_v16  ;;  %v7865_v58 = vld [vmem:[#allocation15] sm:$0xff] }
0x1018   : > { %v7869_v45 = vld [vmem:[#allocation15 + $0x20] sm:$0xff] }
0x1019   : > { %v8907_v37 = vpack.c.bf16 %v7869_v45, %v7866_v2 }
0x101b   : > { %8908 = vmatprep.subr.bf16.mxu0 %v8907_v37 }
0x101c   : > { %v7868_v44 = vld [vmem:[#allocation15 + $0x18] sm:$0xff] }
0x101d   : > { %v8909_v20 = vpack.c.bf16 %v7868_v44, %v7865_v58 }
0x101e   : > { %v8066_v46 = vpop.permute.xlu1 %8065 }
0x101f   : > { %8910 = vmatpush1.bf16.xpose.msra.mxu0 %v8909_v20 }
0x1020   : > { %8913 = vmatprep.subr.msk.bf16.mxu0 %vm8912_vm14, %v8911_v31 }
0x1022   : > { %v8076_v18 = vpop.permute.xlu1 %8075 }
0x1025   : > { %v8071_v27 = vpop.permute.xlu0 %8070 }
0x1026   : > { %7954 = vmatmul.mubr.f32.vlgmr.msra.gmra.mrb[80].mxu0 %v7853_v35  ;;  %v8094_v56 = vpop.permute.xlu1 %8093 }
0x1027   : > { %8916 = vmatpush3.bf16.xpose.msk.msra.mxu0 %vm8912_vm14, %v8911_v31  ;;  %7958 = vmatprep.mubr.f32.mxu0 %v7857_v32 }
0x1029   : > { %v8081_v8 = vpop.permute.xlu0 %8080 }
0x102a   : > { %7959 = vmatmul.mubr.f32.gmra.mrb[82].mxu0 %v7856_v57  ;;  %v8104_v54 = vpop.permute.xlu1 %8103 }
0x102b   : > { %7963 = vmatprep.mubr.f32.mxu0 %v7860_v11 }
0x102d   : > { %v8099_v43 = vpop.permute.xlu0 %8098 }
0x102e   : > { %7964 = vmatmul.mubr.f32.gmra.mrb[84].mxu0 %v7859_v6 }
0x102f   : > { %7968 = vmatprep.mubr.f32.mxu0 %v7863_v59 }
0x1031   : > { %v8109_v29 = vpop.permute.xlu0 %8108 }
0x1032   : > { %7969 = vmatmul.mubr.f32.gmra.mrb[86].mxu0 %v7862_v55 }
0x1033   : > { %8734 = vmatprep.mubr.msk.f32.mxu0 %vm5603_vm8, %v7855_v38 }
0x1036   : > { %8735 = vmatmul.mubr.msk.f32.vlgmr.msra.gmra.mrb[88].mxu0 %vm5603_vm8, %v7858_v36 }
0x1037   : > { %8737 = vmatprep.mubr.msk.f32.mxu0 %vm5603_vm8, %v7861_v17 }
0x103a   : > { %8738 = vmatmul.mubr.msk.f32.gmra.mrb[90].mxu0 %vm5603_vm8, %v7864_v14 }
0x10f9   : > { %v7955_v0 = vpop.f32.mrb[80].mxu0 }
0x10fa   : > { %v7957_v53 = vpop.f32.mrb[81].mxu0 }
0x10fd   : > { %v7960_v41 = vpop.f32.mrb[82].mxu0 }
0x10fe   : > { %v7962_v26 = vpop.f32.mrb[83].mxu0 }
0x1101   : > { %v7965_v25 = vpop.f32.mrb[84].mxu0 }
0x1102   : > { %v7967_v47 = vpop.f32.mrb[85].mxu0 }
0x1105   : > { %v7970_v24 = vpop.f32.mrb[86].mxu0 }
0x1106   : > { %v7972_v39 = vpop.f32.mrb[87].mxu0 }
0x1109   : > { %v8736_v40 = vpop.f32.mrb[88].mxu0 }
0x110a   : > { %v8046_v50 = vadd.f32 %v8736_v40, %v7960_v41  ;;  %v8040_v42 = vpop.f32.mrb[89].mxu0 }
0x110b   : > { %v8041_v28 = vadd.f32 %v8040_v42, %v7955_v0 }
0x110c   : > { %v8084_v4 = vmul.f32 %v8071_v27, %v8046_v50 }
0x110d   : > { %v8083_v62 = vmul.f32 %v8066_v46, %v8041_v28  ;;  %v8739_v5 = vpop.f32.mrb[90].mxu0 }
0x110e   : > { %v8112_v12 = vadd.f32 %v8099_v43, %v8084_v4  ;;  %v8056_v13 = vadd.f32 %v8739_v5, %v7970_v24  ;;  %v8050_v9 = vpop.f32.mrb[91].mxu0 }
0x110f   : > { %v8111_v10 = vadd.f32 %v8094_v56, %v8083_v62  ;;  %v8051_v61 = vadd.f32 %v8050_v9, %v7965_v25 }
0x1110   : > { %v8116_v34 = vmax.f32 %v8112_v12, 0.0  ;;  %v8086_v52 = vmul.f32 %v8081_v8, %v8056_v13 }
0x1111   : > { %v8115_v22 = vmax.f32 %v8111_v10, 0.0  ;;  %v8085_v30 = vmul.f32 %v8076_v18, %v8051_v61 }
0x1112   : > { %8120 = vst.msk [vmem:[%s843_s10 + $0x8] sm:$0xff] %vm6347_vm9, %v8116_v34  ;;  %v8114_v51 = vadd.f32 %v8109_v29, %v8086_v52 }
0x1113   : > { %8119 = vst.msk [vmem:[%s843_s10] sm:$0xff] %vm6347_vm9, %v8115_v22  ;;  %v8113_v33 = vadd.f32 %v8104_v54, %v8085_v30 }
0x1114   : > { %v8118_v3 = vmax.f32 %v8114_v51, 0.0 }
0x1115   : > { %v8117_v23 = vmax.f32 %v8113_v33, 0.0 }
0x1116   : > { %8122 = vst.msk [vmem:[%s843_s10 + $0x18] sm:$0xff] %vm6347_vm9, %v8118_v3 }
0x1117   : > { %8121 = vst.msk [vmem:[%s843_s10 + $0x10] sm:$0xff] %vm6347_vm9, %v8117_v23 }
0x1118 PF: > { %s12594_s4 = sld [smem:[#allocation16_spill]] }
0x111e   : > { %s38_s7 = sadd.s32 1, %s12594_s4  }
0x111f   : > { %p35_p4 = scmp.ge.s32.totalorder %s38_s7, 4  }
0x1121   :  { %37 = sbr.rel (!%p35_p4) target bundleno = 16 (0x10), region = 192 }

</bundles_post_ra>
